<compile_context>
chip_gen: v7x
topology: tpu7x:2x2x1
jax: 0.10.0
libtpu: 0.0.40
codegen_flags: <defaults>
</compile_context>

<pallas_src>
import jax
import jax.numpy as jnp
from jax import lax
from jax.experimental import pallas as pl
from jax.experimental.pallas import tpu as pltpu

NEG_SLOPE = 0.01  # nn.LeakyReLU default


def _leaky(v):
    return jnp.where(v >= 0, v, NEG_SLOPE * v)


def _round_up(x, m):
    return ((x + m - 1) // m) * m


def make_convblock(H, W, Cin, Cout, compute_dtype=jnp.float32):
    """Builds a pallas_call implementing ConvBlock.forward for fixed shapes.

    Activations are NHWC; 3x3 weights are tap-major (9, Cin/Cout, Cout) with
    tap index t = kh*3 + kw, the 1x1 weight is (Cin, Cout), biases (1, Cout).
    """
    HP = H + 2                        # rows incl. top/bottom zero pad
    WPR = _round_up(W + 1, 8)         # image cols [0, W), zero pad cols [W, WPR)
    HWP = H * WPR

    def kernel(x_ref, w1a_ref, w1c_ref, b1_ref, w2s_ref, b2_ref, b11_ref,
               out_ref, xpad_ref, mid_ref):
        f32 = jnp.float32
        cd = compute_dtype

        # ---- stage zero-padded input in VMEM.  Borders are re-zeroed every
        # step (scratch is per-core and persists across grid steps). ----
        xpad_ref[0:1, :, :] = jnp.zeros((1, WPR, Cin), cd)
        xpad_ref[H + 1:HP, :, :] = jnp.zeros((1, WPR, Cin), cd)
        xpad_ref[1:H + 1, W:WPR, :] = jnp.zeros((H, WPR - W, Cin), cd)
        xpad_ref[1:H + 1, 0:W, :] = x_ref[0].astype(cd)       # aligned, col offset 0

        mid_ref[0:1, :, :] = jnp.zeros((1, WPR, Cout), cd)
        mid_ref[H + 1:HP, :, :] = jnp.zeros((1, WPR, Cout), cd)
        mid_ref[1:H + 1, W:WPR, :] = jnp.zeros((H, WPR - W, Cout), cd)

        def row_matmul(src_ref, csrc, kh, w2d):
            # Contiguous full-width slab: a leading-dim slice only -> true view.
            slab = src_ref[kh:kh + H].reshape(HWP, csrc)
            return jnp.dot(slab, w2d, preferred_element_type=f32)

        def align(part, kw):
            # part[i] is the kw-tap contribution at flat slab position i; the
            # output at flat position i needs part[i + kw - 1].  jnp.roll
            # convention: roll(p, s)[i] = p[i - s]  =>  s = 1 - kw.  The single
            # wrapped element reads a zero pad column == the conv zero padding.
            if kw == 1:
                return part
            return pltpu.roll(part, shift=(1 - kw) % HWP, axis=0)

        def acc_taps(part):
            return (align(part[:, 0:Cout], 0)
                    + part[:, Cout:2 * Cout]
                    + align(part[:, 2 * Cout:3 * Cout], 2))

        # ---- conv1: 3 row matmuls; centre row also yields the fused 1x1 skip ----
        p_top = row_matmul(xpad_ref, Cin, 0, w1a_ref[0])      # (HWP, 3*Cout)
        p_mid = row_matmul(xpad_ref, Cin, 1, w1c_ref[...])    # (HWP, 4*Cout)
        p_bot = row_matmul(xpad_ref, Cin, 2, w1a_ref[1])      # (HWP, 3*Cout)
        acc1 = acc_taps(p_top) + acc_taps(p_mid) + acc_taps(p_bot)
        skip = p_mid[:, 3 * Cout:4 * Cout] + b11_ref[...]     # 1x1 path, no ReLU

        y1 = _leaky(acc1 + b1_ref[...]).reshape(H, WPR, Cout)
        mid_ref[1:H + 1, 0:W, :] = y1[:, 0:W, :].astype(cd)   # aligned interior store

        # ---- conv2: same structure on the padded intermediate ----
        q_top = row_matmul(mid_ref, Cout, 0, w2s_ref[0])
        q_mid = row_matmul(mid_ref, Cout, 1, w2s_ref[1])
        q_bot = row_matmul(mid_ref, Cout, 2, w2s_ref[2])
        acc2 = acc_taps(q_top) + acc_taps(q_mid) + acc_taps(q_bot)

        res = (_leaky(acc2 + b2_ref[...]) + skip).reshape(H, WPR, Cout)
        out_ref[0] = res[:, 0:W, :].astype(out_ref.dtype)

    def run(x_nhwc, w1, b1, w2, b2, w11, b11):
        N = x_nhwc.shape[0]
        cd = compute_dtype
        f32 = jnp.float32

        def stack_kw(w, kh):  # (9, Ci, Co) -> (Ci, 3*Co): taps of kernel row kh
            return jnp.concatenate(
                [w[3 * kh + 0], w[3 * kh + 1], w[3 * kh + 2]], axis=-1)

        w1a = jnp.stack([stack_kw(w1, 0), stack_kw(w1, 2)]).astype(cd)   # (2,Cin,3Cout)
        w1c = jnp.concatenate([stack_kw(w1, 1), w11], axis=-1).astype(cd)  # (Cin,4Cout)
        w2s = jnp.stack([stack_kw(w2, kh) for kh in range(3)]).astype(cd)  # (3,Cout,3Cout)

        flops = 2 * N * H * W * (9 * Cin + 9 * Cout + Cin) * Cout
        bytes_accessed = (4 * (int(x_nhwc.size) + N * H * W * Cout)
                          + (int(w1a.size) + int(w1c.size) + int(w2s.size))
                          * jnp.dtype(cd).itemsize
                          + 4 * (int(b1.size) + int(b2.size) + int(b11.size)))

        out = pl.pallas_call(
            kernel,
            out_shape=jax.ShapeDtypeStruct((N, H, W, Cout), f32),
            grid_spec=pltpu.PrefetchScalarGridSpec(
                num_scalar_prefetch=0,
                grid=(N,),
                in_specs=[
                    pl.BlockSpec((1, H, W, Cin), lambda n: (n, 0, 0, 0)),    # x (unpadded)
                    pl.BlockSpec((2, Cin, 3 * Cout), lambda n: (0, 0, 0)),   # w1 rows 0,2
                    pl.BlockSpec((Cin, 4 * Cout), lambda n: (0, 0)),         # w1 row 1 + w11
                    pl.BlockSpec((1, Cout), lambda n: (0, 0)),               # b1
                    pl.BlockSpec((3, Cout, 3 * Cout), lambda n: (0, 0, 0)),  # w2 rows
                    pl.BlockSpec((1, Cout), lambda n: (0, 0)),               # b2
                    pl.BlockSpec((1, Cout), lambda n: (0, 0)),               # b11
                ],
                out_specs=pl.BlockSpec((1, H, W, Cout), lambda n: (n, 0, 0, 0)),
                scratch_shapes=[
                    pltpu.VMEM((HP, WPR, Cin), cd),    # zero-padded input
                    pltpu.VMEM((HP, WPR, Cout), cd),   # zero-padded intermediate
                ],
            ),
            compiler_params=pltpu.CompilerParams(
                dimension_semantics=("parallel",),
                vmem_limit_bytes=64 * 1024 * 1024,
            ),
            cost_estimate=pl.CostEstimate(flops=int(flops), transcendentals=0,
                                          bytes_accessed=int(bytes_accessed)),
        )(x_nhwc.astype(f32), w1a, w1c,
          b1.astype(f32), w2s, b2.astype(f32), b11.astype(f32))
        return out

    return run


def reference_convblock(x_nhwc, w1, b1, w2, b2, w11, b11):
    """Pure-JAX reference (lax conv) for the correctness check."""
    Cin = x_nhwc.shape[-1]
    Cout = b1.shape[-1]
    dn = lax.conv_dimension_numbers(x_nhwc.shape, (3, 3, Cin, Cout),
                                    ("NHWC", "HWIO", "NHWC"))
    w1_hwio = w1.reshape(3, 3, Cin, Cout)
    w2_hwio = w2.reshape(3, 3, Cout, Cout)
    y = lax.conv_general_dilated(x_nhwc, w1_hwio, (1, 1), "SAME",
                                 dimension_numbers=dn) + b1.reshape(1, 1, 1, -1)
    y = jnp.where(y >= 0, y, NEG_SLOPE * y)
    dn2 = lax.conv_dimension_numbers(y.shape, (3, 3, Cout, Cout),
                                     ("NHWC", "HWIO", "NHWC"))
    y = lax.conv_general_dilated(y, w2_hwio, (1, 1), "SAME",
                                 dimension_numbers=dn2) + b2.reshape(1, 1, 1, -1)
    y = jnp.where(y >= 0, y, NEG_SLOPE * y)
    skip = jnp.einsum("nhwc,cd->nhwd", x_nhwc, w11) + b11.reshape(1, 1, 1, -1)
    return y + skip


if __name__ == "__main__":
    # Small shapes: batch=2, in_channel=4, out_channel=8, spatial=16x16.
    N, Cin, Cout, H, W = 2, 4, 8, 16, 16

    key = jax.random.PRNGKey(0)
    k = jax.random.split(key, 8)
    x_nchw = jax.random.normal(k[0], (N, Cin, H, W), jnp.float32)

    # Deterministic synthetic parameters (PyTorch-like scaling, not a checkpoint).
    w1 = jax.random.normal(k[1], (9, Cin, Cout), jnp.float32) * 0.1
    b1 = jax.random.normal(k[2], (1, Cout), jnp.float32) * 0.1
    w2 = jax.random.normal(k[3], (9, Cout, Cout), jnp.float32) * 0.1
    b2 = jax.random.normal(k[4], (1, Cout), jnp.float32) * 0.1
    w11 = jax.random.normal(k[5], (Cin, Cout), jnp.float32) * 0.1
    b11 = jax.random.normal(k[6], (1, Cout), jnp.float32) * 0.1

    # NCHW (PyTorch) -> NHWC for the TPU kernel.
    x_nhwc = jnp.transpose(x_nchw, (0, 2, 3, 1))
    ref = reference_convblock(x_nhwc, w1, b1, w2, b2, w11, b11)

    # f32 compute path (tight check).
    out_f32 = make_convblock(H, W, Cin, Cout, jnp.float32)(
        x_nhwc, w1, b1, w2, b2, w11, b11)
    out_f32 = jax.block_until_ready(out_f32)
    assert out_f32.shape == (N, H, W, Cout)
    assert jnp.allclose(out_f32, ref, atol=1e-4, rtol=1e-4), \
        float(jnp.max(jnp.abs(out_f32 - ref)))

    # bf16 MXU path (recommended on v6e/v7x): f32 accumulation, looser tolerance.
    out_bf16 = make_convblock(H, W, Cin, Cout, jnp.bfloat16)(
        x_nhwc, w1, b1, w2, b2, w11, b11)
    out_bf16 = jax.block_until_ready(out_bf16)
    assert jnp.allclose(out_bf16, ref, atol=5e-2, rtol=5e-2)

    # Back to NCHW if a PyTorch-identical layout is desired.
    out_nchw = jnp.transpose(out_f32, (0, 3, 1, 2))
    jax.block_until_ready(out_nchw)

    print("KERNEL_OK")
</pallas_src>

<mosaic_0001>
module attributes {stable_mosaic.version = 11 : i64} {
  func.func @kernel(%arg0: i32, %arg1: memref<1x16x16x4xf32, #tpu.memory_space<vmem>>, %arg2: memref<2x4x24xf32, #tpu.memory_space<vmem>>, %arg3: memref<4x32xf32, #tpu.memory_space<vmem>>, %arg4: memref<1x8xf32, #tpu.memory_space<vmem>>, %arg5: memref<3x8x24xf32, #tpu.memory_space<vmem>>, %arg6: memref<1x8xf32, #tpu.memory_space<vmem>>, %arg7: memref<1x8xf32, #tpu.memory_space<vmem>>, %arg8: memref<1x16x16x8xf32, #tpu.memory_space<vmem>>, %arg9: memref<18x24x4xf32, #tpu.memory_space<vmem>>, %arg10: memref<18x24x8xf32, #tpu.memory_space<vmem>>) attributes {dimension_semantics = [#tpu.dimension_semantics<parallel>], iteration_bounds = array<i64: 2>, scalar_prefetch = 0 : i64, scratch_operands = 2 : i64, tpu.core_type = #tpu.core_type<tc>, window_params = [{transform_indices = @transform_0, window_bounds = array<i64: 1, 16, 16, 4>}, {pipeline_mode = #tpu.pipeline_mode<synchronous>, transform_indices = @transform_1, window_bounds = array<i64: 2, 4, 24>}, {pipeline_mode = #tpu.pipeline_mode<synchronous>, transform_indices = @transform_2, window_bounds = array<i64: 4, 32>}, {pipeline_mode = #tpu.pipeline_mode<synchronous>, transform_indices = @transform_3, window_bounds = array<i64: 1, 8>}, {pipeline_mode = #tpu.pipeline_mode<synchronous>, transform_indices = @transform_4, window_bounds = array<i64: 3, 8, 24>}, {pipeline_mode = #tpu.pipeline_mode<synchronous>, transform_indices = @transform_5, window_bounds = array<i64: 1, 8>}, {pipeline_mode = #tpu.pipeline_mode<synchronous>, transform_indices = @transform_6, window_bounds = array<i64: 1, 8>}, {transform_indices = @transform_7, window_bounds = array<i64: 1, 16, 16, 8>}]} {
    %cst = arith.constant 0.000000e+00 : f32
    %0 = vector.broadcast %cst : f32 to vector<1x24x4xf32>
    %c0 = arith.constant 0 : index
    %c0_0 = arith.constant 0 : index
    %c0_1 = arith.constant 0 : index
    %1 = vector.load %arg9[%c0, %c0_0, %c0_1] : memref<18x24x4xf32, #tpu.memory_space<vmem>>, vector<1x24x4xf32>
    tpu.vector_store %arg9[%c0, %c0_0, %c0_1], %0 {strides = array<i32>} : memref<18x24x4xf32, #tpu.memory_space<vmem>>, vector<1x24x4xf32>,
    %cst_2 = arith.constant 0.000000e+00 : f32
    %2 = vector.broadcast %cst_2 : f32 to vector<1x24x4xf32>
    %c17 = arith.constant 17 : index
    %c0_3 = arith.constant 0 : index
    %c0_4 = arith.constant 0 : index
    %3 = vector.load %arg9[%c17, %c0_3, %c0_4] : memref<18x24x4xf32, #tpu.memory_space<vmem>>, vector<1x24x4xf32>
    tpu.vector_store %arg9[%c17, %c0_3, %c0_4], %2 {strides = array<i32>} : memref<18x24x4xf32, #tpu.memory_space<vmem>>, vector<1x24x4xf32>,
    %cst_5 = arith.constant 0.000000e+00 : f32
    %4 = vector.broadcast %cst_5 : f32 to vector<16x8x4xf32>
    %c1 = arith.constant 1 : index
    %c16 = arith.constant 16 : index
    %c0_6 = arith.constant 0 : index
    %5 = vector.load %arg9[%c1, %c16, %c0_6] : memref<18x24x4xf32, #tpu.memory_space<vmem>>, vector<16x8x4xf32>
    tpu.vector_store %arg9[%c1, %c16, %c0_6], %4 {strides = array<i32>} : memref<18x24x4xf32, #tpu.memory_space<vmem>>, vector<16x8x4xf32>,
    %c0_7 = arith.constant 0 : index
    %c0_8 = arith.constant 0 : index
    %c0_9 = arith.constant 0 : index
    %c0_10 = arith.constant 0 : index
    %6 = vector.load %arg1[%c0_7, %c0_8, %c0_9, %c0_10] : memref<1x16x16x4xf32, #tpu.memory_space<vmem>>, vector<1x16x16x4xf32>
    %7 = vector.shape_cast %6 : vector<1x16x16x4xf32> to vector<16x16x4xf32>
    %c1_11 = arith.constant 1 : index
    %c0_12 = arith.constant 0 : index
    %c0_13 = arith.constant 0 : index
    %8 = vector.load %arg9[%c1_11, %c0_12, %c0_13] : memref<18x24x4xf32, #tpu.memory_space<vmem>>, vector<16x16x4xf32>
    tpu.vector_store %arg9[%c1_11, %c0_12, %c0_13], %7 {strides = array<i32>} : memref<18x24x4xf32, #tpu.memory_space<vmem>>, vector<16x16x4xf32>,
    %cst_14 = arith.constant 0.000000e+00 : f32
    %9 = vector.broadcast %cst_14 : f32 to vector<1x24x8xf32>
    %c0_15 = arith.constant 0 : index
    %c0_16 = arith.constant 0 : index
    %c0_17 = arith.constant 0 : index
    %10 = vector.load %arg10[%c0_15, %c0_16, %c0_17] : memref<18x24x8xf32, #tpu.memory_space<vmem>>, vector<1x24x8xf32>
    tpu.vector_store %arg10[%c0_15, %c0_16, %c0_17], %9 {strides = array<i32>} : memref<18x24x8xf32, #tpu.memory_space<vmem>>, vector<1x24x8xf32>,
    %cst_18 = arith.constant 0.000000e+00 : f32
    %11 = vector.broadcast %cst_18 : f32 to vector<1x24x8xf32>
    %c17_19 = arith.constant 17 : index
    %c0_20 = arith.constant 0 : index
    %c0_21 = arith.constant 0 : index
    %12 = vector.load %arg10[%c17_19, %c0_20, %c0_21] : memref<18x24x8xf32, #tpu.memory_space<vmem>>, vector<1x24x8xf32>
    tpu.vector_store %arg10[%c17_19, %c0_20, %c0_21], %11 {strides = array<i32>} : memref<18x24x8xf32, #tpu.memory_space<vmem>>, vector<1x24x8xf32>,
    %cst_22 = arith.constant 0.000000e+00 : f32
    %13 = vector.broadcast %cst_22 : f32 to vector<16x8x8xf32>
    %c1_23 = arith.constant 1 : index
    %c16_24 = arith.constant 16 : index
    %c0_25 = arith.constant 0 : index
    %14 = vector.load %arg10[%c1_23, %c16_24, %c0_25] : memref<18x24x8xf32, #tpu.memory_space<vmem>>, vector<16x8x8xf32>
    tpu.vector_store %arg10[%c1_23, %c16_24, %c0_25], %13 {strides = array<i32>} : memref<18x24x8xf32, #tpu.memory_space<vmem>>, vector<16x8x8xf32>,
    %c0_26 = arith.constant 0 : index
    %c0_27 = arith.constant 0 : index
    %c0_28 = arith.constant 0 : index
    %15 = vector.load %arg2[%c0_26, %c0_27, %c0_28] : memref<2x4x24xf32, #tpu.memory_space<vmem>>, vector<1x4x24xf32>
    %16 = vector.shape_cast %15 : vector<1x4x24xf32> to vector<4x24xf32>
    %c0_29 = arith.constant 0 : index
    %c0_30 = arith.constant 0 : index
    %c0_31 = arith.constant 0 : index
    %17 = vector.load %arg9[%c0_29, %c0_30, %c0_31] : memref<18x24x4xf32, #tpu.memory_space<vmem>>, vector<16x24x4xf32>
    %18 = vector.shape_cast %17 : vector<16x24x4xf32> to vector<384x4xf32>
    %cst_32 = arith.constant dense<0.000000e+00> : vector<384x24xf32>
    %19 = tpu.matmul %18, %16, %cst_32 {dimension_numbers = #tpu.dot_dimension_numbers<[1], [0], [0], [1], [0, 0, 1, 1], [], []>} : vector<384x4xf32>, vector<4x24xf32>, vector<384x24xf32> -> vector<384x24xf32>
    %c0_33 = arith.constant 0 : index
    %c0_34 = arith.constant 0 : index
    %20 = vector.load %arg3[%c0_33, %c0_34] : memref<4x32xf32, #tpu.memory_space<vmem>>, vector<4x32xf32>
    %c1_35 = arith.constant 1 : index
    %c0_36 = arith.constant 0 : index
    %c0_37 = arith.constant 0 : index
    %21 = vector.load %arg9[%c1_35, %c0_36, %c0_37] : memref<18x24x4xf32, #tpu.memory_space<vmem>>, vector<16x24x4xf32>
    %22 = vector.shape_cast %21 : vector<16x24x4xf32> to vector<384x4xf32>
    %cst_38 = arith.constant dense<0.000000e+00> : vector<384x32xf32>
    %23 = tpu.matmul %22, %20, %cst_38 {dimension_numbers = #tpu.dot_dimension_numbers<[1], [0], [0], [1], [0, 0, 1, 1], [], []>} : vector<384x4xf32>, vector<4x32xf32>, vector<384x32xf32> -> vector<384x32xf32>
    %c1_39 = arith.constant 1 : index
    %c0_40 = arith.constant 0 : index
    %c0_41 = arith.constant 0 : index
    %24 = vector.load %arg2[%c1_39, %c0_40, %c0_41] : memref<2x4x24xf32, #tpu.memory_space<vmem>>, vector<1x4x24xf32>
    %25 = vector.shape_cast %24 : vector<1x4x24xf32> to vector<4x24xf32>
    %c2 = arith.constant 2 : index
    %c0_42 = arith.constant 0 : index
    %c0_43 = arith.constant 0 : index
    %26 = vector.load %arg9[%c2, %c0_42, %c0_43] : memref<18x24x4xf32, #tpu.memory_space<vmem>>, vector<16x24x4xf32>
    %27 = vector.shape_cast %26 : vector<16x24x4xf32> to vector<384x4xf32>
    %cst_44 = arith.constant dense<0.000000e+00> : vector<384x24xf32>
    %28 = tpu.matmul %27, %25, %cst_44 {dimension_numbers = #tpu.dot_dimension_numbers<[1], [0], [0], [1], [0, 0, 1, 1], [], []>} : vector<384x4xf32>, vector<4x24xf32>, vector<384x24xf32> -> vector<384x24xf32>
    %29 = vector.extract_strided_slice %19 {offsets = [0, 0], sizes = [384, 8], strides = [1, 1]} : vector<384x24xf32> to vector<384x8xf32>
    %c1_i32 = arith.constant 1 : i32
    %30 = tpu.dynamic_rotate %29 by %c1_i32 dim 0 : vector<384x8xf32>, i32 -> vector<384x8xf32>
    %31 = vector.extract_strided_slice %19 {offsets = [0, 8], sizes = [384, 8], strides = [1, 1]} : vector<384x24xf32> to vector<384x8xf32>
    %32 = arith.addf %30, %31 : vector<384x8xf32>
    %33 = vector.extract_strided_slice %19 {offsets = [0, 16], sizes = [384, 8], strides = [1, 1]} : vector<384x24xf32> to vector<384x8xf32>
    %c383_i32 = arith.constant 383 : i32
    %34 = tpu.dynamic_rotate %33 by %c383_i32 dim 0 : vector<384x8xf32>, i32 -> vector<384x8xf32>
    %35 = arith.addf %32, %34 : vector<384x8xf32>
    %36 = vector.extract_strided_slice %23 {offsets = [0, 0], sizes = [384, 8], strides = [1, 1]} : vector<384x32xf32> to vector<384x8xf32>
    %c1_i32_45 = arith.constant 1 : i32
    %37 = tpu.dynamic_rotate %36 by %c1_i32_45 dim 0 : vector<384x8xf32>, i32 -> vector<384x8xf32>
    %38 = vector.extract_strided_slice %23 {offsets = [0, 8], sizes = [384, 8], strides = [1, 1]} : vector<384x32xf32> to vector<384x8xf32>
    %39 = arith.addf %37, %38 : vector<384x8xf32>
    %40 = vector.extract_strided_slice %23 {offsets = [0, 16], sizes = [384, 8], strides = [1, 1]} : vector<384x32xf32> to vector<384x8xf32>
    %c383_i32_46 = arith.constant 383 : i32
    %41 = tpu.dynamic_rotate %40 by %c383_i32_46 dim 0 : vector<384x8xf32>, i32 -> vector<384x8xf32>
    %42 = arith.addf %39, %41 : vector<384x8xf32>
    %43 = arith.addf %35, %42 : vector<384x8xf32>
    %44 = vector.extract_strided_slice %28 {offsets = [0, 0], sizes = [384, 8], strides = [1, 1]} : vector<384x24xf32> to vector<384x8xf32>
    %c1_i32_47 = arith.constant 1 : i32
    %45 = tpu.dynamic_rotate %44 by %c1_i32_47 dim 0 : vector<384x8xf32>, i32 -> vector<384x8xf32>
    %46 = vector.extract_strided_slice %28 {offsets = [0, 8], sizes = [384, 8], strides = [1, 1]} : vector<384x24xf32> to vector<384x8xf32>
    %47 = arith.addf %45, %46 : vector<384x8xf32>
    %48 = vector.extract_strided_slice %28 {offsets = [0, 16], sizes = [384, 8], strides = [1, 1]} : vector<384x24xf32> to vector<384x8xf32>
    %c383_i32_48 = arith.constant 383 : i32
    %49 = tpu.dynamic_rotate %48 by %c383_i32_48 dim 0 : vector<384x8xf32>, i32 -> vector<384x8xf32>
    %50 = arith.addf %47, %49 : vector<384x8xf32>
    %51 = arith.addf %43, %50 : vector<384x8xf32>
    %52 = vector.extract_strided_slice %23 {offsets = [0, 24], sizes = [384, 8], strides = [1, 1]} : vector<384x32xf32> to vector<384x8xf32>
    %c0_49 = arith.constant 0 : index
    %c0_50 = arith.constant 0 : index
    %53 = vector.load %arg7[%c0_49, %c0_50] : memref<1x8xf32, #tpu.memory_space<vmem>>, vector<1x8xf32>
    %54 = vector.broadcast %53 : vector<1x8xf32> to vector<384x8xf32>
    %55 = arith.addf %52, %54 : vector<384x8xf32>
    %c0_51 = arith.constant 0 : index
    %c0_52 = arith.constant 0 : index
    %56 = vector.load %arg4[%c0_51, %c0_52] : memref<1x8xf32, #tpu.memory_space<vmem>>, vector<1x8xf32>
    %57 = vector.broadcast %56 : vector<1x8xf32> to vector<384x8xf32>
    %58 = arith.addf %51, %57 : vector<384x8xf32>
    %cst_53 = arith.constant 0.000000e+00 : f32
    %59 = vector.broadcast %cst_53 : f32 to vector<384x8xf32>
    %60 = arith.cmpf oge, %58, %59 : vector<384x8xf32>
    %cst_54 = arith.constant 0.00999999977 : f32
    %61 = vector.broadcast %cst_54 : f32 to vector<384x8xf32>
    %62 = arith.mulf %61, %58 : vector<384x8xf32>
    %63 = arith.select %60, %58, %62 : vector<384x8xi1>, vector<384x8xf32>
    %64 = vector.shape_cast %63 : vector<384x8xf32> to vector<16x24x8xf32>
    %65 = vector.extract_strided_slice %64 {offsets = [0, 0, 0], sizes = [16, 16, 8], strides = [1, 1, 1]} : vector<16x24x8xf32> to vector<16x16x8xf32>
    %c1_55 = arith.constant 1 : index
    %c0_56 = arith.constant 0 : index
    %c0_57 = arith.constant 0 : index
    %66 = vector.load %arg10[%c1_55, %c0_56, %c0_57] : memref<18x24x8xf32, #tpu.memory_space<vmem>>, vector<16x16x8xf32>
    tpu.vector_store %arg10[%c1_55, %c0_56, %c0_57], %65 {strides = array<i32>} : memref<18x24x8xf32, #tpu.memory_space<vmem>>, vector<16x16x8xf32>,
    %c0_58 = arith.constant 0 : index
    %c0_59 = arith.constant 0 : index
    %c0_60 = arith.constant 0 : index
    %67 = vector.load %arg5[%c0_58, %c0_59, %c0_60] : memref<3x8x24xf32, #tpu.memory_space<vmem>>, vector<1x8x24xf32>
    %68 = vector.shape_cast %67 : vector<1x8x24xf32> to vector<8x24xf32>
    %c0_61 = arith.constant 0 : index
    %c0_62 = arith.constant 0 : index
    %c0_63 = arith.constant 0 : index
    %69 = vector.load %arg10[%c0_61, %c0_62, %c0_63] : memref<18x24x8xf32, #tpu.memory_space<vmem>>, vector<16x24x8xf32>
    %70 = vector.shape_cast %69 : vector<16x24x8xf32> to vector<384x8xf32>
    %cst_64 = arith.constant dense<0.000000e+00> : vector<384x24xf32>
    %71 = tpu.matmul %70, %68, %cst_64 {dimension_numbers = #tpu.dot_dimension_numbers<[1], [0], [0], [1], [0, 0, 1, 1], [], []>} : vector<384x8xf32>, vector<8x24xf32>, vector<384x24xf32> -> vector<384x24xf32>
    %c1_65 = arith.constant 1 : index
    %c0_66 = arith.constant 0 : index
    %c0_67 = arith.constant 0 : index
    %72 = vector.load %arg5[%c1_65, %c0_66, %c0_67] : memref<3x8x24xf32, #tpu.memory_space<vmem>>, vector<1x8x24xf32>
    %73 = vector.shape_cast %72 : vector<1x8x24xf32> to vector<8x24xf32>
    %c1_68 = arith.constant 1 : index
    %c0_69 = arith.constant 0 : index
    %c0_70 = arith.constant 0 : index
    %74 = vector.load %arg10[%c1_68, %c0_69, %c0_70] : memref<18x24x8xf32, #tpu.memory_space<vmem>>, vector<16x24x8xf32>
    %75 = vector.shape_cast %74 : vector<16x24x8xf32> to vector<384x8xf32>
    %cst_71 = arith.constant dense<0.000000e+00> : vector<384x24xf32>
    %76 = tpu.matmul %75, %73, %cst_71 {dimension_numbers = #tpu.dot_dimension_numbers<[1], [0], [0], [1], [0, 0, 1, 1], [], []>} : vector<384x8xf32>, vector<8x24xf32>, vector<384x24xf32> -> vector<384x24xf32>
    %c2_72 = arith.constant 2 : index
    %c0_73 = arith.constant 0 : index
    %c0_74 = arith.constant 0 : index
    %77 = vector.load %arg5[%c2_72, %c0_73, %c0_74] : memref<3x8x24xf32, #tpu.memory_space<vmem>>, vector<1x8x24xf32>
    %78 = vector.shape_cast %77 : vector<1x8x24xf32> to vector<8x24xf32>
    %c2_75 = arith.constant 2 : index
    %c0_76 = arith.constant 0 : index
    %c0_77 = arith.constant 0 : index
    %79 = vector.load %arg10[%c2_75, %c0_76, %c0_77] : memref<18x24x8xf32, #tpu.memory_space<vmem>>, vector<16x24x8xf32>
    %80 = vector.shape_cast %79 : vector<16x24x8xf32> to vector<384x8xf32>
    %cst_78 = arith.constant dense<0.000000e+00> : vector<384x24xf32>
    %81 = tpu.matmul %80, %78, %cst_78 {dimension_numbers = #tpu.dot_dimension_numbers<[1], [0], [0], [1], [0, 0, 1, 1], [], []>} : vector<384x8xf32>, vector<8x24xf32>, vector<384x24xf32> -> vector<384x24xf32>
    %82 = vector.extract_strided_slice %71 {offsets = [0, 0], sizes = [384, 8], strides = [1, 1]} : vector<384x24xf32> to vector<384x8xf32>
    %c1_i32_79 = arith.constant 1 : i32
    %83 = tpu.dynamic_rotate %82 by %c1_i32_79 dim 0 : vector<384x8xf32>, i32 -> vector<384x8xf32>
    %84 = vector.extract_strided_slice %71 {offsets = [0, 8], sizes = [384, 8], strides = [1, 1]} : vector<384x24xf32> to vector<384x8xf32>
    %85 = arith.addf %83, %84 : vector<384x8xf32>
    %86 = vector.extract_strided_slice %71 {offsets = [0, 16], sizes = [384, 8], strides = [1, 1]} : vector<384x24xf32> to vector<384x8xf32>
    %c383_i32_80 = arith.constant 383 : i32
    %87 = tpu.dynamic_rotate %86 by %c383_i32_80 dim 0 : vector<384x8xf32>, i32 -> vector<384x8xf32>
    %88 = arith.addf %85, %87 : vector<384x8xf32>
    %89 = vector.extract_strided_slice %76 {offsets = [0, 0], sizes = [384, 8], strides = [1, 1]} : vector<384x24xf32> to vector<384x8xf32>
    %c1_i32_81 = arith.constant 1 : i32
    %90 = tpu.dynamic_rotate %89 by %c1_i32_81 dim 0 : vector<384x8xf32>, i32 -> vector<384x8xf32>
    %91 = vector.extract_strided_slice %76 {offsets = [0, 8], sizes = [384, 8], strides = [1, 1]} : vector<384x24xf32> to vector<384x8xf32>
    %92 = arith.addf %90, %91 : vector<384x8xf32>
    %93 = vector.extract_strided_slice %76 {offsets = [0, 16], sizes = [384, 8], strides = [1, 1]} : vector<384x24xf32> to vector<384x8xf32>
    %c383_i32_82 = arith.constant 383 : i32
    %94 = tpu.dynamic_rotate %93 by %c383_i32_82 dim 0 : vector<384x8xf32>, i32 -> vector<384x8xf32>
    %95 = arith.addf %92, %94 : vector<384x8xf32>
    %96 = arith.addf %88, %95 : vector<384x8xf32>
    %97 = vector.extract_strided_slice %81 {offsets = [0, 0], sizes = [384, 8], strides = [1, 1]} : vector<384x24xf32> to vector<384x8xf32>
    %c1_i32_83 = arith.constant 1 : i32
    %98 = tpu.dynamic_rotate %97 by %c1_i32_83 dim 0 : vector<384x8xf32>, i32 -> vector<384x8xf32>
    %99 = vector.extract_strided_slice %81 {offsets = [0, 8], sizes = [384, 8], strides = [1, 1]} : vector<384x24xf32> to vector<384x8xf32>
    %100 = arith.addf %98, %99 : vector<384x8xf32>
    %101 = vector.extract_strided_slice %81 {offsets = [0, 16], sizes = [384, 8], strides = [1, 1]} : vector<384x24xf32> to vector<384x8xf32>
    %c383_i32_84 = arith.constant 383 : i32
    %102 = tpu.dynamic_rotate %101 by %c383_i32_84 dim 0 : vector<384x8xf32>, i32 -> vector<384x8xf32>
    %103 = arith.addf %100, %102 : vector<384x8xf32>
    %104 = arith.addf %96, %103 : vector<384x8xf32>
    %c0_85 = arith.constant 0 : index
    %c0_86 = arith.constant 0 : index
    %105 = vector.load %arg6[%c0_85, %c0_86] : memref<1x8xf32, #tpu.memory_space<vmem>>, vector<1x8xf32>
    %106 = vector.broadcast %105 : vector<1x8xf32> to vector<384x8xf32>
    %107 = arith.addf %104, %106 : vector<384x8xf32>
    %cst_87 = arith.constant 0.000000e+00 : f32
    %108 = vector.broadcast %cst_87 : f32 to vector<384x8xf32>
    %109 = arith.cmpf oge, %107, %108 : vector<384x8xf32>
    %cst_88 = arith.constant 0.00999999977 : f32
    %110 = vector.broadcast %cst_88 : f32 to vector<384x8xf32>
    %111 = arith.mulf %110, %107 : vector<384x8xf32>
    %112 = arith.select %109, %107, %111 : vector<384x8xi1>, vector<384x8xf32>
    %113 = arith.addf %112, %55 : vector<384x8xf32>
    %114 = vector.shape_cast %113 : vector<384x8xf32> to vector<16x24x8xf32>
    %115 = vector.extract_strided_slice %114 {offsets = [0, 0, 0], sizes = [16, 16, 8], strides = [1, 1, 1]} : vector<16x24x8xf32> to vector<16x16x8xf32>
    %c0_89 = arith.constant 0 : index
    %c0_90 = arith.constant 0 : index
    %c0_91 = arith.constant 0 : index
    %c0_92 = arith.constant 0 : index
    %116 = vector.load %arg8[%c0_89, %c0_90, %c0_91, %c0_92] : memref<1x16x16x8xf32, #tpu.memory_space<vmem>>, vector<1x16x16x8xf32>
    %117 = vector.shape_cast %116 : vector<1x16x16x8xf32> to vector<16x16x8xf32>
    %118 = vector.shape_cast %115 : vector<16x16x8xf32> to vector<1x16x16x8xf32>
    tpu.vector_store %arg8[%c0_89, %c0_90, %c0_91, %c0_92], %118 {strides = array<i32>} : memref<1x16x16x8xf32, #tpu.memory_space<vmem>>, vector<1x16x16x8xf32>,
    return
  }
  func.func @transform_0(%arg0: i32) -> (i32, i32, i32, i32) {
    %c0_i32 = arith.constant 0 : i32
    %c0_i32_0 = arith.constant 0 : i32
    %c0_i32_1 = arith.constant 0 : i32
    %c0_i32_2 = arith.constant 0 : i32
    return %arg0, %c0_i32, %c0_i32_0, %c0_i32_1 : i32, i32, i32, i32
  }
  func.func @transform_1(%arg0: i32) -> (i32, i32, i32) {
    %c0_i32 = arith.constant 0 : i32
    %c0_i32_0 = arith.constant 0 : i32
    %c0_i32_1 = arith.constant 0 : i32
    %c0_i32_2 = arith.constant 0 : i32
    return %c0_i32, %c0_i32_0, %c0_i32_1 : i32, i32, i32
  }
  func.func @transform_2(%arg0: i32) -> (i32, i32) {
    %c0_i32 = arith.constant 0 : i32
    %c0_i32_0 = arith.constant 0 : i32
    %c0_i32_1 = arith.constant 0 : i32
    return %c0_i32, %c0_i32_0 : i32, i32
  }
  func.func @transform_3(%arg0: i32) -> (i32, i32) {
    %c0_i32 = arith.constant 0 : i32
    %c0_i32_0 = arith.constant 0 : i32
    %c0_i32_1 = arith.constant 0 : i32
    return %c0_i32, %c0_i32_0 : i32, i32
  }
  func.func @transform_4(%arg0: i32) -> (i32, i32, i32) {
    %c0_i32 = arith.constant 0 : i32
    %c0_i32_0 = arith.constant 0 : i32
    %c0_i32_1 = arith.constant 0 : i32
    %c0_i32_2 = arith.constant 0 : i32
    return %c0_i32, %c0_i32_0, %c0_i32_1 : i32, i32, i32
  }
  func.func @transform_5(%arg0: i32) -> (i32, i32) {
    %c0_i32 = arith.constant 0 : i32
    %c0_i32_0 = arith.constant 0 : i32
    %c0_i32_1 = arith.constant 0 : i32
    return %c0_i32, %c0_i32_0 : i32, i32
  }
  func.func @transform_6(%arg0: i32) -> (i32, i32) {
    %c0_i32 = arith.constant 0 : i32
    %c0_i32_0 = arith.constant 0 : i32
    %c0_i32_1 = arith.constant 0 : i32
    return %c0_i32, %c0_i32_0 : i32, i32
  }
  func.func @transform_7(%arg0: i32) -> (i32, i32, i32, i32) {
    %c0_i32 = arith.constant 0 : i32
    %c0_i32_0 = arith.constant 0 : i32
    %c0_i32_1 = arith.constant 0 : i32
    %c0_i32_2 = arith.constant 0 : i32
    return %arg0, %c0_i32, %c0_i32_0, %c0_i32_1 : i32, i32, i32, i32
  }
}

</mosaic_0001>

<bundles_post_ra>
// kernel: tpu_custom_call.1
= control target key start
LH: loop header
LB: loop body
LE: loop exit
PB: predicated region body
PF: predicated region fallthrough
CT: control target
= control target key end

     0   :  { %12 = vsyncpa [#allocation5], 0  ;;  %s14314_s0 = inlined_call_operand.hbm [shape: f32[2,16,16,4], index: 0, kind: input, shape index: {}]   ;;  %s14315_s1 = inlined_call_operand.hbm [shape: f32[2,4,24], index: 1, kind: input, shape index: {}]   ;;  %s14316_s2 = inlined_call_operand.hbm [shape: f32[4,32], index: 2, kind: input, shape index: {}]   ;;  %s14317_s3 = inlined_call_operand.hbm [shape: f32[1,8], index: 3, kind: input, shape index: {}]   ;;  %s14318_s4 = inlined_call_operand.hbm [shape: f32[3,8,24], index: 4, kind: input, shape index: {}]   ;;  %s14319_s5 = inlined_call_operand.hbm [shape: f32[1,8], index: 5, kind: input, shape index: {}]   ;;  %s14320_s6 = inlined_call_operand.hbm [shape: f32[1,8], index: 6, kind: input, shape index: {}]   ;;  %s14321_s7 = inlined_call_operand.hbm [shape: f32[2,16,16,8], index: 7, kind: output, shape index: {}]  }
   0x1   :  { %14 = vsyncpa [#allocation5 + $0x1], 0 }
   0x2   :  { %15 = vsyncpa [#allocation8], 0 }
   0x3   :  { %16 = vsyncpa [#allocation11], 0 }
   0x4   :  { %17 = vsyncpa [#allocation14], 0 }
   0x5   :  { %18 = vsyncpa [#allocation6], 0 }
   0x6   :  { %20 = vsyncpa [#allocation6 + $0x1], 0  ;;  %s8892_s24 = smov 0   ;;  %s8894_s25 = smov 0  }
   0x7   :  { %s8896_s26 = smov 0   ;;  %s8898_s27 = smov 0  }
   0x8 LB: > { %s8833_s28 = smov [#allocation7]   ;;  %s8913_s30 = sadd.s32 4294967295, %s8831_s27   ;;  %s8831_s27 = sphi %s8898_s27, %s15342_s27   ;;  %s8827_s26 = sphi %s8896_s26, %s15341_s26   ;;  %s8823_s25 = sphi %s8894_s25, %s15340_s25   ;;  %s8819_s24 = sphi %s8892_s24, %s15339_s24  }
   0x9   : > { %s221_s29 = sshll.u32 %s8833_s28, 4  ;;  %p7377_p0 = scmp.ge.s32.totalorder %s8831_s27, 1  ;;  %s8918_s29 = int_to_ptr.vmem [resolvable:$true] %s221_s29 }
   0xa   : > { %p14322_p1 = scmp.eq.s32.totalorder %s8913_s30, 0  ;;  %p209_p2 = scmp.lt.s32.totalorder %s8831_s27, 3 }
   0xb   : > { %s8834_s9 = smov [#allocation10]   ;;  %s8835_s12 = smov [#allocation13]  }
   0xc   : > { %p8920_p3 = pnand %p7377_p0, %p209_p2  ;;  %s246_s10 = sshll.u32 %s8834_s9, 4  ;;  %s8933_s10 = int_to_ptr.vmem [resolvable:$true] %s246_s10 }
   0xd   : > { %s270_s13 = sshll.u32 %s8835_s12, 4  ;;  %s8555_s16 = scalar_lea.hbm %s14315_s1, 128  ;;  %s8935_s13 = int_to_ptr.vmem [resolvable:$true] %s270_s13 }
   0xe   : > { %s14553_s8 = scalar_select %p8920_p3, 1, 0 }
   0xf   : > { %p8464_p5 = pneg %p8920_p3  ;;  %p8556_p7 = scmp.ne.s32.totalorder %s14315_s1, %s8555_s16 }
  0x10   : > { %p8562_p11 = scmp.lt.u32.totalorder %s8555_s16, %s14315_s1 }
  0x11   : > { %p8929_p6 = pnand %p8464_p5, %p14322_p1 }
  0x13   : > { %p8945_p8 = pneg %p8929_p6 }
  0x15   : > { %p8558_p9 = pnand %p8945_p8, %p8556_p7 }
  0x17   : > { %p8559_p10 = pneg %p8558_p9 }
  0x19   : > { %p8564_p12 = pnand %p8562_p11, %p8559_p10 }
  0x1b   : > { %8567 = shalt.err (!%p8564_p12)
}
  0x1c   : > { %s8568_s22 = scalar_lea.vmem %s8918_s29, 128  ;;  %p8576_p5 = scmp.lt.s32.totalorder %s8918_s29, %s8918_s29 }
  0x1d   : > { %p8569_p13 = scmp.ne.s32.totalorder %s8918_s29, %s8568_s22  ;;  %p8577_p4 = scmp.lt.s32.totalorder %s8568_s22, %s8568_s22 }
  0x1f   : > { %p8571_p0 = pnand %p8569_p13, %p8945_p8  ;;  %p8578_p7 = por %p8577_p4, %p8576_p5 }
  0x21   : > { %p8572_p2 = pneg %p8571_p0 }
  0x23   : > { %p8579_p9 = pnand %p8578_p7, %p8572_p2 }
  0x25   : > { %8582 = shalt.err (!%p8579_p9)
}
  0x26   : > { %s8836_s23 = smov 64   ;;  %s8837_s28 = smov 4  }
  0x27   : > { %8467 = dma.hbm_to_vmem [thread:$0]  (!%p8929_p6), %s14315_s1, 128, %s8918_s29, [#allocation8], %s8836_s23, %s8836_s23, %s8837_s28  }
  0x28   : > { %s8583_s16 = scalar_lea.hbm %s14317_s3, 16 }
  0x29   : > { %p8584_p4 = scmp.ne.s32.totalorder %s14317_s3, %s8583_s16  ;;  %p8590_p12 = scmp.lt.u32.totalorder %s8583_s16, %s14317_s3 }
  0x2b   : > { %p8586_p10 = pnand %p8584_p4, %p8945_p8 }
  0x2d   : > { %p8587_p11 = pneg %p8586_p10 }
  0x2f   : > { %p8592_p13 = pnand %p8590_p12, %p8587_p11 }
  0x31   : > { %8595 = shalt.err (!%p8592_p13)
}
  0x32   : > { %s8596_s29 = scalar_lea.vmem %s8933_s10, 16  ;;  %s8603_s22 = scalar_lea.vmem %s8933_s10, 32 }
  0x33   : > { %p8597_p0 = scmp.ne.s32.totalorder %s8933_s10, %s8596_s29  ;;  %p8604_p7 = scmp.lt.s32.totalorder %s8933_s10, %s8933_s10 }
  0x34   : > { %p8605_p9 = scmp.lt.s32.totalorder %s8603_s22, %s8596_s29 }
  0x35   : > { %p8599_p2 = pnand %p8597_p0, %p8945_p8 }
  0x36   : > { %p8606_p4 = por %p8605_p9, %p8604_p7 }
  0x37   : > { %p8600_p5 = pneg %p8599_p2 }
  0x39   : > { %p8607_p10 = pnand %p8606_p4, %p8600_p5 }
  0x3b   : > { %8610 = shalt.err (!%p8607_p10)
}
  0x3c   : > { %8473 = dma.hbm_to_vmem [thread:$0]  (!%p8929_p6), %s14317_s3, 16, %s8933_s10, [#allocation11]  }
  0x3d   : > { %s8611_s14 = scalar_lea.hbm %s14319_s5, 16 }
  0x3e   : > { %p8612_p11 = scmp.ne.s32.totalorder %s14319_s5, %s8611_s14  ;;  %p8618_p0 = scmp.lt.u32.totalorder %s8611_s14, %s14319_s5 }
  0x40   : > { %p8614_p12 = pnand %p8612_p11, %p8945_p8 }
  0x42   : > { %p8615_p13 = pneg %p8614_p12 }
  0x44   : > { %p8620_p2 = pnand %p8618_p0, %p8615_p13 }
  0x46   : > { %8623 = shalt.err (!%p8620_p2)
}
  0x47   : > { %s8624_s10 = scalar_lea.vmem %s8935_s13, 16  ;;  %s8631_s20 = scalar_lea.vmem %s8935_s13, 32 }
  0x48   : > { %p8625_p5 = scmp.ne.s32.totalorder %s8935_s13, %s8624_s10  ;;  %p8632_p4 = scmp.lt.s32.totalorder %s8935_s13, %s8935_s13 }
  0x49   : > { %p8633_p10 = scmp.lt.s32.totalorder %s8631_s20, %s8624_s10 }
  0x4a   : > { %p8627_p7 = pnand %p8625_p5, %p8945_p8 }
  0x4b   : > { %p8634_p11 = por %p8633_p10, %p8632_p4 }
  0x4c   : > { %p8628_p9 = pneg %p8627_p7 }
  0x4e   : > { %p8635_p12 = pnand %p8634_p11, %p8628_p9 }
  0x50   : > { %8638 = shalt.err (!%p8635_p12)
}
  0x51   : > { %8479 = dma.hbm_to_vmem [thread:$0]  (!%p8929_p6), %s14319_s5, 16, %s8935_s13, [#allocation14]  }
  0x52   : > { %s8838_s22 = smov [#allocation9]   ;;  %s8839_s28 = smov [#allocation12]  }
  0x53   : > { %s235_s23 = sshll.u32 %s8838_s22, 4  ;;  %s256_s9 = sshll.u32 %s8839_s28, 4  ;;  %s236_s23 = int_to_ptr.vmem [resolvable:$true] %s235_s23  ;;  %s257_s9 = int_to_ptr.vmem [resolvable:$true] %s256_s9 }
  0x54   : > { %s8639_s15 = scalar_lea.hbm %s14316_s2, 64 }
  0x55   : > { %p8640_p13 = scmp.ne.s32.totalorder %s14316_s2, %s8639_s15  ;;  %p8646_p5 = scmp.lt.u32.totalorder %s8639_s15, %s14316_s2 }
  0x57   : > { %p8642_p0 = pnand %p8640_p13, %p8945_p8 }
  0x59   : > { %p8643_p2 = pneg %p8642_p0 }
  0x5b   : > { %p8648_p7 = pnand %p8646_p5, %p8643_p2 }
  0x5d   : > { %8651 = shalt.err (!%p8648_p7)
}
  0x5e   : > { %s8652_s13 = scalar_lea.vmem %s236_s23, 64  ;;  %p8660_p11 = scmp.lt.s32.totalorder %s236_s23, %s236_s23 }
  0x5f   : > { %p8653_p9 = scmp.ne.s32.totalorder %s236_s23, %s8652_s13  ;;  %p8661_p12 = scmp.lt.s32.totalorder %s8652_s13, %s8652_s13 }
  0x61   : > { %p8655_p4 = pnand %p8653_p9, %p8945_p8  ;;  %p8662_p1 = por %p8661_p12, %p8660_p11 }
  0x63   : > { %p8656_p10 = pneg %p8655_p4 }
  0x65   : > { %p8663_p3 = pnand %p8662_p1, %p8656_p10 }
  0x67   : > { %8666 = shalt.err (!%p8663_p3)
}
  0x68   : > { %8470 = dma.hbm_to_vmem [thread:$0]  (!%p8929_p6), %s14316_s2, 64, %s236_s23, [#allocation8]  }
  0x69   : > { %s8667_s28 = scalar_lea.hbm %s14318_s4, 384 }
  0x6a   : > { %p8668_p13 = scmp.ne.s32.totalorder %s14318_s4, %s8667_s28  ;;  %p8674_p3 = scmp.lt.u32.totalorder %s8667_s28, %s14318_s4 }
  0x6c   : > { %p8670_p0 = pnand %p8668_p13, %p8945_p8 }
  0x6e   : > { %p8671_p1 = pneg %p8670_p0 }
  0x70   : > { %p8676_p2 = pnand %p8674_p3, %p8671_p1 }
  0x72   : > { %8679 = shalt.err (!%p8676_p2)
}
  0x73   : > { %s8680_s17 = scalar_lea.vmem %s257_s9, 384  ;;  %p8688_p4 = scmp.lt.s32.totalorder %s257_s9, %s257_s9 }
  0x74   : > { %p8681_p5 = scmp.ne.s32.totalorder %s257_s9, %s8680_s17  ;;  %p8689_p10 = scmp.lt.s32.totalorder %s8680_s17, %s8680_s17 }
  0x76   : > { %p8683_p7 = pnand %p8681_p5, %p8945_p8  ;;  %p8690_p11 = por %p8689_p10, %p8688_p4 }
  0x78   : > { %p8684_p9 = pneg %p8683_p7 }
  0x7a   : > { %p8691_p12 = pnand %p8690_p11, %p8684_p9 }
  0x7c   : > { %8694 = shalt.err (!%p8691_p12)
}
  0x7d   : > { %s14324_s23 = smov 128   ;;  %s8841_s18 = smov 8  }
  0x7e   : > { %8476 = dma.hbm_to_vmem [thread:$0]  (!%p8929_p6), %s14318_s4, 384, %s257_s9, [#allocation11], %s14324_s23, %s14324_s23, %s8841_s18  }
  0x7f   : > { %s8842_s20 = smov [#allocation15]   ;;  %s8695_s28 = scalar_lea.hbm %s14320_s6, 16 }
  0x80   : > { %s281_s21 = sshll.u32 %s8842_s20, 4  ;;  %p8696_p13 = scmp.ne.s32.totalorder %s14320_s6, %s8695_s28  ;;  %s282_s21 = int_to_ptr.vmem [resolvable:$true] %s281_s21 }
  0x81   : > { %p8702_p3 = scmp.lt.u32.totalorder %s8695_s28, %s14320_s6 }
  0x82   : > { %p8698_p0 = pnand %p8696_p13, %p8945_p8 }
  0x84   : > { %p8699_p1 = pneg %p8698_p0 }
  0x86   : > { %p8704_p2 = pnand %p8702_p3, %p8699_p1 }
  0x88   : > { %8707 = shalt.err (!%p8704_p2)
}
  0x89   : > { %s8708_s9 = scalar_lea.vmem %s282_s21, 16  ;;  %s8715_s17 = scalar_lea.vmem %s282_s21, 32 }
  0x8a   : > { %p8709_p5 = scmp.ne.s32.totalorder %s282_s21, %s8708_s9  ;;  %p8716_p4 = scmp.lt.s32.totalorder %s282_s21, %s282_s21 }
  0x8b   : > { %p8717_p10 = scmp.lt.s32.totalorder %s8715_s17, %s8708_s9 }
  0x8c   : > { %p8711_p7 = pnand %p8709_p5, %p8945_p8 }
  0x8d   : > { %p8718_p11 = por %p8717_p10, %p8716_p4 }
  0x8e   : > { %p8712_p9 = pneg %p8711_p7 }
  0x90   : > { %p8719_p12 = pnand %p8718_p11, %p8712_p9 }
  0x92   : > { %8722 = shalt.err (!%p8719_p12)
}
  0x93   : > { %8482 = dma.hbm_to_vmem [thread:$0]  (!%p8929_p6), %s14320_s6, 16, %s282_s21, [#allocation14]  }
  0x94   : > { %s7376_s19 = sadd.s32 4294967294, %s8831_s27   ;;  %s9073_s11 = sadd.s32 1, %s8831_s27  }
  0x95   : > { %s30_s20 = ssub.s32 %s8831_s27, %s9073_s11  ;;  %s33_s29 = sadd.s32 1, %s8827_s26 }
  0x96   : > { %p31_p8 = scmp.eq.s32.totalorder %s30_s20, 0  ;;  %p40_p13 = scmp.ne.s32.totalorder %s8827_s26, %s8823_s25 }
  0x97   : > { %p41_p0 = scmp.eq.s32.totalorder %s8831_s27, 0  ;;  %p46_p1 = scmp.ne.s32.totalorder %s8823_s25, %s8819_s24 }
  0x98   : > { %s9084_s22 = scalar_select %p31_p8, %s8827_s26, %s33_s29  }
  0x99   : > { %p9086_p3 = por %p41_p0, %p40_p13  ;;  %p14557_p2 = scmp.eq.s32.totalorder %s8913_s30, 0 }
  0x9a   : > { %p196_p5 = scmp.eq.s32.totalorder %s8913_s30, 1  ;;  %p202_p7 = scmp.eq.s32.totalorder %s7376_s19, 1 }
  0x9b   : > { %p9092_p6 = por %p14557_p2, %p46_p1  ;;  %p8497_p9 = scmp.lt.s32.totalorder %s8831_s27, 2 }
  0x9c   : > { %s292_s12 = sand.u32 1, %s8827_s26   ;;  %p9099_p4 = por %p196_p5, %p40_p13 }
  0x9d   : > { %p9103_p10 = por %p202_p7, %p46_p1  ;;  %s7385_s16 = sshll.u32 %s292_s12, 8 }
  0x9e   : > { %s14559_s14 = scalar_select %p9099_p4, 1, 0 }
  0x9f   : > { %s14560_s15 = scalar_select %p9103_p10, 1, 0 }
  0xa0   : > { %s7696_s9 = sshll.u32 %s8831_s27, 12  ;;  %s296_s19 = scalar_lea.vmem [#allocation4], %s7385_s16 }
  0xa1   : > { %s9111_s13 = scalar_lea.hbm %s14314_s0, %s7696_s9  ;;  %s303_s20 = sshll.u32 %s296_s19, 4  ;;  %s9113_s20 = int_to_ptr.vmem [resolvable:$true] %s303_s20 }
  0xa2   : > { %p9117_p11 = pnand %p8497_p9, %p9086_p3  ;;  %s9121_s23 = scalar_lea.sflag [#allocation5], %s292_s12 }
  0xa3   : > { %s8723_s17 = scalar_lea.hbm %s9111_s13, 4096  ;;  %s8728_s28 = scalar_lea.hbm %s14314_s0, 8192 }
  0xa4   : > { %p8724_p12 = scmp.ne.s32.totalorder %s9111_s13, %s8723_s17  ;;  %p8725_p8 = pneg %p9117_p11 }
  0xa5   : > { %p8729_p1 = scmp.lt.u32.totalorder %s9111_s13, %s14314_s0  ;;  %p8730_p3 = scmp.lt.u32.totalorder %s8728_s28, %s8723_s17 }
  0xa6   : > { %p8726_p13 = pnand %p8725_p8, %p8724_p12  ;;  %p8732_p5 = scmp.lt.u32.totalorder %s8723_s17, %s9111_s13 }
  0xa7   : > { %p8731_p2 = por %p8730_p3, %p8729_p1 }
  0xa8   : > { %p8727_p0 = pneg %p8726_p13 }
  0xa9   : > { %p8733_p7 = por %p8732_p5, %p8731_p2 }
  0xab   : > { %p8734_p9 = pnand %p8733_p7, %p8727_p0 }
  0xad   : > { %8737 = shalt.err (!%p8734_p9)
}
  0xae   : > { %s8738_s12 = scalar_lea.vmem %s9113_s20, 4096  ;;  %s8843_s16 = smov [#allocation4]  }
  0xaf   : > { %p8739_p12 = scmp.ne.s32.totalorder %s9113_s20, %s8738_s12  ;;  %s8743_s9 = sshll.u32 %s8843_s16, 4  ;;  %s8744_s9 = int_to_ptr.vmem [resolvable:$false] %s8743_s9 }
  0xb0   : > { %s8745_s10 = scalar_lea.vmem %s8744_s9, 8192  ;;  %p8746_p4 = scmp.lt.s32.totalorder %s9113_s20, %s8744_s9 }
  0xb1   : > { %p8741_p13 = pnand %p8739_p12, %p8725_p8  ;;  %p8747_p1 = scmp.lt.s32.totalorder %s8745_s10, %s8738_s12 }
  0xb3   : > { %p8742_p10 = pneg %p8741_p13  ;;  %p8748_p3 = por %p8747_p1, %p8746_p4 }
  0xb5   : > { %p8749_p2 = pnand %p8748_p3, %p8742_p10 }
  0xb7   : > { %8752 = shalt.err (!%p8749_p2)
}
  0xb8   : > { %s14562_s17 = smov 128   ;;  %p14563_p8 = scmp.ne.s32.totalorder %s14553_s8, 0 }
  0xb9   : > { %8486 = dma.hbm_to_vmem [thread:$0]  (!%p9117_p11), %s9111_s13, 4096, %s9113_s20, %s9121_s23, %s14562_s17, %s14562_s17, %s8841_s18  }
  0xba   : > { %315 = sbr.rel (%p14563_p8) target bundleno = 1780 (0x6f4), region = 48 }
  0xc1   : > { %s9155_s28 = sand.u32 1, %s8823_s25  }
  0xc2   : > { %s7389_s19 = sshll.u32 %s9155_s28, 8  ;;  %s318_s12 = scalar_lea.sflag [#allocation5], %s9155_s28 }
  0xc3   : > { %s9161_s29 = scalar_lea.vmem [#allocation4], %s7389_s19 }
  0xc4   : > { %8798 = dma.done.wait (%p9092_p6), %s318_s12, 4096  }
  0xc5   : > { %8800 = vsyncadd (%p9092_p6), %s318_s12, 4294963200  ;;  %p14564_p4 = scmp.eq.s32.totalorder %s8913_s30, 0 }
  0xc7   : > { %8802 = dma.done.wait (%p14564_p4), [#allocation8], 192   ;;  %p14565_p10 = pmov %p14564_p4 }
  0xc8   : > { %p14566_p11 = pmov %p14564_p4 }
  0xc9   : > { %8804 = vsyncadd (%p14565_p10), [#allocation8], 4294967104 }
  0xca   : > { %8806 = dma.done.wait (%p14566_p11), [#allocation11], 400   ;;  %p14567_p0 = pmov %p14564_p4 }
  0xcc   : > { %8808 = vsyncadd (%p14567_p0), [#allocation11], 4294966896  ;;  %p14568_p5 = pmov %p14567_p0 }
  0xcd   : > { %p14569_p7 = pmov %p14567_p0 }
  0xce   : > { %8810 = dma.done.wait (%p14568_p5), [#allocation14], 32  }
  0xcf   : > { %8812 = vsyncadd (%p14569_p7), [#allocation14], 4294967264  ;;  %vm376_vm0 = vcmask 31744   ;;  %v14326_v0 = vmov 0.0   ;;  %vm683_vm1 = vcmask 1043456   ;;  %v401_v3 = vld [vmem:[%s9161_s29] sm:$0xff] }
  0xd0   : > { %377 = vst.msk [vmem:[#allocation2] sm:$0xff] %vm376_vm0, %v14326_v0  ;;  %378 = vst.msk [vmem:[#allocation2 + $0x8] sm:$0xff] %vm376_vm0, %v14326_v0  ;;  %v490_v1 = vld [vmem:[#allocation7] sm:$0xf]  ;;  %v992_v2 = vld [vmem:[#allocation9] sm:$0xf] }
  0xd1   : > { %379 = vst.msk [vmem:[#allocation2 + $0x10] sm:$0xff] %vm376_vm0, %v14326_v0  ;;  %381 = vst.msk [vmem:[#allocation2 + $0x198] sm:$0xff] %vm376_vm0, %v14326_v0  ;;  %7992 = vmatprep.subr.msk.mxu0 %vm683_vm1, %v490_v1  ;;  %8066 = vmatprep.subr.msk.mxu1 %vm683_vm1, %v992_v2  ;;  %v402_v7 = vld [vmem:[%s9161_s29 + $0x8] sm:$0xff]  ;;  %v403_v8 = vld [vmem:[%s9161_s29 + $0x10] sm:$0xff]  ;;  %s8845_s8 = smov 112   ;;  %s8846_s23 = smov 120  }
  0xd2   : > { %382 = vst.msk [vmem:[#allocation2 + $0x1a0] sm:$0xff] %vm376_vm0, %v14326_v0  ;;  %383 = vst.msk [vmem:[#allocation2 + $0x1a8] sm:$0xff] %vm376_vm0, %v14326_v0  ;;  %7993 = vmatpush3.msk.msra.mxu0 %vm683_vm1, %v490_v1  ;;  %8067 = vmatpush3.msk.msra.mxu1 %vm683_vm1, %v992_v2  ;;  %v404_v9 = vld [vmem:[%s9161_s29 + $0x18] sm:$0xff]  ;;  %v405_v10 = vld [vmem:[%s9161_s29 + $0x20] sm:$0xff]  ;;  %vm465_vm4 = vcmask 64512   ;;  %s8847_s18 = smov 24  }
  0xd3   : > { %385 = vst.msk [vmem:[#allocation2 + $0x28] sm:$0xff] %vm376_vm0, %v14326_v0  ;;  %386 = vst.msk [vmem:[#allocation2 + $0x40] sm:$0xff] %vm376_vm0, %v14326_v0  ;;  %v406_v11 = vld [vmem:[%s9161_s29 + $0x28] sm:$0xff]  ;;  %v407_v12 = vld [vmem:[%s9161_s29 + $0x30] sm:$0xff]  ;;  %s8848_s21 = smov 104   ;;  %s14140_s13 = scalar_lea.vmem [#allocation16], %s7389_s19 }
  0xd4   : > { %387 = vst.msk [vmem:[#allocation2 + $0x58] sm:$0xff] %vm376_vm0, %v14326_v0  ;;  %388 = vst.msk [vmem:[#allocation2 + $0x70] sm:$0xff] %vm376_vm0, %v14326_v0  ;;  %v408_v13 = vld [vmem:[%s9161_s29 + $0x38] sm:$0xff]  ;;  %v409_v14 = vld [vmem:[%s9161_s29 + $0x40] sm:$0xff]  ;;  %s7697_s20 = sshll.u32 %s8913_s30, 12  ;;  %s7246_s16 = sshll.u32 %s14140_s13, 4  ;;  %s14268_s16 = int_to_ptr.vmem [resolvable:$true] %s7246_s16 }
  0xd5   : > { %389 = vst.msk [vmem:[#allocation2 + $0x88] sm:$0xff] %vm376_vm0, %v14326_v0  ;;  %390 = vst.msk [vmem:[#allocation2 + $0xa0] sm:$0xff] %vm376_vm0, %v14326_v0  ;;  %v410_v15 = vld [vmem:[%s9161_s29 + $0x48] sm:$0xff]  ;;  %v411_v16 = vld [vmem:[%s9161_s29 + $0x50] sm:$0xff]  ;;  %s14266_s17 = scalar_lea.hbm %s14321_s7, %s7697_s20  ;;  %s7233_s30 = scalar_lea.sflag [#allocation6], %s9155_s28 }
  0xd6   : > { %391 = vst.msk [vmem:[#allocation2 + $0xb8] sm:$0xff] %vm376_vm0, %v14326_v0  ;;  %392 = vst.msk [vmem:[#allocation2 + $0xd0] sm:$0xff] %vm376_vm0, %v14326_v0  ;;  %v412_v17 = vld [vmem:[%s9161_s29 + $0x58] sm:$0xff]  ;;  %v413_v18 = vld [vmem:[%s9161_s29 + $0x60] sm:$0xff]  ;;  %s8753_s19 = scalar_lea.vmem %s14268_s16, 4096  ;;  %p15336_p9 = scmp.ne.s32.totalorder %s14559_s14, 0 }
  0xd7   : > { %393 = vst.msk [vmem:[#allocation2 + $0xe8] sm:$0xff] %vm376_vm0, %v14326_v0  ;;  %394 = vst.msk [vmem:[#allocation2 + $0x100] sm:$0xff] %vm376_vm0, %v14326_v0  ;;  %v491_v4 = vld [vmem:[#allocation2] sm:$0xff]  ;;  %v492_v5 = vld [vmem:[#allocation2 + $0x8] sm:$0xff]  ;;  %p8754_p6 = scmp.ne.s32.totalorder %s14268_s16, %s8753_s19  ;;  %s8849_s12 = smov [#allocation16]  }
  0xd8   : > { %395 = vst.msk [vmem:[#allocation2 + $0x118] sm:$0xff] %vm376_vm0, %v14326_v0  ;;  %396 = vst.msk [vmem:[#allocation2 + $0x130] sm:$0xff] %vm376_vm0, %v14326_v0  ;;  %v493_v6 = vld [vmem:[#allocation2 + $0x10] sm:$0xff]  ;;  %7994 = vmatprep.mubr.msk.f32.mxu0 %vm376_vm0, %v491_v4  ;;  %v414_v20 = vld [vmem:[%s9161_s29 + $0x68] sm:$0xff] }
  0xd9   : > { %397 = vst.msk [vmem:[#allocation2 + $0x148] sm:$0xff] %vm376_vm0, %v14326_v0  ;;  %398 = vst.msk [vmem:[#allocation2 + $0x160] sm:$0xff] %vm376_vm0, %v14326_v0  ;;  %7995 = vmatmul.mubr.msk.f32.vlgmr.msra.gmra.mrb[0].mxu0 %vm376_vm0, %v492_v5  ;;  %v415_v22 = vld [vmem:[%s9161_s29 + $0x70] sm:$0xff]  ;;  %v416_v23 = vld [vmem:[%s9161_s29 + $0x78] sm:$0xff]  ;;  %p8755_p12 = pnand %p8754_p6, %p15336_p9 }
  0xda   : > { %399 = vst.msk [vmem:[#allocation2 + $0x178] sm:$0xff] %vm376_vm0, %v14326_v0  ;;  %400 = vst.msk [vmem:[#allocation2 + $0x190] sm:$0xff] %vm376_vm0, %v14326_v0  ;;  %7997 = vmatprep.mubr.msk.f32.mxu0 %vm376_vm0, %v493_v6  ;;  %v496_v21 = vld [vmem:[#allocation2 + $0x28] sm:$0xff]  ;;  %v417_v25 = vld [vmem:[%s9161_s29 + $0x80] sm:$0xff] }
  0xdb   : > { %433 = vst.msk [vmem:[#allocation2 + $0x18] sm:$0xff] %vm376_vm0, %v401_v3  ;;  %434 = vst.msk [vmem:[#allocation2 + $0x20] sm:$0xff] %vm376_vm0, %v402_v7  ;;  %v418_v26 = vld [vmem:[%s9161_s29 + $0x88] sm:$0xff]  ;;  %v419_v29 = vld [vmem:[%s9161_s29 + $0x90] sm:$0xff]  ;;  %p8756_p13 = pneg %p8755_p12 }
  0xdc   : > { %435 = vst.msk [vmem:[#allocation2 + $0x30] sm:$0xff] %vm376_vm0, %v403_v8  ;;  %436 = vst.msk [vmem:[#allocation2 + $0x38] sm:$0xff] %vm376_vm0, %v404_v9  ;;  %v420_v30 = vld [vmem:[%s9161_s29 + $0x98] sm:$0xff]  ;;  %v9286_v31 = vld [vmem:[#allocation2 + $0x40] sm:$0xff] }
  0xdd   : > { %437 = vst.msk [vmem:[#allocation2 + $0x48] sm:$0xff] %vm376_vm0, %v405_v10  ;;  %438 = vst.msk [vmem:[#allocation2 + $0x50] sm:$0xff] %vm376_vm0, %v406_v11  ;;  %v421_v32 = vld [vmem:[%s9161_s29 + $0xa0] sm:$0xff]  ;;  %v422_v33 = vld [vmem:[%s9161_s29 + $0xa8] sm:$0xff] }
  0xde   : > { %439 = vst.msk [vmem:[#allocation2 + $0x60] sm:$0xff] %vm376_vm0, %v407_v12  ;;  %440 = vst.msk [vmem:[#allocation2 + $0x68] sm:$0xff] %vm376_vm0, %v408_v13  ;;  %v423_v35 = vld [vmem:[%s9161_s29 + $0xb0] sm:$0xff]  ;;  %v424_v36 = vld [vmem:[%s9161_s29 + $0xb8] sm:$0xff] }
  0xdf   : > { %441 = vst.msk [vmem:[#allocation2 + $0x78] sm:$0xff] %vm376_vm0, %v409_v14  ;;  %442 = vst.msk [vmem:[#allocation2 + $0x80] sm:$0xff] %vm376_vm0, %v410_v15  ;;  %v425_v37 = vld [vmem:[%s9161_s29 + $0xc0] sm:$0xff]  ;;  %v426_v39 = vld [vmem:[%s9161_s29 + $0xc8] sm:$0xff] }
  0xe0   : > { %443 = vst.msk [vmem:[#allocation2 + $0x90] sm:$0xff] %vm376_vm0, %v411_v16  ;;  %444 = vst.msk [vmem:[#allocation2 + $0x98] sm:$0xff] %vm376_vm0, %v412_v17  ;;  %v427_v40 = vld [vmem:[%s9161_s29 + $0xd0] sm:$0xff]  ;;  %v9314_v41 = vld [vmem:[#allocation2 + $0x58] sm:$0xff] }
  0xe1   : > { %445 = vst.msk [vmem:[#allocation2 + $0xa8] sm:$0xff] %vm376_vm0, %v413_v18  ;;  %446 = vst.msk [vmem:[#allocation2 + $0xb0] sm:$0xff] %vm376_vm0, %v414_v20  ;;  %v428_v42 = vld [vmem:[%s9161_s29 + $0xd8] sm:$0xff]  ;;  %v429_v43 = vld [vmem:[%s9161_s29 + $0xe0] sm:$0xff] }
  0xe2   : > { %v494_v19 = vld [vmem:[#allocation2 + $0x18] sm:$0xff]  ;;  %v994_v24 = vld [vmem:[#allocation2 + $0x20] sm:$0xff]  ;;  %447 = vst.msk [vmem:[#allocation2 + $0xc0] sm:$0xff] %vm376_vm0, %v415_v22  ;;  %448 = vst.msk [vmem:[#allocation2 + $0xc8] sm:$0xff] %vm376_vm0, %v416_v23 }
  0xe3   : > { %7998 = vmatmul.mubr.msk.f32.gmra.mrb[2].mxu0 %vm376_vm0, %v494_v19  ;;  %8068 = vmatprep.mubr.msk.f32.mxu1 %vm376_vm0, %v494_v19  ;;  %449 = vst.msk [vmem:[#allocation2 + $0xd8] sm:$0xff] %vm376_vm0, %v417_v25  ;;  %v9270_v27 = vld [vmem:[#allocation2 + $0x30] sm:$0xff]  ;;  %450 = vst.msk [vmem:[#allocation2 + $0xe0] sm:$0xff] %vm376_vm0, %v418_v26  ;;  %v9274_v28 = vld [vmem:[#allocation2 + $0x38] sm:$0xff] }
  0xe4   : > { %8069 = vmatmul.mubr.msk.f32.vlgmr.msra.gmra.mrb[0].mxu1 %vm376_vm0, %v994_v24  ;;  %8000 = vmatprep.mubr.msk.f32.mxu0 %vm376_vm0, %v994_v24  ;;  %451 = vst.msk [vmem:[#allocation2 + $0xf0] sm:$0xff] %vm376_vm0, %v419_v29  ;;  %452 = vst.msk [vmem:[#allocation2 + $0xf8] sm:$0xff] %vm376_vm0, %v420_v30  ;;  %v9292_v34 = vld [vmem:[#allocation2 + $0x48] sm:$0xff]  ;;  %v9307_v38 = vld [vmem:[#allocation2 + $0x50] sm:$0xff] }
  0xe5   : > { %8071 = vmatprep.mubr.msk.f32.mxu1 %vm376_vm0, %v496_v21  ;;  %453 = vst.msk [vmem:[#allocation2 + $0x108] sm:$0xff] %vm376_vm0, %v421_v32  ;;  %454 = vst.msk [vmem:[#allocation2 + $0x110] sm:$0xff] %vm376_vm0, %v422_v33  ;;  %v430_v44 = vld [vmem:[%s9161_s29 + $0xe8] sm:$0xff]  ;;  %v431_v45 = vld [vmem:[%s9161_s29 + $0xf0] sm:$0xff] }
  0xe6   : > { %455 = vst.msk [vmem:[#allocation2 + $0x120] sm:$0xff] %vm376_vm0, %v423_v35  ;;  %456 = vst.msk [vmem:[#allocation2 + $0x128] sm:$0xff] %vm376_vm0, %v424_v36  ;;  %v432_v46 = vld [vmem:[%s9161_s29 + $0xf8] sm:$0xff]  ;;  %v9332_v47 = vld [vmem:[#allocation2 + $0x60] sm:$0xff]  ;;  %s8757_s29 = sshll.u32 %s8849_s12, 4  ;;  %s8758_s29 = int_to_ptr.vmem [resolvable:$false] %s8757_s29 }
  0xe7   : > { %8001 = vmatmul.mubr.msk.f32.gmra.mrb[4].mxu0 %vm376_vm0, %v496_v21  ;;  %457 = vst.msk [vmem:[#allocation2 + $0x138] sm:$0xff] %vm376_vm0, %v425_v37  ;;  %458 = vst.msk [vmem:[#allocation2 + $0x140] sm:$0xff] %vm376_vm0, %v426_v39  ;;  %v9338_v48 = vld [vmem:[#allocation2 + $0x68] sm:$0xff]  ;;  %v9346_v49 = vld [vmem:[#allocation2 + $0x70] sm:$0xff]  ;;  %p8760_p1 = scmp.lt.s32.totalorder %s14268_s16, %s8758_s29 }
  0xe8   : > { %8003 = vmatprep.mubr.msk.f32.mxu0 %vm376_vm0, %v9270_v27  ;;  %8072 = vmatmul.mubr.msk.f32.gmra.mrb[2].mxu1 %vm376_vm0, %v9270_v27  ;;  %459 = vst.msk [vmem:[#allocation2 + $0x150] sm:$0xff] %vm376_vm0, %v427_v40  ;;  %460 = vst.msk [vmem:[#allocation2 + $0x158] sm:$0xff] %vm376_vm0, %v428_v42  ;;  %v9350_v50 = vld [vmem:[#allocation2 + $0x78] sm:$0xff]  ;;  %v9358_v51 = vld [vmem:[#allocation2 + $0x80] sm:$0xff] }
  0xe9   : > { %8074 = vmatprep.mubr.msk.f32.mxu1 %vm376_vm0, %v9274_v28  ;;  %461 = vst.msk [vmem:[#allocation2 + $0x168] sm:$0xff] %vm376_vm0, %v429_v43  ;;  %462 = vst.msk [vmem:[#allocation2 + $0x170] sm:$0xff] %vm376_vm0, %v430_v44  ;;  %v9362_v52 = vld [vmem:[#allocation2 + $0x88] sm:$0xff]  ;;  %v9370_v53 = vld [vmem:[#allocation2 + $0x90] sm:$0xff] }
  0xea   : > { %463 = vst.msk [vmem:[#allocation2 + $0x180] sm:$0xff] %vm376_vm0, %v431_v45  ;;  %464 = vst.msk [vmem:[#allocation2 + $0x188] sm:$0xff] %vm376_vm0, %v432_v46  ;;  %v9374_v54 = vld [vmem:[#allocation2 + $0x98] sm:$0xff]  ;;  %v9382_v55 = vld [vmem:[#allocation2 + $0xa0] sm:$0xff] }
  0xeb   : > { %8004 = vmatmul.mubr.msk.f32.gmra.mrb[6].mxu0 %vm376_vm0, %v9274_v28  ;;  %v9386_v56 = vld [vmem:[#allocation2 + $0xa8] sm:$0xff]  ;;  %v9394_v57 = vld [vmem:[#allocation2 + $0xb0] sm:$0xff]  ;;  %v9398_v58 = vld [vmem:[#allocation2 + $0xb8] sm:$0xff] }
  0xec   : > { %8006 = vmatprep.mubr.msk.f32.mxu0 %vm376_vm0, %v9286_v31  ;;  %8075 = vmatmul.mubr.msk.f32.gmra.mrb[4].mxu1 %vm376_vm0, %v9286_v31  ;;  %v9406_v59 = vld [vmem:[#allocation2 + $0xc0] sm:$0xff]  ;;  %v9410_v60 = vld [vmem:[#allocation2 + $0xc8] sm:$0xff]  ;;  %v9418_v61 = vld [vmem:[#allocation2 + $0xd0] sm:$0xff] }
  0xed   : > { %8077 = vmatprep.mubr.msk.f32.mxu1 %vm376_vm0, %v9292_v34  ;;  %v9422_v62 = vld [vmem:[#allocation2 + $0xd8] sm:$0xff]  ;;  %v9430_v63 = vld [vmem:[#allocation2 + $0xe0] sm:$0xff]  ;;  %v9434_v1 = vld [vmem:[#allocation2 + $0xe8] sm:$0xff] }
  0xee   : > { %v9442_v2 = vld [vmem:[#allocation2 + $0xf0] sm:$0xff]  ;;  %v9446_v3 = vld [vmem:[#allocation2 + $0xf8] sm:$0xff]  ;;  %v9454_v4 = vld [vmem:[#allocation2 + $0x100] sm:$0xff] }
  0xef   : > { %8007 = vmatmul.mubr.msk.f32.gmra.mrb[8].mxu0 %vm376_vm0, %v9292_v34  ;;  %v9458_v5 = vld [vmem:[#allocation2 + $0x108] sm:$0xff]  ;;  %v9466_v6 = vld [vmem:[#allocation2 + $0x110] sm:$0xff]  ;;  %v9470_v7 = vld [vmem:[#allocation2 + $0x118] sm:$0xff] }
  0xf0   : > { %8009 = vmatprep.mubr.msk.f32.mxu0 %vm376_vm0, %v9307_v38  ;;  %8078 = vmatmul.mubr.msk.f32.gmra.mrb[6].mxu1 %vm376_vm0, %v9307_v38  ;;  %v9478_v8 = vld [vmem:[#allocation2 + $0x120] sm:$0xff]  ;;  %v9482_v9 = vld [vmem:[#allocation2 + $0x128] sm:$0xff]  ;;  %v9490_v10 = vld [vmem:[#allocation2 + $0x130] sm:$0xff] }
  0xf1   : > { %8080 = vmatprep.mubr.msk.f32.mxu1 %vm376_vm0, %v9314_v41  ;;  %v9494_v11 = vld [vmem:[#allocation2 + $0x138] sm:$0xff]  ;;  %v9502_v12 = vld [vmem:[#allocation2 + $0x140] sm:$0xff]  ;;  %v9506_v13 = vld [vmem:[#allocation2 + $0x148] sm:$0xff] }
  0xf2   : > { %v9514_v14 = vld [vmem:[#allocation2 + $0x150] sm:$0xff]  ;;  %v9518_v15 = vld [vmem:[#allocation2 + $0x158] sm:$0xff]  ;;  %v1034_v16 = vld [vmem:[#allocation2 + $0x160] sm:$0xff] }
  0xf3   : > { %8010 = vmatmul.mubr.msk.f32.gmra.mrb[10].mxu0 %vm376_vm0, %v9314_v41  ;;  %v536_v17 = vld [vmem:[#allocation2 + $0x168] sm:$0xff]  ;;  %v1036_v18 = vld [vmem:[#allocation2 + $0x170] sm:$0xff]  ;;  %v538_v19 = vld [vmem:[#allocation2 + $0x178] sm:$0xff] }
  0xf4   : > { %8012 = vmatprep.mubr.msk.f32.mxu0 %vm376_vm0, %v9332_v47  ;;  %8081 = vmatmul.mubr.msk.f32.gmra.mrb[8].mxu1 %vm376_vm0, %v9332_v47  ;;  %v1494_v20 = vld [vmem:[#allocation7 + $0x4] sm:$0xf]  ;;  %v1039_v22 = vld [vmem:[#allocation2 + $0x188] sm:$0xff]  ;;  %v1040_v23 = vld [vmem:[#allocation2 + $0x190] sm:$0xff] }
  0xf5   : > { %8083 = vmatprep.mubr.msk.f32.mxu1 %vm376_vm0, %v9338_v48  ;;  %8140 = vmatprep.subr.msk.mxu0 %vm683_vm1, %v1494_v20  ;;  %v1038_v21 = vld [vmem:[#allocation2 + $0x180] sm:$0xff]  ;;  %v1541_v24 = vld [vmem:[#allocation2 + $0x198] sm:$0xff]  ;;  %v1543_v26 = vld [vmem:[#allocation2 + $0x1a8] sm:$0xff] }
  0xf6   : > { %8141 = vmatpush3.msk.msra.mxu0 %vm683_vm1, %v1494_v20  ;;  %v1542_v25 = vld [vmem:[#allocation2 + $0x1a0] sm:$0xff] }
  0xf7   : > { %8013 = vmatmul.mubr.msk.f32.gmra.mrb[12].mxu0 %vm376_vm0, %v9338_v48 }
  0xf8   : > { %8015 = vmatprep.mubr.msk.f32.mxu0 %vm376_vm0, %v9346_v49  ;;  %8084 = vmatmul.mubr.msk.f32.gmra.mrb[10].mxu1 %vm376_vm0, %v9346_v49 }
  0xf9   : > { %8086 = vmatprep.mubr.msk.f32.mxu1 %vm376_vm0, %v9350_v50 }
  0xfb   : > { %8016 = vmatmul.mubr.msk.f32.gmra.mrb[14].mxu0 %vm376_vm0, %v9350_v50 }
  0xfc   : > { %8018 = vmatprep.mubr.msk.f32.mxu0 %vm376_vm0, %v9358_v51  ;;  %8087 = vmatmul.mubr.msk.f32.gmra.mrb[12].mxu1 %vm376_vm0, %v9358_v51 }
  0xfd   : > { %8089 = vmatprep.mubr.msk.f32.mxu1 %vm376_vm0, %v9362_v52 }
  0xff   : > { %8019 = vmatmul.mubr.msk.f32.gmra.mrb[16].mxu0 %vm376_vm0, %v9362_v52 }
 0x100   : > { %8021 = vmatprep.mubr.msk.f32.mxu0 %vm376_vm0, %v9370_v53  ;;  %8090 = vmatmul.mubr.msk.f32.gmra.mrb[14].mxu1 %vm376_vm0, %v9370_v53 }
 0x101   : > { %8092 = vmatprep.mubr.msk.f32.mxu1 %vm376_vm0, %v9374_v54 }
 0x103   : > { %8022 = vmatmul.mubr.msk.f32.gmra.mrb[18].mxu0 %vm376_vm0, %v9374_v54 }
 0x104   : > { %8024 = vmatprep.mubr.msk.f32.mxu0 %vm376_vm0, %v9382_v55  ;;  %8093 = vmatmul.mubr.msk.f32.gmra.mrb[16].mxu1 %vm376_vm0, %v9382_v55 }
 0x105   : > { %8095 = vmatprep.mubr.msk.f32.mxu1 %vm376_vm0, %v9386_v56 }
 0x107   : > { %8025 = vmatmul.mubr.msk.f32.gmra.mrb[20].mxu0 %vm376_vm0, %v9386_v56 }
 0x108   : > { %8027 = vmatprep.mubr.msk.f32.mxu0 %vm376_vm0, %v9394_v57  ;;  %8096 = vmatmul.mubr.msk.f32.gmra.mrb[18].mxu1 %vm376_vm0, %v9394_v57 }
 0x109   : > { %8098 = vmatprep.mubr.msk.f32.mxu1 %vm376_vm0, %v9398_v58 }
 0x10b   : > { %8028 = vmatmul.mubr.msk.f32.gmra.mrb[22].mxu0 %vm376_vm0, %v9398_v58 }
 0x10c   : > { %8030 = vmatprep.mubr.msk.f32.mxu0 %vm376_vm0, %v9406_v59  ;;  %8099 = vmatmul.mubr.msk.f32.gmra.mrb[20].mxu1 %vm376_vm0, %v9406_v59 }
 0x10d   : > { %8101 = vmatprep.mubr.msk.f32.mxu1 %vm376_vm0, %v9410_v60 }
 0x10f   : > { %8031 = vmatmul.mubr.msk.f32.gmra.mrb[24].mxu0 %vm376_vm0, %v9410_v60 }
 0x110   : > { %8033 = vmatprep.mubr.msk.f32.mxu0 %vm376_vm0, %v9418_v61  ;;  %8102 = vmatmul.mubr.msk.f32.gmra.mrb[22].mxu1 %vm376_vm0, %v9418_v61 }
 0x111   : > { %8104 = vmatprep.mubr.msk.f32.mxu1 %vm376_vm0, %v9422_v62 }
 0x113   : > { %8034 = vmatmul.mubr.msk.f32.gmra.mrb[26].mxu0 %vm376_vm0, %v9422_v62 }
 0x114   : > { %8036 = vmatprep.mubr.msk.f32.mxu0 %vm376_vm0, %v9430_v63  ;;  %8105 = vmatmul.mubr.msk.f32.gmra.mrb[24].mxu1 %vm376_vm0, %v9430_v63 }
 0x115   : > { %8107 = vmatprep.mubr.msk.f32.mxu1 %vm376_vm0, %v9434_v1 }
 0x117   : > { %8037 = vmatmul.mubr.msk.f32.gmra.mrb[28].mxu0 %vm376_vm0, %v9434_v1 }
 0x118   : > { %8039 = vmatprep.mubr.msk.f32.mxu0 %vm376_vm0, %v9442_v2  ;;  %8108 = vmatmul.mubr.msk.f32.gmra.mrb[26].mxu1 %vm376_vm0, %v9442_v2 }
 0x119   : > { %8110 = vmatprep.mubr.msk.f32.mxu1 %vm376_vm0, %v9446_v3 }
 0x11b   : > { %8040 = vmatmul.mubr.msk.f32.gmra.mrb[30].mxu0 %vm376_vm0, %v9446_v3 }
 0x11c   : > { %8042 = vmatprep.mubr.msk.f32.mxu0 %vm376_vm0, %v9454_v4  ;;  %8111 = vmatmul.mubr.msk.f32.gmra.mrb[28].mxu1 %vm376_vm0, %v9454_v4 }
 0x11d   : > { %8113 = vmatprep.mubr.msk.f32.mxu1 %vm376_vm0, %v9458_v5 }
 0x11f   : > { %8043 = vmatmul.mubr.msk.f32.gmra.mrb[32].mxu0 %vm376_vm0, %v9458_v5 }
 0x120   : > { %8045 = vmatprep.mubr.msk.f32.mxu0 %vm376_vm0, %v9466_v6  ;;  %8114 = vmatmul.mubr.msk.f32.gmra.mrb[30].mxu1 %vm376_vm0, %v9466_v6 }
 0x121   : > { %8116 = vmatprep.mubr.msk.f32.mxu1 %vm376_vm0, %v9470_v7 }
 0x123   : > { %8046 = vmatmul.mubr.msk.f32.gmra.mrb[34].mxu0 %vm376_vm0, %v9470_v7 }
 0x124   : > { %8048 = vmatprep.mubr.msk.f32.mxu0 %vm376_vm0, %v9478_v8  ;;  %8117 = vmatmul.mubr.msk.f32.gmra.mrb[32].mxu1 %vm376_vm0, %v9478_v8 }
 0x125   : > { %8119 = vmatprep.mubr.msk.f32.mxu1 %vm376_vm0, %v9482_v9 }
 0x127   : > { %8049 = vmatmul.mubr.msk.f32.gmra.mrb[36].mxu0 %vm376_vm0, %v9482_v9 }
 0x128   : > { %8051 = vmatprep.mubr.msk.f32.mxu0 %vm376_vm0, %v9490_v10  ;;  %8120 = vmatmul.mubr.msk.f32.gmra.mrb[34].mxu1 %vm376_vm0, %v9490_v10 }
 0x129   : > { %8122 = vmatprep.mubr.msk.f32.mxu1 %vm376_vm0, %v9494_v11 }
 0x12b   : > { %8052 = vmatmul.mubr.msk.f32.gmra.mrb[38].mxu0 %vm376_vm0, %v9494_v11 }
 0x12c   : > { %8054 = vmatprep.mubr.msk.f32.mxu0 %vm376_vm0, %v9502_v12  ;;  %8123 = vmatmul.mubr.msk.f32.gmra.mrb[36].mxu1 %vm376_vm0, %v9502_v12 }
 0x12d   : > { %8125 = vmatprep.mubr.msk.f32.mxu1 %vm376_vm0, %v9506_v13 }
 0x12f   : > { %8055 = vmatmul.mubr.msk.f32.gmra.mrb[40].mxu0 %vm376_vm0, %v9506_v13 }
 0x130   : > { %8057 = vmatprep.mubr.msk.f32.mxu0 %vm376_vm0, %v9514_v14  ;;  %8126 = vmatmul.mubr.msk.f32.gmra.mrb[38].mxu1 %vm376_vm0, %v9514_v14 }
 0x131   : > { %8128 = vmatprep.mubr.msk.f32.mxu1 %vm376_vm0, %v9518_v15 }
 0x133   : > { %8058 = vmatmul.mubr.msk.f32.gmra.mrb[42].mxu0 %vm376_vm0, %v9518_v15 }
 0x134   : > { %8060 = vmatprep.mubr.msk.f32.mxu0 %vm376_vm0, %v1034_v16  ;;  %8129 = vmatmul.mubr.msk.f32.gmra.mrb[40].mxu1 %vm376_vm0, %v1034_v16 }
 0x135   : > { %8131 = vmatprep.mubr.msk.f32.mxu1 %vm376_vm0, %v536_v17 }
 0x137   : > { %8061 = vmatmul.mubr.msk.f32.gmra.mrb[44].mxu0 %vm376_vm0, %v536_v17 }
 0x138   : > { %8063 = vmatprep.mubr.msk.f32.mxu0 %vm376_vm0, %v1036_v18  ;;  %8132 = vmatmul.mubr.msk.f32.gmra.mrb[42].mxu1 %vm376_vm0, %v1036_v18 }
 0x139   : > { %8134 = vmatprep.mubr.msk.f32.mxu1 %vm376_vm0, %v538_v19 }
 0x13b   : > { %8064 = vmatmul.mubr.msk.f32.gmra.mrb[46].mxu0 %vm376_vm0, %v538_v19 }
 0x13c   : > { %8142 = vmatprep.mubr.msk.f32.mxu0 %vm376_vm0, %v9270_v27  ;;  %8135 = vmatmul.mubr.msk.f32.gmra.mrb[44].mxu1 %vm376_vm0, %v1038_v21  ;;  %v2044_v27 = vlaneseq }
 0x13d   : > { %8137 = vmatprep.mubr.msk.f32.mxu1 %vm376_vm0, %v1039_v22 }
 0x13f   : > { %8143 = vmatmul.mubr.msk.f32.vlgmr.msra.gmra.mrb[48].mxu0 %vm376_vm0, %v9274_v28  ;;  %v9627_v28 = vshrl.u32 %v2044_v27, 7 }
 0x140   : > { %8145 = vmatprep.mubr.msk.f32.mxu0 %vm376_vm0, %v9286_v31  ;;  %8138 = vmatmul.mubr.msk.f32.gmra.mrb[46].mxu1 %vm376_vm0, %v1040_v23 }
 0x141   : > { %vm2046_vm2 = vcmp.lt.s32.totalorder %v9627_v28, 1  ;;  %vm2447_vm3 = vcmp.lt.s32.totalorder %v9627_v28, 7 }
 0x143   : > { %8146 = vmatmul.mubr.msk.f32.gmra.mrb[50].mxu0 %vm376_vm0, %v9292_v34 }
 0x144   : > { %8148 = vmatprep.mubr.msk.f32.mxu0 %vm376_vm0, %v9307_v38 }
 0x147   : > { %8149 = vmatmul.mubr.msk.f32.gmra.mrb[52].mxu0 %vm376_vm0, %v9314_v41 }
 0x148   : > { %8151 = vmatprep.mubr.msk.f32.mxu0 %vm376_vm0, %v9332_v47 }
 0x14b   : > { %8152 = vmatmul.mubr.msk.f32.gmra.mrb[54].mxu0 %vm376_vm0, %v9338_v48 }
 0x14c   : > { %8154 = vmatprep.mubr.msk.f32.mxu0 %vm376_vm0, %v9346_v49 }
 0x14f   : > { %8155 = vmatmul.mubr.msk.f32.gmra.mrb[56].mxu0 %vm376_vm0, %v9350_v50 }
 0x150   : > { %8157 = vmatprep.mubr.msk.f32.mxu0 %vm376_vm0, %v9358_v51 }
 0x153   : > { %8158 = vmatmul.mubr.msk.f32.gmra.mrb[58].mxu0 %vm376_vm0, %v9362_v52 }
 0x154   : > { %8160 = vmatprep.mubr.msk.f32.mxu0 %vm376_vm0, %v9370_v53 }
 0x157   : > { %8161 = vmatmul.mubr.msk.f32.gmra.mrb[60].mxu0 %vm376_vm0, %v9374_v54 }
 0x158   : > { %8163 = vmatprep.mubr.msk.f32.mxu0 %vm376_vm0, %v9382_v55 }
 0x15b   : > { %8164 = vmatmul.mubr.msk.f32.gmra.mrb[62].mxu0 %vm376_vm0, %v9386_v56 }
 0x15c   : > { %8166 = vmatprep.mubr.msk.f32.mxu0 %vm376_vm0, %v9394_v57 }
 0x15f   : > { %8167 = vmatmul.mubr.msk.f32.gmra.mrb[64].mxu0 %vm376_vm0, %v9398_v58 }
 0x160   : > { %8169 = vmatprep.mubr.msk.f32.mxu0 %vm376_vm0, %v9406_v59 }
 0x163   : > { %8170 = vmatmul.mubr.msk.f32.gmra.mrb[66].mxu0 %vm376_vm0, %v9410_v60 }
 0x164   : > { %8172 = vmatprep.mubr.msk.f32.mxu0 %vm376_vm0, %v9418_v61 }
 0x167   : > { %8173 = vmatmul.mubr.msk.f32.gmra.mrb[68].mxu0 %vm376_vm0, %v9422_v62 }
 0x168   : > { %8175 = vmatprep.mubr.msk.f32.mxu0 %vm376_vm0, %v9430_v63 }
 0x16b   : > { %8176 = vmatmul.mubr.msk.f32.gmra.mrb[70].mxu0 %vm376_vm0, %v9434_v1 }
 0x16c   : > { %8178 = vmatprep.mubr.msk.f32.mxu0 %vm376_vm0, %v9442_v2 }
 0x16f   : > { %8179 = vmatmul.mubr.msk.f32.gmra.mrb[72].mxu0 %vm376_vm0, %v9446_v3 }
 0x170   : > { %8181 = vmatprep.mubr.msk.f32.mxu0 %vm376_vm0, %v9454_v4 }
 0x173   : > { %8182 = vmatmul.mubr.msk.f32.gmra.mrb[74].mxu0 %vm376_vm0, %v9458_v5 }
 0x174   : > { %8184 = vmatprep.mubr.msk.f32.mxu0 %vm376_vm0, %v9466_v6 }
 0x177   : > { %8185 = vmatmul.mubr.msk.f32.gmra.mrb[76].mxu0 %vm376_vm0, %v9470_v7 }
 0x178   : > { %8187 = vmatprep.mubr.msk.f32.mxu0 %vm376_vm0, %v9478_v8 }
 0x17b   : > { %8188 = vmatmul.mubr.msk.f32.gmra.mrb[78].mxu0 %vm376_vm0, %v9482_v9 }
 0x17c   : > { %8190 = vmatprep.mubr.msk.f32.mxu0 %vm376_vm0, %v9490_v10 }
 0x17f   : > { %8191 = vmatmul.mubr.msk.f32.gmra.mrb[80].mxu0 %vm376_vm0, %v9494_v11 }
 0x180   : > { %8193 = vmatprep.mubr.msk.f32.mxu0 %vm376_vm0, %v9502_v12 }
 0x183   : > { %8194 = vmatmul.mubr.msk.f32.gmra.mrb[82].mxu0 %vm376_vm0, %v9506_v13 }
 0x184   : > { %8196 = vmatprep.mubr.msk.f32.mxu0 %vm376_vm0, %v9514_v14 }
 0x187   : > { %8197 = vmatmul.mubr.msk.f32.gmra.mrb[84].mxu0 %vm376_vm0, %v9518_v15 }
 0x188   : > { %8199 = vmatprep.mubr.msk.f32.mxu0 %vm376_vm0, %v1034_v16 }
 0x18b   : > { %8200 = vmatmul.mubr.msk.f32.gmra.mrb[86].mxu0 %vm376_vm0, %v536_v17 }
 0x18c   : > { %8202 = vmatprep.mubr.msk.f32.mxu0 %vm376_vm0, %v1036_v18 }
 0x18f   : > { %8203 = vmatmul.mubr.msk.f32.gmra.mrb[88].mxu0 %vm376_vm0, %v538_v19 }
 0x190   : > { %8205 = vmatprep.mubr.msk.f32.mxu0 %vm376_vm0, %v1038_v21 }
 0x193   : > { %8206 = vmatmul.mubr.msk.f32.gmra.mrb[90].mxu0 %vm376_vm0, %v1039_v22 }
 0x194   : > { %8208 = vmatprep.mubr.msk.f32.mxu0 %vm376_vm0, %v1040_v23 }
 0x197   : > { %8209 = vmatmul.mubr.msk.f32.gmra.mrb[92].mxu0 %vm376_vm0, %v1541_v24 }
 0x198   : > { %8211 = vmatprep.mubr.msk.f32.mxu0 %vm376_vm0, %v1542_v25 }
 0x19b   : > { %8212 = vmatmul.mubr.msk.f32.gmra.mrb[94].mxu0 %vm376_vm0, %v1543_v26 }
 0x1ac   : > { %v7996_v29 = vpop.f32.mrb[0].mxu0 }
 0x1ad   : > { %v1997_v30 = vrot.slane %v7996_v29, 7  ;;  %2257 = vrot.lane.b32.xlu1 %v7996_v29, %s8845_s8  ;;  %2113 = vrot.lane.b32.xlu0 %v7996_v29, %s8846_s23  ;;  %v9631_v31 = vpop.f32.mrb[1].mxu0 }
 0x1ae   : > { %v14329_v32 = vrot.slane %v9631_v31, 7 }
 0x1b0   : > { %v9639_v33 = vsel %vm2046_vm2, %v14329_v32, %v1997_v30 }
 0x1b1   : > { %2111 = vrot.lane.b32.xlu0 %v9631_v31, %s8846_s23 }
 0x1b5   : > { %2255 = vrot.lane.b32.xlu0 %v9631_v31, %s8845_s8 }
 0x1b6   : > { %v7999_v34 = vpop.f32.mrb[2].mxu0 }
 0x1b7   : > { %v1999_v35 = vrot.slane %v7999_v34, 7  ;;  %2115 = vrot.lane.b32.xlu1 %v7999_v34, %s8846_s23  ;;  %v763_v36 = vpop.f32.mrb[3].mxu0  ;;  %v9644_v38 = vpop.f32.mrb[0].mxu1 }
 0x1b8   : > { %v1998_v37 = vrot.slane %v763_v36, 7  ;;  %14570 = vst [vmem:[#allocation22_spill] sm:$0xff] %v9644_v38  ;;  %v2513_v39 = vrot.slane %v9644_v38, 7  ;;  %v9649_v40 = vpop.f32.mrb[1].mxu1 }
 0x1b9   : > { %14571 = vst [vmem:[#allocation23_spill] sm:$0xff] %v9649_v40  ;;  %v14328_v42 = vrot.slane %v9649_v40, 7  ;;  %2259 = vrot.lane.b32.xlu0 %v763_v36, %s8845_s8 }
 0x1ba   : > { %v8002_v41 = vpop.f32.mrb[4].mxu0  ;;  %v9654_v43 = vsel %vm2046_vm2, %v1998_v37, %v1999_v35 }
 0x1bb   : > { %2261 = vrot.lane.b32.xlu1 %v7999_v34, %s8845_s8  ;;  %v773_v44 = vpop.f32.mrb[5].mxu0  ;;  %v9657_v46 = vpop.f32.mrb[2].mxu1  ;;  %v9663_v47 = vsel %vm2046_vm2, %v14328_v42, %v2513_v39  ;;  %v2001_v50 = vrot.slane %v8002_v41, 7 }
 0x1bc   : > { %v2000_v45 = vrot.slane %v773_v44, 7  ;;  %14572 = vst [vmem:[#allocation24_spill] sm:$0xff] %v9657_v46  ;;  %v2515_v48 = vrot.slane %v9657_v46, 7  ;;  %v9667_v49 = vpop.f32.mrb[3].mxu1 }
 0x1bd   : > { %v2514_v52 = vrot.slane %v9667_v49, 7  ;;  %2624 = vrot.lane.b32.xlu0 %v9649_v40, %s8846_s23 }
 0x1be   : > { %v9669_v51 = vpop.f32.mrb[6].mxu0  ;;  %v9674_v53 = vsel %vm2046_vm2, %v1999_v35, %v2000_v45 }
 0x1bf   : > { %2626 = vrot.lane.b32.xlu1 %v9644_v38, %s8846_s23  ;;  %v2003_v54 = vrot.slane %v9669_v51, 7  ;;  %v9679_v55 = vpop.f32.mrb[7].mxu0  ;;  %v9682_v57 = vpop.f32.mrb[4].mxu1  ;;  %v9686_v58 = vsel %vm2046_vm2, %v2514_v52, %v2515_v48 }
 0x1c0   : > { %v2002_v56 = vrot.slane %v9679_v55, 7  ;;  %v9690_v59 = vpop.f32.mrb[5].mxu1  ;;  %v2517_v3 = vrot.slane %v9682_v57, 7 }
 0x1c1   : > { %14573 = vst [vmem:[#allocation25_spill] sm:$0xff] %v9690_v59  ;;  %v2516_v60 = vrot.slane %v9690_v59, 7  ;;  %2768 = vrot.lane.b32.xlu0 %v9649_v40, %s8845_s8 }
 0x1c2   : > { %v9693_v61 = vpop.f32.mrb[8].mxu0  ;;  %v9697_v62 = vsel %vm2046_vm2, %v2002_v56, %v2003_v54  ;;  %v9701_v63 = vsel %vm2046_vm2, %v2001_v50, %v2002_v56 }
 0x1c3   : > { %14574 = vst [vmem:[#allocation26_spill] sm:$0xff] %v9697_v62  ;;  %14575 = vst [vmem:[#allocation27_spill] sm:$0xff] %v9701_v63  ;;  %2770 = vrot.lane.b32.xlu1 %v9644_v38, %s8845_s8  ;;  %v2005_v1 = vrot.slane %v9693_v61, 7  ;;  %v9706_v2 = vpop.f32.mrb[9].mxu0  ;;  %v9709_v4 = vpop.f32.mrb[6].mxu1  ;;  %v9714_v6 = vsel %vm2046_vm2, %v2515_v48, %v2516_v60 }
 0x1c4   : > { %14576 = vst [vmem:[#allocation28_spill] sm:$0xff] %v9709_v4  ;;  %v2004_v5 = vrot.slane %v9706_v2, 7  ;;  %v2519_v7 = vrot.slane %v9709_v4, 7  ;;  %v9719_v8 = vpop.f32.mrb[7].mxu1 }
 0x1c5   : > { %14577 = vst [vmem:[#allocation29_spill] sm:$0xff] %v9719_v8  ;;  %v2518_v9 = vrot.slane %v9719_v8, 7  ;;  %2263 = vrot.lane.b32.xlu0 %v773_v44, %s8845_s8 }
 0x1c6   : > { %v9722_v10 = vpop.f32.mrb[10].mxu0  ;;  %v9726_v11 = vsel %vm2046_vm2, %v2004_v5, %v2005_v1 }
 0x1c7   : > { %14578 = vst [vmem:[#allocation30_spill] sm:$0xff] %v9726_v11  ;;  %2265 = vrot.lane.b32.xlu1 %v8002_v41, %s8845_s8  ;;  %v9729_v12 = vpop.f32.mrb[11].mxu0  ;;  %v9732_v14 = vpop.f32.mrb[8].mxu1  ;;  %v9736_v15 = vsel %vm2046_vm2, %v2518_v9, %v2519_v7  ;;  %v9740_v16 = vsel %vm2046_vm2, %v2517_v3, %v2518_v9  ;;  %v2007_v19 = vrot.slane %v9722_v10, 7 }
 0x1c8   : > { %v2006_v13 = vrot.slane %v9729_v12, 7  ;;  %14579 = vst [vmem:[#allocation31_spill] sm:$0xff] %v9732_v14  ;;  %14580 = vst [vmem:[#allocation32_spill] sm:$0xff] %v9736_v15  ;;  %v2521_v17 = vrot.slane %v9732_v14, 7  ;;  %v9744_v18 = vpop.f32.mrb[9].mxu1 }
 0x1c9   : > { %14581 = vst [vmem:[#allocation33_spill] sm:$0xff] %v9740_v16  ;;  %v2520_v21 = vrot.slane %v9744_v18, 7  ;;  %2628 = vrot.lane.b32.xlu0 %v9657_v46, %s8846_s23 }
 0x1ca   : > { %v9747_v20 = vpop.f32.mrb[12].mxu0  ;;  %v9752_v22 = vsel %vm2046_vm2, %v2005_v1, %v2006_v13 }
 0x1cb   : > { %14582 = vst [vmem:[#allocation34_spill] sm:$0xff] %v9752_v22  ;;  %2117 = vrot.lane.b32.xlu1 %v773_v44, %s8846_s23  ;;  %v2009_v23 = vrot.slane %v9747_v20, 7  ;;  %v9756_v24 = vpop.f32.mrb[13].mxu0  ;;  %v9759_v26 = vpop.f32.mrb[10].mxu1  ;;  %v9763_v27 = vsel %vm2046_vm2, %v2520_v21, %v2521_v17 }
 0x1cc   : > { %v2008_v25 = vrot.slane %v9756_v24, 7  ;;  %14583 = vst [vmem:[#allocation35_spill] sm:$0xff] %v9763_v27  ;;  %v9767_v29 = vpop.f32.mrb[11].mxu1  ;;  %v2523_v41 = vrot.slane %v9759_v26, 7 }
 0x1cd   : > { %14584 = vst [vmem:[#allocation36_spill] sm:$0xff] %v9767_v29  ;;  %v2522_v34 = vrot.slane %v9767_v29, 7  ;;  %2772 = vrot.lane.b32.xlu0 %v9667_v49, %s8845_s8 }
 0x1ce   : > { %v9769_v30 = vpop.f32.mrb[14].mxu0  ;;  %v9774_v35 = vsel %vm2046_vm2, %v2008_v25, %v2009_v23  ;;  %v9778_v36 = vsel %vm2046_vm2, %v2007_v19, %v2008_v25 }
 0x1cf   : > { %14585 = vst [vmem:[#allocation37_spill] sm:$0xff] %v9774_v35  ;;  %14586 = vst [vmem:[#allocation38_spill] sm:$0xff] %v9778_v36  ;;  %2774 = vrot.lane.b32.xlu1 %v9657_v46, %s8845_s8  ;;  %v2011_v37 = vrot.slane %v9769_v30, 7  ;;  %v9783_v39 = vpop.f32.mrb[15].mxu0  ;;  %v9787_v45 = vpop.f32.mrb[12].mxu1  ;;  %v9791_v48 = vsel %vm2046_vm2, %v2521_v17, %v2522_v34 }
 0x1d0   : > { %v2010_v44 = vrot.slane %v9783_v39, 7  ;;  %14587 = vst [vmem:[#allocation39_spill] sm:$0xff] %v9787_v45  ;;  %14588 = vst [vmem:[#allocation40_spill] sm:$0xff] %v9791_v48  ;;  %v2525_v50 = vrot.slane %v9787_v45, 7  ;;  %v9796_v52 = vpop.f32.mrb[13].mxu1 }
 0x1d1   : > { %14589 = vst [vmem:[#allocation41_spill] sm:$0xff] %v9796_v52  ;;  %v2524_v56 = vrot.slane %v9796_v52, 7  ;;  %2119 = vrot.lane.b32.xlu0 %v9679_v55, %s8846_s23 }
 0x1d2   : > { %v9798_v54 = vpop.f32.mrb[16].mxu0  ;;  %v9803_v60 = vsel %vm2046_vm2, %v2010_v44, %v2011_v37 }
 0x1d3   : > { %14590 = vst [vmem:[#allocation42_spill] sm:$0xff] %v9803_v60  ;;  %2121 = vrot.lane.b32.xlu1 %v9669_v51, %s8846_s23  ;;  %v9807_v1 = vpop.f32.mrb[17].mxu0  ;;  %v9810_v49 = vpop.f32.mrb[14].mxu1  ;;  %v9814_v5 = vsel %vm2046_vm2, %v2524_v56, %v2525_v50  ;;  %v9818_v7 = vsel %vm2046_vm2, %v2523_v41, %v2524_v56  ;;  %v2013_v17 = vrot.slane %v9798_v54, 7 }
 0x1d4   : > { %v2012_v3 = vrot.slane %v9807_v1, 7  ;;  %14591 = vst [vmem:[#allocation43_spill] sm:$0xff] %v9810_v49  ;;  %14592 = vst [vmem:[#allocation44_spill] sm:$0xff] %v9814_v5  ;;  %v2527_v9 = vrot.slane %v9810_v49, 7  ;;  %v9823_v13 = vpop.f32.mrb[15].mxu1 }
 0x1d5   : > { %14593 = vst [vmem:[#allocation45_spill] sm:$0xff] %v9818_v7  ;;  %v2526_v21 = vrot.slane %v9823_v13, 7  ;;  %2267 = vrot.lane.b32.xlu0 %v9679_v55, %s8845_s8 }
 0x1d6   : > { %v9826_v19 = vpop.f32.mrb[18].mxu0  ;;  %v9831_v23 = vsel %vm2046_vm2, %v2011_v37, %v2012_v3 }
 0x1d7   : > { %14594 = vst [vmem:[#allocation46_spill] sm:$0xff] %v9831_v23  ;;  %2269 = vrot.lane.b32.xlu1 %v9669_v51, %s8845_s8  ;;  %v2015_v25 = vrot.slane %v9826_v19, 7  ;;  %v9836_v34 = vpop.f32.mrb[19].mxu0  ;;  %v9839_v44 = vpop.f32.mrb[16].mxu1  ;;  %v9843_v50 = vsel %vm2046_vm2, %v2526_v21, %v2527_v9 }
 0x1d8   : > { %v2014_v41 = vrot.slane %v9836_v34, 7  ;;  %14595 = vst [vmem:[#allocation47_spill] sm:$0xff] %v9843_v50  ;;  %v9847_v37 = vpop.f32.mrb[17].mxu1  ;;  %v2529_v42 = vrot.slane %v9839_v44, 7 }
 0x1d9   : > { %14596 = vst [vmem:[#allocation48_spill] sm:$0xff] %v9847_v37  ;;  %v2528_v51 = vrot.slane %v9847_v37, 7  ;;  %2776 = vrot.lane.b32.xlu0 %v9690_v59, %s8845_s8 }
 0x1da   : > { %v9849_v56 = vpop.f32.mrb[20].mxu0  ;;  %v9854_v3 = vsel %vm2046_vm2, %v2014_v41, %v2015_v25  ;;  %v9858_v0 = vsel %vm2046_vm2, %v2013_v17, %v2014_v41 }
 0x1db   : > { %14597 = vst [vmem:[#allocation49_spill] sm:$0xff] %v9854_v3  ;;  %14598 = vst [vmem:[#allocation50_spill] sm:$0xff] %v9858_v0  ;;  %2778 = vrot.lane.b32.xlu1 %v9682_v57, %s8845_s8  ;;  %v2017_v21 = vrot.slane %v9849_v56, 7  ;;  %v9863_v55 = vpop.f32.mrb[21].mxu0  ;;  %v9867_v46 = vpop.f32.mrb[18].mxu1  ;;  %v9871_v25 = vsel %vm2046_vm2, %v2527_v9, %v2528_v51 }
 0x1dc   : > { %v2016_v32 = vrot.slane %v9863_v55, 7  ;;  %14599 = vst [vmem:[#allocation51_spill] sm:$0xff] %v9867_v46  ;;  %14600 = vst [vmem:[#allocation52_spill] sm:$0xff] %v9871_v25  ;;  %v2531_v17 = vrot.slane %v9867_v46, 7  ;;  %v9876_v57 = vpop.f32.mrb[19].mxu1 }
 0x1dd   : > { %14601 = vst [vmem:[#allocation53_spill] sm:$0xff] %v9876_v57  ;;  %v2530_v38 = vrot.slane %v9876_v57, 7  ;;  %2123 = vrot.lane.b32.xlu0 %v9693_v61, %s8846_s23 }
 0x1de   : > { %v9878_v41 = vpop.f32.mrb[22].mxu0  ;;  %v9883_v3 = vsel %vm2046_vm2, %v2016_v32, %v2017_v21 }
 0x1df   : > { %14602 = vst [vmem:[#allocation54_spill] sm:$0xff] %v9883_v3  ;;  %2630 = vrot.lane.b32.xlu1 %v9690_v59, %s8846_s23  ;;  %v9887_v9 = vpop.f32.mrb[23].mxu0  ;;  %v9890_v0 = vpop.f32.mrb[20].mxu1  ;;  %v9894_v25 = vsel %vm2046_vm2, %v2530_v38, %v2531_v17  ;;  %v9898_v50 = vsel %vm2046_vm2, %v2529_v42, %v2530_v38  ;;  %v2019_v3 = vrot.slane %v9878_v41, 7 }
 0x1e0   : > { %v2018_v51 = vrot.slane %v9887_v9, 7  ;;  %14603 = vst [vmem:[#allocation55_spill] sm:$0xff] %v9890_v0  ;;  %14604 = vst [vmem:[#allocation56_spill] sm:$0xff] %v9894_v25  ;;  %v2533_v32 = vrot.slane %v9890_v0, 7  ;;  %v9903_v59 = vpop.f32.mrb[21].mxu1 }
 0x1e1   : > { %14605 = vst [vmem:[#allocation57_spill] sm:$0xff] %v9898_v50  ;;  %v2532_v23 = vrot.slane %v9903_v59, 7  ;;  %2271 = vrot.lane.b32.xlu0 %v9706_v2, %s8845_s8 }
 0x1e2   : > { %v9906_v60 = vpop.f32.mrb[24].mxu0  ;;  %v9911_v17 = vsel %vm2046_vm2, %v2017_v21, %v2018_v51 }
 0x1e3   : > { %14606 = vst [vmem:[#allocation58_spill] sm:$0xff] %v9911_v17  ;;  %2273 = vrot.lane.b32.xlu1 %v9693_v61, %s8845_s8  ;;  %v2021_v38 = vrot.slane %v9906_v60, 7  ;;  %v9916_v42 = vpop.f32.mrb[25].mxu0  ;;  %v9919_v50 = vpop.f32.mrb[22].mxu1  ;;  %v9923_v5 = vsel %vm2046_vm2, %v2532_v23, %v2533_v32 }
 0x1e4   : > { %v2020_v25 = vrot.slane %v9916_v42, 7  ;;  %14607 = vst [vmem:[#allocation59_spill] sm:$0xff] %v9923_v5  ;;  %v9927_v21 = vpop.f32.mrb[23].mxu1  ;;  %v2535_v5 = vrot.slane %v9919_v50, 7 }
 0x1e5   : > { %14608 = vst [vmem:[#allocation60_spill] sm:$0xff] %v9927_v21  ;;  %v2534_v61 = vrot.slane %v9927_v21, 7  ;;  %2632 = vrot.lane.b32.xlu0 %v9719_v8, %s8846_s23 }
 0x1e6   : > { %v9929_v51 = vpop.f32.mrb[26].mxu0  ;;  %v9934_v17 = vsel %vm2046_vm2, %v2020_v25, %v2021_v38  ;;  %v9938_v35 = vsel %vm2046_vm2, %v2019_v3, %v2020_v25 }
 0x1e7   : > { %14609 = vst [vmem:[#allocation61_spill] sm:$0xff] %v9934_v17  ;;  %14610 = vst [vmem:[#allocation62_spill] sm:$0xff] %v9938_v35  ;;  %2634 = vrot.lane.b32.xlu1 %v9709_v4, %s8846_s23  ;;  %v2023_v23 = vrot.slane %v9929_v51, 7  ;;  %v9943_v2 = vpop.f32.mrb[27].mxu0  ;;  %v9947_v36 = vpop.f32.mrb[24].mxu1  ;;  %v9951_v38 = vsel %vm2046_vm2, %v2533_v32, %v2534_v61 }
 0x1e8   : > { %14611 = vst [vmem:[#allocation63_spill] sm:$0xff] %v9943_v2  ;;  %v2022_v7 = vrot.slane %v9943_v2, 7  ;;  %14612 = vst [vmem:[#allocation64_spill] sm:$0xff] %v9947_v36  ;;  %v2537_v3 = vrot.slane %v9947_v36, 7  ;;  %v9956_v25 = vpop.f32.mrb[25].mxu1 }
 0x1e9   : > { %14613 = vst [vmem:[#allocation65_spill] sm:$0xff] %v9951_v38  ;;  %14614 = vst [vmem:[#allocation66_spill] sm:$0xff] %v9956_v25  ;;  %v2536_v35 = vrot.slane %v9956_v25, 7  ;;  %2780 = vrot.lane.b32.xlu0 %v9719_v8, %s8845_s8 }
 0x1ea   : > { %v9958_v17 = vpop.f32.mrb[28].mxu0  ;;  %v9963_v48 = vsel %vm2046_vm2, %v2022_v7, %v2023_v23 }
 0x1eb   : > { %14615 = vst [vmem:[#allocation67_spill] sm:$0xff] %v9958_v17  ;;  %14616 = vst [vmem:[#allocation68_spill] sm:$0xff] %v9963_v48  ;;  %2782 = vrot.lane.b32.xlu1 %v9709_v4, %s8845_s8  ;;  %v9967_v32 = vpop.f32.mrb[29].mxu0  ;;  %v9970_v38 = vpop.f32.mrb[26].mxu1  ;;  %v9974_v27 = vsel %vm2046_vm2, %v2536_v35, %v2537_v3  ;;  %v9978_v11 = vsel %vm2046_vm2, %v2535_v5, %v2536_v35  ;;  %v2025_v48 = vrot.slane %v9958_v17, 7 }
 0x1ec   : > { %14617 = vst [vmem:[#allocation69_spill] sm:$0xff] %v9967_v32  ;;  %v2024_v61 = vrot.slane %v9967_v32, 7  ;;  %14618 = vst [vmem:[#allocation70_spill] sm:$0xff] %v9970_v38  ;;  %v2539_v7 = vrot.slane %v9970_v38, 7  ;;  %v9983_v4 = vpop.f32.mrb[27].mxu1 }
 0x1ed   : > { %14619 = vst [vmem:[#allocation71_spill] sm:$0xff] %v9974_v27  ;;  %14620 = vst [vmem:[#allocation72_spill] sm:$0xff] %v9978_v11  ;;  %v2538_v15 = vrot.slane %v9983_v4, 7  ;;  %2275 = vrot.lane.b32.xlu0 %v9729_v12, %s8845_s8 }
 0x1ee   : > { %14621 = vst [vmem:[#allocation73_spill] sm:$0xff] %v9983_v4  ;;  %v9986_v22 = vpop.f32.mrb[30].mxu0  ;;  %v9991_v3 = vsel %vm2046_vm2, %v2023_v23, %v2024_v61 }
 0x1ef   : > { %14622 = vst [vmem:[#allocation74_spill] sm:$0xff] %v9986_v22  ;;  %14623 = vst [vmem:[#allocation75_spill] sm:$0xff] %v9991_v3  ;;  %2277 = vrot.lane.b32.xlu1 %v9722_v10, %s8845_s8  ;;  %v9995_v35 = vpop.f32.mrb[31].mxu0  ;;  %v9998_v8 = vpop.f32.mrb[28].mxu1  ;;  %v10002_v27 = vsel %vm2046_vm2, %v2538_v15, %v2539_v7  ;;  %v2027_v3 = vrot.slane %v9986_v22, 7 }
 0x1f0   : > { %14624 = vst [vmem:[#allocation76_spill] sm:$0xff] %v9995_v35  ;;  %v2026_v5 = vrot.slane %v9995_v35, 7  ;;  %14625 = vst [vmem:[#allocation77_spill] sm:$0xff] %v9998_v8  ;;  %v10006_v11 = vpop.f32.mrb[29].mxu1 }
 0x1f1   : > { %14626 = vst [vmem:[#allocation78_spill] sm:$0xff] %v10002_v27  ;;  %14627 = vst [vmem:[#allocation79_spill] sm:$0xff] %v10006_v11  ;;  %v2540_v61 = vrot.slane %v10006_v11, 7  ;;  %2636 = vrot.lane.b32.xlu0 %v9732_v14, %s8846_s23 }
 0x1f2   : > { %v10008_v23 = vpop.f32.mrb[32].mxu0  ;;  %v10013_v10 = vsel %vm2046_vm2, %v2025_v48, %v2026_v5 }
 0x1f3   : > { %14628 = vst [vmem:[#allocation80_spill] sm:$0xff] %v10008_v23  ;;  %14629 = vst [vmem:[#allocation81_spill] sm:$0xff] %v10013_v10  ;;  %2125 = vrot.lane.b32.xlu1 %v9729_v12, %s8846_s23  ;;  %v10018_v15 = vpop.f32.mrb[33].mxu0  ;;  %v10020_v27 = vpop.f32.mrb[30].mxu1  ;;  %v10024_v35 = vsel %vm2046_vm2, %v2539_v7, %v2540_v61  ;;  %v10038_v10 = vsel %vm2046_vm2, %v2026_v5, %v2027_v3 }
 0x1f4   : > { %14630 = vst [vmem:[#allocation82_spill] sm:$0xff] %v10018_v15  ;;  %14631 = vst [vmem:[#allocation83_spill] sm:$0xff] %v10020_v27  ;;  %v10028_v11 = vpop.f32.mrb[31].mxu1  ;;  %v2028_v38 = vrot.slane %v10018_v15, 7 }
 0x1f5   : > { %14632 = vst [vmem:[#allocation84_spill] sm:$0xff] %v10024_v35  ;;  %14633 = vst [vmem:[#allocation85_spill] sm:$0xff] %v10028_v11  ;;  %2784 = vrot.lane.b32.xlu0 %v9744_v18, %s8845_s8  ;;  %v2542_v35 = vrot.slane %v10028_v11, 7  ;;  %v2029_v11 = vrot.slane %v10008_v23, 7 }
 0x1f6   : > { %v10030_v48 = vpop.f32.mrb[34].mxu0  ;;  %14636 = vst [vmem:[#allocation88_spill] sm:$0xff] %v10038_v10 }
 0x1f7   : > { %14634 = vst [vmem:[#allocation86_spill] sm:$0xff] %v10030_v48  ;;  %2786 = vrot.lane.b32.xlu1 %v9732_v14, %s8845_s8  ;;  %v10034_v12 = vpop.f32.mrb[35].mxu0  ;;  %v10040_v22 = vpop.f32.mrb[32].mxu1  ;;  %v2541_v14 = vrot.slane %v9998_v8, 7  ;;  %v10089_v15 = vsel %vm2046_vm2, %v2028_v38, %v2029_v11  ;;  %v2031_v63 = vrot.slane %v10030_v48, 7 }
 0x1f8   : > { %14635 = vst [vmem:[#allocation87_spill] sm:$0xff] %v10034_v12  ;;  %14637 = vst [vmem:[#allocation89_spill] sm:$0xff] %v10040_v22  ;;  %v10044_v7 = vpop.f32.mrb[33].mxu1  ;;  %v2030_v62 = vrot.slane %v10034_v12, 7 }
 0x1f9   : > { %2127 = vrot.lane.b32.xlu0 %v9756_v24, %s8846_s23  ;;  %v10068_v8 = vsel %vm2046_vm2, %v2541_v14, %v2542_v35  ;;  %14646 = vst [vmem:[#allocation98_spill] sm:$0xff] %v10089_v15  ;;  %v2544_v48 = vrot.slane %v10044_v7, 7 }
 0x1fa   : > { %v10046_v61 = vpop.f32.mrb[36].mxu0  ;;  %14640 = vst [vmem:[#allocation92_spill] sm:$0xff] %v10068_v8  ;;  %v10093_v12 = vsel %vm2046_vm2, %v2029_v11, %v2030_v62 }
 0x1fb   : > { %2129 = vrot.lane.b32.xlu1 %v9747_v20, %s8846_s23  ;;  %v10052_v4 = vpop.f32.mrb[37].mxu0  ;;  %v10054_v3 = vpop.f32.mrb[34].mxu1  ;;  %14647 = vst [vmem:[#allocation99_spill] sm:$0xff] %v10093_v12 }
 0x1fc   : > { %14638 = vst [vmem:[#allocation90_spill] sm:$0xff] %v10052_v4  ;;  %v10058_v5 = vpop.f32.mrb[35].mxu1  ;;  %v2032_v36 = vrot.slane %v10052_v4, 7  ;;  %v2545_v4 = vrot.slane %v10040_v22, 7 }
 0x1fd   : > { %14639 = vst [vmem:[#allocation91_spill] sm:$0xff] %v10058_v5  ;;  %2279 = vrot.lane.b32.xlu0 %v9756_v24, %s8845_s8 }
 0x1fe   : > { %v10060_v18 = vpop.f32.mrb[38].mxu0 }
 0x1ff   : > { %2281 = vrot.lane.b32.xlu1 %v9747_v20, %s8845_s8  ;;  %v10064_v10 = vpop.f32.mrb[39].mxu0  ;;  %v10073_v32 = vpop.f32.mrb[36].mxu1 }
 0x200   : > { %14641 = vst [vmem:[#allocation93_spill] sm:$0xff] %v10073_v32  ;;  %v10077_v17 = vpop.f32.mrb[37].mxu1 }
 0x201   : > { %14642 = vst [vmem:[#allocation94_spill] sm:$0xff] %v10077_v17  ;;  %2788 = vrot.lane.b32.xlu0 %v9767_v29, %s8845_s8 }
 0x202   : > { %v10079_v20 = vpop.f32.mrb[40].mxu0 }
 0x203   : > { %14643 = vst [vmem:[#allocation95_spill] sm:$0xff] %v10079_v20  ;;  %2790 = vrot.lane.b32.xlu1 %v9759_v26, %s8845_s8  ;;  %v10083_v14 = vpop.f32.mrb[41].mxu0  ;;  %v10085_v8 = vpop.f32.mrb[38].mxu1  ;;  %v2543_v26 = vrot.slane %v10020_v27, 7 }
 0x204   : > { %14644 = vst [vmem:[#allocation96_spill] sm:$0xff] %v10083_v14  ;;  %14645 = vst [vmem:[#allocation97_spill] sm:$0xff] %v10085_v8  ;;  %v10097_v24 = vpop.f32.mrb[39].mxu1 }
 0x205   : > { %14648 = vst [vmem:[#allocation100_spill] sm:$0xff] %v10097_v24  ;;  %2131 = vrot.lane.b32.xlu0 %v9769_v30, %s8846_s23  ;;  %v10120_v12 = vsel %vm2046_vm2, %v2542_v35, %v2543_v26 }
 0x206   : > { %v10099_v23 = vpop.f32.mrb[42].mxu0  ;;  %14655 = vst [vmem:[#allocation107_spill] sm:$0xff] %v10120_v12 }
 0x207   : > { %14649 = vst [vmem:[#allocation101_spill] sm:$0xff] %v10099_v23  ;;  %2638 = vrot.lane.b32.xlu1 %v9767_v29, %s8846_s23  ;;  %v10104_v25 = vpop.f32.mrb[43].mxu0  ;;  %v10106_v38 = vpop.f32.mrb[40].mxu1 }
 0x208   : > { %14650 = vst [vmem:[#allocation102_spill] sm:$0xff] %v10104_v25  ;;  %14651 = vst [vmem:[#allocation103_spill] sm:$0xff] %v10106_v38  ;;  %v10110_v62 = vpop.f32.mrb[41].mxu1 }
 0x209   : > { %14652 = vst [vmem:[#allocation104_spill] sm:$0xff] %v10110_v62  ;;  %2283 = vrot.lane.b32.xlu0 %v9783_v39, %s8845_s8  ;;  %v14661_v39 = vrot.slane %v9631_v31, 7 }
 0x20a   : > { %v10112_v11 = vpop.f32.mrb[44].mxu0 }
 0x20b   : > { %14653 = vst [vmem:[#allocation105_spill] sm:$0xff] %v10112_v11  ;;  %2285 = vrot.lane.b32.xlu1 %v9769_v30, %s8845_s8  ;;  %v10116_v15 = vpop.f32.mrb[45].mxu0  ;;  %v10122_v29 = vpop.f32.mrb[42].mxu1 }
 0x20c   : > { %14654 = vst [vmem:[#allocation106_spill] sm:$0xff] %v10116_v15  ;;  %14656 = vst [vmem:[#allocation108_spill] sm:$0xff] %v10122_v29  ;;  %v10126_v27 = vpop.f32.mrb[43].mxu1 }
 0x20d   : > { %14657 = vst [vmem:[#allocation109_spill] sm:$0xff] %v10126_v27  ;;  %2640 = vrot.lane.b32.xlu0 %v9796_v52, %s8846_s23 }
 0x20e   : > { %v10128_v16 = vpop.f32.mrb[46].mxu0 }
 0x20f   : > { %14658 = vst [vmem:[#allocation110_spill] sm:$0xff] %v10128_v16  ;;  %v2043_v30 = vrot.slane %v10128_v16, 7  ;;  %2642 = vrot.lane.b32.xlu1 %v9787_v45, %s8846_s23  ;;  %v10135_v35 = vpop.f32.mrb[44].mxu1  ;;  %v10149_v16 = vsel %vm2046_vm2, %v2031_v63, %v2032_v36 }
 0x210   : > { %14659 = vst [vmem:[#allocation111_spill] sm:$0xff] %v10135_v35  ;;  %v10139_v26 = vpop.f32.mrb[45].mxu1  ;;  %14662 = vst [vmem:[#allocation113_spill] sm:$0xff] %v10149_v16  ;;  %v2546_v35 = vrot.slane %v10058_v5, 7  ;;  %v2038_v16 = vrot.slane %v10104_v25, 7 }
 0x211   : > { %14660 = vst [vmem:[#allocation112_spill] sm:$0xff] %v10139_v26  ;;  %v2078_v12 = vsel %vm2046_vm2, %v2043_v30, %v14661_v39  ;;  %2792 = vrot.lane.b32.xlu0 %v9796_v52, %s8845_s8  ;;  %v14664_v30 = vrot.slane %v9649_v40, 7  ;;  %v10167_v39 = vsel %vm2046_vm2, %v2544_v48, %v2545_v4  ;;  %v2033_v52 = vrot.slane %v10046_v61, 7 }
 0x212   : > { %14665 = vst [vmem:[#allocation115_spill] sm:$0xff] %v10167_v39  ;;  %v2548_v48 = vrot.slane %v10077_v17, 7 }
 0x213   : > { %2794 = vrot.lane.b32.xlu1 %v9787_v45, %s8845_s8  ;;  %v10154_v2 = vpop.f32.mrb[46].mxu1  ;;  %v10171_v45 = vsel %vm2046_vm2, %v2545_v4, %v2546_v35  ;;  %v2547_v4 = vrot.slane %v10054_v3, 7 }
 0x214   : > { %14663 = vst [vmem:[#allocation114_spill] sm:$0xff] %v10154_v2  ;;  %v2559_v31 = vrot.slane %v10154_v2, 7  ;;  %14666 = vst [vmem:[#allocation116_spill] sm:$0xff] %v10171_v45 }
 0x215   : > { %2287 = vrot.lane.b32.xlu0 %v9807_v1, %s8845_s8 }
 0x216   : > { %v2591_v63 = vsel %vm2046_vm2, %v2559_v31, %v14664_v30  ;;  %v2036_v30 = vrot.slane %v10083_v14, 7 }
 0x217   : > { %2289 = vrot.lane.b32.xlu1 %v9798_v54, %s8845_s8  ;;  %v10184_v54 = vsel %vm2046_vm2, %v2032_v36, %v2033_v52  ;;  %v10202_v36 = vsel %vm2046_vm2, %v2547_v4, %v2548_v48  ;;  %v2035_v52 = vrot.slane %v10060_v18, 7 }
 0x218   : > { %14667 = vst [vmem:[#allocation117_spill] sm:$0xff] %v10184_v54  ;;  %14668 = vst [vmem:[#allocation118_spill] sm:$0xff] %v10202_v36  ;;  %v2549_v36 = vrot.slane %v10073_v32, 7 }
 0x219   : > { %2644 = vrot.lane.b32.xlu0 %v9810_v49, %s8846_s23  ;;  %v10219_v4 = vsel %vm2046_vm2, %v2035_v52, %v2036_v30 }
 0x21a   : > { %14670 = vst [vmem:[#allocation120_spill] sm:$0xff] %v10219_v4  ;;  %v2037_v4 = vrot.slane %v10079_v20, 7 }
 0x21b   : > { %2133 = vrot.lane.b32.xlu1 %v9807_v1, %s8846_s23 }
 0x21d   : > { %2796 = vrot.lane.b32.xlu0 %v9823_v13, %s8845_s8  ;;  %v2034_v13 = vrot.slane %v10064_v10, 7 }
 0x21f   : > { %2798 = vrot.lane.b32.xlu1 %v9810_v49, %s8845_s8  ;;  %v10190_v35 = vpop.permute.xlu0 %2113  ;;  %v10194_v1 = vpop.permute.xlu1 %2257 }
 0x221   : > { %2135 = vrot.lane.b32.xlu0 %v9836_v34, %s8846_s23 }
 0x223   : > { %2137 = vrot.lane.b32.xlu1 %v9826_v19, %s8846_s23  ;;  %v2112_v31 = vpop.permute.xlu0 %2111 }
 0x225   : > { %2291 = vrot.lane.b32.xlu0 %v9836_v34, %s8845_s8 }
 0x227   : > { %2293 = vrot.lane.b32.xlu1 %v9826_v19, %s8845_s8  ;;  %v2256_v40 = vpop.permute.xlu0 %2255  ;;  %v10215_v19 = vsel %vm2046_vm2, %v2034_v13, %v2035_v52  ;;  %v10234_v52 = vsel %vm2046_vm2, %v2548_v48, %v2549_v36  ;;  %v2207_v36 = vadd.f32 %v2112_v31, %v2078_v12  ;;  %v2551_v12 = vrot.slane %v10085_v8, 7 }
 0x228   : > { %14669 = vst [vmem:[#allocation119_spill] sm:$0xff] %v10215_v19  ;;  %14671 = vst [vmem:[#allocation121_spill] sm:$0xff] %v10234_v52  ;;  %v2399_v30 = vrot.slane %v2256_v40, 1  ;;  %v2552_v31 = vrot.slane %v10110_v62, 7 }
 0x229   : > { %v10207_v49 = vpop.permute.xlu1 %2115  ;;  %2800 = vrot.lane.b32.xlu0 %v9847_v37, %s8845_s8 }
 0x22b   : > { %2802 = vrot.lane.b32.xlu1 %v9839_v44, %s8845_s8  ;;  %v2260_v34 = vpop.permute.xlu0 %2259 }
 0x22d   : > { %v10221_v54 = vpop.permute.xlu1 %2261  ;;  %2139 = vrot.lane.b32.xlu0 %v9849_v56, %s8846_s23 }
 0x22f   : > { %2646 = vrot.lane.b32.xlu1 %v9847_v37, %s8846_s23  ;;  %v2625_v13 = vpop.permute.xlu0 %2624  ;;  %v2400_v37 = vrot.slane %v10194_v1, 1 }
 0x230   : > { %v2720_v52 = vadd.f32 %v2625_v13, %v2591_v63  ;;  %v2550_v63 = vrot.slane %v10097_v24, 7  ;;  %v2041_v24 = vrot.slane %v10112_v11, 7 }
 0x231   : > { %v2627_v44 = vpop.permute.xlu1 %2626  ;;  %2295 = vrot.lane.b32.xlu0 %v9863_v55, %s8845_s8 }
 0x233   : > { %2297 = vrot.lane.b32.xlu1 %v9849_v56, %s8845_s8  ;;  %v2769_v45 = vpop.permute.xlu0 %2768  ;;  %v2479_v56 = vsel %vm2447_vm3, %v2399_v30, %v2400_v37 }
 0x234   : > { %v2912_v48 = vrot.slane %v2769_v45, 1  ;;  %v2480_v1 = vadd.f32 %v2479_v56, %v2207_v36  ;;  %v10258_v45 = vsel %vm2046_vm2, %v2037_v4, %v2038_v16 }
 0x235   : > { %v2771_v19 = vpop.permute.xlu1 %2770  ;;  %2648 = vrot.lane.b32.xlu0 %v9876_v57, %s8846_s23  ;;  %14672 = vst [vmem:[#allocation122_spill] sm:$0xff] %v10258_v45  ;;  %v2208_v45 = vadd.f32 %v10190_v35, %v9639_v33 }
 0x236   : > { %v2913_v40 = vrot.slane %v2771_v19, 1 }
 0x237   : > { %2650 = vrot.lane.b32.xlu1 %v9867_v46, %s8846_s23  ;;  %v10252_v25 = vpop.permute.xlu0 %2263 }
 0x238   : > { %v2991_v55 = vsel %vm2447_vm3, %v2912_v48, %v2913_v40  ;;  %v2401_v48 = vrot.slane %v2260_v34, 1 }
 0x239   : > { %v10246_v39 = vpop.permute.xlu1 %2265  ;;  %v2992_v2 = vadd.f32 %v2991_v55, %v2720_v52  ;;  %2804 = vrot.lane.b32.xlu0 %v9876_v57, %s8845_s8  ;;  %v10267_v52 = vpop.f32.mrb[47].mxu0  ;;  %v10285_v55 = vsel %vm2046_vm2, %v2551_v12, %v2552_v31 }
 0x23a   : > { %14674 = vst [vmem:[#allocation124_spill] sm:$0xff] %v10267_v52  ;;  %v10269_v30 = vpop.f32.mrb[48].mxu0  ;;  %14679 = vst [vmem:[#allocation129_spill] sm:$0xff] %v10285_v55  ;;  %v2721_v55 = vadd.f32 %v2627_v44, %v9663_v47 }
 0x23b   : > { %2806 = vrot.lane.b32.xlu1 %v9867_v46, %s8845_s8  ;;  %v10263_v19 = vadd.f32 %v2992_v2, %v2480_v1  ;;  %14675 = vst [vmem:[#allocation125_spill] sm:$0xff] %v10269_v30  ;;  %v10271_v56 = vpop.permute.xlu0 %2628  ;;  %v10275_v4 = vpop.f32.mrb[49].mxu0  ;;  %v10281_v2 = vsel %vm2046_vm2, %v2550_v63, %v2551_v12  ;;  %v2039_v63 = vrot.slane %v10099_v23, 7  ;;  %v2478_v12 = vsel %vm2447_vm3, %v2400_v37, %v2401_v48 }
 0x23c   : > { %14676 = vst [vmem:[#allocation126_spill] sm:$0xff] %v10275_v4  ;;  %v10277_v36 = vpop.f32.mrb[50].mxu0  ;;  %14678 = vst [vmem:[#allocation128_spill] sm:$0xff] %v10281_v2  ;;  %v2481_v37 = vadd.f32 %v2478_v12, %v2208_v45 }
 0x23d   : > { %14673 = vst [vmem:[#allocation123_spill] sm:$0xff] %v10263_v19  ;;  %v2118_v13 = vpop.permute.xlu1 %2117  ;;  %14677 = vst [vmem:[#allocation127_spill] sm:$0xff] %v10277_v36  ;;  %2299 = vrot.lane.b32.xlu0 %v9887_v9, %s8845_s8  ;;  %v10291_v46 = vpop.f32.mrb[51].mxu0  ;;  %v10327_v35 = vsel %vm2046_vm2, %v2038_v16, %v2039_v63  ;;  %v2553_v63 = vrot.slane %v10106_v38, 7  ;;  %v2040_v38 = vrot.slane %v10116_v15, 7 }
 0x23e   : > { %14680 = vst [vmem:[#allocation130_spill] sm:$0xff] %v10291_v46  ;;  %14684 = vst [vmem:[#allocation134_spill] sm:$0xff] %v10327_v35 }
 0x23f   : > { %2301 = vrot.lane.b32.xlu1 %v9878_v41, %s8845_s8  ;;  %v10293_v41 = vpop.f32.mrb[52].mxu0  ;;  %v2773_v34 = vpop.permute.xlu0 %2772 }
 0x240   : > { %14681 = vst [vmem:[#allocation131_spill] sm:$0xff] %v10293_v41  ;;  %v10297_v57 = vpop.f32.mrb[53].mxu0  ;;  %v2914_v31 = vrot.slane %v2773_v34, 1 }
 0x241   : > { %v10287_v1 = vpop.permute.xlu1 %2774  ;;  %14682 = vst [vmem:[#allocation132_spill] sm:$0xff] %v10297_v57  ;;  %v10302_v19 = vpop.f32.mrb[54].mxu0  ;;  %2652 = vrot.lane.b32.xlu0 %v9890_v0, %s8846_s23 }
 0x242   : > { %v2990_v62 = vsel %vm2447_vm3, %v2913_v40, %v2914_v31  ;;  %v2554_v31 = vrot.slane %v10126_v27, 7  ;;  %v2915_v14 = vrot.slane %v10287_v1, 1 }
 0x243   : > { %2141 = vrot.lane.b32.xlu1 %v9887_v9, %s8846_s23  ;;  %v10311_v9 = vpop.f32.mrb[55].mxu0  ;;  %v2993_v48 = vadd.f32 %v2990_v62, %v2721_v55  ;;  %v10317_v34 = vpop.permute.xlu0 %2119  ;;  %v2403_v55 = vrot.slane %v10252_v25, 1 }
 0x244   : > { %14683 = vst [vmem:[#allocation133_spill] sm:$0xff] %v10311_v9  ;;  %v10315_v23 = vpop.f32.mrb[56].mxu0  ;;  %v10372_v11 = vsel %vm2046_vm2, %v2553_v63, %v2554_v31 }
 0x245   : > { %v10307_v2 = vpop.permute.xlu1 %2121  ;;  %v10321_v33 = vpop.f32.mrb[57].mxu0  ;;  %v10329_v44 = vadd.f32 %v2993_v48, %v2481_v37  ;;  %2808 = vrot.lane.b32.xlu0 %v9903_v59, %s8845_s8  ;;  %v2402_v59 = vrot.slane %v10221_v54, 1  ;;  %v2404_v48 = vrot.slane %v10246_v39, 1  ;;  %v2210_v54 = vadd.f32 %v2118_v13, %v9674_v53  ;;  %14686 = vst [vmem:[#allocation136_spill] sm:$0xff] %v10372_v11 }
 0x246   : > { %v10323_v47 = vpop.f32.mrb[58].mxu0  ;;  %v2042_v53 = vrot.slane %v10267_v52, 7 }
 0x247   : > { %2810 = vrot.lane.b32.xlu1 %v9890_v0, %s8845_s8  ;;  %14685 = vst [vmem:[#allocation135_spill] sm:$0xff] %v10329_v44  ;;  %v10335_v62 = vpop.f32.mrb[59].mxu0  ;;  %v10340_v12 = vpop.permute.xlu0 %2267  ;;  %v2477_v27 = vsel %vm2447_vm3, %v2402_v59, %v2403_v55  ;;  %v2209_v59 = vadd.f32 %v10207_v49, %v9654_v43  ;;  %v2476_v15 = vsel %vm2447_vm3, %v2403_v55, %v2404_v48 }
 0x248   : > { %v10337_v45 = vpop.f32.mrb[60].mxu0  ;;  %v2483_v63 = vadd.f32 %v2476_v15, %v2210_v54 }
 0x249   : > { %v10331_v40 = vpop.permute.xlu1 %2269  ;;  %v10344_v16 = vpop.f32.mrb[61].mxu0  ;;  %2143 = vrot.lane.b32.xlu0 %v9916_v42, %s8846_s23  ;;  %v2482_v55 = vadd.f32 %v2477_v27, %v2209_v59 }
 0x24a   : > { %v10348_v37 = vpop.f32.mrb[62].mxu0 }
 0x24b   : > { %2145 = vrot.lane.b32.xlu1 %v9906_v60, %s8846_s23  ;;  %v10354_v25 = vpop.f32.mrb[63].mxu0  ;;  %v2777_v8 = vpop.permute.xlu0 %2776 }
 0x24c   : > { %v10356_v35 = vpop.f32.mrb[64].mxu0 }
 0x24d   : > { %v2779_v0 = vpop.permute.xlu1 %2778  ;;  %v10364_v39 = vpop.f32.mrb[65].mxu0  ;;  %2303 = vrot.lane.b32.xlu0 %v9916_v42, %s8845_s8 }
 0x24e   : > { %v2917_v44 = vrot.slane %v2779_v0, 1  ;;  %v2916_v0 = vrot.slane %v2777_v8, 1  ;;  %v10368_v20 = vpop.f32.mrb[66].mxu0 }
 0x24f   : > { %2305 = vrot.lane.b32.xlu1 %v9906_v60, %s8845_s8  ;;  %v2722_v60 = vadd.f32 %v10271_v56, %v9686_v58  ;;  %v10383_v8 = vpop.f32.mrb[67].mxu0  ;;  %v10392_v56 = vpop.permute.xlu0 %2123 }
 0x250   : > { %v2989_v13 = vsel %vm2447_vm3, %v2915_v14, %v2916_v0  ;;  %v2988_v43 = vsel %vm2447_vm3, %v2916_v0, %v2917_v44  ;;  %v10390_v49 = vpop.f32.mrb[68].mxu0 }
 0x251   : > { %v2631_v17 = vpop.permute.xlu1 %2630  ;;  %v2994_v58 = vadd.f32 %v2989_v13, %v2722_v60  ;;  %v10396_v42 = vpop.f32.mrb[69].mxu0  ;;  %2812 = vrot.lane.b32.xlu0 %v9927_v21, %s8845_s8 }
 0x252   : > { %v2723_v1 = vadd.f32 %v2631_v17, %v9714_v6  ;;  %v10398_v11 = vpop.f32.mrb[70].mxu0  ;;  %v10402_v6 = vsel %vm2046_vm2, %v2040_v38, %v2041_v24  ;;  %v2555_v38 = vrot.slane %v10122_v29, 7  ;;  %v14701_v29 = vld [vmem:[#allocation33_spill] sm:$0xff] }
 0x253   : > { %2814 = vrot.lane.b32.xlu1 %v9919_v50, %s8845_s8  ;;  %14687 = vst [vmem:[#allocation137_spill] sm:$0xff] %v10402_v6  ;;  %v10404_v17 = vadd.f32 %v2994_v58, %v2482_v55  ;;  %v10410_v27 = vpop.f32.mrb[71].mxu0  ;;  %v10414_v50 = vsel %vm2046_vm2, %v2041_v24, %v2042_v53  ;;  %v10421_v54 = vpop.permute.xlu0 %2271  ;;  %v2405_v55 = vrot.slane %v10340_v12, 1  ;;  %v14697_v6 = vld [vmem:[#allocation64_spill] sm:$0xff] }
 0x254   : > { %v2995_v48 = vadd.f32 %v2988_v43, %v2723_v1  ;;  %14689 = vst [vmem:[#allocation139_spill] sm:$0xff] %v10414_v50  ;;  %v10418_v44 = vpop.f32.mrb[72].mxu0  ;;  %v10443_v43 = vsel %vm2046_vm2, %v2554_v31, %v2555_v38 }
 0x255   : > { %14688 = vst [vmem:[#allocation138_spill] sm:$0xff] %v10404_v17  ;;  %v10406_v14 = vpop.permute.xlu1 %2273  ;;  %v10425_v0 = vpop.f32.mrb[73].mxu0  ;;  %2147 = vrot.lane.b32.xlu0 %v9929_v51, %s8846_s23  ;;  %14692 = vst [vmem:[#allocation142_spill] sm:$0xff] %v10443_v43 }
 0x256   : > { %v10416_v15 = vadd.f32 %v2995_v48, %v2483_v63  ;;  %v10427_v59 = vpop.f32.mrb[74].mxu0  ;;  %v14694_v48 = vld [vmem:[#allocation63_spill] sm:$0xff] }
 0x257   : > { %2654 = vrot.lane.b32.xlu1 %v9927_v21, %s8846_s23  ;;  %v10433_v24 = vpop.f32.mrb[75].mxu0  ;;  %v2633_v13 = vpop.permute.xlu0 %2632 }
 0x258   : > { %14690 = vst [vmem:[#allocation140_spill] sm:$0xff] %v10416_v15  ;;  %v10435_v53 = vpop.f32.mrb[76].mxu0  ;;  %v2406_v15 = vrot.slane %v10331_v40, 1  ;;  %v2724_v40 = vadd.f32 %v2633_v13, %v14701_v29 }
 0x259   : > { %v10429_v60 = vpop.permute.xlu1 %2634  ;;  %14691 = vst [vmem:[#allocation141_spill] sm:$0xff] %v10435_v53  ;;  %v10439_v1 = vpop.f32.mrb[77].mxu0  ;;  %2307 = vrot.lane.b32.xlu0 %v14694_v48, %s8845_s8  ;;  %v14700_v48 = vld [vmem:[#allocation27_spill] sm:$0xff] }
 0x25a   : > { %v10446_v58 = vpop.f32.mrb[78].mxu0  ;;  %v2475_v12 = vsel %vm2447_vm3, %v2405_v55, %v2406_v15  ;;  %v2211_v52 = vadd.f32 %v10317_v34, %v14700_v48  ;;  %v14705_v34 = vld [vmem:[#allocation111_spill] sm:$0xff]  ;;  %v2556_v48 = vrot.slane %v10139_v26, 7  ;;  %v2407_v26 = vrot.slane %v10421_v54, 1 }
 0x25b   : > { %2309 = vrot.lane.b32.xlu1 %v9929_v51, %s8845_s8  ;;  %14693 = vst [vmem:[#allocation143_spill] sm:$0xff] %v10446_v58  ;;  %v10450_v21 = vpop.f32.mrb[79].mxu0  ;;  %v2781_v51 = vpop.permute.xlu0 %2780  ;;  %v2557_v13 = vrot.slane %v14705_v34, 7  ;;  %v3057_v54 = vrot.slane %v10269_v30, 7 }
 0x25c   : > { %14695 = vst [vmem:[#allocation63_spill] sm:$0xff] %v10450_v21  ;;  %v10453_v17 = vpop.f32.mrb[80].mxu0  ;;  %v2918_v50 = vrot.slane %v2781_v51, 1 }
 0x25d   : > { %v2783_v63 = vpop.permute.xlu1 %2782  ;;  %14696 = vst [vmem:[#allocation144_spill] sm:$0xff] %v10453_v17  ;;  %v10457_v31 = vpop.f32.mrb[81].mxu0  ;;  %v14702_v17 = vld [vmem:[#allocation66_spill] sm:$0xff] }
 0x25e   : > { %14698 = vst [vmem:[#allocation145_spill] sm:$0xff] %v10457_v31  ;;  %v2919_v38 = vrot.slane %v2783_v63, 1  ;;  %v10461_v43 = vpop.f32.mrb[82].mxu0  ;;  %2656 = vrot.lane.b32.xlu0 %v14702_v17, %s8846_s23  ;;  %v2484_v63 = vadd.f32 %v2475_v12, %v2211_v52  ;;  %v10490_v52 = vpop.f32.mrb[47].mxu1 }
 0x25f   : > { %2658 = vrot.lane.b32.xlu1 %v14697_v6, %s8846_s23  ;;  %14699 = vst [vmem:[#allocation146_spill] sm:$0xff] %v10461_v43  ;;  %v10470_v21 = vpop.f32.mrb[83].mxu0  ;;  %v10476_v43 = vpop.permute.xlu0 %2275  ;;  %14708 = vst [vmem:[#allocation149_spill] sm:$0xff] %v10490_v52 }
 0x260   : > { %14703 = vst [vmem:[#allocation27_spill] sm:$0xff] %v10470_v21  ;;  %v2987_v31 = vsel %vm2447_vm3, %v2918_v50, %v2919_v38  ;;  %v10474_v55 = vpop.f32.mrb[84].mxu0 }
 0x261   : > { %v10466_v58 = vpop.permute.xlu1 %2277  ;;  %14704 = vst [vmem:[#allocation33_spill] sm:$0xff] %v10474_v55  ;;  %v2996_v51 = vadd.f32 %v2987_v31, %v2724_v40  ;;  %v10480_v29 = vpop.f32.mrb[85].mxu0  ;;  %v2558_v31 = vrot.slane %v10490_v52, 7  ;;  %v14715_v52 = vld [vmem:[#allocation69_spill] sm:$0xff] }
 0x262   : > { %v10484_v53 = vpop.f32.mrb[86].mxu0  ;;  %2816 = vrot.lane.b32.xlu0 %v14702_v17, %s8845_s8 }
 0x263   : > { %2818 = vrot.lane.b32.xlu1 %v14697_v6, %s8845_s8  ;;  %14706 = vst [vmem:[#allocation147_spill] sm:$0xff] %v10484_v53  ;;  %v10486_v21 = vadd.f32 %v2996_v51, %v2484_v63  ;;  %v10493_v12 = vpop.f32.mrb[87].mxu0  ;;  %v2637_v40 = vpop.permute.xlu0 %2636  ;;  %v14710_v6 = vld [vmem:[#allocation67_spill] sm:$0xff]  ;;  %v10504_v51 = vsel %vm2046_vm2, %v2556_v48, %v2557_v13  ;;  %v10508_v17 = vsel %vm2046_vm2, %v2557_v13, %v2558_v31  ;;  %v3056_v48 = vrot.slane %v10275_v4, 7 }
 0x264   : > { %14709 = vst [vmem:[#allocation150_spill] sm:$0xff] %v10493_v12  ;;  %v10497_v34 = vpop.f32.mrb[88].mxu0  ;;  %14713 = vst [vmem:[#allocation152_spill] sm:$0xff] %v10504_v51  ;;  %v2474_v13 = vsel %vm2447_vm3, %v2406_v15, %v2407_v26 }
 0x265   : > { %14707 = vst [vmem:[#allocation148_spill] sm:$0xff] %v10486_v21  ;;  %v2126_v50 = vpop.permute.xlu1 %2125  ;;  %14711 = vst [vmem:[#allocation67_spill] sm:$0xff] %v10497_v34  ;;  %v10500_v63 = vpop.f32.mrb[89].mxu0 }
 0x266   : > { %14712 = vst [vmem:[#allocation151_spill] sm:$0xff] %v10500_v63  ;;  %14714 = vst [vmem:[#allocation153_spill] sm:$0xff] %v10508_v17  ;;  %2311 = vrot.lane.b32.xlu0 %v14715_v52, %s8845_s8  ;;  %v10512_v12 = vpop.f32.mrb[90].mxu0  ;;  %v14719_v63 = vld [vmem:[#allocation26_spill] sm:$0xff] }
 0x267   : > { %2313 = vrot.lane.b32.xlu1 %v14710_v6, %s8845_s8  ;;  %14716 = vst [vmem:[#allocation69_spill] sm:$0xff] %v10512_v12  ;;  %v10514_v6 = vpop.f32.mrb[91].mxu0  ;;  %v2785_v34 = vpop.permute.xlu0 %2784  ;;  %v2212_v12 = vadd.f32 %v10307_v2, %v14719_v63 }
 0x268   : > { %14717 = vst [vmem:[#allocation154_spill] sm:$0xff] %v10514_v6  ;;  %v2920_v31 = vrot.slane %v2785_v34, 1  ;;  %v14720_v6 = vld [vmem:[#allocation32_spill] sm:$0xff] }
 0x269   : > { %v2787_v21 = vpop.permute.xlu1 %2786  ;;  %v2725_v53 = vadd.f32 %v10429_v60, %v14720_v6  ;;  %v2485_v26 = vadd.f32 %v2474_v13, %v2212_v12  ;;  %v10545_v60 = vsel %vm2046_vm2, %v3056_v48, %v3057_v54  ;;  %v14727_v12 = vld [vmem:[#allocation74_spill] sm:$0xff]  ;;  %v3059_v13 = vrot.slane %v10277_v36, 7  ;;  %v14733_v36 = vld [vmem:[#allocation35_spill] sm:$0xff] }
 0x26a   : > { %v10520_v51 = vpop.f32.mrb[92].mxu0  ;;  %v2986_v4 = vsel %vm2447_vm3, %v2919_v38, %v2920_v31  ;;  %14723 = vst [vmem:[#allocation32_spill] sm:$0xff] %v10545_v60  ;;  %v14725_v38 = vld [vmem:[#allocation73_spill] sm:$0xff]  ;;  %v3058_v54 = vrot.slane %v10291_v46, 7  ;;  %v3060_v31 = vrot.slane %v10297_v57, 7  ;;  %v3062_v60 = vrot.slane %v10311_v9, 7 }
 0x26b   : > { %2149 = vrot.lane.b32.xlu1 %v14715_v52, %s8846_s23  ;;  %v10524_v17 = vpop.f32.mrb[93].mxu0  ;;  %v14721_v52 = vld [vmem:[#allocation70_spill] sm:$0xff]  ;;  %v2997_v15 = vadd.f32 %v2986_v4, %v2725_v53  ;;  %v10538_v34 = vpop.permute.xlu0 %2127  ;;  %v2921_v46 = vrot.slane %v2787_v21, 1 }
 0x26c   : > { %14718 = vst [vmem:[#allocation155_spill] sm:$0xff] %v10524_v17  ;;  %2660 = vrot.lane.b32.xlu0 %v14721_v52, %s8846_s23 }
 0x26d   : > { %v10530_v55 = vpop.permute.xlu1 %2129  ;;  %v10547_v63 = vadd.f32 %v2997_v15, %v2485_v26  ;;  %v2409_v26 = vrot.slane %v10476_v43, 1  ;;  %v2410_v15 = vrot.slane %v10466_v58, 1  ;;  %v10575_v43 = vsel %vm2046_vm2, %v3058_v54, %v3059_v13 }
 0x26e   : > { %v10536_v30 = vpop.f32.mrb[94].mxu0  ;;  %14729 = vst [vmem:[#allocation74_spill] sm:$0xff] %v10575_v43  ;;  %v10579_v58 = vsel %vm2046_vm2, %v3059_v13, %v3060_v31  ;;  %v2726_v54 = vadd.f32 %v2637_v40, %v14733_v36  ;;  %v14734_v31 = vld [vmem:[#allocation40_spill] sm:$0xff]  ;;  %v3063_v36 = vrot.slane %v10302_v19, 7 }
 0x26f   : > { %14722 = vst [vmem:[#allocation26_spill] sm:$0xff] %v10536_v30  ;;  %2822 = vrot.lane.b32.xlu1 %v14721_v52, %s8845_s8  ;;  %v3103_v2 = vrot.slane %v10536_v30, 7  ;;  %14724 = vst [vmem:[#allocation156_spill] sm:$0xff] %v10547_v63  ;;  %v10557_v53 = vpop.permute.xlu0 %2279  ;;  %v14728_v52 = vld [vmem:[#allocation76_spill] sm:$0xff]  ;;  %v3061_v30 = vrot.slane %v10293_v41, 7  ;;  %v2472_v9 = vsel %vm2447_vm3, %v2409_v26, %v2410_v15 }
 0x270   : > { %2820 = vrot.lane.b32.xlu0 %v14725_v38, %s8845_s8  ;;  %14730 = vst [vmem:[#allocation76_spill] sm:$0xff] %v10579_v58 }
 0x271   : > { %v10549_v6 = vpop.permute.xlu1 %2281  ;;  %v10555_v4 = vsel %vm2046_vm2, %v3103_v2, %v3056_v48  ;;  %v2408_v48 = vrot.slane %v10406_v14, 1  ;;  %v10603_v40 = vsel %vm2046_vm2, %v3061_v30, %v3062_v60  ;;  %v10619_v30 = vsel %vm2046_vm2, %v3062_v60, %v3063_v36 }
 0x272   : > { %14726 = vst [vmem:[#allocation73_spill] sm:$0xff] %v10555_v4  ;;  %14740 = vst [vmem:[#allocation40_spill] sm:$0xff] %v10619_v30  ;;  %v3068_v36 = vrot.slane %v10344_v16, 7 }
 0x273   : > { %2153 = vrot.lane.b32.xlu1 %v14727_v12, %s8846_s23  ;;  %v2789_v63 = vpop.permute.xlu0 %2788  ;;  %v2473_v14 = vsel %vm2447_vm3, %v2408_v48, %v2409_v26  ;;  %v14735_v26 = vld [vmem:[#allocation77_spill] sm:$0xff] }
 0x274   : > { %2151 = vrot.lane.b32.xlu0 %v14728_v52, %s8846_s23  ;;  %v2922_v57 = vrot.slane %v2789_v63, 1 }
 0x275   : > { %v2791_v38 = vpop.permute.xlu1 %2790 }
 0x276   : > { %v2923_v2 = vrot.slane %v2791_v38, 1  ;;  %v14731_v38 = vld [vmem:[#allocation34_spill] sm:$0xff]  ;;  %v2985_v13 = vsel %vm2447_vm3, %v2921_v46, %v2922_v57 }
 0x277   : > { %2317 = vrot.lane.b32.xlu1 %v14727_v12, %s8845_s8  ;;  %v2214_v4 = vadd.f32 %v2126_v50, %v14731_v38  ;;  %v14732_v12 = vld [vmem:[#allocation30_spill] sm:$0xff]  ;;  %v2998_v63 = vadd.f32 %v2985_v13, %v2726_v54  ;;  %14736 = vst [vmem:[#allocation34_spill] sm:$0xff] %v10603_v40  ;;  %v2411_v13 = vrot.slane %v10557_v53, 1  ;;  %v3067_v53 = vrot.slane %v10323_v47, 7  ;;  %v14806_v40 = vld [vmem:[#allocation67_spill] sm:$0xff] }
 0x278   : > { %v2213_v41 = vadd.f32 %v10392_v56, %v14732_v12  ;;  %2315 = vrot.lane.b32.xlu0 %v14728_v52, %s8845_s8  ;;  %v2984_v21 = vsel %vm2447_vm3, %v2922_v57, %v2923_v2  ;;  %v10596_v56 = vpop.permute.xlu0 %2131  ;;  %v14738_v57 = vld [vmem:[#allocation79_spill] sm:$0xff]  ;;  %v14741_v12 = vld [vmem:[#allocation80_spill] sm:$0xff]  ;;  %v3097_v58 = vrot.slane %v14806_v40, 7 }
 0x279   : > { %v2639_v43 = vpop.permute.xlu1 %2638  ;;  %v2487_v52 = vadd.f32 %v2472_v9, %v2214_v4  ;;  %v3065_v9 = vrot.slane %v10315_v23, 7  ;;  %v3064_v4 = vrot.slane %v10321_v33, 7 }
 0x27a   : > { %v2727_v48 = vadd.f32 %v2639_v43, %v14734_v31  ;;  %v2486_v50 = vadd.f32 %v2473_v14, %v2213_v41  ;;  %v3066_v14 = vrot.slane %v10335_v62, 7 }
 0x27b   : > { %2826 = vrot.lane.b32.xlu1 %v14735_v26, %s8845_s8  ;;  %v10633_v60 = vsel %vm2046_vm2, %v3064_v4, %v3065_v9  ;;  %v14745_v26 = vld [vmem:[#allocation83_spill] sm:$0xff] }
 0x27c   : > { %v2999_v46 = vadd.f32 %v2984_v21, %v2727_v48  ;;  %v10605_v15 = vadd.f32 %v2998_v63, %v2486_v50  ;;  %2824 = vrot.lane.b32.xlu0 %v14738_v57, %s8845_s8  ;;  %v10613_v2 = vpop.permute.xlu0 %2283  ;;  %14742 = vst [vmem:[#allocation77_spill] sm:$0xff] %v10633_v60  ;;  %v10637_v31 = vsel %vm2046_vm2, %v3065_v9, %v3066_v14  ;;  %v14744_v21 = vld [vmem:[#allocation82_spill] sm:$0xff]  ;;  %v14437_v50 = vrot.slane %v10549_v6, 1 }
 0x27d   : > { %v10607_v43 = vpop.permute.xlu1 %2285  ;;  %14743 = vst [vmem:[#allocation80_spill] sm:$0xff] %v10637_v31  ;;  %v14747_v14 = vld [vmem:[#allocation38_spill] sm:$0xff] }
 0x27e   : > { %14737 = vst [vmem:[#allocation30_spill] sm:$0xff] %v10605_v15  ;;  %v10611_v41 = vadd.f32 %v2999_v46, %v2487_v52  ;;  %v14746_v52 = vmov 0.0   ;;  %v2471_v46 = vsel %vm2447_vm3, %v2411_v13, %v14437_v50  ;;  %v14749_v15 = vld [vmem:[#allocation85_spill] sm:$0xff]  ;;  %v3069_v13 = vrot.slane %v10337_v45, 7  ;;  %v14754_v50 = vld [vmem:[#allocation87_spill] sm:$0xff] }
 0x27f   : > { %2662 = vrot.lane.b32.xlu1 %v14738_v57, %s8846_s23  ;;  %466 = vst.msk [vmem:[#allocation3] sm:$0xff] %vm465_vm4, %v14746_v52  ;;  %467 = vst.msk [vmem:[#allocation3 + $0x8] sm:$0xff] %vm465_vm4, %v14746_v52 }
 0x280   : > { %14739 = vst [vmem:[#allocation35_spill] sm:$0xff] %v10611_v41  ;;  %2155 = vrot.lane.b32.xlu0 %v14741_v12, %s8846_s23  ;;  %v2641_v54 = vpop.permute.xlu0 %2640  ;;  %468 = vst.msk [vmem:[#allocation3 + $0x10] sm:$0xff] %vm465_vm4, %v14746_v52 }
 0x281   : > { %v10624_v38 = vpop.permute.xlu1 %2642  ;;  %470 = vst.msk [vmem:[#allocation3 + $0x198] sm:$0xff] %vm465_vm4, %v14746_v52  ;;  %471 = vst.msk [vmem:[#allocation3 + $0x1a0] sm:$0xff] %vm465_vm4, %v14746_v52 }
 0x282   : > { %472 = vst.msk [vmem:[#allocation3 + $0x1a8] sm:$0xff] %vm465_vm4, %v14746_v52  ;;  %474 = vst.msk [vmem:[#allocation3 + $0x28] sm:$0xff] %vm465_vm4, %v14746_v52 }
 0x283   : > { %2321 = vrot.lane.b32.xlu1 %v14741_v12, %s8845_s8  ;;  %475 = vst.msk [vmem:[#allocation3 + $0x40] sm:$0xff] %vm465_vm4, %v14746_v52  ;;  %476 = vst.msk [vmem:[#allocation3 + $0x58] sm:$0xff] %vm465_vm4, %v14746_v52  ;;  %v2215_v12 = vadd.f32 %v10538_v34, %v14747_v14  ;;  %v10713_v34 = vsel %vm2046_vm2, %v3067_v53, %v3068_v36  ;;  %v3071_v14 = vrot.slane %v10348_v37, 7  ;;  %v3072_v53 = vrot.slane %v10364_v39, 7 }
 0x284   : > { %2319 = vrot.lane.b32.xlu0 %v14744_v21, %s8845_s8  ;;  %v2793_v63 = vpop.permute.xlu0 %2792  ;;  %477 = vst.msk [vmem:[#allocation3 + $0x70] sm:$0xff] %vm465_vm4, %v14746_v52  ;;  %478 = vst.msk [vmem:[#allocation3 + $0x88] sm:$0xff] %vm465_vm4, %v14746_v52  ;;  %v14748_v21 = vld [vmem:[#allocation45_spill] sm:$0xff] }
 0x285   : > { %v10639_v48 = vpop.permute.xlu1 %2794  ;;  %479 = vst.msk [vmem:[#allocation3 + $0xa0] sm:$0xff] %vm465_vm4, %v14746_v52  ;;  %480 = vst.msk [vmem:[#allocation3 + $0xb8] sm:$0xff] %vm465_vm4, %v14746_v52  ;;  %v2924_v4 = vrot.slane %v2793_v63, 1  ;;  %v2728_v57 = vadd.f32 %v2641_v54, %v14748_v21  ;;  %v2488_v31 = vadd.f32 %v2471_v46, %v2215_v12  ;;  %v3808_v63 = vld [vmem:[#allocation12] sm:$0xff]  ;;  %v3070_v12 = vrot.slane %v10354_v25, 7 }
 0x286   : > { %481 = vst.msk [vmem:[#allocation3 + $0xd0] sm:$0xff] %vm465_vm4, %v14746_v52  ;;  %482 = vst.msk [vmem:[#allocation3 + $0xe8] sm:$0xff] %vm465_vm4, %v14746_v52  ;;  %v2925_v9 = vrot.slane %v10639_v48, 1  ;;  %8214 = vmatprep.subr.mxu1 %v3808_v63  ;;  %v2413_v21 = vrot.slane %v10613_v2, 1  ;;  %v10743_v2 = vsel %vm2046_vm2, %v3071_v14, %v3072_v53 }
 0x287   : > { %2666 = vrot.lane.b32.xlu1 %v14745_v26, %s8846_s23  ;;  %483 = vst.msk [vmem:[#allocation3 + $0x100] sm:$0xff] %vm465_vm4, %v14746_v52  ;;  %484 = vst.msk [vmem:[#allocation3 + $0x118] sm:$0xff] %vm465_vm4, %v14746_v52  ;;  %8215 = vmatpush3.msra.mxu1 %v3808_v63  ;;  %v3073_v63 = vrot.slane %v10356_v35, 7 }
 0x288   : > { %485 = vst.msk [vmem:[#allocation3 + $0x130] sm:$0xff] %vm465_vm4, %v14746_v52  ;;  %486 = vst.msk [vmem:[#allocation3 + $0x148] sm:$0xff] %vm465_vm4, %v14746_v52  ;;  %2664 = vrot.lane.b32.xlu0 %v14749_v15, %s8846_s23  ;;  %v10706_v30 = vpop.permute.xlu0 %2287 }
 0x289   : > { %487 = vst.msk [vmem:[#allocation3 + $0x160] sm:$0xff] %vm465_vm4, %v14746_v52  ;;  %488 = vst.msk [vmem:[#allocation3 + $0x178] sm:$0xff] %vm465_vm4, %v14746_v52  ;;  %v10700_v41 = vpop.permute.xlu1 %2289 }
 0x28a   : > { %489 = vst.msk [vmem:[#allocation3 + $0x190] sm:$0xff] %vm465_vm4, %v14746_v52  ;;  %v2983_v52 = vsel %vm2447_vm3, %v2924_v4, %v2925_v9  ;;  %14750 = vst [vmem:[#allocation82_spill] sm:$0xff] %v10713_v34  ;;  %v14752_v4 = vld [vmem:[#allocation86_spill] sm:$0xff] }
 0x28b   : > { %v3000_v60 = vadd.f32 %v2983_v52, %v2728_v57  ;;  %2830 = vrot.lane.b32.xlu1 %v14745_v26, %s8845_s8  ;;  %v3809_v57 = vld [vmem:[#allocation3] sm:$0xff]  ;;  %v3074_v26 = vrot.slane %v10383_v8, 7  ;;  %14756 = vst [vmem:[#allocation87_spill] sm:$0xff] %v10743_v2 }
 0x28c   : > { %2828 = vrot.lane.b32.xlu0 %v14749_v15, %s8845_s8  ;;  %v2645_v46 = vpop.permute.xlu0 %2644  ;;  %8216 = vmatprep.mubr.msk.f32.mxu1 %vm465_vm4, %v3809_v57  ;;  %v14758_v15 = vld [vmem:[#allocation37_spill] sm:$0xff] }
 0x28d   : > { %v10715_v54 = vadd.f32 %v3000_v60, %v2488_v31  ;;  %v2134_v48 = vpop.permute.xlu1 %2133  ;;  %v3810_v60 = vld [vmem:[#allocation3 + $0x8] sm:$0xff]  ;;  %v10726_v31 = vsel %vm2046_vm2, %v3068_v36, %v3069_v13  ;;  %v10739_v36 = vsel %vm2046_vm2, %v3070_v12, %v3071_v14  ;;  %v14757_v13 = vrot.slane %v10549_v6, 1 }
 0x28e   : > { %14753 = vst [vmem:[#allocation45_spill] sm:$0xff] %v10726_v31  ;;  %8217 = vmatmul.mubr.msk.f32.vlgmr.msra.gmra.mrb[48].mxu1 %vm465_vm4, %v3810_v60  ;;  %14755 = vst [vmem:[#allocation86_spill] sm:$0xff] %v10739_v36  ;;  %v14759_v31 = vld [vmem:[#allocation44_spill] sm:$0xff] }
 0x28f   : > { %14751 = vst [vmem:[#allocation38_spill] sm:$0xff] %v10715_v54  ;;  %2325 = vrot.lane.b32.xlu1 %v14752_v4, %s8845_s8  ;;  %v2470_v57 = vsel %vm2447_vm3, %v14757_v13, %v2413_v21  ;;  %v2729_v54 = vadd.f32 %v10624_v38, %v14759_v31  ;;  %v3076_v21 = vrot.slane %v10396_v42, 7  ;;  %v2415_v13 = vrot.slane %v10706_v30, 1 }
 0x290   : > { %2323 = vrot.lane.b32.xlu0 %v14754_v50, %s8845_s8  ;;  %v2797_v4 = vpop.permute.xlu0 %2796 }
 0x291   : > { %v2799_v52 = vpop.permute.xlu1 %2798  ;;  %v2926_v60 = vrot.slane %v2797_v4, 1  ;;  %v3078_v4 = vrot.slane %v10410_v27, 7 }
 0x293   : > { %2157 = vrot.lane.b32.xlu1 %v14754_v50, %s8846_s23  ;;  %v2216_v50 = vadd.f32 %v10530_v55, %v14758_v15  ;;  %v2982_v14 = vsel %vm2447_vm3, %v2925_v9, %v2926_v60  ;;  %v3075_v55 = vrot.slane %v10368_v20, 7  ;;  %v10766_v15 = vsel %vm2046_vm2, %v3073_v63, %v3074_v26  ;;  %v14763_v60 = vld [vmem:[#allocation90_spill] sm:$0xff] }
 0x294   : > { %2668 = vrot.lane.b32.xlu0 %v10040_v22, %s8846_s23  ;;  %v3001_v6 = vadd.f32 %v2982_v14, %v2729_v54  ;;  %v10759_v53 = vpop.permute.xlu0 %2135  ;;  %14760 = vst [vmem:[#allocation37_spill] sm:$0xff] %v10766_v15  ;;  %v3077_v54 = vrot.slane %v10390_v49, 7 }
 0x295   : > { %v10753_v34 = vpop.permute.xlu1 %2137  ;;  %v2489_v12 = vadd.f32 %v2470_v57, %v2216_v50  ;;  %v10783_v63 = vsel %vm2046_vm2, %v3074_v26, %v3075_v55  ;;  %v2416_v57 = vrot.slane %v10700_v41, 1  ;;  %v2414_v50 = vrot.slane %v10607_v43, 1  ;;  %v14766_v55 = vld [vmem:[#allocation46_spill] sm:$0xff] }
 0x296   : > { %14762 = vst [vmem:[#allocation157_spill] sm:$0xff] %v10783_v63  ;;  %v3080_v26 = vrot.slane %v10425_v0, 7  ;;  %v10796_v30 = vsel %vm2046_vm2, %v3076_v21, %v3077_v54  ;;  %v10800_v41 = vsel %vm2046_vm2, %v3077_v54, %v3078_v4  ;;  %v14769_v4 = vld [vmem:[#allocation52_spill] sm:$0xff] }
 0x297   : > { %2834 = vrot.lane.b32.xlu1 %v10040_v22, %s8845_s8  ;;  %v10768_v38 = vadd.f32 %v3001_v6, %v2489_v12  ;;  %v3079_v6 = vrot.slane %v10398_v11, 7  ;;  %14764 = vst [vmem:[#allocation90_spill] sm:$0xff] %v10796_v30  ;;  %14765 = vst [vmem:[#allocation158_spill] sm:$0xff] %v10800_v41  ;;  %v2469_v43 = vsel %vm2447_vm3, %v2414_v50, %v2415_v13  ;;  %v2927_v22 = vrot.slane %v2799_v52, 1 }
 0x298   : > { %2832 = vrot.lane.b32.xlu0 %v10044_v7, %s8845_s8  ;;  %v10774_v9 = vpop.permute.xlu0 %2291  ;;  %v2468_v2 = vsel %vm2447_vm3, %v2415_v13, %v2416_v57 }
 0x299   : > { %14761 = vst [vmem:[#allocation44_spill] sm:$0xff] %v10768_v38  ;;  %v10770_v31 = vpop.permute.xlu1 %2293  ;;  %v14768_v38 = vld [vmem:[#allocation47_spill] sm:$0xff] }
 0x29a   : > { %v2730_v21 = vadd.f32 %v2645_v46, %v14768_v38  ;;  %v3081_v46 = vrot.slane %v10418_v44, 7  ;;  %v10824_v38 = vsel %vm2046_vm2, %v3079_v6, %v3080_v26  ;;  %v3084_v6 = vrot.slane %v10439_v1, 7 }
 0x29b   : > { %2161 = vrot.lane.b32.xlu1 %v10046_v61, %s8846_s23  ;;  %14770 = vst [vmem:[#allocation46_spill] sm:$0xff] %v10824_v38 }
 0x29c   : > { %2159 = vrot.lane.b32.xlu0 %v14763_v60, %s8846_s23  ;;  %v2801_v12 = vpop.permute.xlu0 %2800 }
 0x29d   : > { %v2803_v7 = vpop.permute.xlu1 %2802  ;;  %v2928_v63 = vrot.slane %v2801_v12, 1 }
 0x29e   : > { %v2929_v14 = vrot.slane %v2803_v7, 1  ;;  %v2218_v7 = vadd.f32 %v2134_v48, %v14766_v55  ;;  %v2417_v55 = vrot.slane %v10774_v9, 1 }
 0x29f   : > { %2329 = vrot.lane.b32.xlu1 %v10046_v61, %s8845_s8  ;;  %v14767_v61 = vld [vmem:[#allocation42_spill] sm:$0xff]  ;;  %v2981_v54 = vsel %vm2447_vm3, %v2927_v22, %v2928_v63 }
 0x2a0   : > { %v2217_v15 = vadd.f32 %v10596_v56, %v14767_v61  ;;  %2327 = vrot.lane.b32.xlu0 %v14763_v60, %s8845_s8  ;;  %v2980_v48 = vsel %vm2447_vm3, %v2928_v63, %v2929_v14  ;;  %v3002_v12 = vadd.f32 %v2981_v54, %v2730_v21  ;;  %v10817_v56 = vpop.permute.xlu0 %2139  ;;  %v2491_v13 = vadd.f32 %v2468_v2, %v2218_v7  ;;  %v4307_v21 = vld [vmem:[#allocation12 + $0x8] sm:$0xff] }
 0x2a1   : > { %v2647_v30 = vpop.permute.xlu1 %2646  ;;  %v3083_v2 = vrot.slane %v10427_v59, 7  ;;  %v3082_v14 = vrot.slane %v10433_v24, 7  ;;  %v2418_v54 = vrot.slane %v10770_v31, 1  ;;  %8288 = vmatprep.subr.mxu0 %v4307_v21 }
 0x2a2   : > { %v2731_v50 = vadd.f32 %v2647_v30, %v14769_v4  ;;  %v2490_v52 = vadd.f32 %v2469_v43, %v2217_v15  ;;  %8289 = vmatpush3.msra.mxu0 %v4307_v21 }
 0x2a3   : > { %2838 = vrot.lane.b32.xlu1 %v10054_v3, %s8845_s8  ;;  %v10838_v3 = vsel %vm2046_vm2, %v3080_v26, %v3081_v46  ;;  %v10850_v26 = vsel %vm2046_vm2, %v3082_v14, %v3083_v2  ;;  %v10854_v7 = vsel %vm2046_vm2, %v3083_v2, %v3084_v6  ;;  %v14780_v14 = vld [vmem:[#allocation94_spill] sm:$0xff] }
 0x2a4   : > { %v3003_v22 = vadd.f32 %v2980_v48, %v2731_v50  ;;  %v10826_v57 = vadd.f32 %v3002_v12, %v2490_v52  ;;  %2836 = vrot.lane.b32.xlu0 %v10058_v5, %s8845_s8  ;;  %v2296_v63 = vpop.permute.xlu0 %2295  ;;  %14773 = vst [vmem:[#allocation52_spill] sm:$0xff] %v10838_v3  ;;  %14774 = vst [vmem:[#allocation159_spill] sm:$0xff] %v10850_v26  ;;  %v14777_v50 = vld [vmem:[#allocation63_spill] sm:$0xff]  ;;  %v2467_v52 = vsel %vm2447_vm3, %v2417_v55, %v2418_v54 }
 0x2a5   : > { %v10828_v60 = vpop.permute.xlu1 %2297  ;;  %14775 = vst [vmem:[#allocation160_spill] sm:$0xff] %v10854_v7  ;;  %v3086_v48 = vrot.slane %v14777_v50, 7  ;;  %v14781_v55 = vld [vmem:[#allocation143_spill] sm:$0xff]  ;;  %v3092_v3 = vrot.slane %v10480_v29, 7 }
 0x2a6   : > { %14771 = vst [vmem:[#allocation42_spill] sm:$0xff] %v10826_v57  ;;  %v10832_v15 = vadd.f32 %v3003_v22, %v2491_v13  ;;  %v14778_v13 = vld [vmem:[#allocation50_spill] sm:$0xff]  ;;  %v14779_v22 = vld [vmem:[#allocation57_spill] sm:$0xff] }
 0x2a7   : > { %2670 = vrot.lane.b32.xlu1 %v10058_v5, %s8846_s23  ;;  %v14795_v57 = vld [vmem:[#allocation97_spill] sm:$0xff] }
 0x2a8   : > { %14772 = vst [vmem:[#allocation47_spill] sm:$0xff] %v10832_v15  ;;  %2163 = vrot.lane.b32.xlu0 %v10060_v18, %s8846_s23  ;;  %v2649_v43 = vpop.permute.xlu0 %2648 }
 0x2a9   : > { %v2651_v30 = vpop.permute.xlu1 %2650  ;;  %v2732_v31 = vadd.f32 %v2649_v43, %v14779_v22  ;;  %v14786_v22 = vld [vmem:[#allocation145_spill] sm:$0xff] }
 0x2ab   : > { %2333 = vrot.lane.b32.xlu1 %v10060_v18, %s8845_s8  ;;  %v14776_v18 = vld [vmem:[#allocation141_spill] sm:$0xff] }
 0x2ac   : > { %2331 = vrot.lane.b32.xlu0 %v10064_v10, %s8845_s8  ;;  %v2805_v4 = vpop.permute.xlu0 %2804  ;;  %v3085_v9 = vrot.slane %v14776_v18, 7  ;;  %v2219_v10 = vadd.f32 %v10759_v53, %v14778_v13  ;;  %v14785_v13 = vld [vmem:[#allocation144_spill] sm:$0xff]  ;;  %v14812_v18 = vld [vmem:[#allocation59_spill] sm:$0xff] }
 0x2ad   : > { %v2807_v61 = vpop.permute.xlu1 %2806  ;;  %v2930_v46 = vrot.slane %v2805_v4, 1 }
 0x2ae   : > { %v2931_v12 = vrot.slane %v2807_v61, 1  ;;  %v2492_v5 = vadd.f32 %v2467_v52, %v2219_v10  ;;  %v3087_v61 = vrot.slane %v14781_v55, 7  ;;  %v10881_v53 = vsel %vm2046_vm2, %v3085_v9, %v3086_v48  ;;  %v14784_v52 = vld [vmem:[#allocation95_spill] sm:$0xff] }
 0x2af   : > { %2674 = vrot.lane.b32.xlu1 %v10073_v32, %s8846_s23  ;;  %14782 = vst [vmem:[#allocation63_spill] sm:$0xff] %v10881_v53  ;;  %v3089_v10 = vrot.slane %v14785_v13, 7  ;;  %v14789_v53 = vld [vmem:[#allocation96_spill] sm:$0xff] }
 0x2b0   : > { %2672 = vrot.lane.b32.xlu0 %v14780_v14, %s8846_s23  ;;  %v2979_v6 = vsel %vm2447_vm3, %v2930_v46, %v2931_v12  ;;  %v10874_v7 = vpop.permute.xlu0 %2299  ;;  %v10894_v9 = vsel %vm2046_vm2, %v3086_v48, %v3087_v61 }
 0x2b1   : > { %v10868_v2 = vpop.permute.xlu1 %2301  ;;  %v3004_v21 = vadd.f32 %v2979_v6, %v2732_v31  ;;  %v3088_v31 = vrot.slane %v14786_v22, 7  ;;  %v14787_v6 = vld [vmem:[#allocation27_spill] sm:$0xff]  ;;  %14788 = vst [vmem:[#allocation57_spill] sm:$0xff] %v10894_v9  ;;  %v14793_v9 = vld [vmem:[#allocation49_spill] sm:$0xff] }
 0x2b2   : > { %v2220_v41 = vadd.f32 %v10753_v34, %v14793_v9 }
 0x2b3   : > { %2842 = vrot.lane.b32.xlu1 %v10073_v32, %s8845_s8  ;;  %v10883_v43 = vadd.f32 %v3004_v21, %v2492_v5  ;;  %v3090_v32 = vrot.slane %v14787_v6, 7  ;;  %v2419_v5 = vrot.slane %v2296_v63, 1  ;;  %v10904_v38 = vsel %vm2046_vm2, %v3088_v31, %v3089_v10 }
 0x2b4   : > { %2840 = vrot.lane.b32.xlu0 %v14780_v14, %s8845_s8  ;;  %v2653_v46 = vpop.permute.xlu0 %2652  ;;  %14791 = vst [vmem:[#allocation143_spill] sm:$0xff] %v10904_v38 }
 0x2b5   : > { %14783 = vst [vmem:[#allocation50_spill] sm:$0xff] %v10883_v43  ;;  %v2142_v4 = vpop.permute.xlu1 %2141  ;;  %v10908_v48 = vsel %vm2046_vm2, %v3089_v10, %v3090_v32  ;;  %v2466_v63 = vsel %vm2447_vm3, %v2418_v54, %v2419_v5  ;;  %v14796_v54 = vld [vmem:[#allocation33_spill] sm:$0xff]  ;;  %v14799_v5 = vld [vmem:[#allocation100_spill] sm:$0xff] }
 0x2b6   : > { %14792 = vst [vmem:[#allocation95_spill] sm:$0xff] %v10908_v48  ;;  %v2493_v38 = vadd.f32 %v2466_v63, %v2220_v41  ;;  %v2420_v48 = vrot.slane %v10828_v60, 1 }
 0x2b7   : > { %2337 = vrot.lane.b32.xlu1 %v14784_v52, %s8845_s8  ;;  %v14790_v52 = vld [vmem:[#allocation146_spill] sm:$0xff] }
 0x2b8   : > { %2335 = vrot.lane.b32.xlu0 %v14789_v53, %s8845_s8  ;;  %v2809_v14 = vpop.permute.xlu0 %2808  ;;  %v3091_v26 = vrot.slane %v14790_v52, 7 }
 0x2b9   : > { %v2811_v21 = vpop.permute.xlu1 %2810  ;;  %v2932_v61 = vrot.slane %v2809_v14, 1  ;;  %v3093_v14 = vrot.slane %v14796_v54, 7 }
 0x2ba   : > { %v10928_v34 = vsel %vm2046_vm2, %v3091_v26, %v3092_v3  ;;  %v2421_v26 = vrot.slane %v10874_v7, 1 }
 0x2bb   : > { %2165 = vrot.lane.b32.xlu1 %v14789_v53, %s8846_s23  ;;  %v14794_v53 = vld [vmem:[#allocation56_spill] sm:$0xff]  ;;  %v2978_v31 = vsel %vm2447_vm3, %v2931_v12, %v2932_v61  ;;  %14797 = vst [vmem:[#allocation144_spill] sm:$0xff] %v10928_v34  ;;  %v14800_v12 = vld [vmem:[#allocation101_spill] sm:$0xff]  ;;  %v14802_v61 = vld [vmem:[#allocation150_spill] sm:$0xff] }
 0x2bc   : > { %v2733_v43 = vadd.f32 %v2651_v30, %v14794_v53  ;;  %2676 = vrot.lane.b32.xlu0 %v14795_v57, %s8846_s23  ;;  %v10921_v10 = vpop.permute.xlu0 %2143  ;;  %v3094_v53 = vrot.slane %v14802_v61, 7  ;;  %v14805_v34 = vld [vmem:[#allocation102_spill] sm:$0xff]  ;;  %v2465_v60 = vsel %vm2447_vm3, %v2420_v48, %v2421_v26  ;;  %v14813_v48 = vld [vmem:[#allocation65_spill] sm:$0xff] }
 0x2bd   : > { %v10915_v15 = vpop.permute.xlu1 %2145  ;;  %v14807_v61 = vld [vmem:[#allocation154_spill] sm:$0xff] }
 0x2be   : > { %v3005_v32 = vadd.f32 %v2978_v31, %v2733_v43  ;;  %v14801_v43 = vld [vmem:[#allocation147_spill] sm:$0xff] }
 0x2bf   : > { %2846 = vrot.lane.b32.xlu1 %v14795_v57, %s8845_s8  ;;  %v3095_v63 = vrot.slane %v14801_v43, 7  ;;  %v14803_v31 = vld [vmem:[#allocation151_spill] sm:$0xff] }
 0x2c0   : > { %v10930_v30 = vadd.f32 %v3005_v32, %v2493_v38  ;;  %2844 = vrot.lane.b32.xlu0 %v14799_v5, %s8845_s8  ;;  %v10936_v41 = vpop.permute.xlu0 %2303  ;;  %v3096_v57 = vrot.slane %v14803_v31, 7  ;;  %v10945_v38 = vsel %vm2046_vm2, %v3092_v3, %v3093_v14  ;;  %v2422_v32 = vrot.slane %v10868_v2, 1  ;;  %v14810_v14 = vld [vmem:[#allocation58_spill] sm:$0xff] }
 0x2c1   : > { %v10932_v9 = vpop.permute.xlu1 %2305  ;;  %14804 = vst [vmem:[#allocation96_spill] sm:$0xff] %v10945_v38  ;;  %v3098_v3 = vrot.slane %v14807_v61, 7  ;;  %v10958_v7 = vsel %vm2046_vm2, %v3094_v53, %v3095_v63  ;;  %v2933_v38 = vrot.slane %v2811_v21, 1  ;;  %v2734_v53 = vadd.f32 %v2653_v46, %v14812_v18  ;;  %v14815_v18 = vld [vmem:[#allocation69_spill] sm:$0xff] }
 0x2c2   : > { %14798 = vst [vmem:[#allocation27_spill] sm:$0xff] %v10930_v30  ;;  %14808 = vst [vmem:[#allocation49_spill] sm:$0xff] %v10958_v7  ;;  %v10962_v2 = vsel %vm2046_vm2, %v3095_v63, %v3096_v57  ;;  %v2464_v22 = vsel %vm2447_vm3, %v2421_v26, %v2422_v32  ;;  %v14814_v26 = vld [vmem:[#allocation103_spill] sm:$0xff]  ;;  %v3099_v46 = vrot.slane %v14815_v18, 7 }
 0x2c3   : > { %2169 = vrot.lane.b32.xlu1 %v14800_v12, %s8846_s23  ;;  %14809 = vst [vmem:[#allocation56_spill] sm:$0xff] %v10962_v2 }
 0x2c4   : > { %2167 = vrot.lane.b32.xlu0 %v14805_v34, %s8846_s23  ;;  %v2813_v36 = vpop.permute.xlu0 %2812 }
 0x2c5   : > { %v2815_v5 = vpop.permute.xlu1 %2814  ;;  %v2934_v52 = vrot.slane %v2813_v36, 1 }
 0x2c6   : > { %v2935_v30 = vrot.slane %v2815_v5, 1  ;;  %v2222_v5 = vadd.f32 %v2142_v4, %v14810_v14 }
 0x2c7   : > { %2341 = vrot.lane.b32.xlu1 %v14800_v12, %s8845_s8  ;;  %v14811_v12 = vld [vmem:[#allocation54_spill] sm:$0xff]  ;;  %v2977_v57 = vsel %vm2447_vm3, %v2933_v38, %v2934_v52 }
 0x2c8   : > { %v2221_v40 = vadd.f32 %v10817_v56, %v14811_v12  ;;  %2339 = vrot.lane.b32.xlu0 %v14805_v34, %s8845_s8  ;;  %v2976_v36 = vsel %vm2447_vm3, %v2934_v52, %v2935_v30  ;;  %v3006_v21 = vadd.f32 %v2977_v57, %v2734_v53  ;;  %v10979_v56 = vpop.permute.xlu0 %2147  ;;  %v10986_v34 = vsel %vm2046_vm2, %v3097_v58, %v3098_v3  ;;  %v10996_v30 = vpop.f32.mrb[95].mxu0  ;;  %v14821_v57 = vld [vmem:[#allocation105_spill] sm:$0xff] }
 0x2c9   : > { %v2655_v7 = vpop.permute.xlu1 %2654  ;;  %14816 = vst [vmem:[#allocation33_spill] sm:$0xff] %v10986_v34  ;;  %v2495_v32 = vadd.f32 %v2464_v22, %v2222_v5  ;;  %v11002_v58 = vsel %vm2046_vm2, %v3098_v3, %v3099_v46  ;;  %v3101_v22 = vrot.slane %v10520_v51, 7  ;;  %v3100_v5 = vrot.slane %v10524_v17, 7 }
 0x2ca   : > { %v2735_v63 = vadd.f32 %v2655_v7, %v14813_v48  ;;  %v2494_v4 = vadd.f32 %v2465_v60, %v2221_v40  ;;  %v14818_v40 = vld [vmem:[#allocation104_spill] sm:$0xff]  ;;  %14820 = vst [vmem:[#allocation147_spill] sm:$0xff] %v11002_v58  ;;  %v3102_v12 = vrot.slane %v10996_v30, 7 }
 0x2cb   : > { %2850 = vrot.lane.b32.xlu1 %v14814_v26, %s8845_s8  ;;  %v11014_v3 = vsel %vm2046_vm2, %v3100_v5, %v3101_v22  ;;  %v2424_v26 = vrot.slane %v10932_v9, 1 }
 0x2cc   : > { %v3007_v38 = vadd.f32 %v2976_v36, %v2735_v63  ;;  %v10988_v14 = vadd.f32 %v3006_v21, %v2494_v4  ;;  %2848 = vrot.lane.b32.xlu0 %v14818_v40, %s8845_s8  ;;  %v2308_v60 = vpop.permute.xlu0 %2307  ;;  %v2423_v63 = vrot.slane %v10936_v41, 1  ;;  %14822 = vst [vmem:[#allocation151_spill] sm:$0xff] %v11014_v3  ;;  %v11018_v36 = vsel %vm2046_vm2, %v3101_v22, %v3102_v12  ;;  %v14824_v21 = vld [vmem:[#allocation106_spill] sm:$0xff]  ;;  %v14827_v22 = vld [vmem:[#allocation72_spill] sm:$0xff]  ;;  %v14828_v3 = vld [vmem:[#allocation109_spill] sm:$0xff] }
 0x2cd   : > { %v10990_v7 = vpop.permute.xlu1 %2309  ;;  %14823 = vst [vmem:[#allocation102_spill] sm:$0xff] %v11018_v36 }
 0x2ce   : > { %14817 = vst [vmem:[#allocation100_spill] sm:$0xff] %v10988_v14  ;;  %v10994_v52 = vadd.f32 %v3007_v38, %v2495_v32  ;;  %v14825_v32 = vld [vmem:[#allocation108_spill] sm:$0xff]  ;;  %v2463_v41 = vsel %vm2447_vm3, %v2423_v63, %v2424_v26  ;;  %v14843_v14 = vld [vmem:[#allocation149_spill] sm:$0xff] }
 0x2cf   : > { %2678 = vrot.lane.b32.xlu1 %v14818_v40, %s8846_s23 }
 0x2d0   : > { %14819 = vst [vmem:[#allocation101_spill] sm:$0xff] %v10994_v52  ;;  %2171 = vrot.lane.b32.xlu0 %v14821_v57, %s8846_s23  ;;  %v2657_v48 = vpop.permute.xlu0 %2656  ;;  %v14842_v52 = vld [vmem:[#allocation78_spill] sm:$0xff] }
 0x2d1   : > { %v2659_v53 = vpop.permute.xlu1 %2658  ;;  %v2736_v12 = vadd.f32 %v2657_v48, %v14827_v22  ;;  %v14830_v48 = vld [vmem:[#allocation110_spill] sm:$0xff]  ;;  %v14832_v22 = vld [vmem:[#allocation61_spill] sm:$0xff] }
 0x2d3   : > { %2345 = vrot.lane.b32.xlu1 %v14821_v57, %s8845_s8  ;;  %v14826_v57 = vld [vmem:[#allocation62_spill] sm:$0xff] }
 0x2d4   : > { %2343 = vrot.lane.b32.xlu0 %v14824_v21, %s8845_s8  ;;  %v2817_v46 = vpop.permute.xlu0 %2816  ;;  %v2223_v40 = vadd.f32 %v10921_v10, %v14826_v57 }
 0x2d5   : > { %v2819_v4 = vpop.permute.xlu1 %2818  ;;  %v2936_v5 = vrot.slane %v2817_v46, 1  ;;  %v2425_v46 = vrot.slane %v2308_v60, 1  ;;  %v14834_v60 = vld [vmem:[#allocation111_spill] sm:$0xff] }
 0x2d6   : > { %v2937_v38 = vrot.slane %v2819_v4, 1  ;;  %v2496_v21 = vadd.f32 %v2463_v41, %v2223_v40 }
 0x2d7   : > { %2682 = vrot.lane.b32.xlu1 %v14825_v32, %s8846_s23 }
 0x2d8   : > { %2680 = vrot.lane.b32.xlu0 %v14828_v3, %s8846_s23  ;;  %v2975_v9 = vsel %vm2447_vm3, %v2936_v5, %v2937_v38  ;;  %v2312_v34 = vpop.permute.xlu0 %2311  ;;  %v14831_v5 = vld [vmem:[#allocation124_spill] sm:$0xff] }
 0x2d9   : > { %v2314_v36 = vpop.permute.xlu1 %2313  ;;  %v3008_v58 = vadd.f32 %v2975_v9, %v2736_v12  ;;  %v2224_v12 = vadd.f32 %v10915_v15, %v14832_v22  ;;  %v14833_v9 = vld [vmem:[#allocation71_spill] sm:$0xff]  ;;  %v14836_v15 = vld [vmem:[#allocation112_spill] sm:$0xff]  ;;  %v2427_v22 = vrot.slane %v2312_v34, 1 }
 0x2da   : > { %v14841_v34 = vld [vmem:[#allocation68_spill] sm:$0xff] }
 0x2db   : > { %2854 = vrot.lane.b32.xlu1 %v14825_v32, %s8845_s8  ;;  %v11036_v63 = vadd.f32 %v3008_v58, %v2496_v21  ;;  %v2462_v58 = vsel %vm2447_vm3, %v2424_v26, %v2425_v46  ;;  %v2737_v21 = vadd.f32 %v2659_v53, %v14833_v9  ;;  %v2428_v9 = vrot.slane %v2314_v36, 1 }
 0x2dc   : > { %2852 = vrot.lane.b32.xlu0 %v14828_v3, %s8845_s8  ;;  %v2497_v3 = vadd.f32 %v2462_v58, %v2224_v12  ;;  %v14838_v58 = vld [vmem:[#allocation126_spill] sm:$0xff]  ;;  %v2225_v36 = vadd.f32 %v10979_v56, %v14841_v34 }
 0x2dd   : > { %14829 = vst [vmem:[#allocation154_spill] sm:$0xff] %v11036_v63  ;;  %v2150_v4 = vpop.permute.xlu1 %2149  ;;  %v2460_v63 = vsel %vm2447_vm3, %v2427_v22, %v2428_v9 }
 0x2de   : > { %v2661_v10 = vpop.permute.xlu0 %2660 }
 0x2df   : > { %2349 = vrot.lane.b32.xlu1 %v14830_v48, %s8845_s8 }
 0x2e0   : > { %2347 = vrot.lane.b32.xlu0 %v14831_v5, %s8845_s8 }
 0x2e1   : > { %v2823_v57 = vpop.permute.xlu1 %2822 }
 0x2e2   : > { %v2821_v40 = vpop.permute.xlu0 %2820 }
 0x2e3   : > { %2173 = vrot.lane.b32.xlu1 %v14831_v5, %s8846_s23  ;;  %v2938_v41 = vrot.slane %v2821_v40, 1  ;;  %v14837_v40 = vld [vmem:[#allocation125_spill] sm:$0xff] }
 0x2e4   : > { %2684 = vrot.lane.b32.xlu0 %v14834_v60, %s8846_s23 }
 0x2e5   : > { %v11051_v32 = vpop.permute.xlu1 %2153  ;;  %v2974_v48 = vsel %vm2447_vm3, %v2937_v38, %v2938_v41  ;;  %v2426_v41 = vrot.slane %v10990_v7, 1  ;;  %v2738_v7 = vadd.f32 %v2661_v10, %v14842_v52 }
 0x2e6   : > { %v3009_v2 = vadd.f32 %v2974_v48, %v2737_v21  ;;  %v2152_v5 = vpop.permute.xlu0 %2151  ;;  %v14840_v48 = vld [vmem:[#allocation75_spill] sm:$0xff] }
 0x2e7   : > { %2858 = vrot.lane.b32.xlu1 %v14834_v60, %s8845_s8  ;;  %v2461_v21 = vsel %vm2447_vm3, %v2426_v41, %v2427_v22  ;;  %v2939_v60 = vrot.slane %v2823_v57, 1  ;;  %v14844_v41 = vld [vmem:[#allocation84_spill] sm:$0xff] }
 0x2e8   : > { %v11059_v26 = vadd.f32 %v3009_v2, %v2497_v3  ;;  %2856 = vrot.lane.b32.xlu0 %v14836_v15, %s8845_s8  ;;  %v14839_v3 = vld [vmem:[#allocation114_spill] sm:$0xff]  ;;  %v2226_v15 = vadd.f32 %v2150_v4, %v14840_v48  ;;  %v2498_v57 = vadd.f32 %v2461_v21, %v2225_v36 }
 0x2e9   : > { %v11061_v46 = vpop.permute.xlu1 %2317 }
 0x2ea   : > { %14835 = vst [vmem:[#allocation58_spill] sm:$0xff] %v11059_v26  ;;  %v2316_v53 = vpop.permute.xlu0 %2315  ;;  %v2499_v52 = vadd.f32 %v2460_v63, %v2226_v15  ;;  %v14847_v15 = vld [vmem:[#allocation133_spill] sm:$0xff]  ;;  %v2430_v36 = vrot.slane %v11061_v46, 1 }
 0x2eb   : > { %3170 = vrot.lane.b32.xlu1 %v14837_v40, %s8846_s23  ;;  %v2429_v63 = vrot.slane %v2316_v53, 1 }
 0x2ec   : > { %3168 = vrot.lane.b32.xlu0 %v14838_v58, %s8846_s23 }
 0x2ed   : > { %v2827_v38 = vpop.permute.xlu1 %2826 }
 0x2ee   : > { %v2941_v12 = vrot.slane %v2827_v38, 1  ;;  %v2825_v2 = vpop.permute.xlu0 %2824 }
 0x2ef   : > { %2862 = vrot.lane.b32.xlu1 %v14839_v3, %s8845_s8  ;;  %v2940_v26 = vrot.slane %v2825_v2, 1 }
 0x2f0   : > { %2860 = vrot.lane.b32.xlu0 %v14843_v14, %s8845_s8 }
 0x2f1   : > { %v2663_v38 = vpop.permute.xlu1 %2662  ;;  %v2973_v3 = vsel %vm2447_vm3, %v2939_v60, %v2940_v26  ;;  %v2972_v4 = vsel %vm2447_vm3, %v2940_v26, %v2941_v12  ;;  %v14845_v60 = vld [vmem:[#allocation127_spill] sm:$0xff] }
 0x2f2   : > { %v2739_v17 = vadd.f32 %v2663_v38, %v14844_v41  ;;  %v3010_v2 = vadd.f32 %v2973_v3, %v2738_v7  ;;  %v11087_v56 = vpop.permute.xlu0 %2155  ;;  %v2459_v38 = vsel %vm2447_vm3, %v2429_v63, %v2430_v36  ;;  %v14848_v41 = vld [vmem:[#allocation81_spill] sm:$0xff] }
 0x2f3   : > { %2686 = vrot.lane.b32.xlu1 %v14843_v14, %s8846_s23  ;;  %v2227_v53 = vadd.f32 %v2152_v5, %v14848_v41  ;;  %v14851_v5 = vld [vmem:[#allocation130_spill] sm:$0xff]  ;;  %v14852_v41 = vld [vmem:[#allocation88_spill] sm:$0xff] }
 0x2f4   : > { %v3011_v10 = vadd.f32 %v2972_v4, %v2739_v17  ;;  %v11091_v22 = vadd.f32 %v3010_v2, %v2498_v57  ;;  %3172 = vrot.lane.b32.xlu0 %v14845_v60, %s8846_s23  ;;  %v14846_v17 = vld [vmem:[#allocation132_spill] sm:$0xff] }
 0x2f5   : > { %v11093_v9 = vpop.permute.xlu1 %2321  ;;  %v14849_v4 = vld [vmem:[#allocation92_spill] sm:$0xff] }
 0x2f6   : > { %v11097_v48 = vadd.f32 %v3011_v10, %v2499_v52  ;;  %v2320_v34 = vpop.permute.xlu0 %2319  ;;  %v2500_v52 = vadd.f32 %v2459_v38, %v2227_v53  ;;  %v2228_v53 = vadd.f32 %v11051_v32, %v14852_v41  ;;  %v14856_v41 = vld [vmem:[#allocation99_spill] sm:$0xff] }
 0x2f7   : > { %3314 = vrot.lane.b32.xlu1 %v14837_v40, %s8845_s8  ;;  %v3811_v40 = vld [vmem:[#allocation3 + $0x10] sm:$0xff] }
 0x2f8   : > { %3312 = vrot.lane.b32.xlu0 %v14838_v58, %s8845_s8  ;;  %8219 = vmatprep.mubr.msk.f32.mxu1 %vm465_vm4, %v3811_v40 }
 0x2f9   : > { %v2667_v26 = vpop.permute.xlu1 %2666 }
 0x2fa   : > { %v2665_v12 = vpop.permute.xlu0 %2664 }
 0x2fb   : > { %3174 = vrot.lane.b32.xlu1 %v14846_v17, %s8846_s23  ;;  %v2740_v57 = vadd.f32 %v2665_v12, %v14849_v4  ;;  %v14853_v4 = vld [vmem:[#allocation107_spill] sm:$0xff] }
 0x2fc   : > { %3176 = vrot.lane.b32.xlu0 %v14847_v15, %s8846_s23 }
 0x2fd   : > { %v2831_v21 = vpop.permute.xlu1 %2830 }
 0x2fe   : > { %v2829_v7 = vpop.permute.xlu0 %2828  ;;  %v2943_v58 = vrot.slane %v2831_v21, 1 }
 0x2ff   : > { %3178 = vrot.lane.b32.xlu1 %v10302_v19, %s8846_s23  ;;  %v2942_v3 = vrot.slane %v2829_v7, 1  ;;  %v2431_v7 = vrot.slane %v2320_v34, 1 }
 0x300   : > { %3180 = vrot.lane.b32.xlu0 %v10315_v23, %s8846_s23 }
 0x301   : > { %v2326_v2 = vpop.permute.xlu1 %2325  ;;  %v2971_v46 = vsel %vm2447_vm3, %v2942_v3, %v2943_v58 }
 0x302   : > { %v3012_v10 = vadd.f32 %v2971_v46, %v2740_v57  ;;  %v2324_v14 = vpop.permute.xlu0 %2323  ;;  %v2741_v57 = vadd.f32 %v2667_v26, %v14853_v4 }
 0x303   : > { %3318 = vrot.lane.b32.xlu1 %v14845_v60, %s8845_s8  ;;  %v2458_v60 = vsel %vm2447_vm3, %v2430_v36, %v2431_v7  ;;  %v2433_v26 = vrot.slane %v2324_v14, 1  ;;  %v14857_v14 = vld [vmem:[#allocation98_spill] sm:$0xff] }
 0x304   : > { %v11121_v63 = vadd.f32 %v3012_v10, %v2500_v52  ;;  %3316 = vrot.lane.b32.xlu0 %v14851_v5, %s8845_s8  ;;  %v2501_v52 = vadd.f32 %v2458_v60, %v2228_v53  ;;  %v2432_v60 = vrot.slane %v11093_v9, 1 }
 0x305   : > { %v2158_v21 = vpop.permute.xlu1 %2157 }
 0x306   : > { %14850 = vst [vmem:[#allocation54_spill] sm:$0xff] %v11121_v63  ;;  %v2669_v12 = vpop.permute.xlu0 %2668  ;;  %v14854_v63 = vld [vmem:[#allocation131_spill] sm:$0xff]  ;;  %v2230_v53 = vadd.f32 %v2158_v21, %v14856_v41 }
 0x307   : > { %3182 = vrot.lane.b32.xlu1 %v10335_v62, %s8846_s23 }
 0x308   : > { %3184 = vrot.lane.b32.xlu0 %v10344_v16, %s8846_s23 }
 0x309   : > { %v2835_v40 = vpop.permute.xlu1 %2834 }
 0x30a   : > { %v2833_v38 = vpop.permute.xlu0 %2832  ;;  %v2945_v4 = vrot.slane %v2835_v40, 1 }
 0x30b   : > { %3186 = vrot.lane.b32.xlu1 %v10337_v45, %s8846_s23  ;;  %v2944_v3 = vrot.slane %v2833_v38, 1  ;;  %v2434_v38 = vrot.slane %v2326_v2, 1  ;;  %v2229_v2 = vadd.f32 %v11087_v56, %v14857_v14 }
 0x30c   : > { %3188 = vrot.lane.b32.xlu0 %v10348_v37, %s8846_s23 }
 0x30d   : > { %v11136_v46 = vpop.permute.xlu1 %2161  ;;  %v2970_v34 = vsel %vm2447_vm3, %v2943_v58, %v2944_v3 }
 0x30e   : > { %v3013_v10 = vadd.f32 %v2970_v34, %v2741_v57  ;;  %v2160_v5 = vpop.permute.xlu0 %2159  ;;  %v2456_v34 = vsel %vm2447_vm3, %v2433_v26, %v2434_v38 }
 0x30f   : > { %3322 = vrot.lane.b32.xlu1 %v14854_v63, %s8845_s8 }
 0x310   : > { %v11144_v36 = vadd.f32 %v3013_v10, %v2501_v52  ;;  %3320 = vrot.lane.b32.xlu0 %v14846_v17, %s8845_s8  ;;  %v2457_v17 = vsel %vm2447_vm3, %v2432_v60, %v2433_v26  ;;  %v14858_v52 = vld [vmem:[#allocation115_spill] sm:$0xff]  ;;  %v14859_v60 = vld [vmem:[#allocation116_spill] sm:$0xff] }
 0x311   : > { %v11146_v7 = vpop.permute.xlu1 %2329  ;;  %v2742_v9 = vadd.f32 %v2669_v12, %v14858_v52  ;;  %v2502_v40 = vadd.f32 %v2457_v17, %v2229_v2  ;;  %v2503_v12 = vadd.f32 %v2456_v34, %v2230_v53  ;;  %v14860_v52 = vld [vmem:[#allocation113_spill] sm:$0xff] }
 0x312   : > { %14855 = vst [vmem:[#allocation59_spill] sm:$0xff] %v11144_v36  ;;  %v2328_v32 = vpop.permute.xlu0 %2327 }
 0x313   : > { %3190 = vrot.lane.b32.xlu1 %v10364_v39, %s8846_s23 }
 0x314   : > { %3192 = vrot.lane.b32.xlu0 %v10383_v8, %s8846_s23 }
 0x315   : > { %v2839_v58 = vpop.permute.xlu1 %2838 }
 0x316   : > { %v2947_v63 = vrot.slane %v2839_v58, 1  ;;  %v2837_v3 = vpop.permute.xlu0 %2836 }
 0x317   : > { %3194 = vrot.lane.b32.xlu1 %v10368_v20, %s8846_s23  ;;  %v2946_v57 = vrot.slane %v2837_v3, 1 }
 0x318   : > { %3196 = vrot.lane.b32.xlu0 %v10390_v49, %s8846_s23 }
 0x319   : > { %v2671_v10 = vpop.permute.xlu1 %2670  ;;  %v2969_v58 = vsel %vm2447_vm3, %v2945_v4, %v2946_v57  ;;  %v2968_v21 = vsel %vm2447_vm3, %v2946_v57, %v2947_v63 }
 0x31a   : > { %v2743_v36 = vadd.f32 %v2671_v10, %v14859_v60  ;;  %v3014_v3 = vadd.f32 %v2969_v58, %v2742_v9  ;;  %v11172_v56 = vpop.permute.xlu0 %2163  ;;  %v2231_v9 = vadd.f32 %v2160_v5, %v14860_v52  ;;  %v14861_v10 = vld [vmem:[#allocation118_spill] sm:$0xff] }
 0x31b   : > { %3326 = vrot.lane.b32.xlu1 %v10302_v19, %s8845_s8 }
 0x31c   : > { %v3015_v26 = vadd.f32 %v2968_v21, %v2743_v36  ;;  %v11176_v38 = vadd.f32 %v3014_v3, %v2502_v40  ;;  %3324 = vrot.lane.b32.xlu0 %v14847_v15, %s8845_s8  ;;  %v2435_v36 = vrot.slane %v2328_v32, 1  ;;  %v2436_v15 = vrot.slane %v11146_v7, 1 }
 0x31d   : > { %v11178_v41 = vpop.permute.xlu1 %2333 }
 0x31e   : > { %v11182_v4 = vadd.f32 %v3015_v26, %v2503_v12  ;;  %v2332_v14 = vpop.permute.xlu0 %2331  ;;  %v2455_v57 = vsel %vm2447_vm3, %v2435_v36, %v2436_v15 }
 0x31f   : > { %3198 = vrot.lane.b32.xlu1 %v10410_v27, %s8846_s23  ;;  %v2504_v60 = vadd.f32 %v2455_v57, %v2231_v9  ;;  %v14863_v57 = vld [vmem:[#allocation121_spill] sm:$0xff] }
 0x320   : > { %3200 = vrot.lane.b32.xlu0 %v10425_v0, %s8846_s23 }
 0x321   : > { %v2675_v63 = vpop.permute.xlu1 %2674 }
 0x322   : > { %v2673_v19 = vpop.permute.xlu0 %2672 }
 0x323   : > { %3202 = vrot.lane.b32.xlu1 %v10418_v44, %s8846_s23  ;;  %v2744_v58 = vadd.f32 %v2673_v19, %v14861_v10 }
 0x324   : > { %3204 = vrot.lane.b32.xlu0 %v10427_v59, %s8846_s23 }
 0x325   : > { %v2843_v17 = vpop.permute.xlu1 %2842 }
 0x326   : > { %v2841_v53 = vpop.permute.xlu0 %2840  ;;  %v2949_v2 = vrot.slane %v2843_v17, 1  ;;  %v14862_v17 = vld [vmem:[#allocation117_spill] sm:$0xff] }
 0x327   : > { %3330 = vrot.lane.b32.xlu1 %v10315_v23, %s8845_s8  ;;  %v2948_v34 = vrot.slane %v2841_v53, 1  ;;  %v2232_v53 = vadd.f32 %v11136_v46, %v14862_v17 }
 0x328   : > { %3328 = vrot.lane.b32.xlu0 %v10321_v33, %s8845_s8  ;;  %v2437_v33 = vrot.slane %v2332_v14, 1 }
 0x329   : > { %v2338_v32 = vpop.permute.xlu1 %2337  ;;  %v2967_v7 = vsel %vm2447_vm3, %v2948_v34, %v2949_v2  ;;  %v2745_v34 = vadd.f32 %v2675_v63, %v14863_v57  ;;  %v14866_v57 = vld [vmem:[#allocation128_spill] sm:$0xff] }
 0x32a   : > { %v3016_v21 = vadd.f32 %v2967_v7, %v2744_v58  ;;  %v2336_v40 = vpop.permute.xlu0 %2335  ;;  %v2454_v19 = vsel %vm2447_vm3, %v2436_v15, %v2437_v33  ;;  %v2440_v63 = vrot.slane %v2338_v32, 1  ;;  %v2438_v7 = vrot.slane %v11178_v41, 1 }
 0x32b   : > { %3206 = vrot.lane.b32.xlu1 %v10439_v1, %s8846_s23  ;;  %v2505_v9 = vadd.f32 %v2454_v19, %v2232_v53 }
 0x32c   : > { %v11205_v23 = vadd.f32 %v3016_v21, %v2504_v60  ;;  %3208 = vrot.lane.b32.xlu0 %v14777_v50, %s8846_s23 }
 0x32d   : > { %v2166_v3 = vpop.permute.xlu1 %2165 }
 0x32e   : > { %v2677_v5 = vpop.permute.xlu0 %2676 }
 0x32f   : > { %3210 = vrot.lane.b32.xlu1 %v14781_v55, %s8846_s23  ;;  %v2746_v41 = vadd.f32 %v2677_v5, %v14866_v57 }
 0x330   : > { %3212 = vrot.lane.b32.xlu0 %v14785_v13, %s8846_s23 }
 0x331   : > { %v2847_v12 = vpop.permute.xlu1 %2846 }
 0x332   : > { %v2845_v26 = vpop.permute.xlu0 %2844 }
 0x333   : > { %3334 = vrot.lane.b32.xlu1 %v10323_v47, %s8845_s8  ;;  %v2950_v36 = vrot.slane %v2845_v26, 1  ;;  %v14864_v26 = vld [vmem:[#allocation120_spill] sm:$0xff] }
 0x334   : > { %3332 = vrot.lane.b32.xlu0 %v10335_v62, %s8845_s8  ;;  %v2439_v62 = vrot.slane %v2336_v40, 1  ;;  %v2234_v19 = vadd.f32 %v2166_v3, %v14864_v26  ;;  %v14865_v40 = vld [vmem:[#allocation119_spill] sm:$0xff] }
 0x335   : > { %v11220_v52 = vpop.permute.xlu1 %2169  ;;  %v2966_v14 = vsel %vm2447_vm3, %v2949_v2, %v2950_v36  ;;  %v2951_v36 = vrot.slane %v2847_v12, 1  ;;  %v2233_v32 = vadd.f32 %v11172_v56, %v14865_v40 }
 0x336   : > { %v3017_v10 = vadd.f32 %v2966_v14, %v2745_v34  ;;  %v2168_v47 = vpop.permute.xlu0 %2167  ;;  %v2453_v33 = vsel %vm2447_vm3, %v2438_v7, %v2439_v62  ;;  %v2452_v53 = vsel %vm2447_vm3, %v2439_v62, %v2440_v63  ;;  %v14867_v14 = vld [vmem:[#allocation129_spill] sm:$0xff] }
 0x337   : > { %3214 = vrot.lane.b32.xlu1 %v14787_v6, %s8846_s23  ;;  %v2506_v12 = vadd.f32 %v2453_v33, %v2233_v32  ;;  %v2507_v5 = vadd.f32 %v2452_v53, %v2234_v19  ;;  %v14868_v53 = vld [vmem:[#allocation122_spill] sm:$0xff] }
 0x338   : > { %v11228_v15 = vadd.f32 %v3017_v10, %v2505_v9  ;;  %3216 = vrot.lane.b32.xlu0 %v10480_v29, %s8846_s23  ;;  %v2235_v57 = vadd.f32 %v2168_v47, %v14868_v53 }
 0x339   : > { %v11230_v58 = vpop.permute.xlu1 %2341 }
 0x33a   : > { %v2340_v46 = vpop.permute.xlu0 %2339  ;;  %v2442_v19 = vrot.slane %v11230_v58, 1 }
 0x33b   : > { %3218 = vrot.lane.b32.xlu1 %v14796_v54, %s8846_s23  ;;  %v2441_v33 = vrot.slane %v2340_v46, 1 }
 0x33c   : > { %3220 = vrot.lane.b32.xlu0 %v14801_v43, %s8846_s23 }
 0x33d   : > { %v2851_v2 = vpop.permute.xlu1 %2850 }
 0x33e   : > { %v2953_v60 = vrot.slane %v2851_v2, 1  ;;  %v2849_v21 = vpop.permute.xlu0 %2848 }
 0x33f   : > { %3338 = vrot.lane.b32.xlu1 %v10337_v45, %s8845_s8  ;;  %v2952_v17 = vrot.slane %v2849_v21, 1 }
 0x340   : > { %3336 = vrot.lane.b32.xlu0 %v10344_v16, %s8845_s8 }
 0x341   : > { %v2679_v34 = vpop.permute.xlu1 %2678  ;;  %v2965_v45 = vsel %vm2447_vm3, %v2951_v36, %v2952_v17  ;;  %v2964_v3 = vsel %vm2447_vm3, %v2952_v17, %v2953_v60  ;;  %v2451_v17 = vsel %vm2447_vm3, %v2441_v33, %v2442_v19 }
 0x342   : > { %v2747_v9 = vadd.f32 %v2679_v34, %v14867_v14  ;;  %v3018_v10 = vadd.f32 %v2965_v45, %v2746_v41  ;;  %v11256_v56 = vpop.permute.xlu0 %2171  ;;  %v14869_v41 = vld [vmem:[#allocation136_spill] sm:$0xff]  ;;  %v2508_v58 = vadd.f32 %v2451_v17, %v2235_v57 }
 0x343   : > { %3222 = vrot.lane.b32.xlu1 %v14803_v31, %s8846_s23 }
 0x344   : > { %v3019_v62 = vadd.f32 %v2964_v3, %v2747_v9  ;;  %v11260_v63 = vadd.f32 %v3018_v10, %v2506_v12  ;;  %3224 = vrot.lane.b32.xlu0 %v14807_v61, %s8846_s23 }
 0x345   : > { %v2346_v16 = vpop.permute.xlu1 %2345 }
 0x346   : > { %v11264_v2 = vadd.f32 %v3019_v62, %v2507_v5  ;;  %v2344_v7 = vpop.permute.xlu0 %2343  ;;  %v14870_v5 = vld [vmem:[#allocation134_spill] sm:$0xff] }
 0x347   : > { %3226 = vrot.lane.b32.xlu1 %v14815_v18, %s8846_s23  ;;  %v14871_v62 = vld [vmem:[#allocation142_spill] sm:$0xff] }
 0x348   : > { %3228 = vrot.lane.b32.xlu0 %v10520_v51, %s8846_s23 }
 0x349   : > { %v2683_v60 = vpop.permute.xlu1 %2682 }
 0x34a   : > { %v2681_v21 = vpop.permute.xlu0 %2680 }
 0x34b   : > { %3342 = vrot.lane.b32.xlu1 %v10348_v37, %s8845_s8  ;;  %v2748_v37 = vadd.f32 %v2681_v21, %v14869_v41  ;;  %v2749_v21 = vadd.f32 %v2683_v60, %v14871_v62  ;;  %v2444_v60 = vrot.slane %v2346_v16, 1  ;;  %v14874_v16 = vld [vmem:[#allocation152_spill] sm:$0xff] }
 0x34c   : > { %3340 = vrot.lane.b32.xlu0 %v10354_v25, %s8845_s8 }
 0x34d   : > { %v2855_v26 = vpop.permute.xlu1 %2854 }
 0x34e   : > { %v2853_v36 = vpop.permute.xlu0 %2852  ;;  %v2955_v40 = vrot.slane %v2855_v26, 1 }
 0x34f   : > { %3230 = vrot.lane.b32.xlu1 %v10996_v30, %s8846_s23  ;;  %v2954_v32 = vrot.slane %v2853_v36, 1 }
 0x350   : > { %3344 = vrot.lane.b32.xlu0 %v10364_v39, %s8845_s8  ;;  %v2443_v39 = vrot.slane %v2344_v7, 1 }
 0x351   : > { %v2350_v46 = vpop.permute.xlu1 %2349  ;;  %v2963_v25 = vsel %vm2447_vm3, %v2954_v32, %v2955_v40  ;;  %v14872_v32 = vld [vmem:[#allocation139_spill] sm:$0xff] }
 0x352   : > { %v3020_v34 = vadd.f32 %v2963_v25, %v2748_v37  ;;  %v2348_v45 = vpop.permute.xlu0 %2347  ;;  %v14873_v37 = vld [vmem:[#allocation137_spill] sm:$0xff] }
 0x353   : > { %3346 = vrot.lane.b32.xlu1 %v10356_v35, %s8845_s8  ;;  %v2450_v35 = vsel %vm2447_vm3, %v2442_v19, %v2443_v39  ;;  %v2445_v26 = vrot.slane %v2348_v45, 1  ;;  %v2446_v19 = vrot.slane %v2350_v46, 1  ;;  %v2237_v46 = vadd.f32 %v11256_v56, %v14873_v37  ;;  %v14881_v37 = vld [vmem:[#allocation32_spill] sm:$0xff] }
 0x354   : > { %v11287_v14 = vadd.f32 %v3020_v34, %v2508_v58  ;;  %3348 = vrot.lane.b32.xlu0 %v10383_v8, %s8845_s8  ;;  %v2236_v8 = vadd.f32 %v11220_v52, %v14870_v5  ;;  %v14875_v34 = vld [vmem:[#allocation153_spill] sm:$0xff] }
 0x355   : > { %v2174_v9 = vpop.permute.xlu1 %2173 }
 0x356   : > { %v2685_v47 = vpop.permute.xlu0 %2684  ;;  %v2238_v53 = vadd.f32 %v2174_v9, %v14872_v32 }
 0x357   : > { %3350 = vrot.lane.b32.xlu1 %v10368_v20, %s8845_s8  ;;  %v2750_v25 = vadd.f32 %v2685_v47, %v14874_v16 }
 0x358   : > { %3352 = vrot.lane.b32.xlu0 %v10396_v42, %s8845_s8  ;;  %v2509_v42 = vadd.f32 %v2450_v35, %v2236_v8  ;;  %v14876_v8 = vld [vmem:[#allocation141_spill] sm:$0xff] }
 0x359   : > { %v2859_v3 = vpop.permute.xlu1 %2858 }
 0x35a   : > { %v2857_v12 = vpop.permute.xlu0 %2856 }
 0x35b   : > { %3354 = vrot.lane.b32.xlu1 %v10390_v49, %s8845_s8  ;;  %v2956_v10 = vrot.slane %v2857_v12, 1 }
 0x35c   : > { %3356 = vrot.lane.b32.xlu0 %v10410_v27, %s8845_s8 }
 0x35d   : > { %v11302_v33 = vpop.permute.xlu1 %3170  ;;  %v2962_v20 = vsel %vm2447_vm3, %v2955_v40, %v2956_v10  ;;  %v2449_v40 = vsel %vm2447_vm3, %v2444_v60, %v2445_v26 }
 0x35e   : > { %v3021_v7 = vadd.f32 %v2962_v20, %v2749_v21  ;;  %v3169_v49 = vpop.permute.xlu0 %3168  ;;  %v2510_v39 = vadd.f32 %v2449_v40, %v2237_v46  ;;  %v14877_v20 = vld [vmem:[#allocation73_spill] sm:$0xff]  ;;  %v3265_v46 = vadd.f32 %v11302_v33, %v14881_v37  ;;  %v14883_v33 = vld [vmem:[#allocation150_spill] sm:$0xff] }
 0x35f   : > { %3358 = vrot.lane.b32.xlu1 %v10398_v11, %s8845_s8  ;;  %v2957_v11 = vrot.slane %v2859_v3, 1 }
 0x360   : > { %v11310_v36 = vadd.f32 %v3021_v7, %v2509_v42  ;;  %3360 = vrot.lane.b32.xlu0 %v10425_v0, %s8845_s8  ;;  %v2448_v0 = vsel %vm2447_vm3, %v2445_v26, %v2446_v19  ;;  %v3264_v42 = vadd.f32 %v3169_v49, %v14877_v20  ;;  %v14879_v49 = vld [vmem:[#allocation145_spill] sm:$0xff] }
 0x361   : > { %v2863_v52 = vpop.permute.xlu1 %2862  ;;  %v11319_v41 = vpop.f32.mrb[48].mxu1  ;;  %v2511_v12 = vadd.f32 %v2448_v0, %v2238_v53 }
 0x362   : > { %v2959_v17 = vrot.slane %v2863_v52, 1  ;;  %v2861_v27 = vpop.permute.xlu0 %2860  ;;  %v14878_v52 = vld [vmem:[#allocation123_spill] sm:$0xff] }
 0x363   : > { %3362 = vrot.lane.b32.xlu1 %v10418_v44, %s8845_s8  ;;  %v2958_v57 = vrot.slane %v2861_v27, 1 }
 0x364   : > { %3364 = vrot.lane.b32.xlu0 %v10433_v24, %s8845_s8 }
 0x365   : > { %v2687_v58 = vpop.permute.xlu1 %2686  ;;  %v2961_v44 = vsel %vm2447_vm3, %v2957_v11, %v2958_v57  ;;  %v2960_v9 = vsel %vm2447_vm3, %v2958_v57, %v2959_v17  ;;  %v14880_v11 = vld [vmem:[#allocation146_spill] sm:$0xff] }
 0x366   : > { %v2751_v45 = vadd.f32 %v2687_v58, %v14875_v34  ;;  %v3022_v3 = vadd.f32 %v2961_v44, %v2750_v25  ;;  %v3173_v56 = vpop.permute.xlu0 %3172  ;;  %v14882_v25 = vld [vmem:[#allocation135_spill] sm:$0xff] }
 0x367   : > { %3366 = vrot.lane.b32.xlu1 %v10427_v59, %s8845_s8 }
 0x368   : > { %v3023_v47 = vadd.f32 %v2960_v9, %v2751_v45  ;;  %v11335_v35 = vadd.f32 %v3022_v3, %v2510_v39  ;;  %3368 = vrot.lane.b32.xlu0 %v10439_v1, %s8845_s8  ;;  %v11352_v1 = vld [vmem:[#allocation10] ss:$0 sm:$0xff] }
 0x369   : > { %v3315_v10 = vpop.permute.xlu1 %3314 }
 0x36a   : > { %v11339_v24 = vadd.f32 %v3023_v47, %v2511_v12  ;;  %v3313_v5 = vpop.permute.xlu0 %3312  ;;  %v3457_v62 = vrot.slane %v3315_v10, 1  ;;  %v14884_v12 = vld [vmem:[#allocation67_spill] sm:$0xff] }
 0x36b   : > { %3370 = vrot.lane.b32.xlu1 %v14876_v8, %s8845_s8  ;;  %v3456_v21 = vrot.slane %v3313_v5, 1  ;;  %v14885_v5 = vld [vmem:[#allocation74_spill] sm:$0xff] }
 0x36c   : > { %3372 = vrot.lane.b32.xlu0 %v14777_v50, %s8845_s8  ;;  %v3266_v8 = vadd.f32 %v3173_v56, %v14885_v5  ;;  %v14887_v56 = vld [vmem:[#allocation138_spill] sm:$0xff] }
 0x36d   : > { %v3175_v7 = vpop.permute.xlu1 %3174  ;;  %v3535_v59 = vsel %vm2447_vm3, %v3456_v21, %v3457_v62 }
 0x36e   : > { %v3536_v26 = vadd.f32 %v3535_v59, %v3264_v42  ;;  %v11348_v19 = vpop.permute.xlu0 %3176 }
 0x36f   : > { %3374 = vrot.lane.b32.xlu1 %v14781_v55, %s8845_s8 }
 0x370   : > { %v3568_v60 = vadd.f32 %v3536_v26, %v14878_v52  ;;  %3376 = vrot.lane.b32.xlu0 %v14879_v49, %s8845_s8 }
 0x371   : > { %v11355_v17 = vpop.permute.xlu1 %3178 }
 0x372   : > { %v3648_v50 = vadd.f32 %v11352_v1, %v3568_v60  ;;  %v11360_v27 = vpop.permute.xlu0 %3180  ;;  %v14888_v60 = vld [vmem:[#allocation140_spill] sm:$0xff] }
 0x373   : > { %3378 = vrot.lane.b32.xlu1 %v14785_v13, %s8845_s8 }
 0x374   : > { %vm3680_vm5 = vcmp.ge.f32.partialorder %v3648_v50, 0.0  ;;  %v3712_v40 = vmul.f32 0.01, %v3648_v50  ;;  %3380 = vrot.lane.b32.xlu0 %v14787_v6, %s8845_s8 }
 0x375   : > { %v3319_v32 = vpop.permute.xlu1 %3318 }
 0x376   : > { %v3744_v55 = vsel %vm3680_vm5, %v3648_v50, %v3712_v40  ;;  %v3317_v53 = vpop.permute.xlu0 %3316  ;;  %v3459_v47 = vrot.slane %v3319_v32, 1  ;;  %v3814_v40 = vld [vmem:[#allocation3 + $0x28] sm:$0xff] }
 0x377   : > { %3382 = vrot.lane.b32.xlu1 %v14880_v11, %s8845_s8  ;;  %3776 = vst.msk [vmem:[#allocation3 + $0x18] sm:$0xff] %vm465_vm4, %v3744_v55  ;;  %v3458_v57 = vrot.slane %v3317_v53, 1 }
 0x378   : > { %3384 = vrot.lane.b32.xlu0 %v10480_v29, %s8845_s8 }
 0x379   : > { %v11371_v0 = vpop.permute.xlu1 %3182  ;;  %v3534_v13 = vsel %vm2447_vm3, %v3457_v62, %v3458_v57  ;;  %v14886_v62 = vld [vmem:[#allocation76_spill] sm:$0xff] }
 0x37a   : > { %v3537_v6 = vadd.f32 %v3534_v13, %v3265_v46  ;;  %v11377_v16 = vpop.permute.xlu0 %3184  ;;  %v3267_v21 = vadd.f32 %v3175_v7, %v14886_v62  ;;  %v7544_v46 = vld [vmem:[#allocation15] ss:$0 sm:$0xff] }
 0x37b   : > { %3386 = vrot.lane.b32.xlu1 %v14796_v54, %s8845_s8 }
 0x37c   : > { %v3569_v58 = vadd.f32 %v3537_v6, %v14882_v25  ;;  %3388 = vrot.lane.b32.xlu0 %v14883_v33, %s8845_s8  ;;  %v14890_v25 = vld [vmem:[#allocation26_spill] sm:$0xff] }
 0x37d   : > { %v11382_v44 = vpop.permute.xlu1 %3186 }
 0x37e   : > { %v3649_v34 = vadd.f32 %v11352_v1, %v3569_v58  ;;  %v11387_v45 = vpop.permute.xlu0 %3188  ;;  %v3812_v29 = vld [vmem:[#allocation3 + $0x18] sm:$0xff] }
 0x37f   : > { %3390 = vrot.lane.b32.xlu1 %v14801_v43, %s8845_s8  ;;  %8220 = vmatmul.mubr.msk.f32.gmra.mrb[50].mxu1 %vm465_vm4, %v3812_v29 }
 0x380   : > { %8290 = vmatprep.mubr.msk.f32.mxu0 %vm465_vm4, %v3812_v29  ;;  %vm3681_vm6 = vcmp.ge.f32.partialorder %v3649_v34, 0.0  ;;  %v3713_v54 = vmul.f32 0.01, %v3649_v34  ;;  %3392 = vrot.lane.b32.xlu0 %v14803_v31, %s8845_s8 }
 0x381   : > { %v3323_v9 = vpop.permute.xlu1 %3322 }
 0x382   : > { %v3745_v39 = vsel %vm3681_vm6, %v3649_v34, %v3713_v54  ;;  %v3321_v3 = vpop.permute.xlu0 %3320  ;;  %v3461_v43 = vrot.slane %v3323_v9, 1  ;;  %v14891_v34 = vld [vmem:[#allocation34_spill] sm:$0xff] }
 0x383   : > { %3394 = vrot.lane.b32.xlu1 %v14884_v12, %s8845_s8  ;;  %3777 = vst.msk [vmem:[#allocation3 + $0x20] sm:$0xff] %vm465_vm4, %v3745_v39  ;;  %v3460_v10 = vrot.slane %v3321_v3, 1  ;;  %v3268_v29 = vadd.f32 %v11348_v19, %v14891_v34  ;;  %v4806_v3 = vld [vmem:[#allocation12 + $0x10] sm:$0xff] }
 0x384   : > { %3396 = vrot.lane.b32.xlu0 %v14807_v61, %s8845_s8  ;;  %v14889_v61 = vld [vmem:[#allocation155_spill] sm:$0xff]  ;;  %v14892_v12 = vld [vmem:[#allocation148_spill] sm:$0xff]  ;;  %8362 = vmatprep.subr.mxu1 %v4806_v3 }
 0x385   : > { %v11400_v20 = vpop.permute.xlu1 %3190  ;;  %v3532_v31 = vsel %vm2447_vm3, %v3460_v10, %v3461_v43  ;;  %v3533_v42 = vsel %vm2447_vm3, %v3459_v47, %v3460_v10  ;;  %8363 = vmatpush3.msra.mxu1 %v4806_v3 }
 0x386   : > { %v3538_v59 = vadd.f32 %v3533_v42, %v3266_v8  ;;  %v3539_v26 = vadd.f32 %v3532_v31, %v3267_v21  ;;  %v11408_v52 = vpop.permute.xlu0 %3192  ;;  %v11462_v31 = vld [vmem:[#allocation3 + $0x40] sm:$0xff] }
 0x387   : > { %3398 = vrot.lane.b32.xlu1 %v14815_v18, %s8845_s8 }
 0x388   : > { %v3570_v7 = vadd.f32 %v3538_v59, %v14887_v56  ;;  %v3571_v49 = vadd.f32 %v3539_v26, %v14888_v60  ;;  %3400 = vrot.lane.b32.xlu0 %v14889_v61, %s8845_s8  ;;  %v14893_v56 = vld [vmem:[#allocation40_spill] sm:$0xff] }
 0x389   : > { %v11414_v50 = vpop.permute.xlu1 %3194 }
 0x38a   : > { %v3650_v32 = vadd.f32 %v11352_v1, %v3570_v7  ;;  %v3651_v55 = vadd.f32 %v11352_v1, %v3571_v49  ;;  %v11420_v53 = vpop.permute.xlu0 %3196  ;;  %v3813_v18 = vld [vmem:[#allocation3 + $0x20] sm:$0xff]  ;;  %v3269_v7 = vadd.f32 %v11355_v17, %v14893_v56  ;;  %v11508_v56 = vld [vmem:[#allocation3 + $0x58] sm:$0xff] }
 0x38b   : > { %3402 = vrot.lane.b32.xlu1 %v10520_v51, %s8845_s8  ;;  %8222 = vmatprep.mubr.msk.f32.mxu1 %vm465_vm4, %v3813_v18 }
 0x38c   : > { %8291 = vmatmul.mubr.msk.f32.vlgmr.msra.gmra.mrb[96].mxu0 %vm465_vm4, %v3813_v18  ;;  %vm3682_vm7 = vcmp.ge.f32.partialorder %v3650_v32, 0.0  ;;  %vm3683_vm8 = vcmp.ge.f32.partialorder %v3651_v55, 0.0  ;;  %v3714_v11 = vmul.f32 0.01, %v3650_v32  ;;  %v3715_v57 = vmul.f32 0.01, %v3651_v55  ;;  %8223 = vmatmul.mubr.msk.f32.gmra.mrb[52].mxu1 %vm465_vm4, %v3814_v40 }
 0x38d   : > { %v3327_v37 = vpop.permute.xlu1 %3326  ;;  %3404 = vrot.lane.b32.xlu0 %v10996_v30, %s8845_s8  ;;  %8293 = vmatprep.mubr.msk.f32.mxu0 %vm465_vm4, %v3814_v40 }
 0x38e   : > { %v3746_v13 = vsel %vm3682_vm7, %v3650_v32, %v3714_v11  ;;  %v3747_v51 = vsel %vm3683_vm8, %v3651_v55, %v3715_v57  ;;  %v3325_v6 = vpop.permute.xlu0 %3324  ;;  %v3463_v58 = vrot.slane %v3327_v37, 1  ;;  %v14894_v32 = vld [vmem:[#allocation156_spill] sm:$0xff] }
 0x38f   : > { %3406 = vrot.lane.b32.xlu1 %v14890_v25, %s8845_s8  ;;  %3778 = vst.msk [vmem:[#allocation3 + $0x30] sm:$0xff] %vm465_vm4, %v3746_v13  ;;  %3779 = vst.msk [vmem:[#allocation3 + $0x38] sm:$0xff] %vm465_vm4, %v3747_v51  ;;  %v3462_v33 = vrot.slane %v3325_v6, 1 }
 0x391   : > { %v11436_v54 = vpop.permute.xlu1 %3198  ;;  %3606 = vrot.lane.b32.xlu0 %v7544_v46, %s8847_s18  ;;  %v3531_v30 = vsel %vm2447_vm3, %v3462_v33, %v3463_v58  ;;  %v14895_v33 = vld [vmem:[#allocation77_spill] sm:$0xff] }
 0x392   : > { %v3540_v9 = vadd.f32 %v3531_v30, %v3268_v29  ;;  %v11440_v39 = vpop.permute.xlu0 %3200  ;;  %v3270_v34 = vadd.f32 %v11360_v27, %v14895_v33  ;;  %v14896_v29 = vld [vmem:[#allocation80_spill] sm:$0xff] }
 0x393   : > { %v3271_v30 = vadd.f32 %v11371_v0, %v14896_v29 }
 0x394   : > { %v3572_v47 = vadd.f32 %v3540_v9, %v14892_v12 }
 0x395   : > { %v11443_v43 = vpop.permute.xlu1 %3202  ;;  %5419 = vrot.lane.b32.xlu0 %v11319_v41, %s8846_s23 }
 0x396   : > { %v3652_v19 = vadd.f32 %v11352_v1, %v3572_v47  ;;  %v11448_v10 = vpop.permute.xlu0 %3204  ;;  %v11450_v5 = vld [vmem:[#allocation3 + $0x30] sm:$0xff]  ;;  %v11452_v8 = vld [vmem:[#allocation3 + $0x38] sm:$0xff] }
 0x397   : > { %8225 = vmatprep.mubr.msk.f32.mxu1 %vm465_vm4, %v11450_v5  ;;  %8294 = vmatmul.mubr.msk.f32.gmra.mrb[98].mxu0 %vm465_vm4, %v11450_v5 }
 0x398   : > { %vm3684_vm9 = vcmp.ge.f32.partialorder %v3652_v19, 0.0  ;;  %v3716_v62 = vmul.f32 0.01, %v3652_v19  ;;  %8226 = vmatmul.mubr.msk.f32.gmra.mrb[54].mxu1 %vm465_vm4, %v11452_v8  ;;  %8296 = vmatprep.mubr.msk.f32.mxu0 %vm465_vm4, %v11452_v8 }
 0x399   : > { %v3331_v21 = vpop.permute.xlu1 %3330  ;;  %8228 = vmatprep.mubr.msk.f32.mxu1 %vm465_vm4, %v11462_v31  ;;  %5563 = vrot.lane.b32.xlu0 %v11319_v41, %s8845_s8 }
 0x39a   : > { %v3748_v42 = vsel %vm3684_vm9, %v3652_v19, %v3716_v62  ;;  %v3329_v59 = vpop.permute.xlu0 %3328  ;;  %v3465_v6 = vrot.slane %v3331_v21, 1  ;;  %v14897_v21 = vld [vmem:[#allocation30_spill] sm:$0xff] }
 0x39b   : > { %3780 = vst.msk [vmem:[#allocation3 + $0x48] sm:$0xff] %vm465_vm4, %v3748_v42  ;;  %v3464_v26 = vrot.slane %v3329_v59, 1  ;;  %8297 = vmatmul.mubr.msk.f32.gmra.mrb[100].mxu0 %vm465_vm4, %v11462_v31  ;;  %v14898_v59 = vld [vmem:[#allocation35_spill] sm:$0xff] }
 0x39d   : > { %v11473_v60 = vpop.permute.xlu1 %3206  ;;  %v3530_v49 = vsel %vm2447_vm3, %v3463_v58, %v3464_v26 }
 0x39e   : > { %v3541_v61 = vadd.f32 %v3530_v49, %v3269_v7  ;;  %v11477_v40 = vpop.permute.xlu0 %3208 }
 0x3a0   : > { %v3573_v55 = vadd.f32 %v3541_v61, %v14894_v32 }
 0x3a1   : > { %v11480_v18 = vpop.permute.xlu1 %3210 }
 0x3a2   : > { %v3653_v11 = vadd.f32 %v11352_v1, %v3573_v55  ;;  %v11483_v57 = vpop.permute.xlu0 %3212  ;;  %v11485_v37 = vld [vmem:[#allocation3 + $0x48] sm:$0xff] }
 0x3a3   : > { %8229 = vmatmul.mubr.msk.f32.gmra.mrb[56].mxu1 %vm465_vm4, %v11485_v37  ;;  %8299 = vmatprep.mubr.msk.f32.mxu0 %vm465_vm4, %v11485_v37 }
 0x3a4   : > { %vm3685_vm10 = vcmp.ge.f32.partialorder %v3653_v11, 0.0  ;;  %v3717_v17 = vmul.f32 0.01, %v3653_v11 }
 0x3a5   : > { %v3335_v46 = vpop.permute.xlu1 %3334 }
 0x3a6   : > { %v3749_v13 = vsel %vm3685_vm10, %v3653_v11, %v3717_v17  ;;  %v3333_v51 = vpop.permute.xlu0 %3332  ;;  %v3467_v25 = vrot.slane %v3335_v46, 1 }
 0x3a7   : > { %3781 = vst.msk [vmem:[#allocation3 + $0x50] sm:$0xff] %vm465_vm4, %v3749_v13  ;;  %v3466_v58 = vrot.slane %v3333_v51, 1 }
 0x3a9   : > { %v11496_v9 = vpop.permute.xlu1 %3214  ;;  %v3528_v3 = vsel %vm2447_vm3, %v3466_v58, %v3467_v25  ;;  %v3529_v12 = vsel %vm2447_vm3, %v3465_v6, %v3466_v58  ;;  %v14899_v25 = vld [vmem:[#allocation82_spill] sm:$0xff] }
 0x3aa   : > { %v3542_v47 = vadd.f32 %v3529_v12, %v3270_v34  ;;  %v3543_v19 = vadd.f32 %v3528_v3, %v3271_v30  ;;  %v11502_v62 = vpop.permute.xlu0 %3216  ;;  %v3272_v58 = vadd.f32 %v11377_v16, %v14899_v25  ;;  %v14900_v3 = vld [vmem:[#allocation38_spill] sm:$0xff] }
 0x3ac   : > { %v3574_v42 = vadd.f32 %v3542_v47, %v14897_v21  ;;  %v3575_v26 = vadd.f32 %v3543_v19, %v14898_v59 }
 0x3ad   : > { %v11506_v27 = vpop.permute.xlu1 %3218 }
 0x3ae   : > { %v3654_v0 = vadd.f32 %v11352_v1, %v3574_v42  ;;  %v3655_v7 = vadd.f32 %v11352_v1, %v3575_v26  ;;  %v11512_v49 = vpop.permute.xlu0 %3220  ;;  %v11514_v61 = vld [vmem:[#allocation3 + $0x50] sm:$0xff] }
 0x3af   : > { %8231 = vmatprep.mubr.msk.f32.mxu1 %vm465_vm4, %v11514_v61  ;;  %8300 = vmatmul.mubr.msk.f32.gmra.mrb[102].mxu0 %vm465_vm4, %v11514_v61 }
 0x3b0   : > { %vm3686_vm11 = vcmp.ge.f32.partialorder %v3654_v0, 0.0  ;;  %vm3687_vm12 = vcmp.ge.f32.partialorder %v3655_v7, 0.0  ;;  %v3718_v32 = vmul.f32 0.01, %v3654_v0  ;;  %v3719_v55 = vmul.f32 0.01, %v3655_v7  ;;  %8232 = vmatmul.mubr.msk.f32.gmra.mrb[58].mxu1 %vm465_vm4, %v11508_v56  ;;  %8302 = vmatprep.mubr.msk.f32.mxu0 %vm465_vm4, %v11508_v56 }
 0x3b1   : > { %v3339_v11 = vpop.permute.xlu1 %3338 }
 0x3b2   : > { %v3750_v17 = vsel %vm3686_vm11, %v3654_v0, %v3718_v32  ;;  %v3751_v46 = vsel %vm3687_vm12, %v3655_v7, %v3719_v55  ;;  %v3337_v13 = vpop.permute.xlu0 %3336  ;;  %v3469_v51 = vrot.slane %v3339_v11, 1  ;;  %v11552_v0 = vld [vmem:[#allocation3 + $0x70] sm:$0xff] }
 0x3b3   : > { %3782 = vst.msk [vmem:[#allocation3 + $0x60] sm:$0xff] %vm465_vm4, %v3750_v17  ;;  %3783 = vst.msk [vmem:[#allocation3 + $0x68] sm:$0xff] %vm465_vm4, %v3751_v46  ;;  %v3468_v6 = vrot.slane %v3337_v13, 1  ;;  %v14902_v11 = vld [vmem:[#allocation45_spill] sm:$0xff] }
 0x3b4   : > { %14901 = vst [vmem:[#allocation65_spill] sm:$0xff] %v11552_v0  ;;  %v3273_v17 = vadd.f32 %v11382_v44, %v14902_v11  ;;  %v14905_v44 = vld [vmem:[#allocation87_spill] sm:$0xff] }
 0x3b5   : > { %v11528_v33 = vpop.permute.xlu1 %3222  ;;  %v3527_v34 = vsel %vm2447_vm3, %v3468_v6, %v3469_v51  ;;  %v3275_v11 = vadd.f32 %v11400_v20, %v14905_v44 }
 0x3b6   : > { %v3544_v29 = vadd.f32 %v3527_v34, %v3272_v58  ;;  %v11532_v30 = vpop.permute.xlu0 %3224 }
 0x3b8   : > { %v3576_v12 = vadd.f32 %v3544_v29, %v14900_v3  ;;  %v14903_v29 = vld [vmem:[#allocation86_spill] sm:$0xff] }
 0x3b9   : > { %v11535_v47 = vpop.permute.xlu1 %3226  ;;  %v3274_v3 = vadd.f32 %v11387_v45, %v14903_v29 }
 0x3ba   : > { %v3656_v19 = vadd.f32 %v11352_v1, %v3576_v12  ;;  %v11538_v21 = vpop.permute.xlu0 %3228  ;;  %v11540_v42 = vld [vmem:[#allocation3 + $0x60] sm:$0xff]  ;;  %v11542_v59 = vld [vmem:[#allocation3 + $0x68] sm:$0xff] }
 0x3bb   : > { %8234 = vmatprep.mubr.msk.f32.mxu1 %vm465_vm4, %v11540_v42  ;;  %8303 = vmatmul.mubr.msk.f32.gmra.mrb[104].mxu0 %vm465_vm4, %v11540_v42  ;;  %v14904_v12 = vld [vmem:[#allocation44_spill] sm:$0xff] }
 0x3bc   : > { %vm3688_vm13 = vcmp.ge.f32.partialorder %v3656_v19, 0.0  ;;  %v3720_v16 = vmul.f32 0.01, %v3656_v19  ;;  %8235 = vmatmul.mubr.msk.f32.gmra.mrb[60].mxu1 %vm465_vm4, %v11542_v59  ;;  %8305 = vmatprep.mubr.msk.f32.mxu0 %vm465_vm4, %v11542_v59 }
 0x3bd   : > { %v3343_v26 = vpop.permute.xlu1 %3342  ;;  %8237 = vmatprep.mubr.msk.f32.mxu1 %vm465_vm4, %v11552_v0 }
 0x3be   : > { %v3752_v7 = vsel %vm3688_vm13, %v3656_v19, %v3720_v16  ;;  %v3341_v32 = vpop.permute.xlu0 %3340  ;;  %v3471_v58 = vrot.slane %v3343_v26, 1 }
 0x3bf   : > { %3784 = vst.msk [vmem:[#allocation3 + $0x78] sm:$0xff] %vm465_vm4, %v3752_v7  ;;  %v3470_v55 = vrot.slane %v3341_v32, 1  ;;  %8306 = vmatmul.mubr.msk.f32.gmra.mrb[106].mxu0 %vm465_vm4, %v11552_v0 }
 0x3c1   : > { %v11561_v46 = vpop.permute.xlu1 %3230  ;;  %v3526_v13 = vsel %vm2447_vm3, %v3469_v51, %v3470_v55 }
 0x3c2   : > { %v3545_v6 = vadd.f32 %v3526_v13, %v3273_v17  ;;  %v3345_v25 = vpop.permute.xlu0 %3344  ;;  %v14906_v13 = vld [vmem:[#allocation42_spill] sm:$0xff] }
 0x3c3   : > { %v3472_v34 = vrot.slane %v3345_v25, 1 }
 0x3c4   : > { %v3577_v19 = vadd.f32 %v3545_v6, %v14904_v12  ;;  %v14907_v12 = vld [vmem:[#allocation37_spill] sm:$0xff] }
 0x3c5   : > { %v3347_v16 = vpop.permute.xlu1 %3346  ;;  %v3525_v7 = vsel %vm2447_vm3, %v3471_v58, %v3472_v34 }
 0x3c6   : > { %v3473_v32 = vrot.slane %v3347_v16, 1  ;;  %v3657_v0 = vadd.f32 %v11352_v1, %v3577_v19  ;;  %v3546_v51 = vadd.f32 %v3525_v7, %v3274_v3  ;;  %v3349_v55 = vpop.permute.xlu0 %3348  ;;  %v11573_v17 = vld [vmem:[#allocation3 + $0x78] sm:$0xff]  ;;  %v11582_v3 = vpop.f32.mrb[49].mxu1  ;;  %v3276_v19 = vadd.f32 %v11408_v52, %v14907_v12  ;;  %v14908_v7 = vld [vmem:[#allocation47_spill] sm:$0xff] }
 0x3c7   : > { %8238 = vmatmul.mubr.msk.f32.gmra.mrb[62].mxu1 %vm465_vm4, %v11573_v17  ;;  %8308 = vmatprep.mubr.msk.f32.mxu0 %vm465_vm4, %v11573_v17  ;;  %v3474_v58 = vrot.slane %v3349_v55, 1  ;;  %v14910_v12 = vld [vmem:[#allocation50_spill] sm:$0xff] }
 0x3c8   : > { %v3524_v26 = vsel %vm2447_vm3, %v3472_v34, %v3473_v32  ;;  %vm3689_vm14 = vcmp.ge.f32.partialorder %v3657_v0, 0.0  ;;  %v3721_v45 = vmul.f32 0.01, %v3657_v0  ;;  %v3578_v6 = vadd.f32 %v3546_v51, %v14906_v13  ;;  %5417 = vrot.lane.b32.xlu1 %v11582_v3, %s8846_s23 }
 0x3c9   : > { %v3547_v20 = vadd.f32 %v3524_v26, %v3275_v11  ;;  %v3351_v25 = vpop.permute.xlu1 %3350 }
 0x3ca   : > { %v3475_v29 = vrot.slane %v3351_v25, 1  ;;  %v3753_v34 = vsel %vm3689_vm14, %v3657_v0, %v3721_v45  ;;  %v3658_v16 = vadd.f32 %v11352_v1, %v3578_v6  ;;  %v3353_v44 = vpop.permute.xlu0 %3352  ;;  %v14909_v45 = vld [vmem:[#allocation157_spill] sm:$0xff] }
 0x3cb   : > { %v3579_v32 = vadd.f32 %v3547_v20, %v14908_v7  ;;  %3785 = vst.msk [vmem:[#allocation3 + $0x80] sm:$0xff] %vm465_vm4, %v3753_v34  ;;  %v3476_v51 = vrot.slane %v3353_v44, 1  ;;  %v3277_v13 = vadd.f32 %v11414_v50, %v14909_v45  ;;  %v14911_v44 = vld [vmem:[#allocation90_spill] sm:$0xff] }
 0x3cc   : > { %v3523_v11 = vsel %vm2447_vm3, %v3474_v58, %v3475_v29  ;;  %vm3690_vm15 = vcmp.ge.f32.partialorder %v3658_v16, 0.0  ;;  %v3722_v55 = vmul.f32 0.01, %v3658_v16  ;;  %5561 = vrot.lane.b32.xlu1 %v11582_v3, %s8845_s8  ;;  %v3278_v50 = vadd.f32 %v11420_v53, %v14911_v44 }
 0x3cd   : > { %v3659_v26 = vadd.f32 %v11352_v1, %v3579_v32  ;;  %v3548_v52 = vadd.f32 %v3523_v11, %v3276_v19  ;;  %v3355_v0 = vpop.permute.xlu1 %3354  ;;  %v3522_v6 = vsel %vm2447_vm3, %v3475_v29, %v3476_v51  ;;  %v5306_v51 = vrot.slane %v11319_v41, 7 }
 0x3ce   : > { %v3754_v20 = vsel %vm3690_vm15, %v3658_v16, %v3722_v55  ;;  %v3357_v7 = vpop.permute.xlu0 %3356  ;;  %v3549_v58 = vadd.f32 %v3522_v6, %v3277_v13  ;;  %v3477_v19 = vrot.slane %v3355_v0, 1  ;;  %v14912_v55 = vld [vmem:[#allocation27_spill] sm:$0xff]  ;;  %v14453_v0 = vrot.slane %v11582_v3, 7  ;;  %v14913_v6 = vld [vmem:[#allocation158_spill] sm:$0xff] }
 0x3cf   : > { %vm3691_vm0 = vcmp.ge.f32.partialorder %v3659_v26, 0.0  ;;  %v3723_v25 = vmul.f32 0.01, %v3659_v26  ;;  %v3580_v34 = vadd.f32 %v3548_v52, %v14910_v12  ;;  %3786 = vst.msk [vmem:[#allocation3 + $0x90] sm:$0xff] %vm465_vm4, %v3754_v20  ;;  %v3478_v32 = vrot.slane %v3357_v7, 1  ;;  %v11610_v13 = vld [vmem:[#allocation3 + $0x88] sm:$0xff] }
 0x3d0   : > { %v3581_v52 = vadd.f32 %v3549_v58, %v14912_v55  ;;  %v3279_v53 = vadd.f32 %v11436_v54, %v14913_v6  ;;  %v14915_v55 = vld [vmem:[#allocation46_spill] sm:$0xff] }
 0x3d1   : > { %v3755_v11 = vsel %vm3691_vm0, %v3659_v26, %v3723_v25  ;;  %v3660_v29 = vadd.f32 %v11352_v1, %v3580_v34  ;;  %v3359_v16 = vpop.permute.xlu1 %3358  ;;  %v3521_v45 = vsel %vm2447_vm3, %v3477_v19, %v3478_v32  ;;  %v14914_v19 = vld [vmem:[#allocation100_spill] sm:$0xff] }
 0x3d2   : > { %3787 = vst.msk [vmem:[#allocation3 + $0x98] sm:$0xff] %vm465_vm4, %v3755_v11  ;;  %v3479_v20 = vrot.slane %v3359_v16, 1  ;;  %v3550_v25 = vadd.f32 %v3521_v45, %v3278_v50  ;;  %v3361_v12 = vpop.permute.xlu0 %3360  ;;  %v11615_v41 = vld [vmem:[#allocation3 + $0x80] sm:$0xff]  ;;  %v3661_v34 = vadd.f32 %v11352_v1, %v3581_v52  ;;  %v3280_v52 = vadd.f32 %v11440_v39, %v14915_v55 }
 0x3d3   : > { %vm3692_vm1 = vcmp.ge.f32.partialorder %v3660_v29, 0.0  ;;  %v3724_v26 = vmul.f32 0.01, %v3660_v29  ;;  %8240 = vmatprep.mubr.msk.f32.mxu1 %vm465_vm4, %v11615_v41  ;;  %8309 = vmatmul.mubr.msk.f32.gmra.mrb[108].mxu0 %vm465_vm4, %v11615_v41  ;;  %v3480_v11 = vrot.slane %v3361_v12, 1 }
 0x3d4   : > { %v3520_v7 = vsel %vm2447_vm3, %v3478_v32, %v3479_v20  ;;  %v3582_v54 = vadd.f32 %v3550_v25, %v14914_v19  ;;  %8241 = vmatmul.mubr.msk.f32.gmra.mrb[64].mxu1 %vm465_vm4, %v11610_v13  ;;  %8311 = vmatprep.mubr.msk.f32.mxu0 %vm465_vm4, %v11610_v13  ;;  %vm3693_vm5 = vcmp.ge.f32.partialorder %v3661_v34, 0.0  ;;  %v3725_v32 = vmul.f32 0.01, %v3661_v34  ;;  %v14916_v20 = vld [vmem:[#allocation101_spill] sm:$0xff] }
 0x3d5   : > { %v3756_v58 = vsel %vm3692_vm1, %v3660_v29, %v3724_v26  ;;  %v3551_v44 = vadd.f32 %v3520_v7, %v3279_v53  ;;  %v3363_v50 = vpop.permute.xlu1 %3362  ;;  %v11634_v29 = vsel %vm2046_vm2, %v14453_v0, %v5306_v51  ;;  %v11648_v51 = vld [vmem:[#allocation3 + $0xa0] sm:$0xff] }
 0x3d6   : > { %3788 = vst.msk [vmem:[#allocation3 + $0xa8] sm:$0xff] %vm465_vm4, %v3756_v58  ;;  %v3481_v16 = vrot.slane %v3363_v50, 1  ;;  %v3662_v45 = vadd.f32 %v11352_v1, %v3582_v54  ;;  %v3365_v53 = vpop.permute.xlu0 %3364  ;;  %v11640_v26 = vld [vmem:[#allocation3 + $0x90] sm:$0xff]  ;;  %v3757_v25 = vsel %vm3693_vm5, %v3661_v34, %v3725_v32 }
 0x3d7   : > { %v3583_v6 = vadd.f32 %v3551_v44, %v14916_v20  ;;  %v3482_v7 = vrot.slane %v3365_v53, 1  ;;  %8243 = vmatprep.mubr.msk.f32.mxu1 %vm465_vm4, %v11640_v26  ;;  %8312 = vmatmul.mubr.msk.f32.gmra.mrb[110].mxu0 %vm465_vm4, %v11640_v26  ;;  %3789 = vst.msk [vmem:[#allocation3 + $0xb0] sm:$0xff] %vm465_vm4, %v3757_v25  ;;  %v14917_v44 = vld [vmem:[#allocation52_spill] sm:$0xff]  ;;  %v14918_v20 = vld [vmem:[#allocation154_spill] sm:$0xff]  ;;  %v14919_v25 = vld [vmem:[#allocation159_spill] sm:$0xff] }
 0x3d8   : > { %v3519_v12 = vsel %vm2447_vm3, %v3480_v11, %v3481_v16  ;;  %vm3694_vm6 = vcmp.ge.f32.partialorder %v3662_v45, 0.0  ;;  %v3726_v39 = vmul.f32 0.01, %v3662_v45  ;;  %v3281_v11 = vadd.f32 %v11443_v43, %v14917_v44  ;;  %v14920_v44 = vld [vmem:[#allocation58_spill] sm:$0xff] }
 0x3d9   : > { %v3663_v58 = vadd.f32 %v11352_v1, %v3583_v6  ;;  %v3552_v19 = vadd.f32 %v3519_v12, %v3280_v52  ;;  %v3367_v34 = vpop.permute.xlu1 %3366  ;;  %v11652_v54 = vld [vmem:[#allocation3 + $0x98] sm:$0xff]  ;;  %v3518_v50 = vsel %vm2447_vm3, %v3481_v16, %v3482_v7  ;;  %v3282_v12 = vadd.f32 %v11448_v10, %v14919_v25  ;;  %v14921_v10 = vld [vmem:[#allocation160_spill] sm:$0xff] }
 0x3da   : > { %8244 = vmatmul.mubr.msk.f32.gmra.mrb[66].mxu1 %vm465_vm4, %v11652_v54  ;;  %8314 = vmatprep.mubr.msk.f32.mxu0 %vm465_vm4, %v11652_v54  ;;  %v3758_v32 = vsel %vm3694_vm6, %v3662_v45, %v3726_v39  ;;  %v3369_v6 = vpop.permute.xlu0 %3368  ;;  %v3553_v43 = vadd.f32 %v3518_v50, %v3281_v11  ;;  %v3483_v53 = vrot.slane %v3367_v34, 1 }
 0x3db   : > { %vm3695_vm7 = vcmp.ge.f32.partialorder %v3663_v58, 0.0  ;;  %v3727_v55 = vmul.f32 0.01, %v3663_v58  ;;  %v3584_v52 = vadd.f32 %v3552_v19, %v14918_v20  ;;  %8246 = vmatprep.mubr.msk.f32.mxu1 %vm465_vm4, %v11648_v51  ;;  %3790 = vst.msk [vmem:[#allocation3 + $0xc0] sm:$0xff] %vm465_vm4, %v3758_v32  ;;  %v3484_v16 = vrot.slane %v3369_v6, 1  ;;  %8315 = vmatmul.mubr.msk.f32.gmra.mrb[112].mxu0 %vm465_vm4, %v11648_v51 }
 0x3dc   : > { %v3585_v20 = vadd.f32 %v3553_v43, %v14920_v44 }
 0x3dd   : > { %v3759_v45 = vsel %vm3695_vm7, %v3663_v58, %v3727_v55  ;;  %v3664_v7 = vadd.f32 %v11352_v1, %v3584_v52  ;;  %v3371_v39 = vpop.permute.xlu1 %3370  ;;  %v11671_v19 = vld [vmem:[#allocation3 + $0xa8] sm:$0xff]  ;;  %v3517_v34 = vsel %vm2447_vm3, %v3483_v53, %v3484_v16  ;;  %v3283_v58 = vadd.f32 %v11473_v60, %v14921_v10  ;;  %v11683_v52 = vld [vmem:[#allocation3 + $0xb8] sm:$0xff] }
 0x3de   : > { %3791 = vst.msk [vmem:[#allocation3 + $0xc8] sm:$0xff] %vm465_vm4, %v3759_v45  ;;  %v3485_v11 = vrot.slane %v3371_v39, 1  ;;  %8247 = vmatmul.mubr.msk.f32.gmra.mrb[68].mxu1 %vm465_vm4, %v11671_v19  ;;  %8317 = vmatprep.mubr.msk.f32.mxu0 %vm465_vm4, %v11671_v19  ;;  %v3554_v32 = vadd.f32 %v3517_v34, %v3282_v12  ;;  %v3373_v55 = vpop.permute.xlu0 %3372  ;;  %v3665_v6 = vadd.f32 %v11352_v1, %v3585_v20  ;;  %v11688_v53 = vld [vmem:[#allocation3 + $0xb0] sm:$0xff] }
 0x3df   : > { %vm3696_vm8 = vcmp.ge.f32.partialorder %v3664_v7, 0.0  ;;  %v3728_v50 = vmul.f32 0.01, %v3664_v7  ;;  %8249 = vmatprep.mubr.msk.f32.mxu1 %vm465_vm4, %v11688_v53  ;;  %8318 = vmatmul.mubr.msk.f32.gmra.mrb[114].mxu0 %vm465_vm4, %v11688_v53  ;;  %v3486_v44 = vrot.slane %v3373_v55, 1  ;;  %v11710_v55 = vld [vmem:[#allocation3 + $0xd0] sm:$0xff] }
 0x3e0   : > { %v3516_v43 = vsel %vm2447_vm3, %v3484_v16, %v3485_v11  ;;  %v3586_v45 = vadd.f32 %v3554_v32, %v11091_v22  ;;  %vm3697_vm9 = vcmp.ge.f32.partialorder %v3665_v6, 0.0  ;;  %v3729_v12 = vmul.f32 0.01, %v3665_v6  ;;  %8320 = vmatprep.mubr.msk.f32.mxu0 %vm465_vm4, %v11683_v52  ;;  %v14922_v22 = vld [vmem:[#allocation63_spill] sm:$0xff] }
 0x3e1   : > { %v3760_v25 = vsel %vm3696_vm8, %v3664_v7, %v3728_v50  ;;  %v3555_v39 = vadd.f32 %v3516_v43, %v3283_v58  ;;  %v3375_v60 = vpop.permute.xlu1 %3374  ;;  %v3284_v16 = vadd.f32 %v11477_v40, %v14922_v22  ;;  %v14924_v22 = vld [vmem:[#allocation54_spill] sm:$0xff] }
 0x3e2   : > { %3792 = vst.msk [vmem:[#allocation3 + $0xd8] sm:$0xff] %vm465_vm4, %v3760_v25  ;;  %v3487_v20 = vrot.slane %v3375_v60, 1  ;;  %8250 = vmatmul.mubr.msk.f32.gmra.mrb[70].mxu1 %vm465_vm4, %v11683_v52  ;;  %v3666_v7 = vadd.f32 %v11352_v1, %v3586_v45  ;;  %v3377_v11 = vpop.permute.xlu0 %3376  ;;  %v11704_v10 = vld [vmem:[#allocation3 + $0xc0] sm:$0xff]  ;;  %v3761_v58 = vsel %vm3697_vm9, %v3665_v6, %v3729_v12  ;;  %v14923_v45 = vld [vmem:[#allocation57_spill] sm:$0xff] }
 0x3e3   : > { %v3587_v34 = vadd.f32 %v3555_v39, %v11097_v48  ;;  %v3488_v32 = vrot.slane %v3377_v11, 1  ;;  %8252 = vmatprep.mubr.msk.f32.mxu1 %vm465_vm4, %v11704_v10  ;;  %3793 = vst.msk [vmem:[#allocation3 + $0xe0] sm:$0xff] %vm465_vm4, %v3761_v58  ;;  %8321 = vmatmul.mubr.msk.f32.gmra.mrb[116].mxu0 %vm465_vm4, %v11704_v10  ;;  %v3285_v39 = vadd.f32 %v11480_v18, %v14923_v45  ;;  %v14925_v58 = vld [vmem:[#allocation143_spill] sm:$0xff] }
 0x3e4   : > { %v3515_v50 = vsel %vm2447_vm3, %v3486_v44, %v3487_v20  ;;  %vm3698_vm10 = vcmp.ge.f32.partialorder %v3666_v7, 0.0  ;;  %v3730_v40 = vmul.f32 0.01, %v3666_v7 }
 0x3e5   : > { %v3667_v43 = vadd.f32 %v11352_v1, %v3587_v34  ;;  %v3556_v48 = vadd.f32 %v3515_v50, %v3284_v16  ;;  %v3379_v6 = vpop.permute.xlu1 %3378  ;;  %v11716_v25 = vld [vmem:[#allocation3 + $0xc8] sm:$0xff]  ;;  %v3514_v60 = vsel %vm2447_vm3, %v3487_v20, %v3488_v32  ;;  %v3286_v50 = vadd.f32 %v11483_v57, %v14925_v58 }
 0x3e6   : > { %8253 = vmatmul.mubr.msk.f32.gmra.mrb[72].mxu1 %vm465_vm4, %v11716_v25  ;;  %8323 = vmatprep.mubr.msk.f32.mxu0 %vm465_vm4, %v11716_v25  ;;  %v3762_v12 = vsel %vm3698_vm10, %v3666_v7, %v3730_v40  ;;  %v3381_v34 = vpop.permute.xlu0 %3380  ;;  %v3557_v18 = vadd.f32 %v3514_v60, %v3285_v39  ;;  %v3489_v11 = vrot.slane %v3379_v6, 1  ;;  %v14927_v57 = vld [vmem:[#allocation95_spill] sm:$0xff] }
 0x3e7   : > { %vm3699_vm11 = vcmp.ge.f32.partialorder %v3667_v43, 0.0  ;;  %v3731_v44 = vmul.f32 0.01, %v3667_v43  ;;  %v3588_v16 = vadd.f32 %v3556_v48, %v14924_v22  ;;  %8255 = vmatprep.mubr.msk.f32.mxu1 %vm465_vm4, %v11710_v55  ;;  %3794 = vst.msk [vmem:[#allocation3 + $0xf0] sm:$0xff] %vm465_vm4, %v3762_v12  ;;  %v3490_v20 = vrot.slane %v3381_v34, 1  ;;  %8324 = vmatmul.mubr.msk.f32.gmra.mrb[118].mxu0 %vm465_vm4, %v11710_v55  ;;  %v14926_v48 = vld [vmem:[#allocation59_spill] sm:$0xff] }
 0x3e8   : > { %v3589_v22 = vadd.f32 %v3557_v18, %v14926_v48 }
 0x3e9   : > { %v3763_v32 = vsel %vm3699_vm11, %v3667_v43, %v3731_v44  ;;  %v3668_v45 = vadd.f32 %v11352_v1, %v3588_v16  ;;  %v3383_v7 = vpop.permute.xlu1 %3382  ;;  %v11735_v40 = vld [vmem:[#allocation3 + $0xd8] sm:$0xff]  ;;  %v3513_v6 = vsel %vm2447_vm3, %v3489_v11, %v3490_v20  ;;  %v3287_v43 = vadd.f32 %v11496_v9, %v14927_v57  ;;  %v11747_v16 = vld [vmem:[#allocation3 + $0xe8] sm:$0xff] }
 0x3ea   : > { %3795 = vst.msk [vmem:[#allocation3 + $0xf8] sm:$0xff] %vm465_vm4, %v3763_v32  ;;  %v3491_v39 = vrot.slane %v3383_v7, 1  ;;  %8256 = vmatmul.mubr.msk.f32.gmra.mrb[74].mxu1 %vm465_vm4, %v11735_v40  ;;  %8326 = vmatprep.mubr.msk.f32.mxu0 %vm465_vm4, %v11735_v40  ;;  %v3558_v12 = vadd.f32 %v3513_v6, %v3286_v50  ;;  %v3385_v44 = vpop.permute.xlu0 %3384  ;;  %v3669_v34 = vadd.f32 %v11352_v1, %v3589_v22  ;;  %v11752_v11 = vld [vmem:[#allocation3 + $0xe0] sm:$0xff] }
 0x3eb   : > { %vm3700_vm12 = vcmp.ge.f32.partialorder %v3668_v45, 0.0  ;;  %v3732_v60 = vmul.f32 0.01, %v3668_v45  ;;  %8258 = vmatprep.mubr.msk.f32.mxu1 %vm465_vm4, %v11752_v11  ;;  %8327 = vmatmul.mubr.msk.f32.gmra.mrb[120].mxu0 %vm465_vm4, %v11752_v11  ;;  %v3492_v48 = vrot.slane %v3385_v44, 1  ;;  %v11774_v44 = vld [vmem:[#allocation3 + $0x100] sm:$0xff] }
 0x3ec   : > { %v3512_v18 = vsel %vm2447_vm3, %v3490_v20, %v3491_v39  ;;  %v3590_v32 = vadd.f32 %v3558_v12, %v11176_v38  ;;  %vm3701_vm13 = vcmp.ge.f32.partialorder %v3669_v34, 0.0  ;;  %v3733_v50 = vmul.f32 0.01, %v3669_v34  ;;  %8329 = vmatprep.mubr.msk.f32.mxu0 %vm465_vm4, %v11747_v16  ;;  %v14928_v38 = vld [vmem:[#allocation144_spill] sm:$0xff] }
 0x3ed   : > { %v3764_v58 = vsel %vm3700_vm12, %v3668_v45, %v3732_v60  ;;  %v3559_v7 = vadd.f32 %v3512_v18, %v3287_v43  ;;  %v3387_v9 = vpop.permute.xlu1 %3386  ;;  %v3288_v20 = vadd.f32 %v11502_v62, %v14928_v38 }
 0x3ee   : > { %3796 = vst.msk [vmem:[#allocation3 + $0x108] sm:$0xff] %vm465_vm4, %v3764_v58  ;;  %v3493_v22 = vrot.slane %v3387_v9, 1  ;;  %8259 = vmatmul.mubr.msk.f32.gmra.mrb[76].mxu1 %vm465_vm4, %v11747_v16  ;;  %v3670_v45 = vadd.f32 %v11352_v1, %v3590_v32  ;;  %v3389_v39 = vpop.permute.xlu0 %3388  ;;  %v11768_v57 = vld [vmem:[#allocation3 + $0xf0] sm:$0xff]  ;;  %v3765_v43 = vsel %vm3701_vm13, %v3669_v34, %v3733_v50 }
 0x3ef   : > { %v3591_v6 = vadd.f32 %v3559_v7, %v11182_v4  ;;  %v3494_v12 = vrot.slane %v3389_v39, 1  ;;  %8261 = vmatprep.mubr.msk.f32.mxu1 %vm465_vm4, %v11768_v57  ;;  %3797 = vst.msk [vmem:[#allocation3 + $0x110] sm:$0xff] %vm465_vm4, %v3765_v43  ;;  %8330 = vmatmul.mubr.msk.f32.gmra.mrb[122].mxu0 %vm465_vm4, %v11768_v57  ;;  %v14929_v32 = vld [vmem:[#allocation96_spill] sm:$0xff]  ;;  %v14930_v39 = vld [vmem:[#allocation49_spill] sm:$0xff] }
 0x3f0   : > { %v3511_v60 = vsel %vm2447_vm3, %v3492_v48, %v3493_v22  ;;  %vm3702_vm14 = vcmp.ge.f32.partialorder %v3670_v45, 0.0  ;;  %v3734_v62 = vmul.f32 0.01, %v3670_v45  ;;  %v3289_v7 = vadd.f32 %v11506_v27, %v14929_v32 }
 0x3f1   : > { %v3671_v18 = vadd.f32 %v11352_v1, %v3591_v6  ;;  %v3560_v4 = vadd.f32 %v3511_v60, %v3288_v20  ;;  %v3391_v34 = vpop.permute.xlu1 %3390  ;;  %v11780_v58 = vld [vmem:[#allocation3 + $0xf8] sm:$0xff]  ;;  %v3510_v9 = vsel %vm2447_vm3, %v3493_v22, %v3494_v12  ;;  %v3290_v43 = vadd.f32 %v11512_v49, %v14930_v39  ;;  %v14931_v49 = vld [vmem:[#allocation56_spill] sm:$0xff] }
 0x3f2   : > { %8262 = vmatmul.mubr.msk.f32.gmra.mrb[78].mxu1 %vm465_vm4, %v11780_v58  ;;  %8332 = vmatprep.mubr.msk.f32.mxu0 %vm465_vm4, %v11780_v58  ;;  %v3766_v50 = vsel %vm3702_vm14, %v3670_v45, %v3734_v62  ;;  %v3393_v20 = vpop.permute.xlu0 %3392  ;;  %v3561_v27 = vadd.f32 %v3510_v9, %v3289_v7  ;;  %v3495_v6 = vrot.slane %v3391_v34, 1 }
 0x3f3   : > { %vm3703_vm15 = vcmp.ge.f32.partialorder %v3671_v18, 0.0  ;;  %v3735_v48 = vmul.f32 0.01, %v3671_v18  ;;  %v3592_v38 = vadd.f32 %v3560_v4, %v11205_v23  ;;  %8264 = vmatprep.mubr.msk.f32.mxu1 %vm465_vm4, %v11774_v44  ;;  %3798 = vst.msk [vmem:[#allocation3 + $0x120] sm:$0xff] %vm465_vm4, %v3766_v50  ;;  %v3496_v22 = vrot.slane %v3393_v20, 1  ;;  %8333 = vmatmul.mubr.msk.f32.gmra.mrb[124].mxu0 %vm465_vm4, %v11774_v44  ;;  %v11811_v50 = vld [vmem:[#allocation3 + $0x118] sm:$0xff] }
 0x3f4   : > { %v3593_v62 = vadd.f32 %v3561_v27, %v11228_v15 }
 0x3f5   : > { %v3767_v60 = vsel %vm3703_vm15, %v3671_v18, %v3735_v48  ;;  %v3672_v12 = vadd.f32 %v11352_v1, %v3592_v38  ;;  %v3395_v45 = vpop.permute.xlu1 %3394  ;;  %v11799_v23 = vld [vmem:[#allocation3 + $0x108] sm:$0xff]  ;;  %v3509_v4 = vsel %vm2447_vm3, %v3495_v6, %v3496_v22  ;;  %v3291_v18 = vadd.f32 %v11528_v33, %v14931_v49 }
 0x3f6   : > { %3799 = vst.msk [vmem:[#allocation3 + $0x128] sm:$0xff] %vm465_vm4, %v3767_v60  ;;  %v3497_v34 = vrot.slane %v3395_v45, 1  ;;  %8265 = vmatmul.mubr.msk.f32.gmra.mrb[80].mxu1 %vm465_vm4, %v11799_v23  ;;  %8335 = vmatprep.mubr.msk.f32.mxu0 %vm465_vm4, %v11799_v23  ;;  %v3562_v7 = vadd.f32 %v3509_v4, %v3290_v43  ;;  %v3397_v9 = vpop.permute.xlu0 %3396  ;;  %v3673_v15 = vadd.f32 %v11352_v1, %v3593_v62  ;;  %v11816_v38 = vld [vmem:[#allocation3 + $0x110] sm:$0xff] }
 0x3f7   : > { %vm3704_vm0 = vcmp.ge.f32.partialorder %v3672_v12, 0.0  ;;  %v3736_v32 = vmul.f32 0.01, %v3672_v12  ;;  %8267 = vmatprep.mubr.msk.f32.mxu1 %vm465_vm4, %v11816_v38  ;;  %8336 = vmatmul.mubr.msk.f32.gmra.mrb[126].mxu0 %vm465_vm4, %v11816_v38  ;;  %v3498_v43 = vrot.slane %v3397_v9, 1 }
 0x3f8   : > { %v3508_v48 = vsel %vm2447_vm3, %v3496_v22, %v3497_v34  ;;  %v3594_v27 = vadd.f32 %v3562_v7, %v11260_v63  ;;  %vm3705_vm1 = vcmp.ge.f32.partialorder %v3673_v15, 0.0  ;;  %v3737_v39 = vmul.f32 0.01, %v3673_v15  ;;  %8338 = vmatprep.mubr.msk.f32.mxu0 %vm465_vm4, %v11811_v50  ;;  %v14932_v63 = vld [vmem:[#allocation33_spill] sm:$0xff] }
 0x3f9   : > { %v3768_v20 = vsel %vm3704_vm0, %v3672_v12, %v3736_v32  ;;  %v3563_v6 = vadd.f32 %v3508_v48, %v3291_v18  ;;  %v3399_v33 = vpop.permute.xlu1 %3398  ;;  %v3292_v22 = vadd.f32 %v11532_v30, %v14932_v63  ;;  %v11838_v32 = vld [vmem:[#allocation3 + $0x130] sm:$0xff]  ;;  %v14933_v48 = vld [vmem:[#allocation147_spill] sm:$0xff] }
 0x3fa   : > { %3800 = vst.msk [vmem:[#allocation3 + $0x138] sm:$0xff] %vm465_vm4, %v3768_v20  ;;  %v3499_v60 = vrot.slane %v3399_v33, 1  ;;  %8268 = vmatmul.mubr.msk.f32.gmra.mrb[82].mxu1 %vm465_vm4, %v11811_v50  ;;  %v3674_v12 = vadd.f32 %v11352_v1, %v3594_v27  ;;  %v3401_v62 = vpop.permute.xlu0 %3400  ;;  %v11832_v4 = vld [vmem:[#allocation3 + $0x120] sm:$0xff]  ;;  %v3769_v34 = vsel %vm3705_vm1, %v3673_v15, %v3737_v39  ;;  %v3293_v20 = vadd.f32 %v11535_v47, %v14933_v48  ;;  %v8554_v48 = vld [vmem:[#allocation10] ss:$0 sm:$0xff] }
 0x3fb   : > { %v3595_v45 = vadd.f32 %v3563_v6, %v11264_v2  ;;  %v3500_v18 = vrot.slane %v3401_v62, 1  ;;  %8270 = vmatprep.mubr.msk.f32.mxu1 %vm465_vm4, %v11832_v4  ;;  %3801 = vst.msk [vmem:[#allocation3 + $0x140] sm:$0xff] %vm465_vm4, %v3769_v34  ;;  %8339 = vmatmul.mubr.msk.f32.gmra.mrb[128].mxu0 %vm465_vm4, %v11832_v4 }
 0x3fc   : > { %v3507_v49 = vsel %vm2447_vm3, %v3498_v43, %v3499_v60  ;;  %vm3706_vm5 = vcmp.ge.f32.partialorder %v3674_v12, 0.0  ;;  %v3738_v30 = vmul.f32 0.01, %v3674_v12 }
 0x3fd   : > { %v3675_v7 = vadd.f32 %v11352_v1, %v3595_v45  ;;  %v3564_v2 = vadd.f32 %v3507_v49, %v3292_v22  ;;  %v3403_v9 = vpop.permute.xlu1 %3402  ;;  %v11844_v15 = vld [vmem:[#allocation3 + $0x128] sm:$0xff]  ;;  %v3506_v27 = vsel %vm2447_vm3, %v3499_v60, %v3500_v18 }
 0x3fe   : > { %8271 = vmatmul.mubr.msk.f32.gmra.mrb[84].mxu1 %vm465_vm4, %v11844_v15  ;;  %8341 = vmatprep.mubr.msk.f32.mxu0 %vm465_vm4, %v11844_v15  ;;  %v3770_v6 = vsel %vm3706_vm5, %v3674_v12, %v3738_v30  ;;  %v3565_v47 = vadd.f32 %v3506_v27, %v3293_v20  ;;  %v3501_v63 = vrot.slane %v3403_v9, 1  ;;  %v14934_v22 = vld [vmem:[#allocation151_spill] sm:$0xff] }
 0x3ff   : > { %vm3707_vm6 = vcmp.ge.f32.partialorder %v3675_v7, 0.0  ;;  %v3739_v33 = vmul.f32 0.01, %v3675_v7  ;;  %v3596_v39 = vadd.f32 %v3564_v2, %v11287_v14  ;;  %v3405_v43 = vpop.permute.xlu0 %3404  ;;  %8273 = vmatprep.mubr.msk.f32.mxu1 %vm465_vm4, %v11838_v32  ;;  %3802 = vst.msk [vmem:[#allocation3 + $0x150] sm:$0xff] %vm465_vm4, %v3770_v6  ;;  %v3294_v45 = vadd.f32 %v11538_v21, %v14934_v22  ;;  %8342 = vmatmul.mubr.msk.f32.gmra.mrb[130].mxu0 %vm465_vm4, %v11838_v32  ;;  %v11875_v9 = vld [vmem:[#allocation3 + $0x148] sm:$0xff] }
 0x400   : > { %v3502_v60 = vrot.slane %v3405_v43, 1  ;;  %v3597_v49 = vadd.f32 %v3565_v47, %v11310_v36 }
 0x401   : > { %v3771_v62 = vsel %vm3707_vm6, %v3675_v7, %v3739_v33  ;;  %v3676_v34 = vadd.f32 %v11352_v1, %v3596_v39  ;;  %v3407_v12 = vpop.permute.xlu1 %3406  ;;  %v11863_v14 = vld [vmem:[#allocation3 + $0x138] sm:$0xff] }
 0x402   : > { %3803 = vst.msk [vmem:[#allocation3 + $0x158] sm:$0xff] %vm465_vm4, %v3771_v62  ;;  %v3505_v18 = vsel %vm2447_vm3, %v3501_v63, %v3502_v60  ;;  %v3503_v30 = vrot.slane %v3407_v12, 1  ;;  %8274 = vmatmul.mubr.msk.f32.gmra.mrb[86].mxu1 %vm465_vm4, %v11863_v14  ;;  %8344 = vmatprep.mubr.msk.f32.mxu0 %vm465_vm4, %v11863_v14  ;;  %v14935_v1 = vld [vmem:[#allocation102_spill] sm:$0xff]  ;;  %v3677_v36 = vadd.f32 %v8554_v48, %v3597_v49 }
 0x403   : > { %v3295_v21 = vadd.f32 %v11561_v46, %v14935_v1  ;;  %vm3708_vm7 = vcmp.ge.f32.partialorder %v3676_v34, 0.0  ;;  %v3740_v7 = vmul.f32 0.01, %v3676_v34  ;;  %v3566_v2 = vadd.f32 %v3505_v18, %v3294_v45  ;;  %v11879_v27 = vld [vmem:[#allocation3 + $0x140] sm:$0xff]  ;;  %v11919_v18 = vld [vmem:[#allocation3 + $0x178] sm:$0xff] }
 0x404   : > { %v3504_v20 = vsel %vm2447_vm3, %v3502_v60, %v3503_v30  ;;  %8276 = vmatprep.mubr.msk.f32.mxu1 %vm465_vm4, %v11879_v27  ;;  %8345 = vmatmul.mubr.msk.f32.gmra.mrb[132].mxu0 %vm465_vm4, %v11879_v27  ;;  %vm3709_vm8 = vcmp.ge.f32.partialorder %v3677_v36, 0.0  ;;  %v3741_v46 = vmul.f32 0.01, %v3677_v36  ;;  %v11896_v60 = vld [vmem:[#allocation3 + $0x160] sm:$0xff] }
 0x405   : > { %v3772_v6 = vsel %vm3708_vm7, %v3676_v34, %v3740_v7  ;;  %v3598_v33 = vadd.f32 %v3566_v2, %v11335_v35  ;;  %v3567_v39 = vadd.f32 %v3504_v20, %v3295_v21  ;;  %8347 = vmatprep.mubr.msk.f32.mxu0 %vm465_vm4, %v11875_v9  ;;  %v11943_v7 = vld [vmem:[#allocation3 + $0x190] sm:$0xff] }
 0x406   : > { %3804 = vst.msk [vmem:[#allocation3 + $0x168] sm:$0xff] %vm465_vm4, %v3772_v6  ;;  %8277 = vmatmul.mubr.msk.f32.gmra.mrb[88].mxu1 %vm465_vm4, %v11875_v9  ;;  %v11892_v47 = vld [vmem:[#allocation3 + $0x150] sm:$0xff]  ;;  %v3773_v63 = vsel %vm3709_vm8, %v3677_v36, %v3741_v46 }
 0x407   : > { %v3678_v43 = vadd.f32 %v8554_v48, %v3598_v33  ;;  %v3599_v35 = vadd.f32 %v3567_v39, %v11339_v24  ;;  %8279 = vmatprep.mubr.msk.f32.mxu1 %vm465_vm4, %v11892_v47  ;;  %3805 = vst.msk [vmem:[#allocation3 + $0x170] sm:$0xff] %vm465_vm4, %v3773_v63 }
 0x408   : > { %8348 = vmatmul.mubr.msk.f32.gmra.mrb[134].mxu0 %vm465_vm4, %v11892_v47 }
 0x409   : > { %vm3710_vm9 = vcmp.ge.f32.partialorder %v3678_v43, 0.0  ;;  %v3742_v22 = vmul.f32 0.01, %v3678_v43  ;;  %v3679_v45 = vadd.f32 %v8554_v48, %v3599_v35  ;;  %v11901_v62 = vld [vmem:[#allocation3 + $0x158] sm:$0xff] }
 0x40a   : > { %8280 = vmatmul.mubr.msk.f32.gmra.mrb[90].mxu1 %vm465_vm4, %v11901_v62  ;;  %8350 = vmatprep.mubr.msk.f32.mxu0 %vm465_vm4, %v11901_v62 }
 0x40b   : > { %v3774_v24 = vsel %vm3710_vm9, %v3678_v43, %v3742_v22  ;;  %vm3711_vm10 = vcmp.ge.f32.partialorder %v3679_v45, 0.0  ;;  %v3743_v34 = vmul.f32 0.01, %v3679_v45  ;;  %8282 = vmatprep.mubr.msk.f32.mxu1 %vm465_vm4, %v11896_v60 }
 0x40c   : > { %3806 = vst.msk [vmem:[#allocation3 + $0x180] sm:$0xff] %vm465_vm4, %v3774_v24  ;;  %8351 = vmatmul.mubr.msk.f32.gmra.mrb[136].mxu0 %vm465_vm4, %v11896_v60 }
 0x40d   : > { %v3775_v12 = vsel %vm3711_vm10, %v3679_v45, %v3743_v34  ;;  %v11912_v49 = vld [vmem:[#allocation3 + $0x168] sm:$0xff] }
 0x40e   : > { %3807 = vst.msk [vmem:[#allocation3 + $0x188] sm:$0xff] %vm465_vm4, %v3775_v12  ;;  %8283 = vmatmul.mubr.msk.f32.gmra.mrb[92].mxu1 %vm465_vm4, %v11912_v49  ;;  %8353 = vmatprep.mubr.msk.f32.mxu0 %vm465_vm4, %v11912_v49  ;;  %v11921_v30 = vld [vmem:[#allocation3 + $0x170] sm:$0xff] }
 0x40f   : > { %8285 = vmatprep.mubr.msk.f32.mxu1 %vm465_vm4, %v11921_v30 }
 0x410   : > { %8354 = vmatmul.mubr.msk.f32.gmra.mrb[138].mxu0 %vm465_vm4, %v11921_v30 }
 0x411   : > { %8356 = vmatprep.mubr.msk.f32.mxu0 %vm465_vm4, %v11919_v18 }
 0x412   : > { %8286 = vmatmul.mubr.msk.f32.gmra.mrb[94].mxu1 %vm465_vm4, %v11919_v18 }
 0x413   : > { %8364 = vmatprep.mubr.msk.f32.mxu1 %vm465_vm4, %v11450_v5  ;;  %v11933_v1 = vld [vmem:[#allocation3 + $0x180] sm:$0xff]  ;;  %v14936_v5 = vld [vmem:[#allocation65_spill] sm:$0xff] }
 0x414   : > { %8357 = vmatmul.mubr.msk.f32.gmra.mrb[140].mxu0 %vm465_vm4, %v11933_v1 }
 0x415   : > { %v11937_v21 = vld [vmem:[#allocation3 + $0x188] sm:$0xff] }
 0x416   : > { %8359 = vmatprep.mubr.msk.f32.mxu0 %vm465_vm4, %v11937_v21  ;;  %8365 = vmatmul.mubr.msk.f32.vlgmr.msra.gmra.mrb[96].mxu1 %vm465_vm4, %v11452_v8 }
 0x417   : > { %8367 = vmatprep.mubr.msk.f32.mxu1 %vm465_vm4, %v11462_v31 }
 0x418   : > { %8360 = vmatmul.mubr.msk.f32.gmra.mrb[142].mxu0 %vm465_vm4, %v11943_v7 }
 0x41a   : > { %8368 = vmatmul.mubr.msk.f32.gmra.mrb[98].mxu1 %vm465_vm4, %v11485_v37 }
 0x41b   : > { %8370 = vmatprep.mubr.msk.f32.mxu1 %vm465_vm4, %v11514_v61 }
 0x41e   : > { %8371 = vmatmul.mubr.msk.f32.gmra.mrb[100].mxu1 %vm465_vm4, %v11508_v56 }
 0x41f   : > { %8373 = vmatprep.mubr.msk.f32.mxu1 %vm465_vm4, %v11540_v42 }
 0x422   : > { %8374 = vmatmul.mubr.msk.f32.gmra.mrb[102].mxu1 %vm465_vm4, %v11542_v59 }
 0x423   : > { %8376 = vmatprep.mubr.msk.f32.mxu1 %vm465_vm4, %v14936_v5 }
 0x426   : > { %8377 = vmatmul.mubr.msk.f32.gmra.mrb[104].mxu1 %vm465_vm4, %v11573_v17 }
 0x427   : > { %8379 = vmatprep.mubr.msk.f32.mxu1 %vm465_vm4, %v11615_v41 }
 0x42a   : > { %8380 = vmatmul.mubr.msk.f32.gmra.mrb[106].mxu1 %vm465_vm4, %v11610_v13 }
 0x42b   : > { %8382 = vmatprep.mubr.msk.f32.mxu1 %vm465_vm4, %v11640_v26 }
 0x42e   : > { %8383 = vmatmul.mubr.msk.f32.gmra.mrb[108].mxu1 %vm465_vm4, %v11652_v54 }
 0x42f   : > { %8385 = vmatprep.mubr.msk.f32.mxu1 %vm465_vm4, %v11648_v51 }
 0x432   : > { %8386 = vmatmul.mubr.msk.f32.gmra.mrb[110].mxu1 %vm465_vm4, %v11671_v19 }
 0x433   : > { %8388 = vmatprep.mubr.msk.f32.mxu1 %vm465_vm4, %v11688_v53  ;;  %v4853_v53 = vld [vmem:[#allocation3 + $0x198] sm:$0xff] }
 0x436   : > { %8389 = vmatmul.mubr.msk.f32.gmra.mrb[112].mxu1 %vm465_vm4, %v11683_v52 }
 0x437   : > { %8391 = vmatprep.mubr.msk.f32.mxu1 %vm465_vm4, %v11704_v10 }
 0x43a   : > { %8392 = vmatmul.mubr.msk.f32.gmra.mrb[114].mxu1 %vm465_vm4, %v11716_v25 }
 0x43b   : > { %8394 = vmatprep.mubr.msk.f32.mxu1 %vm465_vm4, %v11710_v55 }
 0x43e   : > { %8395 = vmatmul.mubr.msk.f32.gmra.mrb[116].mxu1 %vm465_vm4, %v11735_v40  ;;  %v4854_v40 = vld [vmem:[#allocation3 + $0x1a0] sm:$0xff] }
 0x43f   : > { %8397 = vmatprep.mubr.msk.f32.mxu1 %vm465_vm4, %v11752_v11 }
 0x442   : > { %8398 = vmatmul.mubr.msk.f32.gmra.mrb[118].mxu1 %vm465_vm4, %v11747_v16 }
 0x443   : > { %8400 = vmatprep.mubr.msk.f32.mxu1 %vm465_vm4, %v11768_v57 }
 0x446   : > { %8401 = vmatmul.mubr.msk.f32.gmra.mrb[120].mxu1 %vm465_vm4, %v11780_v58 }
 0x447   : > { %8403 = vmatprep.mubr.msk.f32.mxu1 %vm465_vm4, %v11774_v44 }
 0x44a   : > { %8404 = vmatmul.mubr.msk.f32.gmra.mrb[122].mxu1 %vm465_vm4, %v11799_v23 }
 0x44b   : > { %8406 = vmatprep.mubr.msk.f32.mxu1 %vm465_vm4, %v11816_v38 }
 0x44e   : > { %8407 = vmatmul.mubr.msk.f32.gmra.mrb[124].mxu1 %vm465_vm4, %v11811_v50  ;;  %v4855_v50 = vld [vmem:[#allocation3 + $0x1a8] sm:$0xff] }
 0x44f   : > { %8409 = vmatprep.mubr.msk.f32.mxu1 %vm465_vm4, %v11832_v4 }
 0x452   : > { %8410 = vmatmul.mubr.msk.f32.gmra.mrb[126].mxu1 %vm465_vm4, %v11844_v15  ;;  %v8221_v8 = vpop.f32.mrb[50].mxu1 }
 0x453   : > { %8412 = vmatprep.mubr.msk.f32.mxu1 %vm465_vm4, %v11838_v32  ;;  %v5308_v31 = vrot.slane %v8221_v8, 7  ;;  %v4077_v37 = vpop.f32.mrb[51].mxu1  ;;  %5567 = vrot.lane.b32.xlu0 %v8221_v8, %s8845_s8 }
 0x454   : > { %5421 = vrot.lane.b32.xlu1 %v8221_v8, %s8846_s23  ;;  %v5307_v56 = vrot.slane %v4077_v37, 7 }
 0x456   : > { %8413 = vmatmul.mubr.msk.f32.gmra.mrb[128].mxu1 %vm465_vm4, %v11863_v14  ;;  %v12017_v61 = vsel %vm2046_vm2, %v5307_v56, %v5308_v31 }
 0x457   : > { %8415 = vmatprep.mubr.msk.f32.mxu1 %vm465_vm4, %v11879_v27 }
 0x458   : > { %5565 = vrot.lane.b32.xlu1 %v4077_v37, %s8845_s8 }
 0x45a   : > { %8416 = vmatmul.mubr.msk.f32.gmra.mrb[130].mxu1 %vm465_vm4, %v11875_v9 }
 0x45b   : > { %8418 = vmatprep.mubr.msk.f32.mxu1 %vm465_vm4, %v11892_v47 }
 0x45e   : > { %8419 = vmatmul.mubr.msk.f32.gmra.mrb[132].mxu1 %vm465_vm4, %v11901_v62 }
 0x45f   : > { %v8292_v42 = vpop.f32.mrb[96].mxu0  ;;  %8421 = vmatprep.mubr.msk.f32.mxu1 %vm465_vm4, %v11896_v60  ;;  %v8224_v17 = vpop.f32.mrb[52].mxu1 }
 0x460   : > { %v5818_v59 = vrot.slane %v8292_v42, 7  ;;  %5931 = vrot.lane.b32.xlu0 %v8292_v42, %s8846_s23  ;;  %v12029_v13 = vpop.f32.mrb[97].mxu0  ;;  %v4087_v26 = vpop.f32.mrb[53].mxu1  ;;  %v5310_v44 = vrot.slane %v8224_v17, 7 }
 0x461   : > { %v14452_v41 = vrot.slane %v12029_v13, 7  ;;  %5929 = vrot.lane.b32.xlu1 %v12029_v13, %s8846_s23  ;;  %v5309_v51 = vrot.slane %v4087_v26, 7 }
 0x462   : > { %8422 = vmatmul.mubr.msk.f32.gmra.mrb[134].mxu1 %vm465_vm4, %v11912_v49 }
 0x463   : > { %8424 = vmatprep.mubr.msk.f32.mxu1 %vm465_vm4, %v11921_v30  ;;  %v12042_v54 = vsel %vm2046_vm2, %v14452_v41, %v5818_v59  ;;  %v12047_v19 = vsel %vm2046_vm2, %v5308_v31, %v5309_v51 }
 0x464   : > { %6075 = vrot.lane.b32.xlu0 %v8292_v42, %s8845_s8 }
 0x465   : > { %6073 = vrot.lane.b32.xlu1 %v12029_v13, %s8845_s8 }
 0x466   : > { %8425 = vmatmul.mubr.msk.f32.gmra.mrb[136].mxu1 %vm465_vm4, %v11919_v18 }
 0x467   : > { %8427 = vmatprep.mubr.msk.f32.mxu1 %vm465_vm4, %v11933_v1 }
 0x468   : > { %5571 = vrot.lane.b32.xlu0 %v8224_v17, %s8845_s8 }
 0x469   : > { %5569 = vrot.lane.b32.xlu1 %v4087_v26, %s8845_s8 }
 0x46a   : > { %8428 = vmatmul.mubr.msk.f32.gmra.mrb[138].mxu1 %vm465_vm4, %v11937_v21  ;;  %v8295_v52 = vpop.f32.mrb[98].mxu0 }
 0x46b   : > { %8430 = vmatprep.mubr.msk.f32.mxu1 %vm465_vm4, %v11943_v7  ;;  %v5820_v10 = vrot.slane %v8295_v52, 7  ;;  %v8227_v55 = vpop.f32.mrb[54].mxu1  ;;  %v4576_v25 = vpop.f32.mrb[99].mxu0 }
 0x46c   : > { %5423 = vrot.lane.b32.xlu0 %v4087_v26, %s8846_s23  ;;  %v5312_v16 = vrot.slane %v8227_v55, 7  ;;  %v5819_v11 = vrot.slane %v4576_v25, 7  ;;  %v4097_v57 = vpop.f32.mrb[55].mxu1 }
 0x46d   : > { %5933 = vrot.lane.b32.xlu1 %v8295_v52, %s8846_s23  ;;  %v5311_v58 = vrot.slane %v4097_v57, 7 }
 0x46e   : > { %8431 = vmatmul.mubr.msk.f32.gmra.mrb[140].mxu1 %vm465_vm4, %v4853_v53  ;;  %v8298_v23 = vpop.f32.mrb[100].mxu0  ;;  %v12067_v38 = vsel %vm2046_vm2, %v5819_v11, %v5820_v10 }
 0x46f   : > { %8433 = vmatprep.mubr.msk.f32.mxu1 %vm465_vm4, %v4854_v40  ;;  %v4586_v4 = vpop.f32.mrb[101].mxu0  ;;  %v12072_v32 = vsel %vm2046_vm2, %v5311_v58, %v5312_v16  ;;  %v12076_v15 = vsel %vm2046_vm2, %v5310_v44, %v5311_v58  ;;  %v5822_v43 = vrot.slane %v8298_v23, 7 }
 0x470   : > { %6079 = vrot.lane.b32.xlu0 %v8295_v52, %s8845_s8  ;;  %v5821_v14 = vrot.slane %v4586_v4, 7 }
 0x471   : > { %6077 = vrot.lane.b32.xlu1 %v4576_v25, %s8845_s8 }
 0x472   : > { %8434 = vmatmul.mubr.msk.f32.gmra.mrb[142].mxu1 %vm465_vm4, %v4855_v50  ;;  %v12082_v2 = vsel %vm2046_vm2, %v5820_v10, %v5821_v14 }
 0x474   : > { %5427 = vrot.lane.b32.xlu0 %v8227_v55, %s8846_s23 }
 0x475   : > { %5425 = vrot.lane.b32.xlu1 %v4097_v57, %s8846_s23 }
 0x476   : > { %v8230_v9 = vpop.f32.mrb[56].mxu1 }
 0x477   : > { %v5314_v48 = vrot.slane %v8230_v9, 7  ;;  %v4107_v36 = vpop.f32.mrb[57].mxu1 }
 0x478   : > { %5575 = vrot.lane.b32.xlu0 %v8227_v55, %s8845_s8  ;;  %v5313_v20 = vrot.slane %v4107_v36, 7 }
 0x479   : > { %5573 = vrot.lane.b32.xlu1 %v4097_v57, %s8845_s8 }
 0x47a   : > { %v12090_v27 = vsel %vm2046_vm2, %v5313_v20, %v5314_v48 }
 0x47c   : > { %6083 = vrot.lane.b32.xlu0 %v8298_v23, %s8845_s8 }
 0x47d   : > { %5429 = vrot.lane.b32.xlu1 %v8230_v9, %s8846_s23 }
 0x480   : > { %5579 = vrot.lane.b32.xlu0 %v8230_v9, %s8845_s8 }
 0x481   : > { %6081 = vrot.lane.b32.xlu1 %v4586_v4, %s8845_s8 }
 0x482   : > { %v8301_v6 = vpop.f32.mrb[102].mxu0 }
 0x483   : > { %v5824_v33 = vrot.slane %v8301_v6, 7  ;;  %v8233_v39 = vpop.f32.mrb[58].mxu1  ;;  %v4596_v46 = vpop.f32.mrb[103].mxu0 }
 0x484   : > { %5935 = vrot.lane.b32.xlu0 %v4586_v4, %s8846_s23  ;;  %v5823_v35 = vrot.slane %v4596_v46, 7  ;;  %v4117_v47 = vpop.f32.mrb[59].mxu1  ;;  %v5316_v1 = vrot.slane %v8233_v39, 7 }
 0x485   : > { %5577 = vrot.lane.b32.xlu1 %v4107_v36, %s8845_s8  ;;  %v5315_v63 = vrot.slane %v4117_v47, 7 }
 0x486   : > { %v12100_v60 = vsel %vm2046_vm2, %v5823_v35, %v5824_v33  ;;  %v12104_v22 = vsel %vm2046_vm2, %v5822_v43, %v5823_v35 }
 0x487   : > { %v12109_v45 = vsel %vm2046_vm2, %v5314_v48, %v5315_v63 }
 0x488   : > { %5939 = vrot.lane.b32.xlu0 %v8301_v6, %s8846_s23 }
 0x489   : > { %5937 = vrot.lane.b32.xlu1 %v4596_v46, %s8846_s23 }
 0x48c   : > { %6087 = vrot.lane.b32.xlu0 %v8301_v6, %s8845_s8 }
 0x48d   : > { %6085 = vrot.lane.b32.xlu1 %v4596_v46, %s8845_s8 }
 0x48e   : > { %v8304_v62 = vpop.f32.mrb[104].mxu0 }
 0x48f   : > { %v5826_v24 = vrot.slane %v8304_v62, 7  ;;  %v8236_v34 = vpop.f32.mrb[60].mxu1  ;;  %v4606_v12 = vpop.f32.mrb[105].mxu0 }
 0x490   : > { %5583 = vrot.lane.b32.xlu0 %v8233_v39, %s8845_s8  ;;  %v5318_v49 = vrot.slane %v8236_v34, 7  ;;  %v5825_v18 = vrot.slane %v4606_v12, 7  ;;  %v4127_v30 = vpop.f32.mrb[61].mxu1 }
 0x491   : > { %5581 = vrot.lane.b32.xlu1 %v4117_v47, %s8845_s8  ;;  %v5317_v21 = vrot.slane %v4127_v30, 7 }
 0x492   : > { %v8307_v7 = vpop.f32.mrb[106].mxu0  ;;  %v12118_v5 = vsel %vm2046_vm2, %v5825_v18, %v5826_v24 }
 0x493   : > { %14937 = vst [vmem:[#allocation103_spill] sm:$0xff] %v12118_v5  ;;  %v4616_v8 = vpop.f32.mrb[107].mxu0  ;;  %v12123_v31 = vsel %vm2046_vm2, %v5317_v21, %v5318_v49  ;;  %v12127_v37 = vsel %vm2046_vm2, %v5316_v1, %v5317_v21  ;;  %v5828_v40 = vrot.slane %v8307_v7, 7 }
 0x494   : > { %5431 = vrot.lane.b32.xlu0 %v4117_v47, %s8846_s23  ;;  %14938 = vst [vmem:[#allocation69_spill] sm:$0xff] %v12123_v31  ;;  %14939 = vst [vmem:[#allocation105_spill] sm:$0xff] %v12127_v37  ;;  %v5827_v56 = vrot.slane %v4616_v8, 7 }
 0x495   : > { %5941 = vrot.lane.b32.xlu1 %v8304_v62, %s8846_s23 }
 0x496   : > { %v12132_v42 = vsel %vm2046_vm2, %v5826_v24, %v5827_v56 }
 0x497   : > { %14940 = vst [vmem:[#allocation106_spill] sm:$0xff] %v12132_v42 }
 0x498   : > { %6091 = vrot.lane.b32.xlu0 %v8304_v62, %s8845_s8 }
 0x499   : > { %6089 = vrot.lane.b32.xlu1 %v4606_v12, %s8845_s8 }
 0x49a   : > { %v8239_v59 = vpop.f32.mrb[62].mxu1 }
 0x49b   : > { %v5320_v17 = vrot.slane %v8239_v59, 7  ;;  %v4137_v26 = vpop.f32.mrb[63].mxu1 }
 0x49c   : > { %5435 = vrot.lane.b32.xlu0 %v8236_v34, %s8846_s23  ;;  %v5319_v51 = vrot.slane %v4137_v26, 7 }
 0x49d   : > { %5433 = vrot.lane.b32.xlu1 %v4127_v30, %s8846_s23 }
 0x49e   : > { %v12140_v52 = vsel %vm2046_vm2, %v5319_v51, %v5320_v17 }
 0x49f   : > { %14941 = vst [vmem:[#allocation62_spill] sm:$0xff] %v12140_v52 }
 0x4a0   : > { %5587 = vrot.lane.b32.xlu0 %v8236_v34, %s8845_s8 }
 0x4a1   : > { %5585 = vrot.lane.b32.xlu1 %v4127_v30, %s8845_s8 }
 0x4a4   : > { %6095 = vrot.lane.b32.xlu0 %v8307_v7, %s8845_s8 }
 0x4a5   : > { %5437 = vrot.lane.b32.xlu1 %v8239_v59, %s8846_s23 }
 0x4a6   : > { %v8310_v53 = vpop.f32.mrb[108].mxu0 }
 0x4a7   : > { %v5830_v10 = vrot.slane %v8310_v53, 7  ;;  %v8242_v55 = vpop.f32.mrb[64].mxu1  ;;  %v4626_v25 = vpop.f32.mrb[109].mxu0 }
 0x4a8   : > { %5591 = vrot.lane.b32.xlu0 %v8239_v59, %s8845_s8  ;;  %v5829_v16 = vrot.slane %v4626_v25, 7  ;;  %v4147_v11 = vpop.f32.mrb[65].mxu1  ;;  %v5322_v9 = vrot.slane %v8242_v55, 7 }
 0x4a9   : > { %6093 = vrot.lane.b32.xlu1 %v4616_v8, %s8845_s8  ;;  %v5321_v57 = vrot.slane %v4147_v11, 7 }
 0x4aa   : > { %v12148_v44 = vpop.f32.mrb[110].mxu0  ;;  %v12152_v58 = vsel %vm2046_vm2, %v5829_v16, %v5830_v10  ;;  %v12156_v23 = vsel %vm2046_vm2, %v5828_v40, %v5829_v16 }
 0x4ab   : > { %14942 = vst [vmem:[#allocation72_spill] sm:$0xff] %v12152_v58  ;;  %14943 = vst [vmem:[#allocation110_spill] sm:$0xff] %v12156_v23  ;;  %v5832_v50 = vrot.slane %v12148_v44, 7  ;;  %v12160_v4 = vpop.f32.mrb[111].mxu0  ;;  %v12164_v14 = vsel %vm2046_vm2, %v5320_v17, %v5321_v57 }
 0x4ac   : > { %5943 = vrot.lane.b32.xlu0 %v4616_v8, %s8846_s23  ;;  %14944 = vst [vmem:[#allocation124_spill] sm:$0xff] %v12164_v14  ;;  %v5831_v48 = vrot.slane %v12160_v4, 7 }
 0x4ad   : > { %v12167_v36 = vpop.f32.mrb[66].mxu1  ;;  %5589 = vrot.lane.b32.xlu1 %v4137_v26, %s8845_s8 }
 0x4ae   : > { %v5324_v20 = vrot.slane %v12167_v36, 7  ;;  %v12171_v6 = vpop.f32.mrb[67].mxu1  ;;  %v12174_v39 = vpop.f32.mrb[112].mxu0  ;;  %v12178_v46 = vsel %vm2046_vm2, %v5831_v48, %v5832_v50 }
 0x4af   : > { %v5323_v33 = vrot.slane %v12171_v6, 7  ;;  %14945 = vst [vmem:[#allocation61_spill] sm:$0xff] %v12178_v46  ;;  %v12181_v43 = vpop.f32.mrb[113].mxu0  ;;  %v5834_v18 = vrot.slane %v12174_v39, 7 }
 0x4b0   : > { %5947 = vrot.lane.b32.xlu0 %v8310_v53, %s8846_s23  ;;  %v5833_v35 = vrot.slane %v12181_v43, 7 }
 0x4b1   : > { %v12184_v47 = vpop.f32.mrb[68].mxu1  ;;  %5945 = vrot.lane.b32.xlu1 %v4626_v25, %s8846_s23  ;;  %v12189_v63 = vsel %vm2046_vm2, %v5323_v33, %v5324_v20  ;;  %v12193_v62 = vsel %vm2046_vm2, %v5322_v9, %v5323_v33  ;;  %v12251_v33 = vpop.permute.xlu1 %5417 }
 0x4b2   : > { %14946 = vst [vmem:[#allocation71_spill] sm:$0xff] %v12189_v63  ;;  %14947 = vst [vmem:[#allocation112_spill] sm:$0xff] %v12193_v62  ;;  %v5326_v24 = vrot.slane %v12184_v47, 7  ;;  %v12196_v34 = vpop.f32.mrb[69].mxu1  ;;  %v12201_v49 = vsel %vm2046_vm2, %v5832_v50, %v5833_v35  ;;  %v12204_v30 = vpop.f32.mrb[114].mxu0 }
 0x4b3   : > { %v5325_v12 = vrot.slane %v12196_v34, 7  ;;  %14948 = vst [vmem:[#allocation125_spill] sm:$0xff] %v12201_v49  ;;  %v5836_v1 = vrot.slane %v12204_v30, 7  ;;  %v12208_v21 = vpop.f32.mrb[115].mxu0 }
 0x4b4   : > { %6099 = vrot.lane.b32.xlu0 %v8310_v53, %s8845_s8  ;;  %v5835_v56 = vrot.slane %v12208_v21, 7 }
 0x4b5   : > { %v12210_v7 = vpop.f32.mrb[70].mxu1  ;;  %6097 = vrot.lane.b32.xlu1 %v4626_v25, %s8845_s8  ;;  %v12215_v8 = vsel %vm2046_vm2, %v5325_v12, %v5326_v24 }
 0x4b6   : > { %14949 = vst [vmem:[#allocation126_spill] sm:$0xff] %v12215_v8  ;;  %v12218_v59 = vpop.f32.mrb[71].mxu1  ;;  %v12221_v26 = vpop.f32.mrb[116].mxu0  ;;  %v12226_v51 = vsel %vm2046_vm2, %v5835_v56, %v5836_v1  ;;  %v12230_v53 = vsel %vm2046_vm2, %v5834_v18, %v5835_v56  ;;  %v5328_v10 = vrot.slane %v12210_v7, 7 }
 0x4b7   : > { %v5327_v17 = vrot.slane %v12218_v59, 7  ;;  %14950 = vst [vmem:[#allocation114_spill] sm:$0xff] %v12226_v51  ;;  %14951 = vst [vmem:[#allocation75_spill] sm:$0xff] %v12230_v53  ;;  %v5838_v25 = vrot.slane %v12221_v26, 7  ;;  %v12234_v40 = vpop.f32.mrb[117].mxu0 }
 0x4b8   : > { %5595 = vrot.lane.b32.xlu0 %v8242_v55, %s8845_s8  ;;  %v5837_v57 = vrot.slane %v12234_v40, 7 }
 0x4b9   : > { %v12236_v16 = vpop.f32.mrb[72].mxu1  ;;  %5593 = vrot.lane.b32.xlu1 %v4147_v11, %s8845_s8  ;;  %v12241_v55 = vsel %vm2046_vm2, %v5326_v24, %v5327_v17 }
 0x4ba   : > { %14952 = vst [vmem:[#allocation68_spill] sm:$0xff] %v12241_v55  ;;  %v5330_v50 = vrot.slane %v12236_v16, 7  ;;  %v12245_v9 = vpop.f32.mrb[73].mxu1  ;;  %v12248_v20 = vpop.f32.mrb[118].mxu0  ;;  %v12255_v35 = vsel %vm2046_vm2, %v5837_v57, %v5838_v25 }
 0x4bb   : > { %v5329_v48 = vrot.slane %v12245_v9, 7  ;;  %14953 = vst [vmem:[#allocation78_spill] sm:$0xff] %v12255_v35  ;;  %v12257_v24 = vpop.f32.mrb[119].mxu0  ;;  %v12275_v57 = vpop.permute.xlu0 %3606  ;;  %v5840_v0 = vrot.slane %v12248_v20, 7 }
 0x4bc   : > { %5439 = vrot.lane.b32.xlu0 %v4147_v11, %s8846_s23  ;;  %v5839_v1 = vrot.slane %v12257_v24, 7  ;;  %14956 = vst [vmem:[#allocation132_spill] sm:$0xff] %v12275_v57  ;;  %v12301_v55 = vpop.permute.xlu1 %5561 }
 0x4bd   : > { %v12259_v12 = vpop.f32.mrb[74].mxu1  ;;  %5949 = vrot.lane.b32.xlu1 %v12148_v44, %s8846_s23  ;;  %v12265_v18 = vsel %vm2046_vm2, %v5329_v48, %v5330_v50  ;;  %v12269_v11 = vsel %vm2046_vm2, %v5328_v10, %v5329_v48 }
 0x4be   : > { %14954 = vst [vmem:[#allocation84_spill] sm:$0xff] %v12265_v18  ;;  %14955 = vst [vmem:[#allocation127_spill] sm:$0xff] %v12269_v11  ;;  %v5332_v56 = vrot.slane %v12259_v12, 7  ;;  %v12273_v17 = vpop.f32.mrb[75].mxu1  ;;  %v12279_v35 = vpop.f32.mrb[120].mxu0  ;;  %v12285_v10 = vsel %vm2046_vm2, %v5838_v25, %v5839_v1 }
 0x4bf   : > { %v5331_v41 = vrot.slane %v12273_v17, 7  ;;  %14957 = vst [vmem:[#allocation133_spill] sm:$0xff] %v12285_v10  ;;  %v5842_v50 = vrot.slane %v12279_v35, 7  ;;  %v12288_v48 = vpop.f32.mrb[121].mxu0  ;;  %v12303_v25 = vpop.permute.xlu0 %5419 }
 0x4c0   : > { %6103 = vrot.lane.b32.xlu0 %v12148_v44, %s8845_s8  ;;  %v5841_v11 = vrot.slane %v12288_v48, 7 }
 0x4c1   : > { %v12290_v18 = vpop.f32.mrb[76].mxu1  ;;  %6101 = vrot.lane.b32.xlu1 %v12160_v4, %s8845_s8  ;;  %v12296_v57 = vsel %vm2046_vm2, %v5331_v41, %v5332_v56 }
 0x4c2   : > { %14958 = vst [vmem:[#allocation81_spill] sm:$0xff] %v12296_v57  ;;  %v12299_v44 = vpop.f32.mrb[77].mxu1  ;;  %v12306_v10 = vpop.f32.mrb[122].mxu0  ;;  %v12312_v4 = vsel %vm2046_vm2, %v5841_v11, %v5842_v50  ;;  %v12316_v41 = vsel %vm2046_vm2, %v5840_v0, %v5841_v11  ;;  %v5334_v57 = vrot.slane %v12290_v18, 7 }
 0x4c3   : > { %v5333_v1 = vrot.slane %v12299_v44, 7  ;;  %14959 = vst [vmem:[#allocation92_spill] sm:$0xff] %v12312_v4  ;;  %14960 = vst [vmem:[#allocation130_spill] sm:$0xff] %v12316_v41  ;;  %v5844_v8 = vrot.slane %v12306_v10, 7  ;;  %v12320_v51 = vpop.f32.mrb[123].mxu0  ;;  %v12334_v4 = vpop.permute.xlu0 %5563 }
 0x4c4   : > { %5443 = vrot.lane.b32.xlu0 %v12167_v36, %s8846_s23  ;;  %v5843_v50 = vrot.slane %v12320_v51, 7 }
 0x4c5   : > { %v12322_v63 = vpop.f32.mrb[78].mxu1  ;;  %5441 = vrot.lane.b32.xlu1 %v12171_v6, %s8846_s23  ;;  %v12328_v53 = vsel %vm2046_vm2, %v5332_v56, %v5333_v1 }
 0x4c6   : > { %14961 = vst [vmem:[#allocation88_spill] sm:$0xff] %v12328_v53  ;;  %v5336_v0 = vrot.slane %v12322_v63, 7  ;;  %v12332_v11 = vpop.f32.mrb[79].mxu1  ;;  %v12337_v62 = vpop.permute.xlu1 %5421  ;;  %v12345_v56 = vsel %vm2046_vm2, %v5843_v50, %v5844_v8 }
 0x4c7   : > { %v5335_v41 = vrot.slane %v12332_v11, 7  ;;  %v12339_v49 = vpop.f32.mrb[124].mxu0  ;;  %14963 = vst [vmem:[#allocation131_spill] sm:$0xff] %v12345_v56 }
 0x4c8   : > { %14962 = vst [vmem:[#allocation107_spill] sm:$0xff] %v12339_v49  ;;  %5599 = vrot.lane.b32.xlu0 %v12167_v36, %s8845_s8  ;;  %v12347_v1 = vpop.f32.mrb[125].mxu0  ;;  %v5846_v58 = vrot.slane %v12339_v49, 7 }
 0x4c9   : > { %14964 = vst [vmem:[#allocation99_spill] sm:$0xff] %v12347_v1  ;;  %v12349_v53 = vpop.f32.mrb[80].mxu1  ;;  %5597 = vrot.lane.b32.xlu1 %v12171_v6, %s8845_s8  ;;  %v12355_v46 = vsel %vm2046_vm2, %v5335_v41, %v5336_v0  ;;  %v12359_v14 = vsel %vm2046_vm2, %v5334_v57, %v5335_v41  ;;  %v5845_v36 = vrot.slane %v12347_v1, 7 }
 0x4ca   : > { %14965 = vst [vmem:[#allocation98_spill] sm:$0xff] %v12355_v46  ;;  %14966 = vst [vmem:[#allocation115_spill] sm:$0xff] %v12359_v14  ;;  %v5338_v50 = vrot.slane %v12349_v53, 7  ;;  %v12363_v56 = vpop.f32.mrb[81].mxu1  ;;  %v12367_v31 = vpop.f32.mrb[126].mxu0 }
 0x4cb   : > { %14967 = vst [vmem:[#allocation116_spill] sm:$0xff] %v12363_v56  ;;  %v5337_v52 = vrot.slane %v12363_v56, 7  ;;  %14968 = vst [vmem:[#allocation113_spill] sm:$0xff] %v12367_v31  ;;  %v12373_v6 = vsel %vm2046_vm2, %v5844_v8, %v5845_v36  ;;  %v5848_v57 = vrot.slane %v12367_v31, 7  ;;  %v12376_v41 = vpop.f32.mrb[127].mxu0  ;;  %v12386_v14 = vpop.permute.xlu0 %5567 }
 0x4cc   : > { %6107 = vrot.lane.b32.xlu0 %v12174_v39, %s8845_s8  ;;  %14969 = vst [vmem:[#allocation118_spill] sm:$0xff] %v12373_v6  ;;  %14970 = vst [vmem:[#allocation117_spill] sm:$0xff] %v12376_v41  ;;  %v5847_v39 = vrot.slane %v12376_v41, 7  ;;  %v12391_v8 = vpop.permute.xlu1 %5565 }
 0x4cd   : > { %v12378_v0 = vpop.f32.mrb[82].mxu1  ;;  %5445 = vrot.lane.b32.xlu1 %v12184_v47, %s8846_s23  ;;  %v12384_v46 = vsel %vm2046_vm2, %v5337_v52, %v5338_v50 }
 0x4ce   : > { %14971 = vst [vmem:[#allocation121_spill] sm:$0xff] %v12378_v0  ;;  %14972 = vst [vmem:[#allocation120_spill] sm:$0xff] %v12384_v46  ;;  %v12389_v49 = vpop.f32.mrb[83].mxu1  ;;  %v12394_v6 = vpop.f32.mrb[128].mxu0  ;;  %v12400_v23 = vsel %vm2046_vm2, %v5847_v39, %v5848_v57  ;;  %v12404_v52 = vsel %vm2046_vm2, %v5846_v58, %v5847_v39  ;;  %v5340_v46 = vrot.slane %v12378_v0, 7 }
 0x4cf   : > { %14973 = vst [vmem:[#allocation119_spill] sm:$0xff] %v12389_v49  ;;  %v5339_v36 = vrot.slane %v12389_v49, 7  ;;  %14974 = vst [vmem:[#allocation128_spill] sm:$0xff] %v12394_v6  ;;  %v5850_v41 = vrot.slane %v12394_v6, 7  ;;  %v12408_v37 = vpop.f32.mrb[129].mxu0 }
 0x4d0   : > { %5603 = vrot.lane.b32.xlu0 %v12184_v47, %s8845_s8  ;;  %14975 = vst [vmem:[#allocation129_spill] sm:$0xff] %v12400_v23  ;;  %14976 = vst [vmem:[#allocation122_spill] sm:$0xff] %v12404_v52  ;;  %v5849_v57 = vrot.slane %v12408_v37, 7 }
 0x4d1   : > { %14977 = vst [vmem:[#allocation136_spill] sm:$0xff] %v12408_v37  ;;  %v12410_v49 = vpop.f32.mrb[84].mxu1  ;;  %6105 = vrot.lane.b32.xlu1 %v12181_v43, %s8845_s8  ;;  %v12416_v47 = vsel %vm2046_vm2, %v5338_v50, %v5339_v36 }
 0x4d2   : > { %14978 = vst [vmem:[#allocation134_spill] sm:$0xff] %v12410_v49  ;;  %14979 = vst [vmem:[#allocation142_spill] sm:$0xff] %v12416_v47  ;;  %v5342_v58 = vrot.slane %v12410_v49, 7  ;;  %v12420_v39 = vpop.f32.mrb[85].mxu1  ;;  %v12422_v23 = vpop.permute.xlu0 %5931  ;;  %v12433_v50 = vsel %vm2046_vm2, %v5849_v57, %v5850_v41 }
 0x4d3   : > { %14980 = vst [vmem:[#allocation139_spill] sm:$0xff] %v12420_v39  ;;  %v5341_v52 = vrot.slane %v12420_v39, 7  ;;  %v12425_v6 = vpop.permute.xlu1 %5929  ;;  %v12427_v0 = vpop.f32.mrb[130].mxu0  ;;  %14982 = vst [vmem:[#allocation152_spill] sm:$0xff] %v12433_v50 }
 0x4d4   : > { %14981 = vst [vmem:[#allocation137_spill] sm:$0xff] %v12427_v0  ;;  %5951 = vrot.lane.b32.xlu0 %v12181_v43, %s8846_s23  ;;  %v12435_v36 = vpop.f32.mrb[131].mxu0 }
 0x4d5   : > { %14983 = vst [vmem:[#allocation153_spill] sm:$0xff] %v12435_v36  ;;  %v12437_v47 = vpop.f32.mrb[86].mxu1  ;;  %5601 = vrot.lane.b32.xlu1 %v12196_v34, %s8845_s8  ;;  %v12443_v37 = vsel %vm2046_vm2, %v5341_v52, %v5342_v58  ;;  %v12447_v39 = vsel %vm2046_vm2, %v5340_v46, %v5341_v52  ;;  %v5851_v43 = vrot.slane %v12435_v36, 7  ;;  %v5852_v34 = vrot.slane %v12427_v0, 7 }
 0x4d6   : > { %14984 = vst [vmem:[#allocation141_spill] sm:$0xff] %v12437_v47  ;;  %14985 = vst [vmem:[#allocation73_spill] sm:$0xff] %v12443_v37  ;;  %v5344_v57 = vrot.slane %v12437_v47, 7  ;;  %v12451_v50 = vpop.f32.mrb[87].mxu1  ;;  %v12453_v49 = vpop.permute.xlu0 %6075 }
 0x4d7   : > { %14986 = vst [vmem:[#allocation123_spill] sm:$0xff] %v12447_v39  ;;  %14987 = vst [vmem:[#allocation145_spill] sm:$0xff] %v12451_v50  ;;  %v5343_v56 = vrot.slane %v12451_v50, 7  ;;  %v12456_v31 = vpop.permute.xlu1 %6073  ;;  %v12459_v58 = vpop.f32.mrb[132].mxu0  ;;  %v12465_v46 = vsel %vm2046_vm2, %v5850_v41, %v5851_v43 }
 0x4d8   : > { %14988 = vst [vmem:[#allocation146_spill] sm:$0xff] %v12459_v58  ;;  %5955 = vrot.lane.b32.xlu0 %v12204_v30, %s8846_s23  ;;  %14989 = vst [vmem:[#allocation32_spill] sm:$0xff] %v12465_v46  ;;  %v5854_v52 = vrot.slane %v12459_v58, 7  ;;  %v12468_v37 = vpop.f32.mrb[133].mxu0 }
 0x4d9   : > { %14990 = vst [vmem:[#allocation135_spill] sm:$0xff] %v12468_v37  ;;  %v12470_v39 = vpop.f32.mrb[88].mxu1  ;;  %5953 = vrot.lane.b32.xlu1 %v12208_v21, %s8846_s23  ;;  %v12476_v0 = vsel %vm2046_vm2, %v5343_v56, %v5344_v57  ;;  %v5853_v50 = vrot.slane %v12468_v37, 7 }
 0x4da   : > { %14991 = vst [vmem:[#allocation150_spill] sm:$0xff] %v12470_v39  ;;  %14992 = vst [vmem:[#allocation67_spill] sm:$0xff] %v12476_v0  ;;  %v12479_v36 = vpop.f32.mrb[89].mxu1  ;;  %v12481_v47 = vpop.permute.xlu0 %5571  ;;  %v5346_v0 = vrot.slane %v12470_v39, 7 }
 0x4db   : > { %14993 = vst [vmem:[#allocation74_spill] sm:$0xff] %v12479_v36  ;;  %v5345_v41 = vrot.slane %v12479_v36, 7  ;;  %v12484_v43 = vpop.permute.xlu1 %5569  ;;  %v12486_v46 = vpop.f32.mrb[134].mxu0  ;;  %v12492_v58 = vsel %vm2046_vm2, %v5853_v50, %v5854_v52  ;;  %v12496_v56 = vsel %vm2046_vm2, %v5852_v34, %v5853_v50 }
 0x4dc   : > { %14994 = vst [vmem:[#allocation76_spill] sm:$0xff] %v12486_v46  ;;  %6111 = vrot.lane.b32.xlu0 %v12204_v30, %s8845_s8  ;;  %14995 = vst [vmem:[#allocation138_spill] sm:$0xff] %v12492_v58  ;;  %v5856_v37 = vrot.slane %v12486_v46, 7  ;;  %v12500_v36 = vpop.f32.mrb[135].mxu0 }
 0x4dd   : > { %14996 = vst [vmem:[#allocation140_spill] sm:$0xff] %v12496_v56  ;;  %14997 = vst [vmem:[#allocation155_spill] sm:$0xff] %v12500_v36  ;;  %v12502_v1 = vpop.f32.mrb[90].mxu1  ;;  %6109 = vrot.lane.b32.xlu1 %v12208_v21, %s8845_s8  ;;  %v12508_v30 = vsel %vm2046_vm2, %v5344_v57, %v5345_v41  ;;  %v5855_v52 = vrot.slane %v12500_v36, 7  ;;  %v5707_v56 = vrot.slane %v12391_v8, 1 }
 0x4de   : > { %14998 = vst [vmem:[#allocation26_spill] sm:$0xff] %v12502_v1  ;;  %14999 = vst [vmem:[#allocation34_spill] sm:$0xff] %v12508_v30  ;;  %v5348_v50 = vrot.slane %v12502_v1, 7  ;;  %v12512_v34 = vpop.f32.mrb[91].mxu1  ;;  %v12514_v58 = vpop.permute.xlu0 %5423 }
 0x4df   : > { %15000 = vst [vmem:[#allocation148_spill] sm:$0xff] %v12512_v34  ;;  %v5347_v46 = vrot.slane %v12512_v34, 7  ;;  %v12518_v39 = vpop.permute.xlu1 %5933  ;;  %v12520_v42 = vpop.f32.mrb[136].mxu0  ;;  %v12526_v21 = vsel %vm2046_vm2, %v5855_v52, %v5856_v37  ;;  %v15008_v34 = vrot.slane %v12334_v4, 1 }
 0x4e0   : > { %15001 = vst [vmem:[#allocation40_spill] sm:$0xff] %v12520_v42  ;;  %5607 = vrot.lane.b32.xlu0 %v12210_v7, %s8845_s8  ;;  %15002 = vst [vmem:[#allocation156_spill] sm:$0xff] %v12526_v21  ;;  %v12529_v41 = vpop.f32.mrb[137].mxu0 }
 0x4e1   : > { %15003 = vst [vmem:[#allocation77_spill] sm:$0xff] %v12529_v41  ;;  %v12531_v30 = vpop.f32.mrb[92].mxu1  ;;  %5605 = vrot.lane.b32.xlu1 %v12218_v59, %s8845_s8  ;;  %v12537_v8 = vsel %vm2046_vm2, %v5347_v46, %v5348_v50  ;;  %v12541_v7 = vsel %vm2046_vm2, %v5346_v0, %v5347_v46  ;;  %v5857_v52 = vrot.slane %v12529_v41, 7  ;;  %v5783_v1 = vsel %vm2447_vm3, %v15008_v34, %v5707_v56 }
 0x4e2   : > { %15004 = vst [vmem:[#allocation80_spill] sm:$0xff] %v12531_v30  ;;  %15005 = vst [vmem:[#allocation30_spill] sm:$0xff] %v12537_v8  ;;  %v5350_v21 = vrot.slane %v12531_v30, 7  ;;  %v12545_v57 = vpop.f32.mrb[93].mxu1  ;;  %v12547_v36 = vpop.permute.xlu0 %6079  ;;  %v5858_v0 = vrot.slane %v12520_v42, 7  ;;  %v5514_v56 = vadd.f32 %v12303_v25, %v11634_v29  ;;  %v6026_v34 = vadd.f32 %v12422_v23, %v12042_v54 }
 0x4e3   : > { %15006 = vst [vmem:[#allocation35_spill] sm:$0xff] %v12541_v7  ;;  %15007 = vst [vmem:[#allocation82_spill] sm:$0xff] %v12545_v57  ;;  %v5349_v50 = vrot.slane %v12545_v57, 7  ;;  %v6078_v8 = vpop.permute.xlu1 %6077  ;;  %v12556_v7 = vpop.f32.mrb[138].mxu0  ;;  %v12562_v41 = vsel %vm2046_vm2, %v5856_v37, %v5857_v52  ;;  %v15012_v37 = vrot.slane %v12453_v49, 1 }
 0x4e4   : > { %v6219_v46 = vrot.slane %v6078_v8, 1  ;;  %15009 = vst [vmem:[#allocation38_spill] sm:$0xff] %v12556_v7  ;;  %5447 = vrot.lane.b32.xlu0 %v12218_v59, %s8846_s23  ;;  %15010 = vst [vmem:[#allocation45_spill] sm:$0xff] %v12562_v41  ;;  %v5860_v5 = vrot.slane %v12556_v7, 7  ;;  %v12569_v57 = vpop.f32.mrb[139].mxu0  ;;  %v5786_v41 = vadd.f32 %v5783_v1, %v5514_v56 }
 0x4e5   : > { %v12571_v8 = vpop.f32.mrb[94].mxu1  ;;  %5957 = vrot.lane.b32.xlu1 %v12221_v26, %s8846_s23  ;;  %v12577_v59 = vsel %vm2046_vm2, %v5349_v50, %v5350_v21  ;;  %v5859_v54 = vrot.slane %v12569_v57, 7  ;;  %v15014_v50 = vrot.slane %v11582_v3, 7 }
 0x4e6   : > { %15011 = vst [vmem:[#allocation86_spill] sm:$0xff] %v12577_v59  ;;  %v6295_v29 = vsel %vm2447_vm3, %v15012_v37, %v6219_v46  ;;  %v5352_v23 = vrot.slane %v12571_v8, 7  ;;  %v12585_v25 = vpop.f32.mrb[95].mxu1  ;;  %v12587_v52 = vpop.permute.xlu0 %5427 }
 0x4e7   : > { %15013 = vst [vmem:[#allocation44_spill] sm:$0xff] %v12585_v25  ;;  %v6298_v42 = vadd.f32 %v6295_v29, %v6026_v34  ;;  %v5351_v7 = vrot.slane %v12585_v25, 7  ;;  %v12590_v30 = vpop.permute.xlu1 %5425  ;;  %v12596_v46 = vpop.f32.mrb[140].mxu0  ;;  %v12602_v37 = vsel %vm2046_vm2, %v5859_v54, %v5860_v5  ;;  %v12606_v1 = vsel %vm2046_vm2, %v5858_v0, %v5859_v54 }
 0x4e8   : > { %v5384_v59 = vsel %vm2046_vm2, %v5352_v23, %v15014_v50  ;;  %15015 = vst [vmem:[#allocation87_spill] sm:$0xff] %v12596_v46  ;;  %6115 = vrot.lane.b32.xlu0 %v12221_v26, %s8845_s8  ;;  %15016 = vst [vmem:[#allocation42_spill] sm:$0xff] %v12602_v37  ;;  %v5862_v3 = vrot.slane %v12596_v46, 7  ;;  %v12611_v34 = vpop.f32.mrb[141].mxu0 }
 0x4e9   : > { %15017 = vst [vmem:[#allocation37_spill] sm:$0xff] %v12606_v1  ;;  %v12608_v56 = vadd.f32 %v6298_v42, %v5786_v41  ;;  %15019 = vst [vmem:[#allocation157_spill] sm:$0xff] %v12611_v34  ;;  %v12613_v29 = vpop.f32.mrb[96].mxu1  ;;  %6113 = vrot.lane.b32.xlu1 %v12234_v40, %s8845_s8  ;;  %v12619_v26 = vsel %vm2046_vm2, %v5350_v21, %v5351_v7  ;;  %v5861_v5 = vrot.slane %v12611_v34, 7  ;;  %v5705_v21 = vrot.slane %v12301_v55, 1 }
 0x4ea   : > { %15020 = vst [vmem:[#allocation50_spill] sm:$0xff] %v12613_v29  ;;  %15021 = vst [vmem:[#allocation90_spill] sm:$0xff] %v12619_v26  ;;  %v6362_v0 = vrot.slane %v12613_v29, 7  ;;  %v12623_v54 = vpop.f32.mrb[97].mxu1  ;;  %v12625_v42 = vpop.permute.xlu0 %5575  ;;  %v6217_v7 = vrot.slane %v12456_v31, 1  ;;  %v15027_v34 = vrot.slane %v12029_v13, 7 }
 0x4eb   : > { %15018 = vst [vmem:[#allocation47_spill] sm:$0xff] %v12608_v56  ;;  %v12628_v23 = vpop.permute.xlu1 %5573  ;;  %v12630_v50 = vpop.f32.mrb[142].mxu0  ;;  %v12636_v40 = vsel %vm2046_vm2, %v5861_v5, %v5862_v3  ;;  %v15024_v37 = vrot.slane %v12623_v54, 7  ;;  %v5513_v5 = vadd.f32 %v12251_v33, %v5384_v59 }
 0x4ec   : > { %15022 = vst [vmem:[#allocation27_spill] sm:$0xff] %v12630_v50  ;;  %5451 = vrot.lane.b32.xlu0 %v12236_v16, %s8846_s23  ;;  %15023 = vst [vmem:[#allocation158_spill] sm:$0xff] %v12636_v40  ;;  %v5864_v56 = vrot.slane %v12630_v50, 7  ;;  %v12641_v26 = vpop.f32.mrb[143].mxu0  ;;  %v5709_v50 = vrot.slane %v12484_v43, 1  ;;  %v15029_v43 = vrot.slane %v12334_v4, 1 }
 0x4ed   : > { %v12643_v41 = vpop.f32.mrb[98].mxu1  ;;  %5449 = vrot.lane.b32.xlu1 %v12245_v9, %s8846_s23  ;;  %v12651_v1 = vsel %vm2046_vm2, %v15024_v37, %v6362_v0  ;;  %v5863_v55 = vrot.slane %v12641_v26, 7  ;;  %v5710_v4 = vrot.slane %v12481_v47, 1 }
 0x4ee   : > { %15025 = vst [vmem:[#allocation100_spill] sm:$0xff] %v12651_v1  ;;  %v6364_v31 = vrot.slane %v12643_v41, 7  ;;  %v12656_v40 = vpop.f32.mrb[99].mxu1  ;;  %v6084_v29 = vpop.permute.xlu0 %6083  ;;  %v5896_v46 = vsel %vm2046_vm2, %v5864_v56, %v15027_v34  ;;  %v5784_v13 = vsel %vm2447_vm3, %v5705_v21, %v15029_v43  ;;  %v5708_v56 = vrot.slane %v12386_v14, 1 }
 0x4ef   : > { %15026 = vst [vmem:[#allocation46_spill] sm:$0xff] %v12656_v40  ;;  %v6363_v25 = vrot.slane %v12656_v40, 7  ;;  %v12664_v37 = vpop.permute.xlu1 %5429  ;;  %v6025_v33 = vadd.f32 %v12425_v6, %v5896_v46  ;;  %v12671_v59 = vsel %vm2046_vm2, %v5862_v3, %v5863_v55  ;;  %v15030_v34 = vrot.slane %v12453_v49, 1 }
 0x4f0   : > { %5611 = vrot.lane.b32.xlu0 %v12236_v16, %s8845_s8  ;;  %15028 = vst [vmem:[#allocation101_spill] sm:$0xff] %v12671_v59  ;;  %v5785_v46 = vadd.f32 %v5784_v13, %v5513_v5  ;;  %v5782_v49 = vsel %vm2447_vm3, %v5708_v56, %v5709_v50  ;;  %v5515_v5 = vadd.f32 %v12337_v62, %v12017_v61 }
 0x4f1   : > { %v6296_v0 = vsel %vm2447_vm3, %v6217_v7, %v15030_v34  ;;  %v12682_v6 = vpop.f32.mrb[100].mxu1  ;;  %5609 = vrot.lane.b32.xlu1 %v12245_v9, %s8845_s8  ;;  %v12688_v16 = vsel %vm2046_vm2, %v6363_v25, %v6364_v31  ;;  %v5516_v9 = vadd.f32 %v12514_v58, %v12047_v19  ;;  %v6220_v25 = vrot.slane %v12547_v36, 1 }
 0x4f2   : > { %15031 = vst [vmem:[#allocation52_spill] sm:$0xff] %v12682_v6  ;;  %15032 = vst [vmem:[#allocation154_spill] sm:$0xff] %v12688_v16  ;;  %v6297_v3 = vadd.f32 %v6296_v0, %v6025_v33  ;;  %v12691_v21 = vpop.f32.mrb[101].mxu1  ;;  %v12693_v14 = vpop.permute.xlu0 %5579  ;;  %v6027_v33 = vadd.f32 %v12518_v39, %v12067_v38  ;;  %v6366_v13 = vrot.slane %v12682_v6, 7  ;;  %v6222_v36 = vrot.slane %v6084_v29, 1  ;;  %v15065_v16 = vld [vmem:[#allocation106_spill] sm:$0xff] }
 0x4f3   : > { %v6365_v7 = vrot.slane %v12691_v21, 7  ;;  %v6082_v55 = vpop.permute.xlu1 %6081  ;;  %v5787_v58 = vadd.f32 %v5782_v49, %v5515_v5 }
 0x4f4   : > { %v6221_v43 = vrot.slane %v6082_v55, 1  ;;  %6119 = vrot.lane.b32.xlu0 %v12248_v20, %s8845_s8  ;;  %v12703_v47 = vadd.f32 %v6297_v3, %v5785_v46  ;;  %v5781_v20 = vsel %vm2447_vm3, %v5709_v50, %v5710_v4 }
 0x4f5   : > { %v12710_v56 = vpop.f32.mrb[102].mxu1  ;;  %5453 = vrot.lane.b32.xlu1 %v12259_v12, %s8846_s23  ;;  %v12716_v19 = vsel %vm2046_vm2, %v6364_v31, %v6365_v7  ;;  %v5788_v3 = vadd.f32 %v5781_v20, %v5516_v9  ;;  %v5711_v20 = vrot.slane %v12628_v23, 1 }
 0x4f6   : > { %15033 = vst [vmem:[#allocation159_spill] sm:$0xff] %v12703_v47  ;;  %15034 = vst [vmem:[#allocation58_spill] sm:$0xff] %v12716_v19  ;;  %v6294_v61 = vsel %vm2447_vm3, %v6220_v25, %v6221_v43  ;;  %v6368_v38 = vrot.slane %v12710_v56, 7  ;;  %v12723_v62 = vpop.f32.mrb[103].mxu1  ;;  %v5936_v39 = vpop.permute.xlu0 %5935  ;;  %v6293_v29 = vsel %vm2447_vm3, %v6221_v43, %v6222_v36 }
 0x4f7   : > { %v6299_v34 = vadd.f32 %v6294_v61, %v6027_v33  ;;  %v6367_v0 = vrot.slane %v12723_v62, 7  ;;  %v6028_v46 = vadd.f32 %v5936_v39, %v12082_v2  ;;  %v12727_v31 = vpop.permute.xlu1 %5577  ;;  %v5712_v33 = vrot.slane %v12625_v42, 1 }
 0x4f8   : > { %5615 = vrot.lane.b32.xlu0 %v12259_v12, %s8845_s8 }
 0x4f9   : > { %v12733_v50 = vadd.f32 %v6299_v34, %v5787_v58  ;;  %v6300_v4 = vadd.f32 %v6293_v29, %v6028_v46  ;;  %v12735_v7 = vpop.f32.mrb[104].mxu1  ;;  %6117 = vrot.lane.b32.xlu1 %v12257_v24, %s8845_s8  ;;  %v12741_v2 = vsel %vm2046_vm2, %v6366_v13, %v6367_v0  ;;  %v12745_v49 = vsel %vm2046_vm2, %v6367_v0, %v6368_v38 }
 0x4fa   : > { %15036 = vst [vmem:[#allocation63_spill] sm:$0xff] %v12741_v2  ;;  %15037 = vst [vmem:[#allocation57_spill] sm:$0xff] %v12745_v49  ;;  %v6370_v55 = vrot.slane %v12735_v7, 7  ;;  %v12748_v9 = vpop.f32.mrb[105].mxu1  ;;  %v5940_v12 = vpop.permute.xlu0 %5939  ;;  %v5780_v23 = vsel %vm2447_vm3, %v5711_v20, %v5712_v33 }
 0x4fb   : > { %15035 = vst [vmem:[#allocation160_spill] sm:$0xff] %v12733_v50  ;;  %15038 = vst [vmem:[#allocation54_spill] sm:$0xff] %v12748_v9  ;;  %v12750_v25 = vadd.f32 %v6300_v4, %v5788_v3  ;;  %v6369_v43 = vrot.slane %v12748_v9, 7  ;;  %v5938_v5 = vpop.permute.xlu1 %5937  ;;  %v15060_v50 = vld [vmem:[#allocation103_spill] sm:$0xff] }
 0x4fc   : > { %5959 = vrot.lane.b32.xlu0 %v12257_v24, %s8846_s23  ;;  %v6029_v34 = vadd.f32 %v5938_v5, %v12104_v22 }
 0x4fd   : > { %15039 = vst [vmem:[#allocation143_spill] sm:$0xff] %v12750_v25  ;;  %v12757_v13 = vpop.f32.mrb[106].mxu1  ;;  %5613 = vrot.lane.b32.xlu1 %v12273_v17, %s8845_s8  ;;  %v12763_v36 = vsel %vm2046_vm2, %v6369_v43, %v6370_v55  ;;  %v5517_v17 = vadd.f32 %v12590_v30, %v12076_v15 }
 0x4fe   : > { %15040 = vst [vmem:[#allocation59_spill] sm:$0xff] %v12757_v13  ;;  %15041 = vst [vmem:[#allocation95_spill] sm:$0xff] %v12763_v36  ;;  %v12765_v61 = vpop.f32.mrb[107].mxu1  ;;  %v6088_v38 = vpop.permute.xlu0 %6087  ;;  %v6372_v0 = vrot.slane %v12757_v13, 7 }
 0x4ff   : > { %v6371_v39 = vrot.slane %v12765_v61, 7  ;;  %v6224_v42 = vrot.slane %v6088_v38, 1  ;;  %v6086_v58 = vpop.permute.xlu1 %6085  ;;  %v5789_v22 = vadd.f32 %v5780_v23, %v5517_v17 }
 0x500   : > { %v6223_v24 = vrot.slane %v6086_v58, 1  ;;  %5963 = vrot.lane.b32.xlu0 %v12279_v35, %s8846_s23 }
 0x501   : > { %v12776_v46 = vpop.f32.mrb[108].mxu1  ;;  %5961 = vrot.lane.b32.xlu1 %v12288_v48, %s8846_s23  ;;  %v12782_v3 = vsel %vm2046_vm2, %v6370_v55, %v6371_v39 }
 0x502   : > { %15042 = vst [vmem:[#allocation144_spill] sm:$0xff] %v12782_v3  ;;  %v6292_v29 = vsel %vm2447_vm3, %v6223_v24, %v6224_v42  ;;  %v6374_v4 = vrot.slane %v12776_v46, 7  ;;  %v12787_v43 = vpop.f32.mrb[109].mxu1  ;;  %v12789_v15 = vpop.permute.xlu0 %5583 }
 0x503   : > { %v6301_v30 = vadd.f32 %v6292_v29, %v6029_v34  ;;  %v6373_v5 = vrot.slane %v12787_v43, 7  ;;  %v12792_v20 = vpop.permute.xlu1 %5581 }
 0x504   : > { %6123 = vrot.lane.b32.xlu0 %v12279_v35, %s8845_s8 }
 0x505   : > { %v12796_v55 = vadd.f32 %v6301_v30, %v5789_v22  ;;  %v12798_v38 = vpop.f32.mrb[110].mxu1  ;;  %6121 = vrot.lane.b32.xlu1 %v12288_v48, %s8845_s8  ;;  %v12804_v39 = vsel %vm2046_vm2, %v6372_v0, %v6373_v5  ;;  %v12808_v58 = vsel %vm2046_vm2, %v6373_v5, %v6374_v4  ;;  %v5713_v48 = vrot.slane %v12727_v31, 1 }
 0x506   : > { %15044 = vst [vmem:[#allocation49_spill] sm:$0xff] %v12804_v39  ;;  %15045 = vst [vmem:[#allocation56_spill] sm:$0xff] %v12808_v58  ;;  %v6376_v23 = vrot.slane %v12798_v38, 7  ;;  %v12811_v24 = vpop.f32.mrb[111].mxu1  ;;  %v12813_v35 = vpop.permute.xlu0 %5431  ;;  %v5518_v58 = vadd.f32 %v12587_v52, %v12072_v32 }
 0x507   : > { %15043 = vst [vmem:[#allocation96_spill] sm:$0xff] %v12796_v55  ;;  %15046 = vst [vmem:[#allocation33_spill] sm:$0xff] %v12811_v24  ;;  %v6375_v17 = vrot.slane %v12811_v24, 7  ;;  %v12816_v34 = vpop.permute.xlu1 %5941  ;;  %v5779_v31 = vsel %vm2447_vm3, %v5712_v33, %v5713_v48  ;;  %v5520_v2 = vadd.f32 %v12813_v35, %v12109_v45 }
 0x508   : > { %5619 = vrot.lane.b32.xlu0 %v12290_v18, %s8845_s8 }
 0x509   : > { %v12821_v0 = vpop.f32.mrb[112].mxu1  ;;  %5617 = vrot.lane.b32.xlu1 %v12299_v44, %s8845_s8  ;;  %v12827_v29 = vsel %vm2046_vm2, %v6375_v17, %v6376_v23  ;;  %v6030_v17 = vadd.f32 %v5940_v12, %v12100_v60  ;;  %v5790_v60 = vadd.f32 %v5779_v31, %v5518_v58 }
 0x50a   : > { %15047 = vst [vmem:[#allocation147_spill] sm:$0xff] %v12821_v0  ;;  %15048 = vst [vmem:[#allocation151_spill] sm:$0xff] %v12827_v29  ;;  %v12829_v4 = vpop.f32.mrb[113].mxu1  ;;  %v12831_v22 = vpop.permute.xlu0 %6091  ;;  %v6378_v29 = vrot.slane %v12821_v0, 7 }
 0x50b   : > { %v6377_v30 = vrot.slane %v12829_v4, 7  ;;  %v6090_v5 = vpop.permute.xlu1 %6089 }
 0x50c   : > { %v6225_v18 = vrot.slane %v6090_v5, 1  ;;  %5455 = vrot.lane.b32.xlu0 %v12299_v44, %s8846_s23 }
 0x50d   : > { %v12842_v39 = vpop.f32.mrb[114].mxu1  ;;  %5965 = vrot.lane.b32.xlu1 %v12306_v10, %s8846_s23  ;;  %v12848_v3 = vsel %vm2046_vm2, %v6376_v23, %v6377_v30 }
 0x50e   : > { %15049 = vst [vmem:[#allocation102_spill] sm:$0xff] %v12848_v3  ;;  %v6291_v33 = vsel %vm2447_vm3, %v6224_v42, %v6225_v18  ;;  %v6380_v44 = vrot.slane %v12842_v39, 7  ;;  %v12853_v48 = vpop.f32.mrb[115].mxu1  ;;  %v12855_v32 = vpop.permute.xlu0 %5435 }
 0x50f   : > { %v6302_v52 = vadd.f32 %v6291_v33, %v6030_v17  ;;  %v6379_v12 = vrot.slane %v12853_v48, 7  ;;  %v12858_v5 = vpop.permute.xlu1 %5433 }
 0x510   : > { %6127 = vrot.lane.b32.xlu0 %v12306_v10, %s8845_s8 }
 0x511   : > { %v12862_v23 = vadd.f32 %v6302_v52, %v5790_v60  ;;  %v12864_v30 = vpop.f32.mrb[116].mxu1  ;;  %6125 = vrot.lane.b32.xlu1 %v12320_v51, %s8845_s8  ;;  %v12870_v42 = vsel %vm2046_vm2, %v6378_v29, %v6379_v12  ;;  %v12874_v58 = vsel %vm2046_vm2, %v6379_v12, %v6380_v44 }
 0x512   : > { %15051 = vst [vmem:[#allocation161_spill] sm:$0xff] %v12870_v42  ;;  %15052 = vst [vmem:[#allocation162_spill] sm:$0xff] %v12874_v58  ;;  %v6382_v31 = vrot.slane %v12864_v30, 7  ;;  %v12877_v18 = vpop.f32.mrb[117].mxu1  ;;  %v12879_v10 = vpop.permute.xlu0 %5587  ;;  %v5715_v58 = vrot.slane %v12792_v20, 1 }
 0x513   : > { %15050 = vst [vmem:[#allocation65_spill] sm:$0xff] %v12862_v23  ;;  %15053 = vst [vmem:[#allocation163_spill] sm:$0xff] %v12877_v18  ;;  %v6381_v17 = vrot.slane %v12877_v18, 7  ;;  %v12882_v33 = vpop.permute.xlu1 %5585  ;;  %v5714_v23 = vrot.slane %v12693_v14, 1 }
 0x514   : > { %5459 = vrot.lane.b32.xlu0 %v12322_v63, %s8846_s23 }
 0x515   : > { %v12886_v51 = vpop.f32.mrb[118].mxu1  ;;  %5457 = vrot.lane.b32.xlu1 %v12332_v11, %s8846_s23  ;;  %v12892_v29 = vsel %vm2046_vm2, %v6381_v17, %v6382_v31 }
 0x516   : > { %15054 = vst [vmem:[#allocation164_spill] sm:$0xff] %v12886_v51  ;;  %15055 = vst [vmem:[#allocation165_spill] sm:$0xff] %v12892_v29  ;;  %v12894_v44 = vpop.f32.mrb[119].mxu1  ;;  %v6096_v60 = vpop.permute.xlu0 %6095  ;;  %v6384_v42 = vrot.slane %v12886_v51, 7  ;;  %v15098_v51 = vld [vmem:[#allocation139_spill] sm:$0xff] }
 0x517   : > { %15056 = vst [vmem:[#allocation166_spill] sm:$0xff] %v12894_v44  ;;  %v6383_v52 = vrot.slane %v12894_v44, 7  ;;  %v12897_v12 = vpop.permute.xlu1 %5437 }
 0x518   : > { %5623 = vrot.lane.b32.xlu0 %v12322_v63, %s8845_s8  ;;  %v5519_v63 = vadd.f32 %v12664_v37, %v12090_v27  ;;  %v6031_v27 = vadd.f32 %v12816_v34, %v15060_v50 }
 0x519   : > { %v12903_v3 = vpop.f32.mrb[120].mxu1  ;;  %5621 = vrot.lane.b32.xlu1 %v12332_v11, %s8845_s8  ;;  %v12909_v17 = vsel %vm2046_vm2, %v6382_v31, %v6383_v52  ;;  %v5716_v11 = vrot.slane %v12789_v15, 1  ;;  %v5778_v31 = vsel %vm2447_vm3, %v5714_v23, %v5715_v58  ;;  %v6226_v52 = vrot.slane %v12831_v22, 1 }
 0x51a   : > { %15057 = vst [vmem:[#allocation167_spill] sm:$0xff] %v12903_v3  ;;  %15058 = vst [vmem:[#allocation168_spill] sm:$0xff] %v12909_v17  ;;  %v6386_v36 = vrot.slane %v12903_v3, 7  ;;  %v12913_v55 = vpop.f32.mrb[121].mxu1  ;;  %v12915_v20 = vpop.permute.xlu0 %5591  ;;  %v6228_v22 = vrot.slane %v6096_v60, 1  ;;  %v5791_v23 = vadd.f32 %v5778_v31, %v5519_v63  ;;  %v15066_v60 = vld [vmem:[#allocation99_spill] sm:$0xff] }
 0x51b   : > { %15059 = vst [vmem:[#allocation169_spill] sm:$0xff] %v12913_v55  ;;  %v6385_v49 = vrot.slane %v12913_v55, 7  ;;  %v6094_v25 = vpop.permute.xlu1 %6093 }
 0x51c   : > { %v6227_v14 = vrot.slane %v6094_v25, 1  ;;  %5627 = vrot.lane.b32.xlu0 %v12349_v53, %s8845_s8 }
 0x51d   : > { %v12930_v37 = vpop.f32.mrb[122].mxu1  ;;  %5461 = vrot.lane.b32.xlu1 %v12349_v53, %s8846_s23  ;;  %v12936_v15 = vsel %vm2046_vm2, %v6384_v42, %v6385_v49  ;;  %v12940_v25 = vsel %vm2046_vm2, %v6385_v49, %v6386_v36  ;;  %v5777_v49 = vsel %vm2447_vm3, %v5715_v58, %v5716_v11 }
 0x51e   : > { %15061 = vst [vmem:[#allocation103_spill] sm:$0xff] %v12930_v37  ;;  %15062 = vst [vmem:[#allocation170_spill] sm:$0xff] %v12936_v15  ;;  %v6290_v45 = vsel %vm2447_vm3, %v6226_v52, %v6227_v14  ;;  %v6388_v35 = vrot.slane %v12930_v37, 7  ;;  %v12945_v50 = vpop.f32.mrb[123].mxu1  ;;  %v5944_v34 = vpop.permute.xlu0 %5943  ;;  %v6289_v36 = vsel %vm2447_vm3, %v6227_v14, %v6228_v22  ;;  %v5792_v52 = vadd.f32 %v5777_v49, %v5520_v2 }
 0x51f   : > { %15063 = vst [vmem:[#allocation171_spill] sm:$0xff] %v12940_v25  ;;  %15064 = vst [vmem:[#allocation172_spill] sm:$0xff] %v12945_v50  ;;  %v6303_v19 = vadd.f32 %v6290_v45, %v6031_v27  ;;  %v6387_v53 = vrot.slane %v12945_v50, 7  ;;  %v6032_v42 = vadd.f32 %v5944_v34, %v15065_v16  ;;  %v12949_v47 = vpop.permute.xlu1 %5589  ;;  %v5717_v22 = vrot.slane %v12882_v33, 1  ;;  %v15072_v45 = vld [vmem:[#allocation113_spill] sm:$0xff] }
 0x520   : > { %5967 = vrot.lane.b32.xlu0 %v15066_v60, %s8846_s23  ;;  %v15081_v25 = vld [vmem:[#allocation117_spill] sm:$0xff] }
 0x521   : > { %v12957_v1 = vadd.f32 %v6303_v19, %v5791_v23  ;;  %v6304_v63 = vadd.f32 %v6289_v36, %v6032_v42  ;;  %v12959_v31 = vpop.f32.mrb[124].mxu1  ;;  %6129 = vrot.lane.b32.xlu1 %v15066_v60, %s8845_s8  ;;  %v12965_v16 = vsel %vm2046_vm2, %v6387_v53, %v6388_v35  ;;  %v5718_v19 = vrot.slane %v12879_v10, 1  ;;  %v15074_v53 = vld [vmem:[#allocation116_spill] sm:$0xff]  ;;  %v15095_v50 = vld [vmem:[#allocation69_spill] sm:$0xff] }
 0x522   : > { %15068 = vst [vmem:[#allocation99_spill] sm:$0xff] %v12959_v31  ;;  %15069 = vst [vmem:[#allocation173_spill] sm:$0xff] %v12965_v16  ;;  %v12967_v58 = vpop.f32.mrb[125].mxu1  ;;  %v5948_v11 = vpop.permute.xlu0 %5947  ;;  %v6390_v34 = vrot.slane %v12959_v31, 7  ;;  %v5522_v59 = vadd.f32 %v12855_v32, %v15095_v50 }
 0x523   : > { %15067 = vst [vmem:[#allocation106_spill] sm:$0xff] %v12957_v1  ;;  %15070 = vst [vmem:[#allocation174_spill] sm:$0xff] %v12967_v58  ;;  %v12969_v14 = vadd.f32 %v6304_v63, %v5792_v52  ;;  %v6389_v27 = vrot.slane %v12967_v58, 7  ;;  %v5946_v2 = vpop.permute.xlu1 %5945  ;;  %v5776_v63 = vsel %vm2447_vm3, %v5717_v22, %v5718_v19  ;;  %v15077_v1 = vld [vmem:[#allocation121_spill] sm:$0xff] }
 0x524   : > { %5971 = vrot.lane.b32.xlu0 %v15072_v45, %s8846_s23 }
 0x525   : > { %15071 = vst [vmem:[#allocation175_spill] sm:$0xff] %v12969_v14  ;;  %v12977_v23 = vpop.f32.mrb[126].mxu1  ;;  %5625 = vrot.lane.b32.xlu1 %v15074_v53, %s8845_s8  ;;  %v12983_v42 = vsel %vm2046_vm2, %v6388_v35, %v6389_v27  ;;  %v15078_v53 = vld [vmem:[#allocation105_spill] sm:$0xff]  ;;  %v15079_v27 = vld [vmem:[#allocation110_spill] sm:$0xff] }
 0x526   : > { %15073 = vst [vmem:[#allocation113_spill] sm:$0xff] %v12977_v23  ;;  %15075 = vst [vmem:[#allocation116_spill] sm:$0xff] %v12983_v42  ;;  %v6392_v49 = vrot.slane %v12977_v23, 7  ;;  %v12986_v36 = vpop.f32.mrb[127].mxu1  ;;  %v6100_v10 = vpop.permute.xlu0 %6099  ;;  %v5521_v35 = vadd.f32 %v12858_v5, %v15078_v53  ;;  %v6033_v42 = vadd.f32 %v5946_v2, %v15079_v27 }
 0x527   : > { %15076 = vst [vmem:[#allocation176_spill] sm:$0xff] %v12986_v36  ;;  %v6391_v33 = vrot.slane %v12986_v36, 7  ;;  %v6230_v60 = vrot.slane %v6100_v10, 1  ;;  %v6098_v52 = vpop.permute.xlu1 %6097 }
 0x528   : > { %v6229_v14 = vrot.slane %v6098_v52, 1  ;;  %5631 = vrot.lane.b32.xlu0 %v15077_v1, %s8845_s8  ;;  %v5793_v53 = vadd.f32 %v5776_v63, %v5521_v35 }
 0x529   : > { %v12996_v16 = vpop.f32.mrb[128].mxu1  ;;  %5969 = vrot.lane.b32.xlu1 %v15081_v25, %s8846_s23  ;;  %v13002_v10 = vsel %vm2046_vm2, %v6390_v34, %v6391_v33  ;;  %v13006_v22 = vsel %vm2046_vm2, %v6391_v33, %v6392_v49  ;;  %v15085_v34 = vld [vmem:[#allocation119_spill] sm:$0xff] }
 0x52a   : > { %15080 = vst [vmem:[#allocation121_spill] sm:$0xff] %v12996_v16  ;;  %15082 = vst [vmem:[#allocation105_spill] sm:$0xff] %v13002_v10  ;;  %v6288_v1 = vsel %vm2447_vm3, %v6229_v14, %v6230_v60  ;;  %v6394_v5 = vrot.slane %v12996_v16, 7  ;;  %v13011_v52 = vpop.f32.mrb[129].mxu1  ;;  %v13013_v2 = vpop.permute.xlu0 %5595 }
 0x52b   : > { %15083 = vst [vmem:[#allocation110_spill] sm:$0xff] %v13006_v22  ;;  %15084 = vst [vmem:[#allocation117_spill] sm:$0xff] %v13011_v52  ;;  %v6305_v27 = vadd.f32 %v6288_v1, %v6033_v42  ;;  %v6393_v15 = vrot.slane %v13011_v52, 7  ;;  %v13016_v17 = vpop.permute.xlu1 %5593  ;;  %v5722_v6 = vrot.slane %v13013_v2, 1 }
 0x52c   : > { %5463 = vrot.lane.b32.xlu0 %v15085_v34, %s8846_s23 }
 0x52d   : > { %v13020_v49 = vadd.f32 %v6305_v27, %v5793_v53  ;;  %v13022_v33 = vpop.f32.mrb[130].mxu1  ;;  %5629 = vrot.lane.b32.xlu1 %v15085_v34, %s8845_s8  ;;  %v13028_v14 = vsel %vm2046_vm2, %v6393_v15, %v6394_v5  ;;  %v5719_v53 = vrot.slane %v12949_v47, 1  ;;  %v15090_v27 = vld [vmem:[#allocation134_spill] sm:$0xff]  ;;  %v15092_v15 = vld [vmem:[#allocation128_spill] sm:$0xff] }
 0x52e   : > { %15087 = vst [vmem:[#allocation177_spill] sm:$0xff] %v13022_v33  ;;  %15088 = vst [vmem:[#allocation178_spill] sm:$0xff] %v13028_v14  ;;  %v13030_v63 = vpop.f32.mrb[131].mxu1  ;;  %v13032_v42 = vpop.permute.xlu0 %5439 }
 0x52f   : > { %15086 = vst [vmem:[#allocation119_spill] sm:$0xff] %v13020_v49  ;;  %15089 = vst [vmem:[#allocation179_spill] sm:$0xff] %v13030_v63  ;;  %v6395_v35 = vrot.slane %v13030_v63, 7  ;;  %v13035_v1 = vpop.permute.xlu1 %5949  ;;  %v6396_v49 = vrot.slane %v13022_v33, 7  ;;  %v5775_v33 = vsel %vm2447_vm3, %v5718_v19, %v5719_v53 }
 0x530   : > { %5467 = vrot.lane.b32.xlu0 %v15090_v27, %s8846_s23  ;;  %v5794_v53 = vadd.f32 %v5775_v33, %v5522_v59 }
 0x531   : > { %v13041_v34 = vpop.f32.mrb[132].mxu1  ;;  %5973 = vrot.lane.b32.xlu1 %v15092_v15, %s8846_s23  ;;  %v13047_v14 = vsel %vm2046_vm2, %v6394_v5, %v6395_v35  ;;  %v15096_v5 = vld [vmem:[#allocation72_spill] sm:$0xff] }
 0x532   : > { %15091 = vst [vmem:[#allocation134_spill] sm:$0xff] %v13041_v34  ;;  %15093 = vst [vmem:[#allocation128_spill] sm:$0xff] %v13047_v14  ;;  %v6398_v22 = vrot.slane %v13041_v34, 7  ;;  %v13050_v10 = vpop.f32.mrb[133].mxu1  ;;  %v6104_v29 = vpop.permute.xlu0 %6103  ;;  %v6034_v35 = vadd.f32 %v5948_v11, %v15096_v5 }
 0x533   : > { %15094 = vst [vmem:[#allocation180_spill] sm:$0xff] %v13050_v10  ;;  %v6397_v47 = vrot.slane %v13050_v10, 7  ;;  %v6102_v52 = vpop.permute.xlu1 %6101  ;;  %v6232_v40 = vrot.slane %v6104_v29, 1 }
 0x534   : > { %v6231_v31 = vrot.slane %v6102_v52, 1  ;;  %5635 = vrot.lane.b32.xlu0 %v15090_v27, %s8845_s8 }
 0x535   : > { %v13060_v14 = vpop.f32.mrb[134].mxu1  ;;  %5465 = vrot.lane.b32.xlu1 %v15098_v51, %s8846_s23  ;;  %v13066_v18 = vsel %vm2046_vm2, %v6396_v49, %v6397_v47  ;;  %v13070_v19 = vsel %vm2046_vm2, %v6397_v47, %v6398_v22  ;;  %v15102_v49 = vld [vmem:[#allocation141_spill] sm:$0xff] }
 0x536   : > { %15097 = vst [vmem:[#allocation69_spill] sm:$0xff] %v13060_v14  ;;  %15099 = vst [vmem:[#allocation72_spill] sm:$0xff] %v13066_v18  ;;  %v6287_v52 = vsel %vm2447_vm3, %v6230_v60, %v6231_v31  ;;  %v6400_v32 = vrot.slane %v13060_v14, 7  ;;  %v13075_v50 = vpop.f32.mrb[135].mxu1  ;;  %v13077_v11 = vpop.permute.xlu0 %5443 }
 0x537   : > { %15100 = vst [vmem:[#allocation139_spill] sm:$0xff] %v13070_v19  ;;  %15101 = vst [vmem:[#allocation181_spill] sm:$0xff] %v13075_v50  ;;  %v6306_v27 = vadd.f32 %v6287_v52, %v6034_v35  ;;  %v6399_v5 = vrot.slane %v13075_v50, 7  ;;  %v13080_v0 = vpop.permute.xlu1 %5441  ;;  %v15107_v52 = vld [vmem:[#allocation153_spill] sm:$0xff]  ;;  %v15111_v50 = vld [vmem:[#allocation146_spill] sm:$0xff] }
 0x538   : > { %5639 = vrot.lane.b32.xlu0 %v15102_v49, %s8845_s8 }
 0x539   : > { %v13084_v22 = vadd.f32 %v6306_v27, %v5794_v53  ;;  %v13086_v47 = vpop.f32.mrb[136].mxu1  ;;  %5633 = vrot.lane.b32.xlu1 %v15098_v51, %s8845_s8  ;;  %v13092_v31 = vsel %vm2046_vm2, %v6399_v5, %v6400_v32 }
 0x53a   : > { %15104 = vst [vmem:[#allocation182_spill] sm:$0xff] %v13086_v47  ;;  %15105 = vst [vmem:[#allocation183_spill] sm:$0xff] %v13092_v31  ;;  %v13094_v59 = vpop.f32.mrb[137].mxu1  ;;  %v13096_v60 = vpop.permute.xlu0 %5599  ;;  %v6402_v53 = vrot.slane %v13086_v47, 7  ;;  %v5721_v47 = vrot.slane %v13016_v17, 1 }
 0x53b   : > { %15103 = vst [vmem:[#allocation141_spill] sm:$0xff] %v13084_v22  ;;  %15106 = vst [vmem:[#allocation184_spill] sm:$0xff] %v13094_v59  ;;  %v6401_v33 = vrot.slane %v13094_v59, 7  ;;  %v13099_v35 = vpop.permute.xlu1 %5597  ;;  %v15121_v59 = vld [vmem:[#allocation135_spill] sm:$0xff] }
 0x53c   : > { %5975 = vrot.lane.b32.xlu0 %v15107_v52, %s8846_s23 }
 0x53d   : > { %5469 = vrot.lane.b32.xlu1 %v15102_v49, %s8846_s23  ;;  %v13106_v51 = vpop.f32.mrb[138].mxu1  ;;  %v13110_v27 = vsel %vm2046_vm2, %v6400_v32, %v6401_v33  ;;  %v15112_v49 = vld [vmem:[#allocation145_spill] sm:$0xff] }
 0x53e   : > { %15108 = vst [vmem:[#allocation153_spill] sm:$0xff] %v13106_v51  ;;  %15109 = vst [vmem:[#allocation185_spill] sm:$0xff] %v13110_v27  ;;  %v6404_v5 = vrot.slane %v13106_v51, 7  ;;  %v6108_v22 = vpop.permute.xlu0 %6107  ;;  %v13113_v31 = vpop.f32.mrb[139].mxu1  ;;  %v5720_v27 = vrot.slane %v12915_v20, 1 }
 0x53f   : > { %15110 = vst [vmem:[#allocation186_spill] sm:$0xff] %v13113_v31  ;;  %v6403_v19 = vrot.slane %v13113_v31, 7  ;;  %v13116_v18 = vpop.permute.xlu1 %5445 }
 0x540   : > { %5979 = vrot.lane.b32.xlu0 %v15111_v50, %s8846_s23 }
 0x541   : > { %5637 = vrot.lane.b32.xlu1 %v15112_v49, %s8845_s8  ;;  %v13123_v24 = vpop.f32.mrb[140].mxu1  ;;  %v13127_v32 = vsel %vm2046_vm2, %v6402_v53, %v6403_v19  ;;  %v13131_v33 = vsel %vm2046_vm2, %v6403_v19, %v6404_v5  ;;  %v5774_v49 = vsel %vm2447_vm3, %v5720_v27, %v5721_v47  ;;  %v15117_v53 = vld [vmem:[#allocation150_spill] sm:$0xff]  ;;  %v15119_v5 = vld [vmem:[#allocation124_spill] sm:$0xff]  ;;  %v6234_v27 = vrot.slane %v6108_v22, 1 }
 0x542   : > { %15113 = vst [vmem:[#allocation146_spill] sm:$0xff] %v13123_v24  ;;  %15114 = vst [vmem:[#allocation145_spill] sm:$0xff] %v13127_v32  ;;  %v13134_v13 = vpop.permute.xlu0 %5603  ;;  %v13136_v17 = vpop.f32.mrb[141].mxu1  ;;  %v15118_v32 = vld [vmem:[#allocation62_spill] sm:$0xff]  ;;  %v5524_v20 = vadd.f32 %v13032_v42, %v15119_v5  ;;  %v15125_v22 = vrot.slane %v12623_v54, 7 }
 0x543   : > { %15115 = vst [vmem:[#allocation187_spill] sm:$0xff] %v13131_v33  ;;  %15116 = vst [vmem:[#allocation188_spill] sm:$0xff] %v13136_v17  ;;  %v6106_v9 = vpop.permute.xlu1 %6105  ;;  %v5523_v19 = vadd.f32 %v12897_v12, %v15118_v32  ;;  %v15120_v33 = vld [vmem:[#allocation61_spill] sm:$0xff]  ;;  %v15124_v5 = vld [vmem:[#allocation74_spill] sm:$0xff] }
 0x544   : > { %v6233_v51 = vrot.slane %v6106_v9, 1  ;;  %5643 = vrot.lane.b32.xlu0 %v15117_v53, %s8845_s8  ;;  %v6035_v31 = vadd.f32 %v13035_v1, %v15120_v33  ;;  %v15123_v32 = vld [vmem:[#allocation125_spill] sm:$0xff]  ;;  %v5773_v1 = vsel %vm2447_vm3, %v5721_v47, %v5722_v6 }
 0x545   : > { %5977 = vrot.lane.b32.xlu1 %v15121_v59, %s8846_s23  ;;  %v13151_v2 = vpop.f32.mrb[142].mxu1  ;;  %v5795_v14 = vadd.f32 %v5774_v49, %v5523_v19  ;;  %v5796_v49 = vadd.f32 %v5773_v1, %v5524_v20  ;;  %v15131_v20 = vld [vmem:[#allocation76_spill] sm:$0xff] }
 0x546   : > { %15122 = vst [vmem:[#allocation150_spill] sm:$0xff] %v13151_v2  ;;  %v6286_v9 = vsel %vm2447_vm3, %v6232_v40, %v6233_v51  ;;  %v6408_v29 = vrot.slane %v13151_v2, 7  ;;  %v5952_v53 = vpop.permute.xlu0 %5951  ;;  %v6285_v33 = vsel %vm2447_vm3, %v6233_v51, %v6234_v27  ;;  %v13175_v27 = vpop.f32.mrb[143].mxu1 }
 0x547   : > { %v6307_v12 = vadd.f32 %v6286_v9, %v6035_v31  ;;  %v6036_v34 = vadd.f32 %v5952_v53, %v15123_v32  ;;  %v5602_v42 = vpop.permute.xlu1 %5601  ;;  %15129 = vst [vmem:[#allocation135_spill] sm:$0xff] %v13175_v27  ;;  %v5724_v9 = vrot.slane %v13096_v60, 1  ;;  %v5723_v53 = vrot.slane %v13099_v35, 1  ;;  %v15132_v35 = vld [vmem:[#allocation112_spill] sm:$0xff] }
 0x548   : > { %5471 = vrot.lane.b32.xlu0 %v15124_v5, %s8846_s23  ;;  %v13167_v40 = vsel %vm2046_vm2, %v6408_v29, %v15125_v22  ;;  %v15130_v29 = vld [vmem:[#allocation26_spill] sm:$0xff]  ;;  %v6407_v32 = vrot.slane %v13175_v27, 7  ;;  %v5525_v22 = vadd.f32 %v13080_v0, %v15132_v35 }
 0x549   : > { %15126 = vst [vmem:[#allocation62_spill] sm:$0xff] %v13167_v40  ;;  %v13169_v31 = vadd.f32 %v6307_v12, %v5795_v14  ;;  %v6308_v19 = vadd.f32 %v6285_v33, %v6036_v34  ;;  %5641 = vrot.lane.b32.xlu1 %v15124_v5, %s8845_s8  ;;  %v6406_v14 = vrot.slane %v13123_v24, 7  ;;  %v6405_v34 = vrot.slane %v13136_v17, 7  ;;  %v15150_v17 = vld [vmem:[#allocation78_spill] sm:$0xff]  ;;  %v15151_v24 = vld [vmem:[#allocation133_spill] sm:$0xff] }
 0x54a   : > { %v5956_v6 = vpop.permute.xlu0 %5955  ;;  %v5772_v60 = vsel %vm2447_vm3, %v5723_v53, %v5724_v9 }
 0x54b   : > { %15127 = vst [vmem:[#allocation124_spill] sm:$0xff] %v13169_v31  ;;  %v13173_v47 = vadd.f32 %v6308_v19, %v5796_v49  ;;  %v5954_v51 = vpop.permute.xlu1 %5953  ;;  %v15133_v49 = vld [vmem:[#allocation75_spill] sm:$0xff]  ;;  %v13197_v31 = vsel %vm2046_vm2, %v6405_v34, %v6406_v14 }
 0x54c   : > { %5475 = vrot.lane.b32.xlu0 %v15130_v29, %s8846_s23  ;;  %v6037_v19 = vadd.f32 %v5954_v51, %v15133_v49  ;;  %15135 = vst [vmem:[#allocation125_spill] sm:$0xff] %v13197_v31  ;;  %v15137_v51 = vld [vmem:[#allocation80_spill] sm:$0xff]  ;;  %v5725_v31 = vrot.slane %v5602_v42, 1 }
 0x54d   : > { %15128 = vst [vmem:[#allocation61_spill] sm:$0xff] %v13173_v47  ;;  %5981 = vrot.lane.b32.xlu1 %v15131_v20, %s8846_s23  ;;  %v15134_v47 = vld [vmem:[#allocation148_spill] sm:$0xff] }
 0x54e   : > { %v6112_v12 = vpop.permute.xlu0 %6111 }
 0x54f   : > { %v6236_v1 = vrot.slane %v6112_v12, 1  ;;  %v6110_v33 = vpop.permute.xlu1 %6109 }
 0x550   : > { %v6235_v5 = vrot.slane %v6110_v33, 1  ;;  %5647 = vrot.lane.b32.xlu0 %v15130_v29, %s8845_s8  ;;  %v13203_v33 = vsel %vm2046_vm2, %v6406_v14, %v6407_v32  ;;  %v5797_v29 = vadd.f32 %v5772_v60, %v5525_v22  ;;  %v5771_v60 = vsel %vm2447_vm3, %v5724_v9, %v5725_v31 }
 0x551   : > { %5473 = vrot.lane.b32.xlu1 %v15134_v47, %s8846_s23  ;;  %15136 = vst [vmem:[#allocation74_spill] sm:$0xff] %v13203_v33 }
 0x552   : > { %v6284_v12 = vsel %vm2447_vm3, %v6235_v5, %v6236_v1  ;;  %v5608_v53 = vpop.permute.xlu0 %5607  ;;  %v15139_v5 = vld [vmem:[#allocation77_spill] sm:$0xff] }
 0x553   : > { %v6309_v40 = vadd.f32 %v6284_v12, %v6037_v19  ;;  %v5606_v0 = vpop.permute.xlu1 %5605  ;;  %v15141_v19 = vld [vmem:[#allocation71_spill] sm:$0xff]  ;;  %v15142_v12 = vld [vmem:[#allocation114_spill] sm:$0xff] }
 0x554   : > { %5651 = vrot.lane.b32.xlu0 %v15137_v51, %s8845_s8  ;;  %v6038_v42 = vadd.f32 %v5956_v6, %v15142_v12  ;;  %v5728_v12 = vrot.slane %v5608_v53, 1 }
 0x555   : > { %v13207_v35 = vadd.f32 %v6309_v40, %v5797_v29  ;;  %5645 = vrot.lane.b32.xlu1 %v15134_v47, %s8845_s8  ;;  %v15140_v40 = vld [vmem:[#allocation38_spill] sm:$0xff]  ;;  %v5526_v47 = vadd.f32 %v13077_v11, %v15141_v19 }
 0x556   : > { %v5448_v34 = vpop.permute.xlu0 %5447  ;;  %v15143_v29 = vld [vmem:[#allocation82_spill] sm:$0xff] }
 0x557   : > { %15138 = vst [vmem:[#allocation26_spill] sm:$0xff] %v13207_v35  ;;  %v5958_v49 = vpop.permute.xlu1 %5957  ;;  %v5798_v33 = vadd.f32 %v5771_v60, %v5526_v47 }
 0x558   : > { %5983 = vrot.lane.b32.xlu0 %v15139_v5, %s8846_s23  ;;  %v6039_v27 = vadd.f32 %v5958_v49, %v15150_v17 }
 0x559   : > { %5477 = vrot.lane.b32.xlu1 %v15137_v51, %s8846_s23 }
 0x55a   : > { %v6116_v14 = vpop.permute.xlu0 %6115 }
 0x55b   : > { %v6114_v32 = vpop.permute.xlu1 %6113 }
 0x55c   : > { %v6237_v22 = vrot.slane %v6114_v32, 1  ;;  %5987 = vrot.lane.b32.xlu0 %v15140_v40, %s8846_s23  ;;  %v15145_v32 = vld [vmem:[#allocation44_spill] sm:$0xff] }
 0x55d   : > { %5649 = vrot.lane.b32.xlu1 %v15143_v29, %s8845_s8  ;;  %v6238_v29 = vrot.slane %v6116_v14, 1 }
 0x55e   : > { %v6283_v51 = vsel %vm2447_vm3, %v6236_v1, %v6237_v22  ;;  %v13226_v35 = vpop.permute.xlu0 %5451  ;;  %v5727_v22 = vrot.slane %v5606_v0, 1  ;;  %v15148_v0 = vld [vmem:[#allocation126_spill] sm:$0xff] }
 0x55f   : > { %v6310_v2 = vadd.f32 %v6283_v51, %v6038_v42  ;;  %v5450_v31 = vpop.permute.xlu1 %5449 }
 0x560   : > { %5655 = vrot.lane.b32.xlu0 %v12571_v8, %s8845_s8  ;;  %v15146_v8 = vld [vmem:[#allocation107_spill] sm:$0xff] }
 0x561   : > { %v13230_v9 = vadd.f32 %v6310_v2, %v5798_v33  ;;  %5985 = vrot.lane.b32.xlu1 %v12569_v57, %s8846_s23  ;;  %v15147_v2 = vld [vmem:[#allocation87_spill] sm:$0xff]  ;;  %v5726_v33 = vrot.slane %v13134_v13, 1 }
 0x562   : > { %v13234_v11 = vpop.permute.xlu0 %5611 }
 0x563   : > { %15144 = vst [vmem:[#allocation76_spill] sm:$0xff] %v13230_v9  ;;  %v5610_v6 = vpop.permute.xlu1 %5609  ;;  %v5770_v42 = vsel %vm2447_vm3, %v5726_v33, %v5727_v22 }
 0x564   : > { %5479 = vrot.lane.b32.xlu0 %v15145_v32, %s8846_s23 }
 0x565   : > { %5653 = vrot.lane.b32.xlu1 %v15145_v32, %s8845_s8  ;;  %v5527_v32 = vadd.f32 %v13116_v18, %v15148_v0  ;;  %v5769_v18 = vsel %vm2447_vm3, %v5727_v22, %v5728_v12  ;;  %v5729_v22 = vrot.slane %v5610_v6, 1  ;;  %v15155_v0 = vld [vmem:[#allocation137_spill] sm:$0xff] }
 0x566   : > { %v6120_v1 = vpop.permute.xlu0 %6119 }
 0x567   : > { %v13240_v60 = vpop.permute.xlu1 %5453  ;;  %v6240_v13 = vrot.slane %v6120_v1, 1  ;;  %v5799_v14 = vadd.f32 %v5770_v42, %v5527_v32  ;;  %v15153_v1 = vld [vmem:[#allocation136_spill] sm:$0xff]  ;;  %v15156_v32 = vld [vmem:[#allocation127_spill] sm:$0xff] }
 0x568   : > { %6131 = vrot.lane.b32.xlu0 %v15146_v8, %s8845_s8  ;;  %v15149_v8 = vld [vmem:[#allocation68_spill] sm:$0xff] }
 0x569   : > { %5989 = vrot.lane.b32.xlu1 %v15147_v2, %s8846_s23  ;;  %v5528_v9 = vadd.f32 %v5448_v34, %v15149_v8  ;;  %v5529_v8 = vadd.f32 %v5450_v31, %v15156_v32  ;;  %v15159_v31 = vld [vmem:[#allocation155_spill] sm:$0xff] }
 0x56a   : > { %v13247_v19 = vpop.permute.xlu0 %5615  ;;  %v15165_v32 = vld [vmem:[#allocation27_spill] sm:$0xff] }
 0x56b   : > { %v6118_v47 = vpop.permute.xlu1 %6117 }
 0x56c   : > { %v6239_v51 = vrot.slane %v6118_v47, 1  ;;  %5991 = vrot.lane.b32.xlu0 %v12641_v26, %s8846_s23 }
 0x56d   : > { %6133 = vrot.lane.b32.xlu1 %v15081_v25, %s8845_s8  ;;  %v5800_v25 = vadd.f32 %v5769_v18, %v5528_v9 }
 0x56e   : > { %v6282_v53 = vsel %vm2447_vm3, %v6238_v29, %v6239_v51  ;;  %v5960_v33 = vpop.permute.xlu0 %5959  ;;  %v6281_v34 = vsel %vm2447_vm3, %v6239_v51, %v6240_v13  ;;  %v5730_v29 = vrot.slane %v13234_v11, 1  ;;  %v15157_v11 = vld [vmem:[#allocation130_spill] sm:$0xff] }
 0x56f   : > { %v6311_v47 = vadd.f32 %v6282_v53, %v6039_v27  ;;  %v6040_v10 = vadd.f32 %v5960_v33, %v15151_v24  ;;  %v5614_v63 = vpop.permute.xlu1 %5613 }
 0x570   : > { %6135 = vrot.lane.b32.xlu0 %v15072_v45, %s8845_s8  ;;  %v5731_v18 = vrot.slane %v5614_v63, 1 }
 0x571   : > { %v13268_v17 = vadd.f32 %v6311_v47, %v5799_v14  ;;  %v6312_v49 = vadd.f32 %v6281_v34, %v6040_v10  ;;  %6137 = vrot.lane.b32.xlu1 %v15153_v1, %s8845_s8  ;;  %v5768_v10 = vsel %vm2447_vm3, %v5729_v22, %v5730_v29  ;;  %v15160_v1 = vld [vmem:[#allocation40_spill] sm:$0xff] }
 0x572   : > { %v5964_v27 = vpop.permute.xlu0 %5963  ;;  %v5801_v13 = vadd.f32 %v5768_v10, %v5529_v8  ;;  %v5732_v8 = vrot.slane %v13247_v19, 1 }
 0x573   : > { %15152 = vst [vmem:[#allocation112_spill] sm:$0xff] %v13268_v17  ;;  %v13272_v42 = vadd.f32 %v6312_v49, %v5800_v25  ;;  %v5962_v24 = vpop.permute.xlu1 %5961 }
 0x574   : > { %6139 = vrot.lane.b32.xlu0 %v15092_v15, %s8845_s8  ;;  %v6041_v6 = vadd.f32 %v5962_v24, %v15157_v11  ;;  %v15161_v24 = vld [vmem:[#allocation84_spill] sm:$0xff] }
 0x575   : > { %15154 = vst [vmem:[#allocation75_spill] sm:$0xff] %v13272_v42  ;;  %6141 = vrot.lane.b32.xlu1 %v15107_v52, %s8845_s8  ;;  %v5530_v22 = vadd.f32 %v13226_v35, %v15161_v24  ;;  %v15164_v35 = vld [vmem:[#allocation157_spill] sm:$0xff] }
 0x576   : > { %v6124_v45 = vpop.permute.xlu0 %6123  ;;  %v15173_v42 = vld [vmem:[#allocation69_spill] sm:$0xff] }
 0x577   : > { %v6242_v9 = vrot.slane %v6124_v45, 1  ;;  %v6122_v12 = vpop.permute.xlu1 %6121  ;;  %v15162_v45 = vld [vmem:[#allocation92_spill] sm:$0xff] }
 0x578   : > { %v6241_v51 = vrot.slane %v6122_v12, 1  ;;  %6143 = vrot.lane.b32.xlu0 %v15155_v0, %s8845_s8  ;;  %v6042_v63 = vadd.f32 %v5964_v27, %v15162_v45 }
 0x579   : > { %6145 = vrot.lane.b32.xlu1 %v15121_v59, %s8845_s8 }
 0x57a   : > { %v6280_v15 = vsel %vm2447_vm3, %v6241_v51, %v6242_v9  ;;  %v13289_v52 = vpop.permute.xlu0 %5619 }
 0x57b   : > { %v6313_v53 = vadd.f32 %v6280_v15, %v6041_v6  ;;  %v13291_v33 = vpop.permute.xlu1 %5617 }
 0x57c   : > { %6147 = vrot.lane.b32.xlu0 %v15111_v50, %s8845_s8  ;;  %v5767_v50 = vsel %vm2447_vm3, %v5730_v29, %v5731_v18  ;;  %v15168_v18 = vld [vmem:[#allocation131_spill] sm:$0xff] }
 0x57d   : > { %v13295_v14 = vadd.f32 %v6313_v53, %v5801_v13  ;;  %6149 = vrot.lane.b32.xlu1 %v15159_v31, %s8845_s8  ;;  %v5802_v12 = vadd.f32 %v5767_v50, %v5530_v22  ;;  %v15166_v13 = vld [vmem:[#allocation50_spill] sm:$0xff]  ;;  %v15167_v53 = vld [vmem:[#allocation81_spill] sm:$0xff] }
 0x57e   : > { %v13299_v47 = vpop.permute.xlu0 %5455  ;;  %v5531_v31 = vadd.f32 %v13240_v60, %v15167_v53 }
 0x57f   : > { %15158 = vst [vmem:[#allocation148_spill] sm:$0xff] %v13295_v14  ;;  %v5966_v59 = vpop.permute.xlu1 %5965  ;;  %v15172_v14 = vld [vmem:[#allocation134_spill] sm:$0xff] }
 0x580   : > { %6151 = vrot.lane.b32.xlu0 %v15131_v20, %s8845_s8  ;;  %v6043_v19 = vadd.f32 %v5966_v59, %v15168_v18 }
 0x581   : > { %6153 = vrot.lane.b32.xlu1 %v15139_v5, %s8845_s8 }
 0x582   : > { %v6128_v34 = vpop.permute.xlu0 %6127 }
 0x583   : > { %v6126_v25 = vpop.permute.xlu1 %6125  ;;  %v6244_v6 = vrot.slane %v6128_v34, 1 }
 0x584   : > { %v6243_v49 = vrot.slane %v6126_v25, 1  ;;  %6155 = vrot.lane.b32.xlu0 %v15160_v1, %s8845_s8 }
 0x585   : > { %6157 = vrot.lane.b32.xlu1 %v12569_v57, %s8845_s8 }
 0x586   : > { %v6279_v20 = vsel %vm2447_vm3, %v6242_v9, %v6243_v49  ;;  %v13316_v5 = vpop.permute.xlu0 %5459 }
 0x587   : > { %v6314_v10 = vadd.f32 %v6279_v20, %v6042_v63  ;;  %v13318_v29 = vpop.permute.xlu1 %5457 }
 0x588   : > { %6159 = vrot.lane.b32.xlu0 %v15140_v40, %s8845_s8  ;;  %v14544_v40 = vrot.slane %v13291_v33, 1 }
 0x589   : > { %v13322_v51 = vadd.f32 %v6314_v10, %v5802_v12  ;;  %6161 = vrot.lane.b32.xlu1 %v15164_v35, %s8845_s8 }
 0x58a   : > { %v13326_v27 = vpop.permute.xlu0 %5623 }
 0x58b   : > { %15163 = vst [vmem:[#allocation80_spill] sm:$0xff] %v13322_v51  ;;  %v13328_v57 = vpop.permute.xlu1 %5621 }
 0x58c   : > { %6163 = vrot.lane.b32.xlu0 %v15147_v2, %s8845_s8 }
 0x58d   : > { %6165 = vrot.lane.b32.xlu1 %v12641_v26, %s8845_s8  ;;  %v5766_v26 = vsel %vm2447_vm3, %v5732_v8, %v14544_v40  ;;  %v15171_v40 = vld [vmem:[#allocation180_spill] sm:$0xff] }
 0x58e   : > { %v13334_v9 = vpop.permute.xlu0 %5627  ;;  %v5803_v34 = vadd.f32 %v5766_v26, %v5531_v31 }
 0x58f   : > { %v13336_v0 = vpop.permute.xlu1 %5461 }
 0x590   : > { %6167 = vrot.lane.b32.xlu0 %v15165_v32, %s8845_s8 }
 0x591   : > { %6473 = vrot.lane.b32.xlu1 %v12623_v54, %s8846_s23 }
 0x592   : > { %v13344_v11 = vpop.permute.xlu0 %5967 }
 0x593   : > { %v13346_v2 = vpop.permute.xlu1 %6129 }
 0x594   : > { %v14543_v15 = vrot.slane %v13346_v2, 1  ;;  %6475 = vrot.lane.b32.xlu0 %v15166_v13, %s8846_s23 }
 0x595   : > { %6477 = vrot.lane.b32.xlu1 %v12643_v41, %s8846_s23 }
 0x596   : > { %v6278_v25 = vsel %vm2447_vm3, %v6244_v6, %v14543_v15  ;;  %v13364_v50 = vpop.permute.xlu0 %5971  ;;  %v15170_v15 = vld [vmem:[#allocation179_spill] sm:$0xff] }
 0x597   : > { %v6315_v49 = vadd.f32 %v6278_v25, %v6043_v19  ;;  %v13366_v1 = vpop.permute.xlu1 %5625 }
 0x598   : > { %6479 = vrot.lane.b32.xlu0 %v12691_v21, %s8846_s23 }
 0x599   : > { %v13370_v60 = vadd.f32 %v6315_v49, %v5803_v34  ;;  %6481 = vrot.lane.b32.xlu1 %v12723_v62, %s8846_s23 }
 0x59a   : > { %v13374_v59 = vpop.permute.xlu0 %5631 }
 0x59b   : > { %15169 = vst [vmem:[#allocation77_spill] sm:$0xff] %v13370_v60  ;;  %v13376_v24 = vpop.permute.xlu1 %5969 }
 0x59c   : > { %6483 = vrot.lane.b32.xlu0 %v12710_v56, %s8846_s23 }
 0x59d   : > { %6485 = vrot.lane.b32.xlu1 %v12735_v7, %s8846_s23 }
 0x59e   : > { %v13382_v22 = vpop.permute.xlu0 %5463 }
 0x59f   : > { %v13384_v45 = vpop.permute.xlu1 %5629 }
 0x5a0   : > { %6487 = vrot.lane.b32.xlu0 %v12765_v61, %s8846_s23 }
 0x5a1   : > { %6489 = vrot.lane.b32.xlu1 %v12787_v43, %s8846_s23 }
 0x5a2   : > { %v13390_v63 = vpop.permute.xlu0 %5467 }
 0x5a3   : > { %v13392_v20 = vpop.permute.xlu1 %5973 }
 0x5a4   : > { %6491 = vrot.lane.b32.xlu0 %v12776_v46, %s8846_s23 }
 0x5a5   : > { %6493 = vrot.lane.b32.xlu1 %v12798_v38, %s8846_s23 }
 0x5a6   : > { %v13398_v12 = vpop.permute.xlu0 %5635 }
 0x5a7   : > { %v13400_v10 = vpop.permute.xlu1 %5465 }
 0x5a8   : > { %6495 = vrot.lane.b32.xlu0 %v12829_v4, %s8846_s23 }
 0x5a9   : > { %6497 = vrot.lane.b32.xlu1 %v12853_v48, %s8846_s23 }
 0x5aa   : > { %v13406_v35 = vpop.permute.xlu0 %5639 }
 0x5ab   : > { %v13408_v32 = vpop.permute.xlu1 %5633 }
 0x5ac   : > { %6499 = vrot.lane.b32.xlu0 %v12842_v39, %s8846_s23 }
 0x5ad   : > { %6501 = vrot.lane.b32.xlu1 %v12864_v30, %s8846_s23 }
 0x5ae   : > { %v13414_v8 = vpop.permute.xlu0 %5975 }
 0x5af   : > { %v13416_v26 = vpop.permute.xlu1 %5469 }
 0x5b0   : > { %6503 = vrot.lane.b32.xlu0 %v12894_v44, %s8846_s23  ;;  %v15187_v44 = vld [vmem:[#allocation52_spill] sm:$0xff] }
 0x5b1   : > { %6505 = vrot.lane.b32.xlu1 %v12913_v55, %s8846_s23 }
 0x5b2   : > { %v13422_v6 = vpop.permute.xlu0 %5979 }
 0x5b3   : > { %v13424_v53 = vpop.permute.xlu1 %5637 }
 0x5b4   : > { %6507 = vrot.lane.b32.xlu0 %v12903_v3, %s8846_s23  ;;  %v15180_v3 = vld [vmem:[#allocation135_spill] sm:$0xff] }
 0x5b5   : > { %6509 = vrot.lane.b32.xlu1 %v12930_v37, %s8846_s23 }
 0x5b6   : > { %v13430_v31 = vpop.permute.xlu0 %5643 }
 0x5b7   : > { %v13432_v18 = vpop.permute.xlu1 %5977 }
 0x5b8   : > { %6511 = vrot.lane.b32.xlu0 %v12967_v58, %s8846_s23  ;;  %v15178_v58 = vld [vmem:[#allocation153_spill] sm:$0xff] }
 0x5b9   : > { %6513 = vrot.lane.b32.xlu1 %v12986_v36, %s8846_s23 }
 0x5ba   : > { %v13438_v19 = vpop.permute.xlu0 %5471 }
 0x5bb   : > { %v13440_v25 = vpop.permute.xlu1 %5641 }
 0x5bc   : > { %6515 = vrot.lane.b32.xlu0 %v12977_v23, %s8846_s23  ;;  %v15175_v23 = vld [vmem:[#allocation184_spill] sm:$0xff] }
 0x5bd   : > { %6517 = vrot.lane.b32.xlu1 %v12996_v16, %s8846_s23 }
 0x5be   : > { %v13446_v34 = vpop.permute.xlu0 %5475 }
 0x5bf   : > { %v13448_v49 = vpop.permute.xlu1 %5981 }
 0x5c0   : > { %6519 = vrot.lane.b32.xlu0 %v15170_v15, %s8846_s23  ;;  %v15176_v15 = vld [vmem:[#allocation186_spill] sm:$0xff] }
 0x5c1   : > { %6521 = vrot.lane.b32.xlu1 %v15171_v40, %s8846_s23 }
 0x5c2   : > { %v13454_v60 = vpop.permute.xlu0 %5647 }
 0x5c3   : > { %v13456_v51 = vpop.permute.xlu1 %5473 }
 0x5c4   : > { %6523 = vrot.lane.b32.xlu0 %v15172_v14, %s8846_s23  ;;  %v15179_v14 = vld [vmem:[#allocation146_spill] sm:$0xff] }
 0x5c5   : > { %6525 = vrot.lane.b32.xlu1 %v15173_v42, %s8846_s23 }
 0x5c6   : > { %v13462_v17 = vpop.permute.xlu0 %5651 }
 0x5c7   : > { %15174 = vst [vmem:[#allocation38_spill] sm:$0xff] %v13462_v17  ;;  %v13464_v16 = vpop.permute.xlu1 %5645 }
 0x5c8   : > { %6527 = vrot.lane.b32.xlu0 %v15175_v23, %s8846_s23 }
 0x5c9   : > { %6529 = vrot.lane.b32.xlu1 %v15176_v15, %s8846_s23 }
 0x5ca   : > { %v13470_v40 = vpop.permute.xlu0 %5983 }
 0x5cb   : > { %v13472_v36 = vpop.permute.xlu1 %5477 }
 0x5cc   : > { %15177 = vst [vmem:[#allocation71_spill] sm:$0xff] %v13472_v36  ;;  %6531 = vrot.lane.b32.xlu0 %v15178_v58, %s8846_s23  ;;  %v15182_v58 = vld [vmem:[#allocation46_spill] sm:$0xff] }
 0x5cd   : > { %6533 = vrot.lane.b32.xlu1 %v15179_v14, %s8846_s23 }
 0x5ce   : > { %v13478_v42 = vpop.permute.xlu0 %5987 }
 0x5cf   : > { %v13480_v37 = vpop.permute.xlu1 %5649 }
 0x5d0   : > { %6535 = vrot.lane.b32.xlu0 %v15180_v3, %s8846_s23  ;;  %v5734_v3 = vrot.slane %v13289_v52, 1 }
 0x5d1   : > { %6617 = vrot.lane.b32.xlu1 %v12623_v54, %s8845_s8  ;;  %v15184_v54 = vld [vmem:[#allocation88_spill] sm:$0xff] }
 0x5d2   : > { %v13486_v15 = vpop.permute.xlu0 %5655 }
 0x5d3   : > { %15181 = vst [vmem:[#allocation114_spill] sm:$0xff] %v13486_v15  ;;  %v13488_v23 = vpop.permute.xlu1 %5985  ;;  %v5532_v15 = vadd.f32 %v13299_v47, %v15184_v54 }
 0x5d4   : > { %6619 = vrot.lane.b32.xlu0 %v15166_v13, %s8845_s8 }
 0x5d5   : > { %6621 = vrot.lane.b32.xlu1 %v15182_v58, %s8845_s8  ;;  %v15186_v58 = vld [vmem:[#allocation118_spill] sm:$0xff] }
 0x5d6   : > { %v13494_v14 = vpop.permute.xlu0 %5479 }
 0x5d7   : > { %15183 = vst [vmem:[#allocation82_spill] sm:$0xff] %v13494_v14  ;;  %v13496_v55 = vpop.permute.xlu1 %5653  ;;  %v6044_v14 = vadd.f32 %v13344_v11, %v15186_v58  ;;  %v5736_v11 = vrot.slane %v13326_v27, 1  ;;  %v5737_v58 = vrot.slane %v13366_v1, 1 }
 0x5d8   : > { %6623 = vrot.lane.b32.xlu0 %v12643_v41, %s8845_s8  ;;  %v15188_v41 = vrot.slane %v13291_v33, 1 }
 0x5d9   : > { %6625 = vrot.lane.b32.xlu1 %v12691_v21, %s8845_s8  ;;  %v15189_v21 = vrot.slane %v13346_v2, 1  ;;  %v15190_v2 = vld [vmem:[#allocation54_spill] sm:$0xff]  ;;  %v5763_v1 = vsel %vm2447_vm3, %v5736_v11, %v5737_v58 }
 0x5da   : > { %v6132_v36 = vpop.permute.xlu0 %6131  ;;  %v5765_v52 = vsel %vm2447_vm3, %v15188_v41, %v5734_v3 }
 0x5db   : > { %v6246_v13 = vrot.slane %v6132_v36, 1  ;;  %v13505_v17 = vpop.permute.xlu1 %5989  ;;  %v5804_v36 = vadd.f32 %v5765_v52, %v5532_v15  ;;  %v15191_v15 = vld [vmem:[#allocation115_spill] sm:$0xff]  ;;  %v15192_v52 = vld [vmem:[#allocation122_spill] sm:$0xff] }
 0x5dc   : > { %15185 = vst [vmem:[#allocation44_spill] sm:$0xff] %v13505_v17  ;;  %6627 = vrot.lane.b32.xlu0 %v15187_v44, %s8845_s8  ;;  %v5735_v44 = vrot.slane %v13328_v57, 1 }
 0x5dd   : > { %v6277_v47 = vsel %vm2447_vm3, %v15189_v21, %v6246_v13  ;;  %6629 = vrot.lane.b32.xlu1 %v12723_v62, %s8845_s8  ;;  %v6045_v21 = vadd.f32 %v13376_v24, %v15192_v52  ;;  %v5738_v24 = vrot.slane %v13334_v9, 1  ;;  %v15196_v9 = vld [vmem:[#allocation120_spill] sm:$0xff] }
 0x5de   : > { %v6316_v54 = vadd.f32 %v6277_v47, %v6044_v14  ;;  %v13521_v17 = vpop.permute.xlu0 %5991  ;;  %v5533_v14 = vadd.f32 %v13318_v29, %v15191_v15  ;;  %v5764_v27 = vsel %vm2447_vm3, %v5735_v44, %v5736_v11 }
 0x5df   : > { %v6134_v33 = vpop.permute.xlu1 %6133 }
 0x5e0   : > { %v13526_v3 = vadd.f32 %v6316_v54, %v5804_v36  ;;  %6631 = vrot.lane.b32.xlu0 %v12710_v56, %s8845_s8  ;;  %v6247_v13 = vrot.slane %v6134_v33, 1  ;;  %v5739_v56 = vrot.slane %v13384_v45, 1  ;;  %v15193_v36 = vld [vmem:[#allocation98_spill] sm:$0xff]  ;;  %v15194_v54 = vld [vmem:[#allocation129_spill] sm:$0xff]  ;;  %v5805_v11 = vadd.f32 %v5764_v27, %v5533_v14  ;;  %v15195_v14 = vld [vmem:[#allocation59_spill] sm:$0xff] }
 0x5e1   : > { %6633 = vrot.lane.b32.xlu1 %v15190_v2, %s8845_s8  ;;  %v5534_v29 = vadd.f32 %v13316_v5, %v15193_v36  ;;  %v6046_v44 = vadd.f32 %v13364_v50, %v15194_v54  ;;  %v5740_v50 = vrot.slane %v13374_v59, 1  ;;  %v5535_v27 = vadd.f32 %v13336_v0, %v15196_v9 }
 0x5e2   : > { %v6136_v62 = vpop.permute.xlu0 %6135 }
 0x5e3   : > { %v6248_v57 = vrot.slane %v6136_v62, 1  ;;  %v6138_v41 = vpop.permute.xlu1 %6137  ;;  %v5806_v2 = vadd.f32 %v5763_v1, %v5534_v29  ;;  %v5761_v59 = vsel %vm2447_vm3, %v5739_v56, %v5740_v50  ;;  %v5741_v29 = vrot.slane %v13408_v32, 1 }
 0x5e4   : > { %v6249_v47 = vrot.slane %v6138_v41, 1  ;;  %6635 = vrot.lane.b32.xlu0 %v12735_v7, %s8845_s8 }
 0x5e5   : > { %v6276_v33 = vsel %vm2447_vm3, %v6247_v13, %v6248_v57  ;;  %6637 = vrot.lane.b32.xlu1 %v12765_v61, %s8845_s8  ;;  %v5762_v13 = vsel %vm2447_vm3, %v5738_v24, %v5739_v56  ;;  %v5742_v56 = vrot.slane %v13398_v12, 1 }
 0x5e6   : > { %v6317_v45 = vadd.f32 %v6276_v33, %v6045_v21  ;;  %v6275_v58 = vsel %vm2447_vm3, %v6248_v57, %v6249_v47  ;;  %v6140_v7 = vpop.permute.xlu0 %6139  ;;  %v15197_v57 = vld [vmem:[#allocation152_spill] sm:$0xff]  ;;  %v5807_v36 = vadd.f32 %v5762_v13, %v5535_v27  ;;  %v15198_v33 = vld [vmem:[#allocation142_spill] sm:$0xff] }
 0x5e7   : > { %v6318_v62 = vadd.f32 %v6275_v58, %v6046_v44  ;;  %v6250_v5 = vrot.slane %v6140_v7, 1  ;;  %v6142_v15 = vpop.permute.xlu1 %6141  ;;  %v6047_v1 = vadd.f32 %v13392_v20, %v15197_v57  ;;  %v5536_v20 = vadd.f32 %v13382_v22, %v15198_v33  ;;  %v15200_v58 = vld [vmem:[#allocation33_spill] sm:$0xff]  ;;  %v15201_v22 = vld [vmem:[#allocation123_spill] sm:$0xff]  ;;  %v15202_v13 = vld [vmem:[#allocation140_spill] sm:$0xff] }
 0x5e8   : > { %v13557_v41 = vadd.f32 %v6317_v45, %v5805_v11  ;;  %v6251_v61 = vrot.slane %v6142_v15, 1  ;;  %6639 = vrot.lane.b32.xlu0 %v15195_v14, %s8845_s8  ;;  %v15199_v11 = vld [vmem:[#allocation32_spill] sm:$0xff]  ;;  %v15204_v57 = vld [vmem:[#allocation138_spill] sm:$0xff] }
 0x5e9   : > { %v13565_v52 = vadd.f32 %v6318_v62, %v5806_v2  ;;  %6641 = vrot.lane.b32.xlu1 %v12787_v43, %s8845_s8  ;;  %v6048_v24 = vadd.f32 %v13414_v8, %v15199_v11  ;;  %v5743_v43 = vrot.slane %v13424_v53, 1  ;;  %v5808_v7 = vadd.f32 %v5761_v59, %v5536_v20  ;;  %v15206_v20 = vld [vmem:[#allocation147_spill] sm:$0xff]  ;;  %v15207_v11 = vld [vmem:[#allocation156_spill] sm:$0xff] }
 0x5ea   : > { %v6274_v21 = vsel %vm2447_vm3, %v6250_v5, %v6251_v61  ;;  %v6144_v47 = vpop.permute.xlu0 %6143  ;;  %v5537_v2 = vadd.f32 %v13400_v10, %v15201_v22  ;;  %v5760_v53 = vsel %vm2447_vm3, %v5741_v29, %v5742_v56  ;;  %v15203_v10 = vld [vmem:[#allocation73_spill] sm:$0xff] }
 0x5eb   : > { %v6319_v54 = vadd.f32 %v6274_v21, %v6047_v1  ;;  %v6252_v0 = vrot.slane %v6144_v47, 1  ;;  %v6146_v44 = vpop.permute.xlu1 %6145  ;;  %v5759_v50 = vsel %vm2447_vm3, %v5742_v56, %v5743_v43  ;;  %v5538_v27 = vadd.f32 %v13390_v63, %v15203_v10  ;;  %v15212_v10 = vld [vmem:[#allocation37_spill] sm:$0xff] }
 0x5ec   : > { %6643 = vrot.lane.b32.xlu0 %v12776_v46, %s8845_s8  ;;  %v5745_v46 = vrot.slane %v13440_v25, 1  ;;  %v6253_v12 = vrot.slane %v6146_v44, 1  ;;  %v5744_v25 = vrot.slane %v13406_v35, 1  ;;  %v6050_v1 = vadd.f32 %v13422_v6, %v15204_v57  ;;  %v15205_v6 = vld [vmem:[#allocation67_spill] sm:$0xff] }
 0x5ed   : > { %v13582_v45 = vadd.f32 %v6319_v54, %v5807_v36  ;;  %v6273_v32 = vsel %vm2447_vm3, %v6251_v61, %v6252_v0  ;;  %6645 = vrot.lane.b32.xlu1 %v15200_v58, %s8845_s8  ;;  %v6049_v61 = vadd.f32 %v13432_v18, %v15202_v13  ;;  %v5809_v18 = vadd.f32 %v5760_v53, %v5537_v2  ;;  %v15209_v53 = vld [vmem:[#allocation45_spill] sm:$0xff] }
 0x5ee   : > { %v6320_v8 = vadd.f32 %v6273_v32, %v6048_v24  ;;  %v6148_v62 = vpop.permute.xlu0 %6147  ;;  %v5810_v36 = vadd.f32 %v5759_v50, %v5538_v27  ;;  %v5758_v63 = vsel %vm2447_vm3, %v5744_v25, %v5745_v46  ;;  %v5539_v0 = vadd.f32 %v13416_v26, %v15205_v6 }
 0x5ef   : > { %v6254_v5 = vrot.slane %v6148_v62, 1  ;;  %v6150_v15 = vpop.permute.xlu1 %6149  ;;  %v5746_v44 = vrot.slane %v13430_v31, 1  ;;  %v6051_v24 = vadd.f32 %v13448_v49, %v15207_v11  ;;  %v5747_v58 = vrot.slane %v13464_v16, 1  ;;  %v15219_v11 = vld [vmem:[#allocation71_spill] sm:$0xff] }
 0x5f0   : > { %v13597_v14 = vadd.f32 %v6320_v8, %v5808_v7  ;;  %v6255_v9 = vrot.slane %v6150_v15, 1  ;;  %6647 = vrot.lane.b32.xlu0 %v12798_v38, %s8845_s8  ;;  %v5811_v26 = vadd.f32 %v5758_v63, %v5539_v0  ;;  %v5749_v7 = vrot.slane %v13480_v37, 1  ;;  %v15208_v8 = vld [vmem:[#allocation34_spill] sm:$0xff]  ;;  %v15210_v37 = vld [vmem:[#allocation163_spill] sm:$0xff] }
 0x5f1   : > { %v6272_v59 = vsel %vm2447_vm3, %v6253_v12, %v6254_v5  ;;  %6649 = vrot.lane.b32.xlu1 %v12829_v4, %s8845_s8  ;;  %v5757_v56 = vsel %vm2447_vm3, %v5745_v46, %v5746_v44  ;;  %v5540_v62 = vadd.f32 %v13438_v19, %v15208_v8  ;;  %v5748_v46 = vrot.slane %v13454_v60, 1  ;;  %v15211_v15 = vld [vmem:[#allocation35_spill] sm:$0xff] }
 0x5f2   : > { %v6321_v21 = vadd.f32 %v6272_v59, %v6049_v61  ;;  %v6271_v47 = vsel %vm2447_vm3, %v6254_v5, %v6255_v9  ;;  %v6152_v38 = vpop.permute.xlu0 %6151  ;;  %v5541_v19 = vadd.f32 %v13456_v51, %v15211_v15  ;;  %v6053_v27 = vadd.f32 %v13488_v23, %v15212_v10  ;;  %v15213_v51 = vld [vmem:[#allocation30_spill] sm:$0xff]  ;;  %v15226_v15 = vld [vmem:[#allocation101_spill] sm:$0xff] }
 0x5f3   : > { %v6322_v35 = vadd.f32 %v6271_v47, %v6050_v1  ;;  %v6256_v29 = vrot.slane %v6152_v38, 1  ;;  %v6154_v54 = vpop.permute.xlu1 %6153  ;;  %v5812_v5 = vadd.f32 %v5757_v56, %v5540_v62  ;;  %v5751_v25 = vrot.slane %v13496_v55, 1  ;;  %v15215_v38 = vld [vmem:[#allocation166_spill] sm:$0xff] }
 0x5f4   : > { %v13617_v33 = vadd.f32 %v6321_v21, %v5809_v18  ;;  %v6257_v4 = vrot.slane %v6154_v54, 1  ;;  %6651 = vrot.lane.b32.xlu0 %v15206_v20, %s8845_s8  ;;  %v5542_v59 = vadd.f32 %v13446_v34, %v15213_v51  ;;  %v15214_v18 = vld [vmem:[#allocation42_spill] sm:$0xff] }
 0x5f5   : > { %v13623_v43 = vadd.f32 %v6322_v35, %v5810_v36  ;;  %6653 = vrot.lane.b32.xlu1 %v12853_v48, %s8845_s8  ;;  %v6052_v48 = vadd.f32 %v13470_v40, %v15209_v53  ;;  %v5756_v40 = vsel %vm2447_vm3, %v5747_v58, %v5748_v46  ;;  %v6054_v21 = vadd.f32 %v13478_v42, %v15214_v18  ;;  %v15216_v23 = vld [vmem:[#allocation38_spill] sm:$0xff]  ;;  %v15233_v18 = vld [vmem:[#allocation176_spill] sm:$0xff] }
 0x5f6   : > { %v6270_v31 = vsel %vm2447_vm3, %v6256_v29, %v6257_v4  ;;  %v6156_v32 = vpop.permute.xlu0 %6155  ;;  %v5750_v55 = vrot.slane %v15216_v23, 1  ;;  %v5813_v36 = vadd.f32 %v5756_v40, %v5541_v19  ;;  %v15218_v20 = vld [vmem:[#allocation86_spill] sm:$0xff]  ;;  %v6056_v19 = vadd.f32 %v13521_v17, %v15226_v15  ;;  %v15230_v17 = vld [vmem:[#allocation103_spill] sm:$0xff]  ;;  %v15235_v23 = vld [vmem:[#allocation117_spill] sm:$0xff] }
 0x5f7   : > { %v6323_v22 = vadd.f32 %v6270_v31, %v6051_v24  ;;  %v6258_v2 = vrot.slane %v6156_v32, 1  ;;  %v6158_v49 = vpop.permute.xlu1 %6157  ;;  %v5543_v24 = vadd.f32 %v15219_v11, %v15218_v20  ;;  %v15220_v56 = vld [vmem:[#allocation114_spill] sm:$0xff]  ;;  %v15222_v32 = vld [vmem:[#allocation44_spill] sm:$0xff]  ;;  %v15250_v15 = vld [vmem:[#allocation173_spill] sm:$0xff] }
 0x5f8   : > { %6655 = vrot.lane.b32.xlu0 %v12842_v39, %s8845_s8  ;;  %v5755_v39 = vsel %vm2447_vm3, %v5748_v46, %v5749_v7  ;;  %v6259_v60 = vrot.slane %v6158_v49, 1  ;;  %v5754_v42 = vsel %vm2447_vm3, %v5750_v55, %v5751_v25  ;;  %v15221_v31 = vld [vmem:[#allocation158_spill] sm:$0xff] }
 0x5f9   : > { %v13640_v12 = vadd.f32 %v6323_v22, %v5811_v26  ;;  %v6269_v16 = vsel %vm2447_vm3, %v6257_v4, %v6258_v2  ;;  %6657 = vrot.lane.b32.xlu1 %v15210_v37, %s8845_s8  ;;  %v5814_v29 = vadd.f32 %v5755_v39, %v5542_v59  ;;  %v15217_v4 = vld [vmem:[#allocation164_spill] sm:$0xff]  ;;  %v5752_v26 = vrot.slane %v15220_v56, 1  ;;  %v15223_v22 = vld [vmem:[#allocation169_spill] sm:$0xff]  ;;  %v15225_v37 = vld [vmem:[#allocation82_spill] sm:$0xff] }
 0x5fa   : > { %v6324_v50 = vadd.f32 %v6269_v16, %v6052_v48  ;;  %v6160_v13 = vpop.permute.xlu0 %6159  ;;  %v6055_v58 = vadd.f32 %v15222_v32, %v15221_v31  ;;  %v5815_v62 = vadd.f32 %v5754_v42, %v5543_v24  ;;  %v15224_v16 = vld [vmem:[#allocation90_spill] sm:$0xff]  ;;  %v15228_v39 = vld [vmem:[#allocation172_spill] sm:$0xff]  ;;  %v15232_v59 = vld [vmem:[#allocation99_spill] sm:$0xff] }
 0x5fb   : > { %v6260_v61 = vrot.slane %v6160_v13, 1  ;;  %v6162_v9 = vpop.permute.xlu1 %6161  ;;  %v5753_v8 = vsel %vm2447_vm3, %v5751_v25, %v5752_v26  ;;  %v15231_v25 = vld [vmem:[#allocation174_spill] sm:$0xff]  ;;  %v15242_v24 = vld [vmem:[#allocation165_spill] sm:$0xff]  ;;  %v15244_v31 = vld [vmem:[#allocation184_spill] sm:$0xff] }
 0x5fc   : > { %v13655_v57 = vadd.f32 %v6324_v50, %v5812_v5  ;;  %v6261_v1 = vrot.slane %v6162_v9, 1  ;;  %6659 = vrot.lane.b32.xlu0 %v12864_v30, %s8845_s8  ;;  %v5544_v5 = vadd.f32 %v15225_v37, %v15224_v16  ;;  %v15227_v50 = vld [vmem:[#allocation167_spill] sm:$0xff]  ;;  %v15243_v26 = vld [vmem:[#allocation69_spill] sm:$0xff] }
 0x5fd   : > { %v6268_v47 = vsel %vm2447_vm3, %v6259_v60, %v6260_v61  ;;  %6661 = vrot.lane.b32.xlu1 %v15215_v38, %s8845_s8  ;;  %v15234_v38 = vld [vmem:[#allocation113_spill] sm:$0xff]  ;;  %v15249_v16 = vld [vmem:[#allocation171_spill] sm:$0xff] }
 0x5fe   : > { %v6325_v63 = vadd.f32 %v6268_v47, %v6053_v27  ;;  %v6267_v35 = vsel %vm2447_vm3, %v6260_v61, %v6261_v1  ;;  %v6164_v30 = vpop.permute.xlu0 %6163  ;;  %v5816_v60 = vadd.f32 %v5753_v8, %v5544_v5 }
 0x5ff   : > { %v6326_v54 = vadd.f32 %v6267_v35, %v6054_v21  ;;  %v6262_v34 = vrot.slane %v6164_v30, 1  ;;  %v6166_v6 = vpop.permute.xlu1 %6165  ;;  %v15237_v35 = vld [vmem:[#allocation179_spill] sm:$0xff] }
 0x600   : > { %v13672_v0 = vadd.f32 %v6325_v63, %v5813_v36  ;;  %v6263_v44 = vrot.slane %v6166_v6, 1  ;;  %6663 = vrot.lane.b32.xlu0 %v15217_v4, %s8845_s8  ;;  %v15236_v63 = vld [vmem:[#allocation121_spill] sm:$0xff] }
 0x601   : > { %v13681_v7 = vadd.f32 %v6326_v54, %v5814_v29  ;;  %6665 = vrot.lane.b32.xlu1 %v15223_v22, %s8845_s8  ;;  %v15238_v54 = vld [vmem:[#allocation177_spill] sm:$0xff] }
 0x602   : > { %v6266_v2 = vsel %vm2447_vm3, %v6262_v34, %v6263_v44  ;;  %v6168_v49 = vpop.permute.xlu0 %6167  ;;  %v15239_v34 = vld [vmem:[#allocation180_spill] sm:$0xff]  ;;  %v15241_v4 = vld [vmem:[#allocation181_spill] sm:$0xff] }
 0x603   : > { %v6327_v53 = vadd.f32 %v6266_v2, %v6055_v58  ;;  %v6264_v48 = vrot.slane %v6168_v49, 1  ;;  %v13689_v46 = vpop.permute.xlu1 %6473  ;;  %v15245_v58 = vld [vmem:[#allocation168_spill] sm:$0xff]  ;;  %v15246_v49 = vld [vmem:[#allocation170_spill] sm:$0xff] }
 0x604   : > { %6667 = vrot.lane.b32.xlu0 %v15227_v50, %s8845_s8  ;;  %v15251_v50 = vld [vmem:[#allocation153_spill] sm:$0xff] }
 0x605   : > { %v13697_v13 = vadd.f32 %v6327_v53, %v5815_v62  ;;  %v6265_v40 = vsel %vm2447_vm3, %v6263_v44, %v6264_v48  ;;  %6669 = vrot.lane.b32.xlu1 %v15228_v39, %s8845_s8  ;;  %v15240_v44 = vld [vmem:[#allocation134_spill] sm:$0xff] }
 0x606   : > { %v6328_v61 = vadd.f32 %v6265_v40, %v6056_v19  ;;  %v13703_v9 = vpop.permute.xlu0 %6475  ;;  %v15247_v62 = vld [vmem:[#allocation182_spill] sm:$0xff]  ;;  %v15252_v40 = vld [vmem:[#allocation188_spill] sm:$0xff] }
 0x607   : > { %v13705_v10 = vpop.permute.xlu1 %6477  ;;  %v15248_v53 = vld [vmem:[#allocation186_spill] sm:$0xff] }
 0x608   : > { %v13707_v27 = vadd.f32 %v6328_v61, %v5816_v60  ;;  %6671 = vrot.lane.b32.xlu0 %v15230_v17, %s8845_s8  ;;  %v15253_v60 = vld [vmem:[#allocation116_spill] sm:$0xff] }
 0x609   : > { %6673 = vrot.lane.b32.xlu1 %v15231_v25, %s8845_s8  ;;  %v15254_v25 = vld [vmem:[#allocation105_spill] sm:$0xff] }
 0x60a   : > { %15229 = vst [vmem:[#allocation107_spill] sm:$0xff] %v13707_v27  ;;  %v13713_v1 = vpop.permute.xlu0 %6479 }
 0x60b   : > { %v13715_v51 = vpop.permute.xlu1 %6481 }
 0x60c   : > { %6675 = vrot.lane.b32.xlu0 %v15232_v59, %s8845_s8 }
 0x60d   : > { %6677 = vrot.lane.b32.xlu1 %v15233_v18, %s8845_s8  ;;  %v15255_v18 = vld [vmem:[#allocation146_spill] sm:$0xff] }
 0x60e   : > { %v13721_v21 = vpop.permute.xlu0 %6483 }
 0x60f   : > { %v13723_v47 = vpop.permute.xlu1 %6485 }
 0x610   : > { %6679 = vrot.lane.b32.xlu0 %v15234_v38, %s8845_s8  ;;  %v15256_v38 = vld [vmem:[#allocation135_spill] sm:$0xff] }
 0x611   : > { %6681 = vrot.lane.b32.xlu1 %v15235_v23, %s8845_s8 }
 0x612   : > { %v13729_v55 = vpop.permute.xlu0 %6487 }
 0x613   : > { %v13731_v36 = vpop.permute.xlu1 %6489 }
 0x614   : > { %6683 = vrot.lane.b32.xlu0 %v15236_v63, %s8845_s8  ;;  %v15257_v63 = vld [vmem:[#allocation110_spill] sm:$0xff] }
 0x615   : > { %6685 = vrot.lane.b32.xlu1 %v15237_v35, %s8845_s8 }
 0x616   : > { %v13737_v30 = vpop.permute.xlu0 %6491 }
 0x617   : > { %v13739_v29 = vpop.permute.xlu1 %6493 }
 0x618   : > { %6687 = vrot.lane.b32.xlu0 %v15238_v54, %s8845_s8 }
 0x619   : > { %6689 = vrot.lane.b32.xlu1 %v15239_v34, %s8845_s8  ;;  %v15258_v34 = vld [vmem:[#allocation23_spill] sm:$0xff] }
 0x61a   : > { %v13745_v6 = vpop.permute.xlu0 %6495 }
 0x61b   : > { %v13747_v42 = vpop.permute.xlu1 %6497 }
 0x61c   : > { %6691 = vrot.lane.b32.xlu0 %v15240_v44, %s8845_s8  ;;  %v15259_v44 = vld [vmem:[#allocation132_spill] sm:$0xff] }
 0x61d   : > { %6693 = vrot.lane.b32.xlu1 %v15241_v4, %s8845_s8  ;;  %v3609_v4 = vadd.f32 %v15259_v44, %v15258_v34 }
 0x61e   : > { %v13753_v20 = vpop.permute.xlu0 %6499 }
 0x61f   : > { %v6502_v11 = vpop.permute.xlu1 %6501 }
 0x620   : > { %v13756_v56 = vadd.f32 %v6502_v11, %v15242_v24  ;;  %6695 = vrot.lane.b32.xlu0 %v15243_v26, %s8845_s8  ;;  %v15260_v11 = vld [vmem:[#allocation178_spill] sm:$0xff] }
 0x621   : > { %6697 = vrot.lane.b32.xlu1 %v15244_v31, %s8845_s8  ;;  %v15261_v26 = vld [vmem:[#allocation150_spill] sm:$0xff] }
 0x622   : > { %v6504_v32 = vpop.permute.xlu0 %6503 }
 0x623   : > { %v13763_v22 = vadd.f32 %v6504_v32, %v15245_v58  ;;  %v6506_v2 = vpop.permute.xlu1 %6505  ;;  %v15262_v32 = vld [vmem:[#allocation22_spill] sm:$0xff] }
 0x624   : > { %v13766_v8 = vadd.f32 %v6506_v2, %v15246_v49  ;;  %6699 = vrot.lane.b32.xlu0 %v15247_v62, %s8845_s8  ;;  %v3610_v58 = vadd.f32 %v15262_v32, %v15259_v44  ;;  %v15263_v2 = vld [vmem:[#allocation128_spill] sm:$0xff] }
 0x625   : > { %6701 = vrot.lane.b32.xlu1 %v15248_v53, %s8845_s8  ;;  %v15264_v53 = vld [vmem:[#allocation24_spill] sm:$0xff] }
 0x626   : > { %v6508_v48 = vpop.permute.xlu0 %6507 }
 0x627   : > { %v13773_v37 = vadd.f32 %v6508_v48, %v15249_v16  ;;  %v6510_v5 = vpop.permute.xlu1 %6509  ;;  %v3611_v48 = vadd.f32 %v15264_v53, %v15259_v44  ;;  %v15265_v16 = vld [vmem:[#allocation72_spill] sm:$0xff] }
 0x628   : > { %v13776_v19 = vadd.f32 %v6510_v5, %v15250_v15  ;;  %6703 = vrot.lane.b32.xlu0 %v15251_v50, %s8845_s8  ;;  %v15266_v50 = vld [vmem:[#allocation25_spill] sm:$0xff]  ;;  %v15274_v53 = vld [vmem:[#allocation36_spill] sm:$0xff] }
 0x629   : > { %6705 = vrot.lane.b32.xlu1 %v15252_v40, %s8845_s8  ;;  %v3612_v40 = vadd.f32 %v15259_v44, %v15266_v50 }
 0x62a   : > { %v6512_v39 = vpop.permute.xlu0 %6511 }
 0x62b   : > { %v13783_v61 = vadd.f32 %v6512_v39, %v15253_v60  ;;  %v6514_v17 = vpop.permute.xlu1 %6513  ;;  %v15267_v39 = vld [vmem:[#allocation139_spill] sm:$0xff] }
 0x62c   : > { %v13786_v59 = vadd.f32 %v6514_v17, %v15254_v25  ;;  %6707 = vrot.lane.b32.xlu0 %v15255_v18, %s8845_s8  ;;  %v15268_v25 = vld [vmem:[#allocation29_spill] sm:$0xff] }
 0x62d   : > { %6709 = vrot.lane.b32.xlu1 %v15256_v38, %s8845_s8  ;;  %v3613_v18 = vadd.f32 %v15259_v44, %v15268_v25  ;;  %v15269_v38 = vld [vmem:[#allocation183_spill] sm:$0xff] }
 0x62e   : > { %v6516_v23 = vpop.permute.xlu0 %6515 }
 0x62f   : > { %v13793_v35 = vadd.f32 %v6516_v23, %v15257_v63  ;;  %v6518_v54 = vpop.permute.xlu1 %6517 }
 0x630   : > { %v13798_v24 = vadd.f32 %v6518_v54, %v15260_v11  ;;  %6711 = vrot.lane.b32.xlu0 %v15261_v26, %s8845_s8  ;;  %v15270_v54 = vld [vmem:[#allocation28_spill] sm:$0xff]  ;;  %s8759_s8 = scalar_lea.vmem %s8758_s29, 8192 }
 0x631   : > { %7072 = vrot.lane.b32.xlu1 %v3609_v4, %s8848_s21  ;;  %v3614_v34 = vadd.f32 %v15270_v54, %v15259_v44  ;;  %v15271_v4 = vld [vmem:[#allocation185_spill] sm:$0xff]  ;;  %v15279_v54 = vld [vmem:[#allocation74_spill] sm:$0xff]  ;;  %p8761_p3 = scmp.lt.s32.totalorder %s8759_s8, %s8753_s19 }
 0x632   : > { %v6520_v31 = vpop.permute.xlu0 %6519 }
 0x633   : > { %v13806_v49 = vadd.f32 %v6520_v31, %v15263_v2  ;;  %v6522_v62 = vpop.permute.xlu1 %6521  ;;  %v15272_v31 = vld [vmem:[#allocation31_spill] sm:$0xff]  ;;  %p8762_p2 = por %p8761_p3, %p8760_p1 }
 0x634   : > { %v13811_v5 = vadd.f32 %v6522_v62, %v15265_v16  ;;  %7074 = vrot.lane.b32.xlu0 %v3610_v58, %s8848_s21  ;;  %v3615_v32 = vadd.f32 %v15272_v31, %v15259_v44  ;;  %v15273_v58 = vld [vmem:[#allocation145_spill] sm:$0xff]  ;;  %v15275_v16 = vld [vmem:[#allocation187_spill] sm:$0xff] }
 0x635   : > { %7076 = vrot.lane.b32.xlu1 %v3611_v48, %s8848_s21  ;;  %v3616_v48 = vadd.f32 %v15259_v44, %v15274_v53  ;;  %p8763_p8 = pnand %p8762_p2, %p8756_p13 }
 0x636   : > { %v6524_v15 = vpop.permute.xlu0 %6523 }
 0x637   : > { %v13818_v60 = vadd.f32 %v6524_v15, %v15267_v39  ;;  %v6526_v17 = vpop.permute.xlu1 %6525 }
 0x638   : > { %v13823_v23 = vadd.f32 %v6526_v17, %v15269_v38  ;;  %7078 = vrot.lane.b32.xlu0 %v3612_v40, %s8848_s21  ;;  %v15276_v40 = vld [vmem:[#allocation41_spill] sm:$0xff]  ;;  %v15278_v38 = vld [vmem:[#allocation39_spill] sm:$0xff] }
 0x639   : > { %7080 = vrot.lane.b32.xlu1 %v3613_v18, %s8848_s21  ;;  %v3617_v39 = vadd.f32 %v15259_v44, %v15276_v40  ;;  %v15277_v17 = vld [vmem:[#allocation125_spill] sm:$0xff] }
 0x63a   : > { %v6528_v63 = vpop.permute.xlu0 %6527 }
 0x63b   : > { %v13830_v11 = vadd.f32 %v6528_v63, %v15271_v4  ;;  %v6530_v26 = vpop.permute.xlu1 %6529  ;;  %v3618_v63 = vadd.f32 %v15278_v38, %v15259_v44  ;;  %v15284_v38 = vld [vmem:[#allocation100_spill] sm:$0xff] }
 0x63c   : > { %v13835_v2 = vadd.f32 %v6530_v26, %v15273_v58  ;;  %7082 = vrot.lane.b32.xlu0 %v3614_v34, %s8848_s21  ;;  %v15280_v26 = vld [vmem:[#allocation43_spill] sm:$0xff]  ;;  %v15281_v58 = vld [vmem:[#allocation48_spill] sm:$0xff] }
 0x63d   : > { %7084 = vrot.lane.b32.xlu1 %v3615_v32, %s8848_s21  ;;  %v3619_v31 = vadd.f32 %v15280_v26, %v15259_v44 }
 0x63e   : > { %v6532_v62 = vpop.permute.xlu0 %6531 }
 0x63f   : > { %v13842_v15 = vadd.f32 %v6532_v62, %v15275_v16  ;;  %v6534_v50 = vpop.permute.xlu1 %6533  ;;  %v3620_v62 = vadd.f32 %v15259_v44, %v15281_v58 }
 0x640   : > { %v13847_v25 = vadd.f32 %v6534_v50, %v15277_v17  ;;  %7086 = vrot.lane.b32.xlu0 %v3616_v48, %s8848_s21  ;;  %v15282_v50 = vld [vmem:[#allocation53_spill] sm:$0xff] }
 0x641   : > { %7088 = vrot.lane.b32.xlu1 %v3617_v39, %s8848_s21  ;;  %v3621_v40 = vadd.f32 %v15259_v44, %v15282_v50  ;;  %v15283_v39 = vld [vmem:[#allocation62_spill] sm:$0xff] }
 0x642   : > { %v6536_v18 = vpop.permute.xlu0 %6535  ;;  %v6569_v17 = vadd.f32 %v13689_v46, %v15283_v39 }
 0x643   : > { %v13854_v34 = vadd.f32 %v6536_v18, %v15279_v54  ;;  %v6618_v4 = vpop.permute.xlu1 %6617 }
 0x644   : > { %7090 = vrot.lane.b32.xlu0 %v3618_v63, %s8848_s21  ;;  %v6761_v53 = vrot.slane %v6618_v4, 1  ;;  %v6570_v63 = vadd.f32 %v13703_v9, %v15284_v38 }
 0x645   : > { %7092 = vrot.lane.b32.xlu1 %v3619_v31, %s8848_s21 }
 0x646   : > { %v6620_v32 = vpop.permute.xlu0 %6619 }
 0x647   : > { %v6762_v48 = vrot.slane %v6620_v32, 1  ;;  %v6622_v16 = vpop.permute.xlu1 %6621  ;;  %v15285_v32 = vld [vmem:[#allocation51_spill] sm:$0xff] }
 0x648   : > { %v6763_v18 = vrot.slane %v6622_v16, 1  ;;  %7094 = vrot.lane.b32.xlu0 %v3620_v62, %s8848_s21  ;;  %v3622_v58 = vadd.f32 %v15285_v32, %v15259_v44  ;;  %v15286_v62 = vld [vmem:[#allocation55_spill] sm:$0xff] }
 0x649   : > { %v6840_v54 = vsel %vm2447_vm3, %v6761_v53, %v6762_v48  ;;  %7096 = vrot.lane.b32.xlu1 %v3621_v40, %s8848_s21  ;;  %v3623_v39 = vadd.f32 %v15286_v62, %v15259_v44  ;;  %v15287_v53 = vld [vmem:[#allocation159_spill] sm:$0xff]  ;;  %v15288_v40 = vld [vmem:[#allocation154_spill] sm:$0xff] }
 0x64a   : > { %v6841_v4 = vadd.f32 %v6840_v54, %v6569_v17  ;;  %v6839_v26 = vsel %vm2447_vm3, %v6762_v48, %v6763_v18  ;;  %v6624_v31 = vpop.permute.xlu0 %6623  ;;  %v6571_v17 = vadd.f32 %v13705_v10, %v15288_v40  ;;  %v15289_v48 = vld [vmem:[#allocation47_spill] sm:$0xff] }
 0x64b   : > { %v6842_v46 = vadd.f32 %v6839_v26, %v6570_v63  ;;  %v6764_v16 = vrot.slane %v6624_v31, 1  ;;  %v6626_v50 = vpop.permute.xlu1 %6625  ;;  %v15290_v26 = vld [vmem:[#allocation60_spill] sm:$0xff] }
 0x64c   : > { %v6765_v9 = vrot.slane %v6626_v50, 1  ;;  %7098 = vrot.lane.b32.xlu0 %v3622_v58, %s8848_s21  ;;  %v13880_v38 = vadd.f32 %v6841_v4, %v15287_v53  ;;  %v3624_v31 = vadd.f32 %v15259_v44, %v15290_v26  ;;  %v15291_v4 = vld [vmem:[#allocation66_spill] sm:$0xff] }
 0x64d   : > { %7100 = vrot.lane.b32.xlu1 %v3623_v39, %s8848_s21  ;;  %v13886_v18 = vadd.f32 %v6842_v46, %v15289_v48  ;;  %v3625_v62 = vadd.f32 %v15259_v44, %v15291_v4  ;;  %v15292_v53 = vld [vmem:[#allocation58_spill] sm:$0xff]  ;;  %v15294_v48 = vld [vmem:[#allocation64_spill] sm:$0xff] }
 0x64e   : > { %v6838_v63 = vsel %vm2447_vm3, %v6764_v16, %v6765_v9  ;;  %v6628_v54 = vpop.permute.xlu0 %6627  ;;  %v6572_v10 = vadd.f32 %v13713_v1, %v15292_v53  ;;  %v15293_v16 = vld [vmem:[#allocation160_spill] sm:$0xff]  ;;  %v15295_v1 = vld [vmem:[#allocation70_spill] sm:$0xff] }
 0x64f   : > { %v6843_v32 = vadd.f32 %v6838_v63, %v6571_v17  ;;  %v6766_v58 = vrot.slane %v6628_v54, 1  ;;  %v6630_v50 = vpop.permute.xlu1 %6629  ;;  %v3626_v63 = vadd.f32 %v15294_v48, %v15259_v44  ;;  %v3627_v53 = vadd.f32 %v15295_v1, %v15259_v44  ;;  %v15300_v1 = vld [vmem:[#allocation85_spill] sm:$0xff] }
 0x650   : > { %7102 = vrot.lane.b32.xlu0 %v3624_v31, %s8848_s21  ;;  %v6767_v54 = vrot.slane %v6630_v50, 1  ;;  %v15296_v31 = vld [vmem:[#allocation63_spill] sm:$0xff] }
 0x651   : > { %v6837_v46 = vsel %vm2447_vm3, %v6765_v9, %v6766_v58  ;;  %7104 = vrot.lane.b32.xlu1 %v3625_v62, %s8848_s21  ;;  %v13901_v39 = vadd.f32 %v6843_v32, %v15293_v16  ;;  %v6573_v27 = vadd.f32 %v13715_v51, %v15296_v31  ;;  %v15297_v58 = vld [vmem:[#allocation143_spill] sm:$0xff]  ;;  %v15298_v62 = vld [vmem:[#allocation57_spill] sm:$0xff]  ;;  %v3629_v31 = vadd.f32 %v15259_v44, %v15300_v1  ;;  %v15306_v1 = vld [vmem:[#allocation144_spill] sm:$0xff] }
 0x652   : > { %v6844_v40 = vadd.f32 %v6837_v46, %v6572_v10  ;;  %v6632_v17 = vpop.permute.xlu0 %6631  ;;  %v6574_v10 = vadd.f32 %v13721_v21, %v15298_v62  ;;  %v15299_v51 = vld [vmem:[#allocation79_spill] sm:$0xff] }
 0x653   : > { %v6768_v26 = vrot.slane %v6632_v17, 1  ;;  %v6634_v4 = vpop.permute.xlu1 %6633  ;;  %v3628_v48 = vadd.f32 %v15259_v44, %v15299_v51 }
 0x654   : > { %v6769_v9 = vrot.slane %v6634_v4, 1  ;;  %7106 = vrot.lane.b32.xlu0 %v3626_v63, %s8848_s21  ;;  %v13911_v32 = vadd.f32 %v6844_v40, %v15297_v58 }
 0x655   : > { %v6836_v50 = vsel %vm2447_vm3, %v6767_v54, %v6768_v26  ;;  %7108 = vrot.lane.b32.xlu1 %v3627_v53, %s8848_s21  ;;  %v15301_v54 = vld [vmem:[#allocation96_spill] sm:$0xff] }
 0x656   : > { %v6845_v46 = vadd.f32 %v6836_v50, %v6573_v27  ;;  %v6835_v16 = vsel %vm2447_vm3, %v6768_v26, %v6769_v9  ;;  %v6636_v17 = vpop.permute.xlu0 %6635  ;;  %v15302_v27 = vld [vmem:[#allocation95_spill] sm:$0xff]  ;;  %v15303_v26 = vld [vmem:[#allocation65_spill] sm:$0xff] }
 0x657   : > { %v6846_v63 = vadd.f32 %v6835_v16, %v6574_v10  ;;  %v6770_v4 = vrot.slane %v6636_v17, 1  ;;  %v6638_v40 = vpop.permute.xlu1 %6637  ;;  %v6575_v53 = vadd.f32 %v13723_v47, %v15302_v27  ;;  %v15304_v50 = vld [vmem:[#allocation83_spill] sm:$0xff]  ;;  %v6576_v47 = vadd.f32 %v13729_v55, %v15306_v1 }
 0x658   : > { %v6771_v21 = vrot.slane %v6638_v40, 1  ;;  %7110 = vrot.lane.b32.xlu0 %v3628_v48, %s8848_s21  ;;  %v13926_v58 = vadd.f32 %v6845_v46, %v15301_v54  ;;  %v3630_v16 = vadd.f32 %v15304_v50, %v15259_v44  ;;  %v15305_v46 = vld [vmem:[#allocation89_spill] sm:$0xff] }
 0x659   : > { %7112 = vrot.lane.b32.xlu1 %v3629_v31, %s8848_s21  ;;  %v13932_v9 = vadd.f32 %v6846_v63, %v15303_v26  ;;  %v3631_v40 = vadd.f32 %v15305_v46, %v15259_v44  ;;  %v15309_v46 = vld [vmem:[#allocation94_spill] sm:$0xff] }
 0x65a   : > { %v6834_v62 = vsel %vm2447_vm3, %v6770_v4, %v6771_v21  ;;  %v6640_v10 = vpop.permute.xlu0 %6639  ;;  %v15307_v4 = vld [vmem:[#allocation106_spill] sm:$0xff]  ;;  %v3633_v55 = vadd.f32 %v15259_v44, %v15309_v46  ;;  %v15314_v46 = vld [vmem:[#allocation97_spill] sm:$0xff] }
 0x65b   : > { %v6847_v17 = vadd.f32 %v6834_v62, %v6575_v53  ;;  %v6772_v51 = vrot.slane %v6640_v10, 1  ;;  %v6642_v48 = vpop.permute.xlu1 %6641  ;;  %v15308_v53 = vld [vmem:[#allocation91_spill] sm:$0xff] }
 0x65c   : > { %7114 = vrot.lane.b32.xlu0 %v3630_v16, %s8848_s21  ;;  %v3632_v26 = vadd.f32 %v15259_v44, %v15308_v53  ;;  %v6773_v62 = vrot.slane %v6642_v48, 1  ;;  %v15310_v16 = vld [vmem:[#allocation49_spill] sm:$0xff] }
 0x65d   : > { %v6833_v63 = vsel %vm2447_vm3, %v6771_v21, %v6772_v51  ;;  %7116 = vrot.lane.b32.xlu1 %v3631_v40, %s8848_s21  ;;  %v13947_v31 = vadd.f32 %v6847_v17, %v15307_v4  ;;  %v6577_v1 = vadd.f32 %v13731_v36, %v15310_v16  ;;  %v15311_v51 = vld [vmem:[#allocation175_spill] sm:$0xff]  ;;  %v15312_v40 = vld [vmem:[#allocation56_spill] sm:$0xff]  ;;  %v15313_v36 = vld [vmem:[#allocation93_spill] sm:$0xff]  ;;  %v3635_v16 = vadd.f32 %v15314_v46, %v15259_v44 }
 0x65e   : > { %v6848_v54 = vadd.f32 %v6833_v63, %v6576_v47  ;;  %v6644_v27 = vpop.permute.xlu0 %6643  ;;  %v6578_v47 = vadd.f32 %v13737_v30, %v15312_v40  ;;  %v3634_v53 = vadd.f32 %v15313_v36, %v15259_v44  ;;  %v15320_v46 = vld [vmem:[#allocation102_spill] sm:$0xff] }
 0x65f   : > { %v6774_v10 = vrot.slane %v6644_v27, 1  ;;  %v6646_v50 = vpop.permute.xlu1 %6645 }
 0x660   : > { %v6775_v21 = vrot.slane %v6646_v50, 1  ;;  %7118 = vrot.lane.b32.xlu0 %v3632_v26, %s8848_s21  ;;  %v13957_v17 = vadd.f32 %v6848_v54, %v15311_v51 }
 0x661   : > { %v6832_v48 = vsel %vm2447_vm3, %v6773_v62, %v6774_v10  ;;  %7120 = vrot.lane.b32.xlu1 %v3633_v55, %s8848_s21  ;;  %v15315_v62 = vld [vmem:[#allocation119_spill] sm:$0xff] }
 0x662   : > { %v6849_v63 = vadd.f32 %v6832_v48, %v6577_v1  ;;  %v6831_v4 = vsel %vm2447_vm3, %v6774_v10, %v6775_v21  ;;  %v6648_v27 = vpop.permute.xlu0 %6647  ;;  %v15316_v55 = vld [vmem:[#allocation151_spill] sm:$0xff]  ;;  %v15317_v10 = vld [vmem:[#allocation141_spill] sm:$0xff]  ;;  %v15318_v48 = vld [vmem:[#allocation104_spill] sm:$0xff] }
 0x663   : > { %v6850_v26 = vadd.f32 %v6831_v4, %v6578_v47  ;;  %v6776_v50 = vrot.slane %v6648_v27, 1  ;;  %v6650_v54 = vpop.permute.xlu1 %6649  ;;  %v6579_v1 = vadd.f32 %v13739_v29, %v15316_v55  ;;  %v3636_v4 = vadd.f32 %v15259_v44, %v15318_v48 }
 0x664   : > { %v6777_v30 = vrot.slane %v6650_v54, 1  ;;  %7122 = vrot.lane.b32.xlu0 %v3634_v53, %s8848_s21  ;;  %v13972_v51 = vadd.f32 %v6849_v63, %v15315_v62  ;;  %v15319_v63 = vld [vmem:[#allocation109_spill] sm:$0xff]  ;;  %v6580_v29 = vadd.f32 %v13745_v6, %v15320_v46  ;;  %v15323_v6 = vld [vmem:[#allocation111_spill] sm:$0xff] }
 0x665   : > { %7124 = vrot.lane.b32.xlu1 %v3635_v16, %s8848_s21  ;;  %v13978_v21 = vadd.f32 %v6850_v26, %v15317_v10  ;;  %v3637_v54 = vadd.f32 %v15259_v44, %v15319_v63  ;;  %v3639_v63 = vadd.f32 %v15323_v6, %v15259_v44 }
 0x666   : > { %v6830_v40 = vsel %vm2447_vm3, %v6776_v50, %v6777_v30  ;;  %v6652_v47 = vpop.permute.xlu0 %6651  ;;  %v15321_v50 = vld [vmem:[#allocation124_spill] sm:$0xff] }
 0x667   : > { %v6851_v27 = vadd.f32 %v6830_v40, %v6579_v1  ;;  %v6778_v36 = vrot.slane %v6652_v47, 1  ;;  %v6654_v53 = vpop.permute.xlu1 %6653  ;;  %v15322_v1 = vld [vmem:[#allocation108_spill] sm:$0xff] }
 0x668   : > { %7126 = vrot.lane.b32.xlu0 %v3636_v4, %s8848_s21  ;;  %v3638_v10 = vadd.f32 %v15322_v1, %v15259_v44  ;;  %v6779_v40 = vrot.slane %v6654_v53, 1  ;;  %v15324_v4 = vld [vmem:[#allocation161_spill] sm:$0xff] }
 0x669   : > { %v6829_v26 = vsel %vm2447_vm3, %v6777_v30, %v6778_v36  ;;  %7128 = vrot.lane.b32.xlu1 %v3637_v54, %s8848_s21  ;;  %v13993_v16 = vadd.f32 %v6851_v27, %v15321_v50  ;;  %v6581_v46 = vadd.f32 %v13747_v42, %v15324_v4  ;;  %v15325_v36 = vld [vmem:[#allocation61_spill] sm:$0xff]  ;;  %v15326_v54 = vld [vmem:[#allocation162_spill] sm:$0xff] }
 0x66a   : > { %v6852_v62 = vadd.f32 %v6829_v26, %v6580_v29  ;;  %v6656_v55 = vpop.permute.xlu0 %6655  ;;  %v6582_v29 = vadd.f32 %v13753_v20, %v15326_v54  ;;  %v15327_v42 = vld [vmem:[#allocation149_spill] sm:$0xff]  ;;  %v15328_v20 = vld [vmem:[#allocation26_spill] sm:$0xff] }
 0x66b   : > { %v6780_v47 = vrot.slane %v6656_v55, 1  ;;  %v6658_v48 = vpop.permute.xlu1 %6657  ;;  %v3640_v1 = vadd.f32 %v15259_v44, %v15327_v42 }
 0x66c   : > { %v6781_v30 = vrot.slane %v6658_v48, 1  ;;  %7130 = vrot.lane.b32.xlu0 %v3638_v10, %s8848_s21  ;;  %v14003_v27 = vadd.f32 %v6852_v62, %v15325_v36 }
 0x66d   : > { %v6828_v53 = vsel %vm2447_vm3, %v6779_v40, %v6780_v47  ;;  %7132 = vrot.lane.b32.xlu1 %v3639_v63, %s8848_s21  ;;  %v15329_v40 = vld [vmem:[#allocation76_spill] sm:$0xff] }
 0x66e   : > { %v6853_v26 = vadd.f32 %v6828_v53, %v6581_v46  ;;  %v6827_v50 = vsel %vm2447_vm3, %v6780_v47, %v6781_v30  ;;  %v6660_v55 = vpop.permute.xlu0 %6659 }
 0x66f   : > { %v6854_v10 = vadd.f32 %v6827_v50, %v6582_v29  ;;  %v6782_v48 = vrot.slane %v6660_v55, 1  ;;  %v6662_v62 = vpop.permute.xlu1 %6661  ;;  %v15330_v29 = vld [vmem:[#allocation112_spill] sm:$0xff] }
 0x670   : > { %v6783_v6 = vrot.slane %v6662_v62, 1  ;;  %7134 = vrot.lane.b32.xlu0 %v3640_v1, %s8848_s21  ;;  %v14016_v4 = vadd.f32 %v6853_v26, %v15328_v20  ;;  %v15331_v62 = vld [vmem:[#allocation75_spill] sm:$0xff] }
 0x671   : > { %v14019_v36 = vadd.f32 %v6854_v10, %v15329_v40 }
 0x672   : > { %v6826_v63 = vsel %vm2447_vm3, %v6782_v48, %v6783_v6  ;;  %v6664_v47 = vpop.permute.xlu0 %6663 }
 0x673   : > { %v6855_v46 = vadd.f32 %v6826_v63, %v13756_v56  ;;  %v6784_v30 = vrot.slane %v6664_v47, 1  ;;  %v6666_v44 = vpop.permute.xlu1 %6665 }
 0x674   : > { %v6785_v55 = vrot.slane %v6666_v44, 1 }
 0x675   : > { %v6825_v54 = vsel %vm2447_vm3, %v6783_v6, %v6784_v30  ;;  %v14027_v53 = vadd.f32 %v6855_v46, %v15330_v29  ;;  %v15332_v30 = vld [vmem:[#allocation148_spill] sm:$0xff] }
 0x676   : > { %v6856_v26 = vadd.f32 %v6825_v54, %v13763_v22  ;;  %v6668_v50 = vpop.permute.xlu0 %6667  ;;  %v15333_v54 = vld [vmem:[#allocation80_spill] sm:$0xff] }
 0x677   : > { %v6786_v42 = vrot.slane %v6668_v50, 1  ;;  %v6670_v1 = vpop.permute.xlu1 %6669 }
 0x678   : > { %v6787_v10 = vrot.slane %v6670_v1, 1  ;;  %v14031_v48 = vadd.f32 %v6856_v26, %v15331_v62  ;;  %v15334_v1 = vld [vmem:[#allocation77_spill] sm:$0xff] }
 0x679   : > { %v6824_v56 = vsel %vm2447_vm3, %v6785_v55, %v6786_v42 }
 0x67a   : > { %v6857_v20 = vadd.f32 %v6824_v56, %v13766_v8  ;;  %v6823_v6 = vsel %vm2447_vm3, %v6786_v42, %v6787_v10  ;;  %v6672_v40 = vpop.permute.xlu0 %6671 }
 0x67b   : > { %v6858_v63 = vadd.f32 %v6823_v6, %v13773_v37  ;;  %v6788_v22 = vrot.slane %v6672_v40, 1  ;;  %v6674_v47 = vpop.permute.xlu1 %6673 }
 0x67c   : > { %v6789_v46 = vrot.slane %v6674_v47, 1  ;;  %v14040_v44 = vadd.f32 %v6857_v20, %v15332_v30 }
 0x67d   : > { %v14043_v29 = vadd.f32 %v6858_v63, %v15333_v54 }
 0x67e   : > { %v6822_v26 = vsel %vm2447_vm3, %v6788_v22, %v6789_v46  ;;  %v6676_v50 = vpop.permute.xlu0 %6675 }
 0x67f   : > { %v6859_v8 = vadd.f32 %v6822_v26, %v13776_v19  ;;  %v6790_v55 = vrot.slane %v6676_v50, 1  ;;  %v6678_v42 = vpop.permute.xlu1 %6677 }
 0x680   : > { %v6791_v20 = vrot.slane %v6678_v42, 1 }
 0x681   : > { %v6821_v37 = vsel %vm2447_vm3, %v6789_v46, %v6790_v55  ;;  %v14051_v10 = vadd.f32 %v6859_v8, %v15334_v1 }
 0x682   : > { %v6860_v62 = vadd.f32 %v6821_v37, %v13783_v61  ;;  %v6680_v56 = vpop.permute.xlu0 %6679 }
 0x683   : > { %v6792_v6 = vrot.slane %v6680_v56, 1  ;;  %v6682_v40 = vpop.permute.xlu1 %6681 }
 0x684   : > { %v6793_v63 = vrot.slane %v6682_v40, 1  ;;  %v14055_v22 = vadd.f32 %v6860_v62, %v13526_v3 }
 0x685   : > { %v6820_v19 = vsel %vm2447_vm3, %v6791_v20, %v6792_v6 }
 0x686   : > { %v6861_v47 = vadd.f32 %v6820_v19, %v13786_v59  ;;  %v6819_v46 = vsel %vm2447_vm3, %v6792_v6, %v6793_v63  ;;  %v6684_v30 = vpop.permute.xlu0 %6683 }
 0x687   : > { %v6862_v54 = vadd.f32 %v6819_v46, %v13793_v35  ;;  %v6794_v61 = vrot.slane %v6684_v30, 1  ;;  %v6686_v26 = vpop.permute.xlu1 %6685 }
 0x688   : > { %v6795_v50 = vrot.slane %v6686_v26, 1  ;;  %v14064_v8 = vadd.f32 %v6861_v47, %v13557_v41 }
 0x689   : > { %v14067_v3 = vadd.f32 %v6862_v54, %v13565_v52 }
 0x68a   : > { %v6818_v55 = vsel %vm2447_vm3, %v6794_v61, %v6795_v50  ;;  %v6688_v42 = vpop.permute.xlu0 %6687 }
 0x68b   : > { %v6863_v59 = vadd.f32 %v6818_v55, %v13798_v24  ;;  %v6796_v37 = vrot.slane %v6688_v42, 1  ;;  %v6690_v1 = vpop.permute.xlu1 %6689 }
 0x68c   : > { %v6797_v20 = vrot.slane %v6690_v1, 1 }
 0x68d   : > { %v6817_v35 = vsel %vm2447_vm3, %v6795_v50, %v6796_v37  ;;  %v14075_v62 = vadd.f32 %v6863_v59, %v13582_v45  ;;  %v14096_v59 = vld [vmem:[#allocation13] ss:$0 sm:$0xff] }
 0x68e   : > { %v6864_v41 = vadd.f32 %v6817_v35, %v13806_v49  ;;  %v6692_v56 = vpop.permute.xlu0 %6691  ;;  %v6912_v1 = vadd.f32 %v14096_v59, %v13880_v38  ;;  %v6917_v28 = vadd.f32 %v14096_v59, %v13932_v9 }
 0x68f   : > { %v6798_v52 = vrot.slane %v6692_v56, 1  ;;  %v6694_v6 = vpop.permute.xlu1 %6693 }
 0x690   : > { %v6799_v40 = vrot.slane %v6694_v6, 1  ;;  %v14079_v63 = vadd.f32 %v6864_v41, %v13597_v14  ;;  %v6976_v38 = vmul.f32 0.01, %v6912_v1  ;;  %vm6944_vm2 = vcmp.ge.f32.partialorder %v6912_v1, 0.0 }
 0x691   : > { %v6816_v24 = vsel %vm2447_vm3, %v6797_v20, %v6798_v52  ;;  %vm6949_vm14 = vcmp.ge.f32.partialorder %v6917_v28, 0.0 }
 0x692   : > { %v6865_v19 = vadd.f32 %v6816_v24, %v13811_v5  ;;  %v6815_v47 = vsel %vm2447_vm3, %v6798_v52, %v6799_v40  ;;  %v6696_v45 = vpop.permute.xlu0 %6695  ;;  %v6914_v24 = vadd.f32 %v14096_v59, %v13901_v39  ;;  %v7008_v39 = vsel %vm6944_vm2, %v6912_v1, %v6976_v38 }
 0x693   : > { %v6866_v46 = vadd.f32 %v6815_v47, %v13818_v60  ;;  %v6800_v49 = vrot.slane %v6696_v45, 1  ;;  %v6698_v30 = vpop.permute.xlu1 %6697  ;;  %v6920_v38 = vadd.f32 %v14096_v59, %v13972_v51 }
 0x694   : > { %v6801_v54 = vrot.slane %v6698_v30, 1  ;;  %v14088_v61 = vadd.f32 %v6865_v19, %v13617_v33  ;;  %vm6946_vm12 = vcmp.ge.f32.partialorder %v6914_v24, 0.0 }
 0x695   : > { %v14091_v14 = vadd.f32 %v6866_v46, %v13623_v43  ;;  %vm6952_vm1 = vcmp.ge.f32.partialorder %v6920_v38, 0.0 }
 0x696   : > { %v6814_v26 = vsel %vm2447_vm3, %v6800_v49, %v6801_v54  ;;  %v6700_v50 = vpop.permute.xlu0 %6699 }
 0x697   : > { %v6867_v5 = vadd.f32 %v6814_v26, %v13823_v23  ;;  %v6802_v55 = vrot.slane %v6700_v50, 1  ;;  %v6702_v42 = vpop.permute.xlu1 %6701 }
 0x698   : > { %v6803_v35 = vrot.slane %v6702_v42, 1 }
 0x699   : > { %v6813_v60 = vsel %vm2447_vm3, %v6801_v54, %v6802_v55  ;;  %v14101_v37 = vadd.f32 %v6867_v5, %v13640_v12  ;;  %v6913_v12 = vadd.f32 %v14096_v59, %v13886_v18  ;;  %v6978_v54 = vmul.f32 0.01, %v6914_v24 }
 0x69a   : > { %v6868_v33 = vadd.f32 %v6813_v60, %v13830_v11  ;;  %v6704_v43 = vpop.permute.xlu0 %6703  ;;  %v6916_v5 = vadd.f32 %v14096_v59, %v13926_v58 }
 0x69b   : > { %v6804_v41 = vrot.slane %v6704_v43, 1  ;;  %v6706_v56 = vpop.permute.xlu1 %6705  ;;  %vm6945_vm11 = vcmp.ge.f32.partialorder %v6913_v12, 0.0  ;;  %v6977_v18 = vmul.f32 0.01, %v6913_v12 }
 0x69c   : > { %v6805_v23 = vrot.slane %v6706_v56, 1  ;;  %v14107_v20 = vadd.f32 %v6868_v33, %v13655_v57  ;;  %vm6948_vm13 = vcmp.ge.f32.partialorder %v6916_v5, 0.0 }
 0x69d   : > { %v6812_v52 = vsel %vm2447_vm3, %v6803_v35, %v6804_v41  ;;  %v7009_v42 = vsel %vm6945_vm11, %v6913_v12, %v6977_v18  ;;  %v6981_v12 = vmul.f32 0.01, %v6917_v28 }
 0x69e   : > { %v6869_v6 = vadd.f32 %v6812_v52, %v13835_v2  ;;  %v6811_v11 = vsel %vm2447_vm3, %v6804_v41, %v6805_v23  ;;  %v6708_v40 = vpop.permute.xlu0 %6707  ;;  %v15335_v41 = vld [vmem:[#allocation107_spill] sm:$0xff]  ;;  %v6919_v23 = vadd.f32 %v14096_v59, %v13957_v17 }
 0x69f   : > { %v6870_v19 = vadd.f32 %v6811_v11, %v13842_v15  ;;  %v6806_v57 = vrot.slane %v6708_v40, 1  ;;  %v6710_v47 = vpop.permute.xlu1 %6709  ;;  %v6915_v15 = vadd.f32 %v14096_v59, %v13911_v32  ;;  %v7010_v32 = vsel %vm6946_vm12, %v6914_v24, %v6978_v54 }
 0x6a0   : > { %v6807_v45 = vrot.slane %v6710_v47, 1  ;;  %v14120_v46 = vadd.f32 %v6869_v6, %v13672_v0  ;;  %v6983_v17 = vmul.f32 0.01, %v6919_v23  ;;  %vm6951_vm0 = vcmp.ge.f32.partialorder %v6919_v23, 0.0 }
 0x6a1   : > { %v14123_v2 = vadd.f32 %v6870_v19, %v13681_v7  ;;  %v6979_v58 = vmul.f32 0.01, %v6915_v15  ;;  %v7013_v19 = vsel %vm6949_vm14, %v6917_v28, %v6981_v12  ;;  %v6921_v47 = vadd.f32 %v14096_v59, %v13978_v21 }
 0x6a2   : > { %v6810_v49 = vsel %vm2447_vm3, %v6806_v57, %v6807_v45  ;;  %v6712_v30 = vpop.permute.xlu0 %6711  ;;  %v7015_v54 = vsel %vm6951_vm0, %v6919_v23, %v6983_v17 }
 0x6a3   : > { %v6871_v26 = vadd.f32 %v6810_v49, %v13847_v25  ;;  %v6808_v50 = vrot.slane %v6712_v30, 1  ;;  %v7073_v0 = vpop.permute.xlu1 %7072  ;;  %v6984_v30 = vmul.f32 0.01, %v6920_v38  ;;  %vm6953_vm5 = vcmp.ge.f32.partialorder %v6921_v47, 0.0 }
 0x6a4   : > { %v7168_v7 = vadd.f32 %v7073_v0, %v7008_v39 }
 0x6a5   : > { %v6809_v55 = vsel %vm2447_vm3, %v6807_v45, %v6808_v50  ;;  %v14135_v60 = vadd.f32 %v6871_v26, %v13697_v13  ;;  %vm6947_vm3 = vcmp.ge.f32.partialorder %v6915_v15, 0.0  ;;  %v6980_v13 = vmul.f32 0.01, %v6916_v5 }
 0x6a6   : > { %v6872_v33 = vadd.f32 %v6809_v55, %v13854_v34  ;;  %7200 = vst.msk [vmem:[%s14140_s13] sm:$0xff] %vm465_vm4, %v7168_v7  ;;  %v7075_v25 = vpop.permute.xlu0 %7074  ;;  %v6918_v34 = vadd.f32 %v14096_v59, %v13947_v31  ;;  %v7011_v9 = vsel %vm6947_vm3, %v6915_v15, %v6979_v58  ;;  %v6922_v45 = vadd.f32 %v14096_v59, %v13993_v16 }
 0x6a7   : > { %v7169_v43 = vadd.f32 %v7075_v25, %v7009_v42  ;;  %v7077_v1 = vpop.permute.xlu1 %7076  ;;  %v7012_v11 = vsel %vm6948_vm13, %v6916_v5, %v6980_v13  ;;  %v6985_v26 = vmul.f32 0.01, %v6921_v47  ;;  %v6923_v16 = vadd.f32 %v14096_v59, %v14003_v27 }
 0x6a8   : > { %v7170_v35 = vadd.f32 %v7077_v1, %v7010_v32  ;;  %v14149_v56 = vadd.f32 %v6872_v33, %v15335_v41  ;;  %v6982_v40 = vmul.f32 0.01, %v6918_v34  ;;  %vm6950_vm15 = vcmp.ge.f32.partialorder %v6918_v34, 0.0 }
 0x6a9   : > { %7201 = vst.msk [vmem:[%s14140_s13 + $0x8] sm:$0xff] %vm465_vm4, %v7169_v43  ;;  %v6986_v21 = vmul.f32 0.01, %v6922_v45  ;;  %v7016_v5 = vsel %vm6952_vm1, %v6920_v38, %v6984_v30  ;;  %vm6954_vm6 = vcmp.ge.f32.partialorder %v6922_v45, 0.0  ;;  %v6924_v7 = vadd.f32 %v14096_v59, %v14016_v4 }
 0x6aa   : > { %7202 = vst.msk [vmem:[%s14140_s13 + $0x10] sm:$0xff] %vm465_vm4, %v7170_v35  ;;  %v7079_v52 = vpop.permute.xlu0 %7078  ;;  %v7014_v49 = vsel %vm6950_vm15, %v6918_v34, %v6982_v40  ;;  %v7017_v42 = vsel %vm6953_vm5, %v6921_v47, %v6985_v26  ;;  %v6987_v32 = vmul.f32 0.01, %v6923_v16  ;;  %v6925_v27 = vadd.f32 %v14096_v59, %v14019_v36 }
 0x6ab   : > { %v7171_v6 = vadd.f32 %v7079_v52, %v7011_v9  ;;  %v7081_v31 = vpop.permute.xlu1 %7080  ;;  %v7018_v25 = vsel %vm6954_vm6, %v6922_v45, %v6986_v21  ;;  %vm6955_vm7 = vcmp.ge.f32.partialorder %v6923_v16, 0.0  ;;  %v6988_v43 = vmul.f32 0.01, %v6924_v7 }
 0x6ac   : > { %v7172_v24 = vadd.f32 %v7081_v31, %v7012_v11  ;;  %v6926_v4 = vadd.f32 %v14096_v59, %v14027_v53  ;;  %vm6956_vm8 = vcmp.ge.f32.partialorder %v6924_v7, 0.0  ;;  %v6927_v13 = vadd.f32 %v14096_v59, %v14031_v48 }
 0x6ad   : > { %7203 = vst.msk [vmem:[%s14140_s13 + $0x18] sm:$0xff] %vm465_vm4, %v7171_v6  ;;  %v7019_v34 = vsel %vm6955_vm7, %v6923_v16, %v6987_v32  ;;  %vm6957_vm9 = vcmp.ge.f32.partialorder %v6925_v27, 0.0  ;;  %v6989_v35 = vmul.f32 0.01, %v6925_v27  ;;  %v7020_v9 = vsel %vm6956_vm8, %v6924_v7, %v6988_v43 }
 0x6ae   : > { %7204 = vst.msk [vmem:[%s14140_s13 + $0x20] sm:$0xff] %vm465_vm4, %v7172_v24  ;;  %v7083_v57 = vpop.permute.xlu0 %7082  ;;  %v6990_v52 = vmul.f32 0.01, %v6926_v4  ;;  %v6928_v53 = vadd.f32 %v14096_v59, %v14040_v44  ;;  %vm6958_vm10 = vcmp.ge.f32.partialorder %v6926_v4, 0.0  ;;  %v6991_v48 = vmul.f32 0.01, %v6927_v13 }
 0x6af   : > { %v7173_v18 = vadd.f32 %v7083_v57, %v7013_v19  ;;  %v7085_v51 = vpop.permute.xlu1 %7084  ;;  %v7021_v6 = vsel %vm6957_vm9, %v6925_v27, %v6989_v35  ;;  %vm6959_vm2 = vcmp.ge.f32.partialorder %v6927_v13, 0.0  ;;  %v6929_v11 = vadd.f32 %v14096_v59, %v14043_v29 }
 0x6b0   : > { %v7174_v39 = vadd.f32 %v7085_v51, %v7014_v49  ;;  %v6930_v40 = vadd.f32 %v14096_v59, %v14051_v10  ;;  %v7022_v24 = vsel %vm6958_vm10, %v6926_v4, %v6990_v52  ;;  %v6992_v17 = vmul.f32 0.01, %v6928_v53 }
 0x6b1   : > { %7205 = vst.msk [vmem:[%s14140_s13 + $0x28] sm:$0xff] %vm465_vm4, %v7173_v18  ;;  %vm6960_vm11 = vcmp.ge.f32.partialorder %v6928_v53, 0.0  ;;  %v7023_v57 = vsel %vm6959_vm2, %v6927_v13, %v6991_v48  ;;  %vm6961_vm12 = vcmp.ge.f32.partialorder %v6929_v11, 0.0  ;;  %v6993_v45 = vmul.f32 0.01, %v6929_v11 }
 0x6b2   : > { %7206 = vst.msk [vmem:[%s14140_s13 + $0x30] sm:$0xff] %vm465_vm4, %v7174_v39  ;;  %v7087_v15 = vpop.permute.xlu0 %7086  ;;  %v6994_v29 = vmul.f32 0.01, %v6930_v40  ;;  %v6931_v10 = vadd.f32 %v14096_v59, %v14055_v22  ;;  %v7024_v49 = vsel %vm6960_vm11, %v6928_v53, %v6992_v17  ;;  %vm6962_vm3 = vcmp.ge.f32.partialorder %v6930_v40, 0.0 }
 0x6b3   : > { %v7175_v50 = vadd.f32 %v7087_v15, %v7015_v54  ;;  %v7089_v0 = vpop.permute.xlu1 %7088  ;;  %v6932_v30 = vadd.f32 %v14096_v59, %v14064_v8  ;;  %v7025_v54 = vsel %vm6961_vm12, %v6929_v11, %v6993_v45  ;;  %v6933_v22 = vadd.f32 %v14096_v59, %v14067_v3 }
 0x6b4   : > { %v7176_v55 = vadd.f32 %v7089_v0, %v7016_v5  ;;  %v7026_v26 = vsel %vm6962_vm3, %v6930_v40, %v6994_v29  ;;  %v6995_v21 = vmul.f32 0.01, %v6931_v10  ;;  %vm6963_vm13 = vcmp.ge.f32.partialorder %v6931_v10, 0.0 }
 0x6b5   : > { %7207 = vst.msk [vmem:[%s14140_s13 + $0x38] sm:$0xff] %vm465_vm4, %v7175_v50  ;;  %v6996_v0 = vmul.f32 0.01, %v6932_v30  ;;  %v6934_v8 = vadd.f32 %v14096_v59, %v14075_v62  ;;  %vm6964_vm14 = vcmp.ge.f32.partialorder %v6932_v30, 0.0  ;;  %v6935_v7 = vadd.f32 %v14096_v59, %v14079_v63 }
 0x6b6   : > { %7208 = vst.msk [vmem:[%s14140_s13 + $0x40] sm:$0xff] %vm465_vm4, %v7176_v55  ;;  %v7091_v33 = vpop.permute.xlu0 %7090  ;;  %v7027_v55 = vsel %vm6963_vm13, %v6931_v10, %v6995_v21  ;;  %vm6965_vm15 = vcmp.ge.f32.partialorder %v6933_v22, 0.0  ;;  %v6936_v62 = vadd.f32 %v14096_v59, %v14088_v61  ;;  %v6937_v4 = vadd.f32 %v14096_v59, %v14091_v14 }
 0x6b7   : > { %v7177_v58 = vadd.f32 %v7091_v33, %v7017_v42  ;;  %v7093_v28 = vpop.permute.xlu1 %7092  ;;  %v6997_v42 = vmul.f32 0.01, %v6933_v22  ;;  %v7028_v32 = vsel %vm6964_vm14, %v6932_v30, %v6996_v0  ;;  %v6998_v27 = vmul.f32 0.01, %v6934_v8 }
 0x6b8   : > { %v7178_v1 = vadd.f32 %v7093_v28, %v7018_v25  ;;  %vm6966_vm0 = vcmp.ge.f32.partialorder %v6934_v8, 0.0  ;;  %v6999_v63 = vmul.f32 0.01, %v6935_v7  ;;  %vm6967_vm1 = vcmp.ge.f32.partialorder %v6935_v7, 0.0 }
 0x6b9   : > { %7209 = vst.msk [vmem:[%s14140_s13 + $0x48] sm:$0xff] %vm465_vm4, %v7177_v58  ;;  %v7029_v28 = vsel %vm6965_vm15, %v6933_v22, %v6997_v42  ;;  %vm6968_vm5 = vcmp.ge.f32.partialorder %v6936_v62, 0.0  ;;  %vm6969_vm6 = vcmp.ge.f32.partialorder %v6937_v4, 0.0  ;;  %v6940_v48 = vadd.f32 %v14096_v59, %v14120_v46 }
 0x6ba   : > { %7210 = vst.msk [vmem:[%s14140_s13 + $0x50] sm:$0xff] %vm465_vm4, %v7178_v1  ;;  %v7095_v36 = vpop.permute.xlu0 %7094  ;;  %v6938_v1 = vadd.f32 %v14096_v59, %v14101_v37  ;;  %v6939_v37 = vadd.f32 %v14096_v59, %v14107_v20  ;;  %v6941_v20 = vadd.f32 %v14096_v59, %v14123_v2  ;;  %v6942_v46 = vadd.f32 %v14096_v59, %v14135_v60 }
 0x6bb   : > { %v7179_v41 = vadd.f32 %v7095_v36, %v7019_v34  ;;  %v7097_v23 = vpop.permute.xlu1 %7096  ;;  %v7030_v34 = vsel %vm6966_vm0, %v6934_v8, %v6998_v27  ;;  %v7000_v36 = vmul.f32 0.01, %v6936_v62  ;;  %v7004_v17 = vmul.f32 0.01, %v6940_v48 }
 0x6bc   : > { %v7180_v12 = vadd.f32 %v7097_v23, %v7020_v9  ;;  %v7001_v9 = vmul.f32 0.01, %v6937_v4  ;;  %v7002_v14 = vmul.f32 0.01, %v6938_v1  ;;  %vm6970_vm7 = vcmp.ge.f32.partialorder %v6938_v1, 0.0 }
 0x6bd   : > { %7211 = vst.msk [vmem:[%s14140_s13 + $0x58] sm:$0xff] %vm465_vm4, %v7179_v41  ;;  %v7031_v41 = vsel %vm6967_vm1, %v6935_v7, %v6999_v63  ;;  %vm6971_vm8 = vcmp.ge.f32.partialorder %v6939_v37, 0.0  ;;  %vm6972_vm9 = vcmp.ge.f32.partialorder %v6940_v48, 0.0  ;;  %v7005_v45 = vmul.f32 0.01, %v6941_v20 }
 0x6be   : > { %7212 = vst.msk [vmem:[%s14140_s13 + $0x60] sm:$0xff] %vm465_vm4, %v7180_v12  ;;  %v7099_v31 = vpop.permute.xlu0 %7098  ;;  %v7032_v12 = vsel %vm6968_vm5, %v6936_v62, %v7000_v36  ;;  %v7034_v40 = vsel %vm6970_vm7, %v6938_v1, %v7002_v14  ;;  %v6943_v2 = vadd.f32 %v14096_v59, %v14149_v56  ;;  %vm6973_vm10 = vcmp.ge.f32.partialorder %v6941_v20, 0.0 }
 0x6bf   : > { %v7181_v38 = vadd.f32 %v7099_v31, %v7021_v6  ;;  %v7101_v44 = vpop.permute.xlu1 %7100  ;;  %v7033_v31 = vsel %vm6969_vm6, %v6937_v4, %v7001_v9  ;;  %v7006_v60 = vmul.f32 0.01, %v6942_v46  ;;  %vm6974_vm2 = vcmp.ge.f32.partialorder %v6942_v46, 0.0 }
 0x6c0   : > { %v7182_v19 = vadd.f32 %v7101_v44, %v7022_v24  ;;  %vm6975_vm11 = vcmp.ge.f32.partialorder %v6943_v2, 0.0 }
 0x6c1   : > { %7213 = vst.msk [vmem:[%s14140_s13 + $0x68] sm:$0xff] %vm465_vm4, %v7181_v38  ;;  %v7003_v38 = vmul.f32 0.01, %v6939_v37 }
 0x6c2   : > { %7214 = vst.msk [vmem:[%s14140_s13 + $0x70] sm:$0xff] %vm465_vm4, %v7182_v19  ;;  %v7103_v47 = vpop.permute.xlu0 %7102 }
 0x6c3   : > { %v7183_v18 = vadd.f32 %v7103_v47, %v7023_v57  ;;  %v7105_v51 = vpop.permute.xlu1 %7104  ;;  %v7035_v57 = vsel %vm6971_vm8, %v6939_v37, %v7003_v38 }
 0x6c4   : > { %v7184_v39 = vadd.f32 %v7105_v51, %v7024_v49  ;;  %v7037_v49 = vsel %vm6973_vm10, %v6941_v20, %v7005_v45 }
 0x6c5   : > { %7215 = vst.msk [vmem:[%s14140_s13 + $0x78] sm:$0xff] %vm465_vm4, %v7183_v18  ;;  %v7036_v18 = vsel %vm6972_vm9, %v6940_v48, %v7004_v17 }
 0x6c6   : > { %7216 = vst.msk [vmem:[%s14140_s13 + $0x80] sm:$0xff] %vm465_vm4, %v7184_v39  ;;  %v7107_v15 = vpop.permute.xlu0 %7106  ;;  %v7007_v39 = vmul.f32 0.01, %v6943_v2 }
 0x6c7   : > { %v7185_v16 = vadd.f32 %v7107_v15, %v7025_v54  ;;  %v7109_v50 = vpop.permute.xlu1 %7108  ;;  %v7038_v54 = vsel %vm6974_vm2, %v6942_v46, %v7006_v60 }
 0x6c8   : > { %v7186_v5 = vadd.f32 %v7109_v50, %v7026_v26  ;;  %v7039_v21 = vsel %vm6975_vm11, %v6943_v2, %v7007_v39 }
 0x6c9   : > { %7217 = vst.msk [vmem:[%s14140_s13 + $0x88] sm:$0xff] %vm465_vm4, %v7185_v16 }
 0x6ca   : > { %7218 = vst.msk [vmem:[%s14140_s13 + $0x90] sm:$0xff] %vm465_vm4, %v7186_v5  ;;  %v7111_v3 = vpop.permute.xlu0 %7110 }
 0x6cb   : > { %v7187_v33 = vadd.f32 %v7111_v3, %v7027_v55  ;;  %v7113_v25 = vpop.permute.xlu1 %7112 }
 0x6cc   : > { %v7188_v58 = vadd.f32 %v7113_v25, %v7028_v32 }
 0x6cd   : > { %7219 = vst.msk [vmem:[%s14140_s13 + $0x98] sm:$0xff] %vm465_vm4, %v7187_v33 }
 0x6ce   : > { %7220 = vst.msk [vmem:[%s14140_s13 + $0xa0] sm:$0xff] %vm465_vm4, %v7188_v58  ;;  %v7115_v43 = vpop.permute.xlu0 %7114 }
 0x6cf   : > { %v7189_v13 = vadd.f32 %v7115_v43, %v7029_v28  ;;  %v7117_v61 = vpop.permute.xlu1 %7116 }
 0x6d0   : > { %v7190_v35 = vadd.f32 %v7117_v61, %v7030_v34 }
 0x6d1   : > { %7221 = vst.msk [vmem:[%s14140_s13 + $0xa8] sm:$0xff] %vm465_vm4, %v7189_v13 }
 0x6d2   : > { %7222 = vst.msk [vmem:[%s14140_s13 + $0xb0] sm:$0xff] %vm465_vm4, %v7190_v35  ;;  %v7119_v23 = vpop.permute.xlu0 %7118 }
 0x6d3   : > { %v7191_v52 = vadd.f32 %v7119_v23, %v7031_v41  ;;  %v7121_v53 = vpop.permute.xlu1 %7120 }
 0x6d4   : > { %v7192_v6 = vadd.f32 %v7121_v53, %v7032_v12 }
 0x6d5   : > { %7223 = vst.msk [vmem:[%s14140_s13 + $0xb8] sm:$0xff] %vm465_vm4, %v7191_v52 }
 0x6d6   : > { %7224 = vst.msk [vmem:[%s14140_s13 + $0xc0] sm:$0xff] %vm465_vm4, %v7192_v6  ;;  %v7123_v11 = vpop.permute.xlu0 %7122 }
 0x6d7   : > { %v7193_v44 = vadd.f32 %v7123_v11, %v7033_v31  ;;  %v7125_v24 = vpop.permute.xlu1 %7124 }
 0x6d8   : > { %v7194_v19 = vadd.f32 %v7125_v24, %v7034_v40 }
 0x6d9   : > { %7225 = vst.msk [vmem:[%s14140_s13 + $0xc8] sm:$0xff] %vm465_vm4, %v7193_v44 }
 0x6da   : > { %7226 = vst.msk [vmem:[%s14140_s13 + $0xd0] sm:$0xff] %vm465_vm4, %v7194_v19  ;;  %v7127_v47 = vpop.permute.xlu0 %7126 }
 0x6db   : > { %v7195_v29 = vadd.f32 %v7127_v47, %v7035_v57  ;;  %v7129_v10 = vpop.permute.xlu1 %7128 }
 0x6dc   : > { %v7196_v51 = vadd.f32 %v7129_v10, %v7036_v18 }
 0x6dd   : > { %7227 = vst.msk [vmem:[%s14140_s13 + $0xd8] sm:$0xff] %vm465_vm4, %v7195_v29 }
 0x6de   : > { %7228 = vst.msk [vmem:[%s14140_s13 + $0xe0] sm:$0xff] %vm465_vm4, %v7196_v51  ;;  %v7131_v30 = vpop.permute.xlu0 %7130 }
 0x6df   : > { %v7197_v59 = vadd.f32 %v7131_v30, %v7037_v49  ;;  %v7133_v56 = vpop.permute.xlu1 %7132 }
 0x6e0   : > { %v7198_v15 = vadd.f32 %v7133_v56, %v7038_v54 }
 0x6e1   : > { %7229 = vst.msk [vmem:[%s14140_s13 + $0xe8] sm:$0xff] %vm465_vm4, %v7197_v59 }
 0x6e2   : > { %7230 = vst.msk [vmem:[%s14140_s13 + $0xf0] sm:$0xff] %vm465_vm4, %v7198_v15  ;;  %v7135_v26 = vpop.permute.xlu0 %7134 }
 0x6e3   : > { %v7199_v22 = vadd.f32 %v7135_v26, %v7039_v21 }
 0x6e5   : > { %7231 = vst.msk [vmem:[%s14140_s13 + $0xf8] sm:$0xff] %vm465_vm4, %v7199_v22 }
 0x6e6   : > { %8766 = shalt.err (!%p8763_p8)
}
 0x6e7   : > { %s8767_s23 = scalar_lea.hbm %s14266_s17, 4096  ;;  %s8771_s13 = scalar_lea.hbm %s14321_s7, 8192 }
 0x6e8   : > { %p8768_p4 = scmp.ne.s32.totalorder %s14266_s17, %s8767_s23  ;;  %p8772_p0 = scmp.lt.u32.totalorder %s14266_s17, %s14321_s7 }
 0x6e9   : > { %p8773_p5 = scmp.lt.u32.totalorder %s8771_s13, %s8767_s23  ;;  %p8775_p6 = scmp.lt.u32.totalorder %s8767_s23, %s14266_s17 }
 0x6ea   : > { %p8769_p10 = pnand %p8768_p4, %p15336_p9 }
 0x6eb   : > { %p8774_p7 = por %p8773_p5, %p8772_p0 }
 0x6ec   : > { %p8770_p11 = pneg %p8769_p10 }
 0x6ed   : > { %p8776_p12 = por %p8775_p6, %p8774_p7 }
 0x6ef   : > { %p8777_p13 = pnand %p8776_p12, %p8770_p11 }
 0x6f1   : > { %8780 = shalt.err (!%p8777_p13)
}
 0x6f2   : > { %s8850_s10 = smov 128   ;;  %s8851_s19 = smov 8  }
 0x6f3   : > { %8462 = dma.vmem_to_hbm [thread:$0]  (%p15336_p9), %s14268_s16, 4096, %s14266_s17, %s7233_s30, %s8850_s10, %s8850_s10, %s8851_s19  }
 0x6f4 PF: > { %s7261_s12 = sand.u32 1, %s8819_s24   ;;  %p15337_p1 = scmp.ne.s32.totalorder %s14560_s15, 0 }
 0x6f5   : > { %p15338_p3 = scmp.ge.s32.totalorder %s8831_s27, 2  ;;  %s7262_s29 = scalar_lea.sflag [#allocation6], %s7261_s12 }
 0x6f7   : > { %p8488_p2 = pnand %p15338_p3, %p15337_p1 }
 0x6f9   : > { %8814 = dma.done.wait (!%p8488_p2), %s7262_s29, 4096  }
 0x6fa   : > { %8816 = vsyncadd (!%p8488_p2), %s7262_s29, 4294963200  ;;  %p23_p8 = scmp.ge.s32.totalorder %s9073_s11, 4   ;;  %s15339_s24 = smov %s8823_s25 }
 0x6fb   : > { %s15340_s25 = smov %s8827_s26  ;;  %s15341_s26 = smov %s9084_s22 }
 0x6fc   : > { %s15342_s27 = smov %s9073_s11  ;;  %25 = sbr.rel (!%p23_p8) target bundleno = 8 (0x8), region = 126 }
 0x703   :  { %7267 = vsyncpa [#allocation5], 1 }
 0x704   :  { %7269 = vsyncpa [#allocation5 + $0x1], 1 }
 0x705   :  { %7270 = vsyncpa [#allocation8], 1 }
 0x706   :  { %7271 = vsyncpa [#allocation11], 1 }
 0x707   :  { %7272 = vsyncpa [#allocation14], 1 }
 0x708   :  { %7273 = vsyncpa [#allocation6], 1 }
 0x709   :  { %7275 = vsyncpa [#allocation6 + $0x1], 1 }

</bundles_post_ra>
